<compile_context>
chip_gen: v5e
topology: v5e:2x2
jax: 0.10.0
libtpu: 0.0.40
codegen_flags: <defaults>
</compile_context>

<pallas_src>
import jax
import jax.numpy as jnp
import numpy as np
from jax.experimental import pallas as pl
from jax.experimental.pallas import tpu as pltpu

BERT_HIDDEN_DIM = 256   # module hardcodes 1024; lane-aligned small stand-in
NUM_MASKS = 5           # span, arg0, arg1, loc, time


# ---------------------------------------------------------------------------
# Single fused kernel: pooling + 4 arg scorers + final classifier + CE NLL
# (operates on one batch block of size BB per grid step)
# ---------------------------------------------------------------------------
def fused_head_kernel(
        ha_ref, hb_ref, ma_ref, mb_ref, labels_ref,
        # arg scorer weights (W0_arg split along K into a / b / a*b blocks)
        w0aa_ref, w0ab_ref, w0aab_ref, b0a_ref,
        w1a_ref, b1a_ref, w2a_ref, b2a_ref, wta_ref, bta_ref,
        # final head weights (W0 split along K into span_a / span_b / prod / scores)
        w0sa_ref, w0sb_ref, w0sab_ref, w0sc_ref, b0_ref,
        w1_ref, b1_ref, w2_ref, b2_ref, wt_ref, bt_ref,
        logits_ref, nll_ref):
    f32 = jnp.float32

    # ---- masked pooling on the MXU: reps[b, m, :] = sum_s masks[b, m, s]*h[b, s, :]
    dn = (((2,), (1,)), ((0,), (0,)))        # contract S, batch over B
    reps_a = jax.lax.dot_general(ma_ref[...], ha_ref[...], dimension_numbers=dn,
                                 preferred_element_type=f32)     # (BB, 5, H)
    reps_b = jax.lax.dot_general(mb_ref[...], hb_ref[...], dimension_numbers=dn,
                                 preferred_element_type=f32)

    span_a = reps_a[:, 0, :]                 # (BB, H)
    span_b = reps_b[:, 0, :]

    def lin(x, w_ref, b_ref):
        return jnp.dot(x, w_ref[...], preferred_element_type=f32) + b_ref[...]

    def arg_score(a, c):
        # tanh-MLP scorer; W0 split along K -> no [a, c, a*c] concat materialized
        h = jnp.tanh(jnp.dot(a, w0aa_ref[...], preferred_element_type=f32)
                     + jnp.dot(c, w0ab_ref[...], preferred_element_type=f32)
                     + jnp.dot(a * c, w0aab_ref[...], preferred_element_type=f32)
                     + b0a_ref[...])
        h = jnp.tanh(lin(h, w1a_ref, b1a_ref))
        h = jnp.tanh(lin(h, w2a_ref, b2a_ref))
        return lin(h, wta_ref, bta_ref)      # (BB, 1)

    # arg0 / arg1 / loc / time scorers; shared weights stay resident in VMEM.
    scores = [arg_score(reps_a[:, g, :], reps_b[:, g, :])
              for g in range(1, NUM_MASKS)]  # 4 x (BB, 1)

    # Contribution of the 4 scores through hidden_layer_0 (rows 3H:3H+4 of W0),
    # without materializing the (BB, 3H+4) concat: score_g (BB,1) x W0 row (1,H).
    score_contrib = scores[0] * w0sc_ref[0:1, :]
    for g in range(1, 4):
        score_contrib = score_contrib + scores[g] * w0sc_ref[g:g + 1, :]

    h = jnp.tanh(jnp.dot(span_a, w0sa_ref[...], preferred_element_type=f32)
                 + jnp.dot(span_b, w0sb_ref[...], preferred_element_type=f32)
                 + jnp.dot(span_a * span_b, w0sab_ref[...],
                           preferred_element_type=f32)
                 + score_contrib + b0_ref[...])
    h = jnp.tanh(lin(h, w1_ref, b1_ref))
    h = jnp.tanh(lin(h, w2_ref, b2_ref))
    logits = lin(h, wt_ref, bt_ref)          # (BB, tagset)
    logits_ref[...] = logits

    # ---- per-example CrossEntropy NLL; one-hot built in-kernel from int32 labels.
    cols = jax.lax.broadcasted_iota(jnp.int32, logits.shape, 1)
    onehot = (cols == labels_ref[...]).astype(f32)               # (BB, tagset)
    mx = jnp.max(logits, axis=1, keepdims=True)
    lse = mx + jnp.log(jnp.sum(jnp.exp(logits - mx), axis=1, keepdims=True))
    picked = jnp.sum(logits * onehot, axis=1, keepdims=True)     # (BB, 1)
    nll_ref[...] = lse - picked


# ---------------------------------------------------------------------------
# Parameters (deterministic synthetic init; weights stored as (in, out))
# ---------------------------------------------------------------------------
def init_params(key, hidden, tagset_size):
    def linear(k, fin, fout):
        kw, kb = jax.random.split(k)
        w = jax.random.normal(kw, (fin, fout), jnp.float32) * 0.02
        b = jax.random.normal(kb, (1, fout), jnp.float32) * 0.02
        return w, b

    ks = jax.random.split(key, 8)
    return {
        'hidden_layer_0':        linear(ks[0], hidden * 3 + 4, hidden),
        'hidden_layer_1':        linear(ks[1], hidden, hidden),
        'hidden_layer_2':        linear(ks[2], hidden, hidden),
        'single_hidden2tag':     linear(ks[3], hidden, tagset_size),
        'hidden_layer_0_arg':    linear(ks[4], hidden * 3, hidden),
        'hidden_layer_1_arg':    linear(ks[5], hidden, hidden),
        'hidden_layer_2_arg':    linear(ks[6], hidden, hidden),
        'single_hidden2tag_arg': linear(ks[7], hidden, 1),
    }


def _resident_spec(arr):
    """Full-array block with a constant index map -> stays resident in VMEM."""
    nd = arr.ndim
    return pl.BlockSpec(arr.shape, lambda i, _nd=nd: (0,) * _nd)


# ---------------------------------------------------------------------------
# Forward pass (classification branch of the PyTorch module), one pallas_call
# ---------------------------------------------------------------------------
def roberta_for_sequence_classification_forward(
        params, args_dict, tagset_size,
        hidden_a, hidden_b,
        span_a_mask, a_arg0_mask, a_arg1_mask, a_loc_mask, a_time_mask,
        span_b_mask, b_arg0_mask, b_arg1_mask, b_loc_mask, b_time_mask,
        label_ids):
    assert args_dict['classification']
    B, S, H = hidden_a.shape
    T = tagset_size

    # Masks lane-dense on S: (B, NUM_MASKS, S); int labels as (B, 1) int32.
    masks_a = jnp.stack(
        [span_a_mask, a_arg0_mask, a_arg1_mask, a_loc_mask, a_time_mask], axis=1)
    masks_b = jnp.stack(
        [span_b_mask, b_arg0_mask, b_arg1_mask, b_loc_mask, b_time_mask], axis=1)
    labels = label_ids.astype(jnp.int32).reshape(B, 1)

    w0, b0 = params['hidden_layer_0']
    w1, b1 = params['hidden_layer_1']
    w2, b2 = params['hidden_layer_2']
    wt, bt = params['single_hidden2tag']
    w0a, b0a = params['hidden_layer_0_arg']
    w1a, b1a = params['hidden_layer_1_arg']
    w2a, b2a = params['hidden_layer_2_arg']
    wta, bta = params['single_hidden2tag_arg']

    # Split the concat-weights into K blocks once, outside the kernel.
    w0aa, w0ab, w0aab = w0a[:H], w0a[H:2 * H], w0a[2 * H:3 * H]
    w0sa, w0sb, w0sab, w0sc = w0[:H], w0[H:2 * H], w0[2 * H:3 * H], w0[3 * H:]

    weight_args = (w0aa, w0ab, w0aab, b0a, w1a, b1a, w2a, b2a, wta, bta,
                   w0sa, w0sb, w0sab, w0sc, b0, w1, b1, w2, b2, wt, bt)

    # Batch-block size: keep the full batch when it is not 8-aligned (demo
    # sizes); otherwise tile by 8 so the grid can be sharded across cores.
    BB = min(B, 8) if B % 8 == 0 else B
    G = B // BB

    weight_elems = ((3 * H * H + H) + 2 * (H * H + H) + (H + 1)
                    + ((3 * H + 4) * H + H) + 2 * (H * H + H) + (H * T + T))
    flops = (2 * 2 * B * NUM_MASKS * S * H            # pooling (a + b)
             + 2 * 4 * B * H * (5 * H + 1)            # 4 arg scorers
             + 2 * B * H * (5 * H + T) + 2 * B * 4 * H)   # final head
    transc = (4 * 3 + 3) * B * H + B * T + B          # tanh, exp, log
    bytes_accessed = 4 * (2 * B * S * H + 2 * B * NUM_MASKS * S + B
                          + weight_elems + B * T + B)
    cost = pl.CostEstimate(flops=flops, transcendentals=transc,
                           bytes_accessed=bytes_accessed)

    in_specs = ([pl.BlockSpec((BB, S, H), lambda i: (i, 0, 0)),          # hidden_a
                 pl.BlockSpec((BB, S, H), lambda i: (i, 0, 0)),          # hidden_b
                 pl.BlockSpec((BB, NUM_MASKS, S), lambda i: (i, 0, 0)),  # masks_a
                 pl.BlockSpec((BB, NUM_MASKS, S), lambda i: (i, 0, 0)),  # masks_b
                 pl.BlockSpec((BB, 1), lambda i: (i, 0))]                # labels
                + [_resident_spec(w) for w in weight_args])

    logits, nll = pl.pallas_call(
        fused_head_kernel,
        out_shape=(jax.ShapeDtypeStruct((B, T), jnp.float32),
                   jax.ShapeDtypeStruct((B, 1), jnp.float32)),
        grid=(G,),
        in_specs=in_specs,
        out_specs=(pl.BlockSpec((BB, T), lambda i: (i, 0)),
                   pl.BlockSpec((BB, 1), lambda i: (i, 0))),
        compiler_params=pltpu.CompilerParams(
            dimension_semantics=("parallel",),
            vmem_limit_bytes=32 * 1024 * 1024),
        cost_estimate=cost,
    )(hidden_a, hidden_b, masks_a, masks_b, labels, *weight_args)

    loss = jnp.sum(nll) / B   # CrossEntropyLoss(reduction='mean')
    return logits, loss


# ---------------------------------------------------------------------------
# Pure-JAX reference (mirrors the torch math) for a sanity check
# ---------------------------------------------------------------------------
def reference_forward(params, tagset_size, hidden_a, hidden_b,
                      span_a_mask, a_arg0_mask, a_arg1_mask, a_loc_mask, a_time_mask,
                      span_b_mask, b_arg0_mask, b_arg1_mask, b_loc_mask, b_time_mask,
                      label_ids):
    pool = lambda h, m: jnp.sum(h * m[:, :, None], axis=1)
    lin = lambda p, x: x @ p[0] + p[1]

    span_a, a_arg0, a_arg1, a_loc, a_time = (pool(hidden_a, m) for m in
        (span_a_mask, a_arg0_mask, a_arg1_mask, a_loc_mask, a_time_mask))
    span_b, b_arg0, b_arg1, b_loc, b_time = (pool(hidden_b, m) for m in
        (span_b_mask, b_arg0_mask, b_arg1_mask, b_loc_mask, b_time_mask))

    def arg_score(a, b):
        x = jnp.concatenate([a, b, a * b], axis=1)
        h = jnp.tanh(lin(params['hidden_layer_0_arg'], x))
        h = jnp.tanh(lin(params['hidden_layer_1_arg'], h))
        h = jnp.tanh(lin(params['hidden_layer_2_arg'], h))
        return lin(params['single_hidden2tag_arg'], h)

    s0 = arg_score(a_arg0, b_arg0)
    s1 = arg_score(a_arg1, b_arg1)
    sl = arg_score(a_loc, b_loc)
    st = arg_score(a_time, b_time)

    combined = jnp.concatenate([span_a, span_b, span_a * span_b, s0, s1, sl, st], axis=1)
    h = jnp.tanh(lin(params['hidden_layer_0'], combined))
    h = jnp.tanh(lin(params['hidden_layer_2'], jnp.tanh(lin(params['hidden_layer_1'], h))))
    logits = lin(params['single_hidden2tag'], h)
    lse = jax.scipy.special.logsumexp(logits, axis=1)
    nll = lse - jnp.take_along_axis(logits, label_ids[:, None], axis=1)[:, 0]
    return logits, jnp.mean(nll)


if __name__ == "__main__":
    H = BERT_HIDDEN_DIM
    TAGSET = 3
    ARGS_DICT = {'classification': True}

    def make_inputs(key, B, S):
        k_ha, k_hb, k_m, k_lab = jax.random.split(key, 4)
        hidden_a = jax.random.normal(k_ha, (B, S, H), jnp.float32)
        hidden_b = jax.random.normal(k_hb, (B, S, H), jnp.float32)
        mk = jax.random.split(k_m, 10)
        mask = lambda k: (jax.random.uniform(k, (B, S)) > 0.5).astype(jnp.float32)
        masks = [mask(k) for k in mk]
        label_ids = jax.random.randint(k_lab, (B,), 0, TAGSET)
        return hidden_a, hidden_b, masks, label_ids

    key = jax.random.PRNGKey(0)
    k_par, k_in1, k_in2 = jax.random.split(key, 3)
    params = init_params(k_par, H, TAGSET)

    # Case 1: small demo batch (single grid step).
    # Case 2: 8-aligned batch exercising the 2-step "parallel" batch grid.
    for k_in, (B, S) in ((k_in1, (2, 8)), (k_in2, (16, 8))):
        hidden_a, hidden_b, masks, label_ids = make_inputs(k_in, B, S)

        logits, loss = roberta_for_sequence_classification_forward(
            params, ARGS_DICT, TAGSET, hidden_a, hidden_b, *masks, label_ids)
        jax.block_until_ready((logits, loss))

        ref_logits, ref_loss = reference_forward(
            params, TAGSET, hidden_a, hidden_b, *masks, label_ids)

        assert logits.shape == (B, TAGSET)
        assert np.allclose(np.asarray(logits), np.asarray(ref_logits),
                           rtol=5e-2, atol=5e-2)
        assert np.allclose(float(loss), float(ref_loss), rtol=5e-2, atol=5e-2)

    print("KERNEL_OK")
</pallas_src>

<mosaic_0001>
module attributes {stable_mosaic.version = 11 : i64} {
  func.func @fused_head_kernel(%arg0: i32, %arg1: memref<2x8x256xf32, #tpu.memory_space<vmem>>, %arg2: memref<2x8x256xf32, #tpu.memory_space<vmem>>, %arg3: memref<2x5x8xf32, #tpu.memory_space<vmem>>, %arg4: memref<2x5x8xf32, #tpu.memory_space<vmem>>, %arg5: memref<2x1xi32, #tpu.memory_space<vmem>>, %arg6: memref<256x256xf32, #tpu.memory_space<vmem>>, %arg7: memref<256x256xf32, #tpu.memory_space<vmem>>, %arg8: memref<256x256xf32, #tpu.memory_space<vmem>>, %arg9: memref<1x256xf32, #tpu.memory_space<vmem>>, %arg10: memref<256x256xf32, #tpu.memory_space<vmem>>, %arg11: memref<1x256xf32, #tpu.memory_space<vmem>>, %arg12: memref<256x256xf32, #tpu.memory_space<vmem>>, %arg13: memref<1x256xf32, #tpu.memory_space<vmem>>, %arg14: memref<256x1xf32, #tpu.memory_space<vmem>>, %arg15: memref<1x1xf32, #tpu.memory_space<vmem>>, %arg16: memref<256x256xf32, #tpu.memory_space<vmem>>, %arg17: memref<256x256xf32, #tpu.memory_space<vmem>>, %arg18: memref<256x256xf32, #tpu.memory_space<vmem>>, %arg19: memref<4x256xf32, #tpu.memory_space<vmem>>, %arg20: memref<1x256xf32, #tpu.memory_space<vmem>>, %arg21: memref<256x256xf32, #tpu.memory_space<vmem>>, %arg22: memref<1x256xf32, #tpu.memory_space<vmem>>, %arg23: memref<256x256xf32, #tpu.memory_space<vmem>>, %arg24: memref<1x256xf32, #tpu.memory_space<vmem>>, %arg25: memref<256x3xf32, #tpu.memory_space<vmem>>, %arg26: memref<1x3xf32, #tpu.memory_space<vmem>>, %arg27: memref<2x3xf32, #tpu.memory_space<vmem>>, %arg28: memref<2x1xf32, #tpu.memory_space<vmem>>) attributes {dimension_semantics = [#tpu.dimension_semantics<parallel>], iteration_bounds = array<i64: 1>, scalar_prefetch = 0 : i64, scratch_operands = 0 : i64, tpu.core_type = #tpu.core_type<tc>, window_params = [{transform_indices = @transform_0, window_bounds = array<i64: 2, 8, 256>}, {transform_indices = @transform_1, window_bounds = array<i64: 2, 8, 256>}, {transform_indices = @transform_2, window_bounds = array<i64: 2, 5, 8>}, {transform_indices = @transform_3, window_bounds = array<i64: 2, 5, 8>}, {transform_indices = @transform_4, window_bounds = array<i64: 2, 1>}, {pipeline_mode = #tpu.pipeline_mode<synchronous>, transform_indices = @transform_5, window_bounds = array<i64: 256, 256>}, {pipeline_mode = #tpu.pipeline_mode<synchronous>, transform_indices = @transform_6, window_bounds = array<i64: 256, 256>}, {pipeline_mode = #tpu.pipeline_mode<synchronous>, transform_indices = @transform_7, window_bounds = array<i64: 256, 256>}, {pipeline_mode = #tpu.pipeline_mode<synchronous>, transform_indices = @transform_8, window_bounds = array<i64: 1, 256>}, {pipeline_mode = #tpu.pipeline_mode<synchronous>, transform_indices = @transform_9, window_bounds = array<i64: 256, 256>}, {pipeline_mode = #tpu.pipeline_mode<synchronous>, transform_indices = @transform_10, window_bounds = array<i64: 1, 256>}, {pipeline_mode = #tpu.pipeline_mode<synchronous>, transform_indices = @transform_11, window_bounds = array<i64: 256, 256>}, {pipeline_mode = #tpu.pipeline_mode<synchronous>, transform_indices = @transform_12, window_bounds = array<i64: 1, 256>}, {pipeline_mode = #tpu.pipeline_mode<synchronous>, transform_indices = @transform_13, window_bounds = array<i64: 256, 1>}, {pipeline_mode = #tpu.pipeline_mode<synchronous>, transform_indices = @transform_14, window_bounds = array<i64: 1, 1>}, {pipeline_mode = #tpu.pipeline_mode<synchronous>, transform_indices = @transform_15, window_bounds = array<i64: 256, 256>}, {pipeline_mode = #tpu.pipeline_mode<synchronous>, transform_indices = @transform_16, window_bounds = array<i64: 256, 256>}, {pipeline_mode = #tpu.pipeline_mode<synchronous>, transform_indices = @transform_17, window_bounds = array<i64: 256, 256>}, {pipeline_mode = #tpu.pipeline_mode<synchronous>, transform_indices = @transform_18, window_bounds = array<i64: 4, 256>}, {pipeline_mode = #tpu.pipeline_mode<synchronous>, transform_indices = @transform_19, window_bounds = array<i64: 1, 256>}, {pipeline_mode = #tpu.pipeline_mode<synchronous>, transform_indices = @transform_20, window_bounds = array<i64: 256, 256>}, {pipeline_mode = #tpu.pipeline_mode<synchronous>, transform_indices = @transform_21, window_bounds = array<i64: 1, 256>}, {pipeline_mode = #tpu.pipeline_mode<synchronous>, transform_indices = @transform_22, window_bounds = array<i64: 256, 256>}, {pipeline_mode = #tpu.pipeline_mode<synchronous>, transform_indices = @transform_23, window_bounds = array<i64: 1, 256>}, {pipeline_mode = #tpu.pipeline_mode<synchronous>, transform_indices = @transform_24, window_bounds = array<i64: 256, 3>}, {pipeline_mode = #tpu.pipeline_mode<synchronous>, transform_indices = @transform_25, window_bounds = array<i64: 1, 3>}, {transform_indices = @transform_26, window_bounds = array<i64: 2, 3>}, {transform_indices = @transform_27, window_bounds = array<i64: 2, 1>}]} {
    %c0 = arith.constant 0 : index
    %c0_0 = arith.constant 0 : index
    %c0_1 = arith.constant 0 : index
    %0 = vector.load %arg3[%c0, %c0_0, %c0_1] : memref<2x5x8xf32, #tpu.memory_space<vmem>>, vector<2x5x8xf32>
    %c0_2 = arith.constant 0 : index
    %c0_3 = arith.constant 0 : index
    %c0_4 = arith.constant 0 : index
    %1 = vector.load %arg1[%c0_2, %c0_3, %c0_4] : memref<2x8x256xf32, #tpu.memory_space<vmem>>, vector<2x8x256xf32>
    %cst = arith.constant dense<0.000000e+00> : vector<2x5x256xf32>
    %2 = tpu.matmul %0, %1, %cst {dimension_numbers = #tpu.dot_dimension_numbers<[2], [1], [1], [2], [0, 0, 0, 1, 1, 2], [0], [0]>} : vector<2x5x8xf32>, vector<2x8x256xf32>, vector<2x5x256xf32> -> vector<2x5x256xf32>
    %c0_5 = arith.constant 0 : index
    %c0_6 = arith.constant 0 : index
    %c0_7 = arith.constant 0 : index
    %3 = vector.load %arg4[%c0_5, %c0_6, %c0_7] : memref<2x5x8xf32, #tpu.memory_space<vmem>>, vector<2x5x8xf32>
    %c0_8 = arith.constant 0 : index
    %c0_9 = arith.constant 0 : index
    %c0_10 = arith.constant 0 : index
    %4 = vector.load %arg2[%c0_8, %c0_9, %c0_10] : memref<2x8x256xf32, #tpu.memory_space<vmem>>, vector<2x8x256xf32>
    %cst_11 = arith.constant dense<0.000000e+00> : vector<2x5x256xf32>
    %5 = tpu.matmul %3, %4, %cst_11 {dimension_numbers = #tpu.dot_dimension_numbers<[2], [1], [1], [2], [0, 0, 0, 1, 1, 2], [0], [0]>} : vector<2x5x8xf32>, vector<2x8x256xf32>, vector<2x5x256xf32> -> vector<2x5x256xf32>
    %6 = vector.extract_strided_slice %2 {offsets = [0, 0, 0], sizes = [2, 1, 256], strides = [1, 1, 1]} : vector<2x5x256xf32> to vector<2x1x256xf32>
    %7 = vector.shape_cast %6 : vector<2x1x256xf32> to vector<2x256xf32>
    %8 = vector.extract_strided_slice %5 {offsets = [0, 0, 0], sizes = [2, 1, 256], strides = [1, 1, 1]} : vector<2x5x256xf32> to vector<2x1x256xf32>
    %9 = vector.shape_cast %8 : vector<2x1x256xf32> to vector<2x256xf32>
    %10 = vector.extract_strided_slice %2 {offsets = [0, 1, 0], sizes = [2, 1, 256], strides = [1, 1, 1]} : vector<2x5x256xf32> to vector<2x1x256xf32>
    %11 = vector.shape_cast %10 : vector<2x1x256xf32> to vector<2x256xf32>
    %12 = vector.extract_strided_slice %5 {offsets = [0, 1, 0], sizes = [2, 1, 256], strides = [1, 1, 1]} : vector<2x5x256xf32> to vector<2x1x256xf32>
    %13 = vector.shape_cast %12 : vector<2x1x256xf32> to vector<2x256xf32>
    %c0_12 = arith.constant 0 : index
    %c0_13 = arith.constant 0 : index
    %14 = vector.load %arg6[%c0_12, %c0_13] : memref<256x256xf32, #tpu.memory_space<vmem>>, vector<256x256xf32>
    %cst_14 = arith.constant dense<0.000000e+00> : vector<2x256xf32>
    %15 = tpu.matmul %11, %14, %cst_14 {dimension_numbers = #tpu.dot_dimension_numbers<[1], [0], [0], [1], [0, 0, 1, 1], [], []>} : vector<2x256xf32>, vector<256x256xf32>, vector<2x256xf32> -> vector<2x256xf32>
    %c0_15 = arith.constant 0 : index
    %c0_16 = arith.constant 0 : index
    %16 = vector.load %arg7[%c0_15, %c0_16] : memref<256x256xf32, #tpu.memory_space<vmem>>, vector<256x256xf32>
    %cst_17 = arith.constant dense<0.000000e+00> : vector<2x256xf32>
    %17 = tpu.matmul %13, %16, %cst_17 {dimension_numbers = #tpu.dot_dimension_numbers<[1], [0], [0], [1], [0, 0, 1, 1], [], []>} : vector<2x256xf32>, vector<256x256xf32>, vector<2x256xf32> -> vector<2x256xf32>
    %18 = arith.addf %15, %17 : vector<2x256xf32>
    %19 = arith.mulf %11, %13 : vector<2x256xf32>
    %c0_18 = arith.constant 0 : index
    %c0_19 = arith.constant 0 : index
    %20 = vector.load %arg8[%c0_18, %c0_19] : memref<256x256xf32, #tpu.memory_space<vmem>>, vector<256x256xf32>
    %cst_20 = arith.constant dense<0.000000e+00> : vector<2x256xf32>
    %21 = tpu.matmul %19, %20, %cst_20 {dimension_numbers = #tpu.dot_dimension_numbers<[1], [0], [0], [1], [0, 0, 1, 1], [], []>} : vector<2x256xf32>, vector<256x256xf32>, vector<2x256xf32> -> vector<2x256xf32>
    %22 = arith.addf %18, %21 : vector<2x256xf32>
    %c0_21 = arith.constant 0 : index
    %c0_22 = arith.constant 0 : index
    %23 = vector.load %arg9[%c0_21, %c0_22] : memref<1x256xf32, #tpu.memory_space<vmem>>, vector<1x256xf32>
    %24 = vector.broadcast %23 : vector<1x256xf32> to vector<2x256xf32>
    %25 = arith.addf %22, %24 : vector<2x256xf32>
    %26 = math.tanh %25 : vector<2x256xf32>
    %c0_23 = arith.constant 0 : index
    %c0_24 = arith.constant 0 : index
    %27 = vector.load %arg10[%c0_23, %c0_24] : memref<256x256xf32, #tpu.memory_space<vmem>>, vector<256x256xf32>
    %cst_25 = arith.constant dense<0.000000e+00> : vector<2x256xf32>
    %28 = tpu.matmul %26, %27, %cst_25 {dimension_numbers = #tpu.dot_dimension_numbers<[1], [0], [0], [1], [0, 0, 1, 1], [], []>} : vector<2x256xf32>, vector<256x256xf32>, vector<2x256xf32> -> vector<2x256xf32>
    %c0_26 = arith.constant 0 : index
    %c0_27 = arith.constant 0 : index
    %29 = vector.load %arg11[%c0_26, %c0_27] : memref<1x256xf32, #tpu.memory_space<vmem>>, vector<1x256xf32>
    %30 = vector.broadcast %29 : vector<1x256xf32> to vector<2x256xf32>
    %31 = arith.addf %28, %30 : vector<2x256xf32>
    %32 = math.tanh %31 : vector<2x256xf32>
    %c0_28 = arith.constant 0 : index
    %c0_29 = arith.constant 0 : index
    %33 = vector.load %arg12[%c0_28, %c0_29] : memref<256x256xf32, #tpu.memory_space<vmem>>, vector<256x256xf32>
    %cst_30 = arith.constant dense<0.000000e+00> : vector<2x256xf32>
    %34 = tpu.matmul %32, %33, %cst_30 {dimension_numbers = #tpu.dot_dimension_numbers<[1], [0], [0], [1], [0, 0, 1, 1], [], []>} : vector<2x256xf32>, vector<256x256xf32>, vector<2x256xf32> -> vector<2x256xf32>
    %c0_31 = arith.constant 0 : index
    %c0_32 = arith.constant 0 : index
    %35 = vector.load %arg13[%c0_31, %c0_32] : memref<1x256xf32, #tpu.memory_space<vmem>>, vector<1x256xf32>
    %36 = vector.broadcast %35 : vector<1x256xf32> to vector<2x256xf32>
    %37 = arith.addf %34, %36 : vector<2x256xf32>
    %38 = math.tanh %37 : vector<2x256xf32>
    %c0_33 = arith.constant 0 : index
    %c0_34 = arith.constant 0 : index
    %39 = vector.load %arg14[%c0_33, %c0_34] : memref<256x1xf32, #tpu.memory_space<vmem>>, vector<256x1xf32>
    %cst_35 = arith.constant dense<0.000000e+00> : vector<2x1xf32>
    %40 = tpu.matmul %38, %39, %cst_35 {dimension_numbers = #tpu.dot_dimension_numbers<[1], [0], [0], [1], [0, 0, 1, 1], [], []>} : vector<2x256xf32>, vector<256x1xf32>, vector<2x1xf32> -> vector<2x1xf32>
    %c0_36 = arith.constant 0 : index
    %c0_37 = arith.constant 0 : index
    %41 = vector.load %arg15[%c0_36, %c0_37] : memref<1x1xf32, #tpu.memory_space<vmem>>, vector<1x1xf32>
    %42 = vector.broadcast %41 : vector<1x1xf32> to vector<2x1xf32>
    %43 = arith.addf %40, %42 : vector<2x1xf32>
    %44 = vector.extract_strided_slice %2 {offsets = [0, 2, 0], sizes = [2, 1, 256], strides = [1, 1, 1]} : vector<2x5x256xf32> to vector<2x1x256xf32>
    %45 = vector.shape_cast %44 : vector<2x1x256xf32> to vector<2x256xf32>
    %46 = vector.extract_strided_slice %5 {offsets = [0, 2, 0], sizes = [2, 1, 256], strides = [1, 1, 1]} : vector<2x5x256xf32> to vector<2x1x256xf32>
    %47 = vector.shape_cast %46 : vector<2x1x256xf32> to vector<2x256xf32>
    %c0_38 = arith.constant 0 : index
    %c0_39 = arith.constant 0 : index
    %48 = vector.load %arg6[%c0_38, %c0_39] : memref<256x256xf32, #tpu.memory_space<vmem>>, vector<256x256xf32>
    %cst_40 = arith.constant dense<0.000000e+00> : vector<2x256xf32>
    %49 = tpu.matmul %45, %48, %cst_40 {dimension_numbers = #tpu.dot_dimension_numbers<[1], [0], [0], [1], [0, 0, 1, 1], [], []>} : vector<2x256xf32>, vector<256x256xf32>, vector<2x256xf32> -> vector<2x256xf32>
    %c0_41 = arith.constant 0 : index
    %c0_42 = arith.constant 0 : index
    %50 = vector.load %arg7[%c0_41, %c0_42] : memref<256x256xf32, #tpu.memory_space<vmem>>, vector<256x256xf32>
    %cst_43 = arith.constant dense<0.000000e+00> : vector<2x256xf32>
    %51 = tpu.matmul %47, %50, %cst_43 {dimension_numbers = #tpu.dot_dimension_numbers<[1], [0], [0], [1], [0, 0, 1, 1], [], []>} : vector<2x256xf32>, vector<256x256xf32>, vector<2x256xf32> -> vector<2x256xf32>
    %52 = arith.addf %49, %51 : vector<2x256xf32>
    %53 = arith.mulf %45, %47 : vector<2x256xf32>
    %c0_44 = arith.constant 0 : index
    %c0_45 = arith.constant 0 : index
    %54 = vector.load %arg8[%c0_44, %c0_45] : memref<256x256xf32, #tpu.memory_space<vmem>>, vector<256x256xf32>
    %cst_46 = arith.constant dense<0.000000e+00> : vector<2x256xf32>
    %55 = tpu.matmul %53, %54, %cst_46 {dimension_numbers = #tpu.dot_dimension_numbers<[1], [0], [0], [1], [0, 0, 1, 1], [], []>} : vector<2x256xf32>, vector<256x256xf32>, vector<2x256xf32> -> vector<2x256xf32>
    %56 = arith.addf %52, %55 : vector<2x256xf32>
    %c0_47 = arith.constant 0 : index
    %c0_48 = arith.constant 0 : index
    %57 = vector.load %arg9[%c0_47, %c0_48] : memref<1x256xf32, #tpu.memory_space<vmem>>, vector<1x256xf32>
    %58 = vector.broadcast %57 : vector<1x256xf32> to vector<2x256xf32>
    %59 = arith.addf %56, %58 : vector<2x256xf32>
    %60 = math.tanh %59 : vector<2x256xf32>
    %c0_49 = arith.constant 0 : index
    %c0_50 = arith.constant 0 : index
    %61 = vector.load %arg10[%c0_49, %c0_50] : memref<256x256xf32, #tpu.memory_space<vmem>>, vector<256x256xf32>
    %cst_51 = arith.constant dense<0.000000e+00> : vector<2x256xf32>
    %62 = tpu.matmul %60, %61, %cst_51 {dimension_numbers = #tpu.dot_dimension_numbers<[1], [0], [0], [1], [0, 0, 1, 1], [], []>} : vector<2x256xf32>, vector<256x256xf32>, vector<2x256xf32> -> vector<2x256xf32>
    %c0_52 = arith.constant 0 : index
    %c0_53 = arith.constant 0 : index
    %63 = vector.load %arg11[%c0_52, %c0_53] : memref<1x256xf32, #tpu.memory_space<vmem>>, vector<1x256xf32>
    %64 = vector.broadcast %63 : vector<1x256xf32> to vector<2x256xf32>
    %65 = arith.addf %62, %64 : vector<2x256xf32>
    %66 = math.tanh %65 : vector<2x256xf32>
    %c0_54 = arith.constant 0 : index
    %c0_55 = arith.constant 0 : index
    %67 = vector.load %arg12[%c0_54, %c0_55] : memref<256x256xf32, #tpu.memory_space<vmem>>, vector<256x256xf32>
    %cst_56 = arith.constant dense<0.000000e+00> : vector<2x256xf32>
    %68 = tpu.matmul %66, %67, %cst_56 {dimension_numbers = #tpu.dot_dimension_numbers<[1], [0], [0], [1], [0, 0, 1, 1], [], []>} : vector<2x256xf32>, vector<256x256xf32>, vector<2x256xf32> -> vector<2x256xf32>
    %c0_57 = arith.constant 0 : index
    %c0_58 = arith.constant 0 : index
    %69 = vector.load %arg13[%c0_57, %c0_58] : memref<1x256xf32, #tpu.memory_space<vmem>>, vector<1x256xf32>
    %70 = vector.broadcast %69 : vector<1x256xf32> to vector<2x256xf32>
    %71 = arith.addf %68, %70 : vector<2x256xf32>
    %72 = math.tanh %71 : vector<2x256xf32>
    %c0_59 = arith.constant 0 : index
    %c0_60 = arith.constant 0 : index
    %73 = vector.load %arg14[%c0_59, %c0_60] : memref<256x1xf32, #tpu.memory_space<vmem>>, vector<256x1xf32>
    %cst_61 = arith.constant dense<0.000000e+00> : vector<2x1xf32>
    %74 = tpu.matmul %72, %73, %cst_61 {dimension_numbers = #tpu.dot_dimension_numbers<[1], [0], [0], [1], [0, 0, 1, 1], [], []>} : vector<2x256xf32>, vector<256x1xf32>, vector<2x1xf32> -> vector<2x1xf32>
    %c0_62 = arith.constant 0 : index
    %c0_63 = arith.constant 0 : index
    %75 = vector.load %arg15[%c0_62, %c0_63] : memref<1x1xf32, #tpu.memory_space<vmem>>, vector<1x1xf32>
    %76 = vector.broadcast %75 : vector<1x1xf32> to vector<2x1xf32>
    %77 = arith.addf %74, %76 : vector<2x1xf32>
    %78 = vector.extract_strided_slice %2 {offsets = [0, 3, 0], sizes = [2, 1, 256], strides = [1, 1, 1]} : vector<2x5x256xf32> to vector<2x1x256xf32>
    %79 = vector.shape_cast %78 : vector<2x1x256xf32> to vector<2x256xf32>
    %80 = vector.extract_strided_slice %5 {offsets = [0, 3, 0], sizes = [2, 1, 256], strides = [1, 1, 1]} : vector<2x5x256xf32> to vector<2x1x256xf32>
    %81 = vector.shape_cast %80 : vector<2x1x256xf32> to vector<2x256xf32>
    %c0_64 = arith.constant 0 : index
    %c0_65 = arith.constant 0 : index
    %82 = vector.load %arg6[%c0_64, %c0_65] : memref<256x256xf32, #tpu.memory_space<vmem>>, vector<256x256xf32>
    %cst_66 = arith.constant dense<0.000000e+00> : vector<2x256xf32>
    %83 = tpu.matmul %79, %82, %cst_66 {dimension_numbers = #tpu.dot_dimension_numbers<[1], [0], [0], [1], [0, 0, 1, 1], [], []>} : vector<2x256xf32>, vector<256x256xf32>, vector<2x256xf32> -> vector<2x256xf32>
    %c0_67 = arith.constant 0 : index
    %c0_68 = arith.constant 0 : index
    %84 = vector.load %arg7[%c0_67, %c0_68] : memref<256x256xf32, #tpu.memory_space<vmem>>, vector<256x256xf32>
    %cst_69 = arith.constant dense<0.000000e+00> : vector<2x256xf32>
    %85 = tpu.matmul %81, %84, %cst_69 {dimension_numbers = #tpu.dot_dimension_numbers<[1], [0], [0], [1], [0, 0, 1, 1], [], []>} : vector<2x256xf32>, vector<256x256xf32>, vector<2x256xf32> -> vector<2x256xf32>
    %86 = arith.addf %83, %85 : vector<2x256xf32>
    %87 = arith.mulf %79, %81 : vector<2x256xf32>
    %c0_70 = arith.constant 0 : index
    %c0_71 = arith.constant 0 : index
    %88 = vector.load %arg8[%c0_70, %c0_71] : memref<256x256xf32, #tpu.memory_space<vmem>>, vector<256x256xf32>
    %cst_72 = arith.constant dense<0.000000e+00> : vector<2x256xf32>
    %89 = tpu.matmul %87, %88, %cst_72 {dimension_numbers = #tpu.dot_dimension_numbers<[1], [0], [0], [1], [0, 0, 1, 1], [], []>} : vector<2x256xf32>, vector<256x256xf32>, vector<2x256xf32> -> vector<2x256xf32>
    %90 = arith.addf %86, %89 : vector<2x256xf32>
    %c0_73 = arith.constant 0 : index
    %c0_74 = arith.constant 0 : index
    %91 = vector.load %arg9[%c0_73, %c0_74] : memref<1x256xf32, #tpu.memory_space<vmem>>, vector<1x256xf32>
    %92 = vector.broadcast %91 : vector<1x256xf32> to vector<2x256xf32>
    %93 = arith.addf %90, %92 : vector<2x256xf32>
    %94 = math.tanh %93 : vector<2x256xf32>
    %c0_75 = arith.constant 0 : index
    %c0_76 = arith.constant 0 : index
    %95 = vector.load %arg10[%c0_75, %c0_76] : memref<256x256xf32, #tpu.memory_space<vmem>>, vector<256x256xf32>
    %cst_77 = arith.constant dense<0.000000e+00> : vector<2x256xf32>
    %96 = tpu.matmul %94, %95, %cst_77 {dimension_numbers = #tpu.dot_dimension_numbers<[1], [0], [0], [1], [0, 0, 1, 1], [], []>} : vector<2x256xf32>, vector<256x256xf32>, vector<2x256xf32> -> vector<2x256xf32>
    %c0_78 = arith.constant 0 : index
    %c0_79 = arith.constant 0 : index
    %97 = vector.load %arg11[%c0_78, %c0_79] : memref<1x256xf32, #tpu.memory_space<vmem>>, vector<1x256xf32>
    %98 = vector.broadcast %97 : vector<1x256xf32> to vector<2x256xf32>
    %99 = arith.addf %96, %98 : vector<2x256xf32>
    %100 = math.tanh %99 : vector<2x256xf32>
    %c0_80 = arith.constant 0 : index
    %c0_81 = arith.constant 0 : index
    %101 = vector.load %arg12[%c0_80, %c0_81] : memref<256x256xf32, #tpu.memory_space<vmem>>, vector<256x256xf32>
    %cst_82 = arith.constant dense<0.000000e+00> : vector<2x256xf32>
    %102 = tpu.matmul %100, %101, %cst_82 {dimension_numbers = #tpu.dot_dimension_numbers<[1], [0], [0], [1], [0, 0, 1, 1], [], []>} : vector<2x256xf32>, vector<256x256xf32>, vector<2x256xf32> -> vector<2x256xf32>
    %c0_83 = arith.constant 0 : index
    %c0_84 = arith.constant 0 : index
    %103 = vector.load %arg13[%c0_83, %c0_84] : memref<1x256xf32, #tpu.memory_space<vmem>>, vector<1x256xf32>
    %104 = vector.broadcast %103 : vector<1x256xf32> to vector<2x256xf32>
    %105 = arith.addf %102, %104 : vector<2x256xf32>
    %106 = math.tanh %105 : vector<2x256xf32>
    %c0_85 = arith.constant 0 : index
    %c0_86 = arith.constant 0 : index
    %107 = vector.load %arg14[%c0_85, %c0_86] : memref<256x1xf32, #tpu.memory_space<vmem>>, vector<256x1xf32>
    %cst_87 = arith.constant dense<0.000000e+00> : vector<2x1xf32>
    %108 = tpu.matmul %106, %107, %cst_87 {dimension_numbers = #tpu.dot_dimension_numbers<[1], [0], [0], [1], [0, 0, 1, 1], [], []>} : vector<2x256xf32>, vector<256x1xf32>, vector<2x1xf32> -> vector<2x1xf32>
    %c0_88 = arith.constant 0 : index
    %c0_89 = arith.constant 0 : index
    %109 = vector.load %arg15[%c0_88, %c0_89] : memref<1x1xf32, #tpu.memory_space<vmem>>, vector<1x1xf32>
    %110 = vector.broadcast %109 : vector<1x1xf32> to vector<2x1xf32>
    %111 = arith.addf %108, %110 : vector<2x1xf32>
    %112 = vector.extract_strided_slice %2 {offsets = [0, 4, 0], sizes = [2, 1, 256], strides = [1, 1, 1]} : vector<2x5x256xf32> to vector<2x1x256xf32>
    %113 = vector.shape_cast %112 : vector<2x1x256xf32> to vector<2x256xf32>
    %114 = vector.extract_strided_slice %5 {offsets = [0, 4, 0], sizes = [2, 1, 256], strides = [1, 1, 1]} : vector<2x5x256xf32> to vector<2x1x256xf32>
    %115 = vector.shape_cast %114 : vector<2x1x256xf32> to vector<2x256xf32>
    %c0_90 = arith.constant 0 : index
    %c0_91 = arith.constant 0 : index
    %116 = vector.load %arg6[%c0_90, %c0_91] : memref<256x256xf32, #tpu.memory_space<vmem>>, vector<256x256xf32>
    %cst_92 = arith.constant dense<0.000000e+00> : vector<2x256xf32>
    %117 = tpu.matmul %113, %116, %cst_92 {dimension_numbers = #tpu.dot_dimension_numbers<[1], [0], [0], [1], [0, 0, 1, 1], [], []>} : vector<2x256xf32>, vector<256x256xf32>, vector<2x256xf32> -> vector<2x256xf32>
    %c0_93 = arith.constant 0 : index
    %c0_94 = arith.constant 0 : index
    %118 = vector.load %arg7[%c0_93, %c0_94] : memref<256x256xf32, #tpu.memory_space<vmem>>, vector<256x256xf32>
    %cst_95 = arith.constant dense<0.000000e+00> : vector<2x256xf32>
    %119 = tpu.matmul %115, %118, %cst_95 {dimension_numbers = #tpu.dot_dimension_numbers<[1], [0], [0], [1], [0, 0, 1, 1], [], []>} : vector<2x256xf32>, vector<256x256xf32>, vector<2x256xf32> -> vector<2x256xf32>
    %120 = arith.addf %117, %119 : vector<2x256xf32>
    %121 = arith.mulf %113, %115 : vector<2x256xf32>
    %c0_96 = arith.constant 0 : index
    %c0_97 = arith.constant 0 : index
    %122 = vector.load %arg8[%c0_96, %c0_97] : memref<256x256xf32, #tpu.memory_space<vmem>>, vector<256x256xf32>
    %cst_98 = arith.constant dense<0.000000e+00> : vector<2x256xf32>
    %123 = tpu.matmul %121, %122, %cst_98 {dimension_numbers = #tpu.dot_dimension_numbers<[1], [0], [0], [1], [0, 0, 1, 1], [], []>} : vector<2x256xf32>, vector<256x256xf32>, vector<2x256xf32> -> vector<2x256xf32>
    %124 = arith.addf %120, %123 : vector<2x256xf32>
    %c0_99 = arith.constant 0 : index
    %c0_100 = arith.constant 0 : index
    %125 = vector.load %arg9[%c0_99, %c0_100] : memref<1x256xf32, #tpu.memory_space<vmem>>, vector<1x256xf32>
    %126 = vector.broadcast %125 : vector<1x256xf32> to vector<2x256xf32>
    %127 = arith.addf %124, %126 : vector<2x256xf32>
    %128 = math.tanh %127 : vector<2x256xf32>
    %c0_101 = arith.constant 0 : index
    %c0_102 = arith.constant 0 : index
    %129 = vector.load %arg10[%c0_101, %c0_102] : memref<256x256xf32, #tpu.memory_space<vmem>>, vector<256x256xf32>
    %cst_103 = arith.constant dense<0.000000e+00> : vector<2x256xf32>
    %130 = tpu.matmul %128, %129, %cst_103 {dimension_numbers = #tpu.dot_dimension_numbers<[1], [0], [0], [1], [0, 0, 1, 1], [], []>} : vector<2x256xf32>, vector<256x256xf32>, vector<2x256xf32> -> vector<2x256xf32>
    %c0_104 = arith.constant 0 : index
    %c0_105 = arith.constant 0 : index
    %131 = vector.load %arg11[%c0_104, %c0_105] : memref<1x256xf32, #tpu.memory_space<vmem>>, vector<1x256xf32>
    %132 = vector.broadcast %131 : vector<1x256xf32> to vector<2x256xf32>
    %133 = arith.addf %130, %132 : vector<2x256xf32>
    %134 = math.tanh %133 : vector<2x256xf32>
    %c0_106 = arith.constant 0 : index
    %c0_107 = arith.constant 0 : index
    %135 = vector.load %arg12[%c0_106, %c0_107] : memref<256x256xf32, #tpu.memory_space<vmem>>, vector<256x256xf32>
    %cst_108 = arith.constant dense<0.000000e+00> : vector<2x256xf32>
    %136 = tpu.matmul %134, %135, %cst_108 {dimension_numbers = #tpu.dot_dimension_numbers<[1], [0], [0], [1], [0, 0, 1, 1], [], []>} : vector<2x256xf32>, vector<256x256xf32>, vector<2x256xf32> -> vector<2x256xf32>
    %c0_109 = arith.constant 0 : index
    %c0_110 = arith.constant 0 : index
    %137 = vector.load %arg13[%c0_109, %c0_110] : memref<1x256xf32, #tpu.memory_space<vmem>>, vector<1x256xf32>
    %138 = vector.broadcast %137 : vector<1x256xf32> to vector<2x256xf32>
    %139 = arith.addf %136, %138 : vector<2x256xf32>
    %140 = math.tanh %139 : vector<2x256xf32>
    %c0_111 = arith.constant 0 : index
    %c0_112 = arith.constant 0 : index
    %141 = vector.load %arg14[%c0_111, %c0_112] : memref<256x1xf32, #tpu.memory_space<vmem>>, vector<256x1xf32>
    %cst_113 = arith.constant dense<0.000000e+00> : vector<2x1xf32>
    %142 = tpu.matmul %140, %141, %cst_113 {dimension_numbers = #tpu.dot_dimension_numbers<[1], [0], [0], [1], [0, 0, 1, 1], [], []>} : vector<2x256xf32>, vector<256x1xf32>, vector<2x1xf32> -> vector<2x1xf32>
    %c0_114 = arith.constant 0 : index
    %c0_115 = arith.constant 0 : index
    %143 = vector.load %arg15[%c0_114, %c0_115] : memref<1x1xf32, #tpu.memory_space<vmem>>, vector<1x1xf32>
    %144 = vector.broadcast %143 : vector<1x1xf32> to vector<2x1xf32>
    %145 = arith.addf %142, %144 : vector<2x1xf32>
    %c0_116 = arith.constant 0 : index
    %c0_117 = arith.constant 0 : index
    %146 = vector.load %arg19[%c0_116, %c0_117] : memref<4x256xf32, #tpu.memory_space<vmem>>, vector<1x256xf32>
    %147 = vector.broadcast %43 : vector<2x1xf32> to vector<2x256xf32>
    %148 = vector.broadcast %146 : vector<1x256xf32> to vector<2x256xf32>
    %149 = arith.mulf %147, %148 : vector<2x256xf32>
    %c1 = arith.constant 1 : index
    %c0_118 = arith.constant 0 : index
    %150 = vector.load %arg19[%c1, %c0_118] : memref<4x256xf32, #tpu.memory_space<vmem>>, vector<1x256xf32>
    %151 = vector.broadcast %77 : vector<2x1xf32> to vector<2x256xf32>
    %152 = vector.broadcast %150 : vector<1x256xf32> to vector<2x256xf32>
    %153 = arith.mulf %151, %152 : vector<2x256xf32>
    %154 = arith.addf %149, %153 : vector<2x256xf32>
    %c2 = arith.constant 2 : index
    %c0_119 = arith.constant 0 : index
    %155 = vector.load %arg19[%c2, %c0_119] : memref<4x256xf32, #tpu.memory_space<vmem>>, vector<1x256xf32>
    %156 = vector.broadcast %111 : vector<2x1xf32> to vector<2x256xf32>
    %157 = vector.broadcast %155 : vector<1x256xf32> to vector<2x256xf32>
    %158 = arith.mulf %156, %157 : vector<2x256xf32>
    %159 = arith.addf %154, %158 : vector<2x256xf32>
    %c3 = arith.constant 3 : index
    %c0_120 = arith.constant 0 : index
    %160 = vector.load %arg19[%c3, %c0_120] : memref<4x256xf32, #tpu.memory_space<vmem>>, vector<1x256xf32>
    %161 = vector.broadcast %145 : vector<2x1xf32> to vector<2x256xf32>
    %162 = vector.broadcast %160 : vector<1x256xf32> to vector<2x256xf32>
    %163 = arith.mulf %161, %162 : vector<2x256xf32>
    %164 = arith.addf %159, %163 : vector<2x256xf32>
    %c0_121 = arith.constant 0 : index
    %c0_122 = arith.constant 0 : index
    %165 = vector.load %arg16[%c0_121, %c0_122] : memref<256x256xf32, #tpu.memory_space<vmem>>, vector<256x256xf32>
    %cst_123 = arith.constant dense<0.000000e+00> : vector<2x256xf32>
    %166 = tpu.matmul %7, %165, %cst_123 {dimension_numbers = #tpu.dot_dimension_numbers<[1], [0], [0], [1], [0, 0, 1, 1], [], []>} : vector<2x256xf32>, vector<256x256xf32>, vector<2x256xf32> -> vector<2x256xf32>
    %c0_124 = arith.constant 0 : index
    %c0_125 = arith.constant 0 : index
    %167 = vector.load %arg17[%c0_124, %c0_125] : memref<256x256xf32, #tpu.memory_space<vmem>>, vector<256x256xf32>
    %cst_126 = arith.constant dense<0.000000e+00> : vector<2x256xf32>
    %168 = tpu.matmul %9, %167, %cst_126 {dimension_numbers = #tpu.dot_dimension_numbers<[1], [0], [0], [1], [0, 0, 1, 1], [], []>} : vector<2x256xf32>, vector<256x256xf32>, vector<2x256xf32> -> vector<2x256xf32>
    %169 = arith.addf %166, %168 : vector<2x256xf32>
    %170 = arith.mulf %7, %9 : vector<2x256xf32>
    %c0_127 = arith.constant 0 : index
    %c0_128 = arith.constant 0 : index
    %171 = vector.load %arg18[%c0_127, %c0_128] : memref<256x256xf32, #tpu.memory_space<vmem>>, vector<256x256xf32>
    %cst_129 = arith.constant dense<0.000000e+00> : vector<2x256xf32>
    %172 = tpu.matmul %170, %171, %cst_129 {dimension_numbers = #tpu.dot_dimension_numbers<[1], [0], [0], [1], [0, 0, 1, 1], [], []>} : vector<2x256xf32>, vector<256x256xf32>, vector<2x256xf32> -> vector<2x256xf32>
    %173 = arith.addf %169, %172 : vector<2x256xf32>
    %174 = arith.addf %173, %164 : vector<2x256xf32>
    %c0_130 = arith.constant 0 : index
    %c0_131 = arith.constant 0 : index
    %175 = vector.load %arg20[%c0_130, %c0_131] : memref<1x256xf32, #tpu.memory_space<vmem>>, vector<1x256xf32>
    %176 = vector.broadcast %175 : vector<1x256xf32> to vector<2x256xf32>
    %177 = arith.addf %174, %176 : vector<2x256xf32>
    %178 = math.tanh %177 : vector<2x256xf32>
    %c0_132 = arith.constant 0 : index
    %c0_133 = arith.constant 0 : index
    %179 = vector.load %arg21[%c0_132, %c0_133] : memref<256x256xf32, #tpu.memory_space<vmem>>, vector<256x256xf32>
    %cst_134 = arith.constant dense<0.000000e+00> : vector<2x256xf32>
    %180 = tpu.matmul %178, %179, %cst_134 {dimension_numbers = #tpu.dot_dimension_numbers<[1], [0], [0], [1], [0, 0, 1, 1], [], []>} : vector<2x256xf32>, vector<256x256xf32>, vector<2x256xf32> -> vector<2x256xf32>
    %c0_135 = arith.constant 0 : index
    %c0_136 = arith.constant 0 : index
    %181 = vector.load %arg22[%c0_135, %c0_136] : memref<1x256xf32, #tpu.memory_space<vmem>>, vector<1x256xf32>
    %182 = vector.broadcast %181 : vector<1x256xf32> to vector<2x256xf32>
    %183 = arith.addf %180, %182 : vector<2x256xf32>
    %184 = math.tanh %183 : vector<2x256xf32>
    %c0_137 = arith.constant 0 : index
    %c0_138 = arith.constant 0 : index
    %185 = vector.load %arg23[%c0_137, %c0_138] : memref<256x256xf32, #tpu.memory_space<vmem>>, vector<256x256xf32>
    %cst_139 = arith.constant dense<0.000000e+00> : vector<2x256xf32>
    %186 = tpu.matmul %184, %185, %cst_139 {dimension_numbers = #tpu.dot_dimension_numbers<[1], [0], [0], [1], [0, 0, 1, 1], [], []>} : vector<2x256xf32>, vector<256x256xf32>, vector<2x256xf32> -> vector<2x256xf32>
    %c0_140 = arith.constant 0 : index
    %c0_141 = arith.constant 0 : index
    %187 = vector.load %arg24[%c0_140, %c0_141] : memref<1x256xf32, #tpu.memory_space<vmem>>, vector<1x256xf32>
    %188 = vector.broadcast %187 : vector<1x256xf32> to vector<2x256xf32>
    %189 = arith.addf %186, %188 : vector<2x256xf32>
    %190 = math.tanh %189 : vector<2x256xf32>
    %c0_142 = arith.constant 0 : index
    %c0_143 = arith.constant 0 : index
    %191 = vector.load %arg25[%c0_142, %c0_143] : memref<256x3xf32, #tpu.memory_space<vmem>>, vector<256x3xf32>
    %cst_144 = arith.constant dense<0.000000e+00> : vector<2x3xf32>
    %192 = tpu.matmul %190, %191, %cst_144 {dimension_numbers = #tpu.dot_dimension_numbers<[1], [0], [0], [1], [0, 0, 1, 1], [], []>} : vector<2x256xf32>, vector<256x3xf32>, vector<2x3xf32> -> vector<2x3xf32>
    %c0_145 = arith.constant 0 : index
    %c0_146 = arith.constant 0 : index
    %193 = vector.load %arg26[%c0_145, %c0_146] : memref<1x3xf32, #tpu.memory_space<vmem>>, vector<1x3xf32>
    %194 = vector.broadcast %193 : vector<1x3xf32> to vector<2x3xf32>
    %195 = arith.addf %192, %194 : vector<2x3xf32>
    %c0_147 = arith.constant 0 : index
    %c0_148 = arith.constant 0 : index
    %196 = vector.load %arg27[%c0_147, %c0_148] : memref<2x3xf32, #tpu.memory_space<vmem>>, vector<2x3xf32>
    tpu.vector_store %arg27[%c0_147, %c0_148], %195 {strides = array<i32>} : memref<2x3xf32, #tpu.memory_space<vmem>>, vector<2x3xf32>,
    %197 = tpu.iota {dimensions = array<i32: 1>} : vector<2x3xi32>
    %c0_149 = arith.constant 0 : index
    %c0_150 = arith.constant 0 : index
    %198 = vector.load %arg5[%c0_149, %c0_150] : memref<2x1xi32, #tpu.memory_space<vmem>>, vector<2x1xi32>
    %199 = vector.broadcast %198 : vector<2x1xi32> to vector<2x3xi32>
    %200 = arith.cmpi eq, %197, %199 : vector<2x3xi32>
    %201 = arith.extui %200 : vector<2x3xi1> to vector<2x3xi32>
    %202 = arith.sitofp %201 : vector<2x3xi32> to vector<2x3xf32>
    %cst_151 = arith.constant dense<0xFF800000> : vector<2xf32>
    %203 = vector.multi_reduction <maximumf>, %195, %cst_151 [1] : vector<2x3xf32> to vector<2xf32>
    %204 = vector.shape_cast %203 : vector<2xf32> to vector<2x1xf32>
    %205 = vector.broadcast %204 : vector<2x1xf32> to vector<2x3xf32>
    %206 = arith.subf %195, %205 : vector<2x3xf32>
    %207 = math.exp %206 : vector<2x3xf32>
    %cst_152 = arith.constant dense<0.000000e+00> : vector<2xf32>
    %208 = vector.multi_reduction <add>, %207, %cst_152 [1] : vector<2x3xf32> to vector<2xf32>
    %209 = vector.shape_cast %208 : vector<2xf32> to vector<2x1xf32>
    %210 = math.log %209 : vector<2x1xf32>
    %211 = arith.addf %204, %210 : vector<2x1xf32>
    %212 = arith.mulf %195, %202 : vector<2x3xf32>
    %cst_153 = arith.constant dense<0.000000e+00> : vector<2xf32>
    %213 = vector.multi_reduction <add>, %212, %cst_153 [1] : vector<2x3xf32> to vector<2xf32>
    %214 = vector.shape_cast %213 : vector<2xf32> to vector<2x1xf32>
    %215 = arith.subf %211, %214 : vector<2x1xf32>
    %c0_154 = arith.constant 0 : index
    %c0_155 = arith.constant 0 : index
    %216 = vector.load %arg28[%c0_154, %c0_155] : memref<2x1xf32, #tpu.memory_space<vmem>>, vector<2x1xf32>
    tpu.vector_store %arg28[%c0_154, %c0_155], %215 {strides = array<i32>} : memref<2x1xf32, #tpu.memory_space<vmem>>, vector<2x1xf32>,
    return
  }
  func.func @transform_0(%arg0: i32) -> (i32, i32, i32) {
    %c0_i32 = arith.constant 0 : i32
    %c0_i32_0 = arith.constant 0 : i32
    %c0_i32_1 = arith.constant 0 : i32
    return %arg0, %c0_i32, %c0_i32_0 : i32, i32, i32
  }
  func.func @transform_1(%arg0: i32) -> (i32, i32, i32) {
    %c0_i32 = arith.constant 0 : i32
    %c0_i32_0 = arith.constant 0 : i32
    %c0_i32_1 = arith.constant 0 : i32
    return %arg0, %c0_i32, %c0_i32_0 : i32, i32, i32
  }
  func.func @transform_2(%arg0: i32) -> (i32, i32, i32) {
    %c0_i32 = arith.constant 0 : i32
    %c0_i32_0 = arith.constant 0 : i32
    %c0_i32_1 = arith.constant 0 : i32
    return %arg0, %c0_i32, %c0_i32_0 : i32, i32, i32
  }
  func.func @transform_3(%arg0: i32) -> (i32, i32, i32) {
    %c0_i32 = arith.constant 0 : i32
    %c0_i32_0 = arith.constant 0 : i32
    %c0_i32_1 = arith.constant 0 : i32
    return %arg0, %c0_i32, %c0_i32_0 : i32, i32, i32
  }
  func.func @transform_4(%arg0: i32) -> (i32, i32) {
    %c0_i32 = arith.constant 0 : i32
    %c0_i32_0 = arith.constant 0 : i32
    return %arg0, %c0_i32 : i32, i32
  }
  func.func @transform_5(%arg0: i32) -> (i32, i32) {
    %c0_i32 = arith.constant 0 : i32
    %c0_i32_0 = arith.constant 0 : i32
    %c0_i32_1 = arith.constant 0 : i32
    return %c0_i32, %c0_i32_0 : i32, i32
  }
  func.func @transform_6(%arg0: i32) -> (i32, i32) {
    %c0_i32 = arith.constant 0 : i32
    %c0_i32_0 = arith.constant 0 : i32
    %c0_i32_1 = arith.constant 0 : i32
    return %c0_i32, %c0_i32_0 : i32, i32
  }
  func.func @transform_7(%arg0: i32) -> (i32, i32) {
    %c0_i32 = arith.constant 0 : i32
    %c0_i32_0 = arith.constant 0 : i32
    %c0_i32_1 = arith.constant 0 : i32
    return %c0_i32, %c0_i32_0 : i32, i32
  }
  func.func @transform_8(%arg0: i32) -> (i32, i32) {
    %c0_i32 = arith.constant 0 : i32
    %c0_i32_0 = arith.constant 0 : i32
    %c0_i32_1 = arith.constant 0 : i32
    return %c0_i32, %c0_i32_0 : i32, i32
  }
  func.func @transform_9(%arg0: i32) -> (i32, i32) {
    %c0_i32 = arith.constant 0 : i32
    %c0_i32_0 = arith.constant 0 : i32
    %c0_i32_1 = arith.constant 0 : i32
    return %c0_i32, %c0_i32_0 : i32, i32
  }
  func.func @transform_10(%arg0: i32) -> (i32, i32) {
    %c0_i32 = arith.constant 0 : i32
    %c0_i32_0 = arith.constant 0 : i32
    %c0_i32_1 = arith.constant 0 : i32
    return %c0_i32, %c0_i32_0 : i32, i32
  }
  func.func @transform_11(%arg0: i32) -> (i32, i32) {
    %c0_i32 = arith.constant 0 : i32
    %c0_i32_0 = arith.constant 0 : i32
    %c0_i32_1 = arith.constant 0 : i32
    return %c0_i32, %c0_i32_0 : i32, i32
  }
  func.func @transform_12(%arg0: i32) -> (i32, i32) {
    %c0_i32 = arith.constant 0 : i32
    %c0_i32_0 = arith.constant 0 : i32
    %c0_i32_1 = arith.constant 0 : i32
    return %c0_i32, %c0_i32_0 : i32, i32
  }
  func.func @transform_13(%arg0: i32) -> (i32, i32) {
    %c0_i32 = arith.constant 0 : i32
    %c0_i32_0 = arith.constant 0 : i32
    %c0_i32_1 = arith.constant 0 : i32
    return %c0_i32, %c0_i32_0 : i32, i32
  }
  func.func @transform_14(%arg0: i32) -> (i32, i32) {
    %c0_i32 = arith.constant 0 : i32
    %c0_i32_0 = arith.constant 0 : i32
    %c0_i32_1 = arith.constant 0 : i32
    return %c0_i32, %c0_i32_0 : i32, i32
  }
  func.func @transform_15(%arg0: i32) -> (i32, i32) {
    %c0_i32 = arith.constant 0 : i32
    %c0_i32_0 = arith.constant 0 : i32
    %c0_i32_1 = arith.constant 0 : i32
    return %c0_i32, %c0_i32_0 : i32, i32
  }
  func.func @transform_16(%arg0: i32) -> (i32, i32) {
    %c0_i32 = arith.constant 0 : i32
    %c0_i32_0 = arith.constant 0 : i32
    %c0_i32_1 = arith.constant 0 : i32
    return %c0_i32, %c0_i32_0 : i32, i32
  }
  func.func @transform_17(%arg0: i32) -> (i32, i32) {
    %c0_i32 = arith.constant 0 : i32
    %c0_i32_0 = arith.constant 0 : i32
    %c0_i32_1 = arith.constant 0 : i32
    return %c0_i32, %c0_i32_0 : i32, i32
  }
  func.func @transform_18(%arg0: i32) -> (i32, i32) {
    %c0_i32 = arith.constant 0 : i32
    %c0_i32_0 = arith.constant 0 : i32
    %c0_i32_1 = arith.constant 0 : i32
    return %c0_i32, %c0_i32_0 : i32, i32
  }
  func.func @transform_19(%arg0: i32) -> (i32, i32) {
    %c0_i32 = arith.constant 0 : i32
    %c0_i32_0 = arith.constant 0 : i32
    %c0_i32_1 = arith.constant 0 : i32
    return %c0_i32, %c0_i32_0 : i32, i32
  }
  func.func @transform_20(%arg0: i32) -> (i32, i32) {
    %c0_i32 = arith.constant 0 : i32
    %c0_i32_0 = arith.constant 0 : i32
    %c0_i32_1 = arith.constant 0 : i32
    return %c0_i32, %c0_i32_0 : i32, i32
  }
  func.func @transform_21(%arg0: i32) -> (i32, i32) {
    %c0_i32 = arith.constant 0 : i32
    %c0_i32_0 = arith.constant 0 : i32
    %c0_i32_1 = arith.constant 0 : i32
    return %c0_i32, %c0_i32_0 : i32, i32
  }
  func.func @transform_22(%arg0: i32) -> (i32, i32) {
    %c0_i32 = arith.constant 0 : i32
    %c0_i32_0 = arith.constant 0 : i32
    %c0_i32_1 = arith.constant 0 : i32
    return %c0_i32, %c0_i32_0 : i32, i32
  }
  func.func @transform_23(%arg0: i32) -> (i32, i32) {
    %c0_i32 = arith.constant 0 : i32
    %c0_i32_0 = arith.constant 0 : i32
    %c0_i32_1 = arith.constant 0 : i32
    return %c0_i32, %c0_i32_0 : i32, i32
  }
  func.func @transform_24(%arg0: i32) -> (i32, i32) {
    %c0_i32 = arith.constant 0 : i32
    %c0_i32_0 = arith.constant 0 : i32
    %c0_i32_1 = arith.constant 0 : i32
    return %c0_i32, %c0_i32_0 : i32, i32
  }
  func.func @transform_25(%arg0: i32) -> (i32, i32) {
    %c0_i32 = arith.constant 0 : i32
    %c0_i32_0 = arith.constant 0 : i32
    %c0_i32_1 = arith.constant 0 : i32
    return %c0_i32, %c0_i32_0 : i32, i32
  }
  func.func @transform_26(%arg0: i32) -> (i32, i32) {
    %c0_i32 = arith.constant 0 : i32
    %c0_i32_0 = arith.constant 0 : i32
    return %arg0, %c0_i32 : i32, i32
  }
  func.func @transform_27(%arg0: i32) -> (i32, i32) {
    %c0_i32 = arith.constant 0 : i32
    %c0_i32_0 = arith.constant 0 : i32
    return %arg0, %c0_i32 : i32, i32
  }
}

</mosaic_0001>

<bundles_post_ra>
// kernel: tpu_custom_call.1
= control target key start
LH: loop header
LB: loop body
LE: loop exit
PB: predicated region body
PF: predicated region fallthrough
CT: control target
= control target key end

     0   :  { %s8110_s0 = inlined_call_operand.vmem [shape: f32[2,8,256], index: 0, kind: input, shape index: {}]   ;;  %s8111_s1 = inlined_call_operand.vmem [shape: f32[2,8,256], index: 1, kind: input, shape index: {}]   ;;  %s8112_s2 = inlined_call_operand.vmem [shape: f32[2,5,8], index: 2, kind: input, shape index: {}]   ;;  %s8113_s3 = inlined_call_operand.vmem [shape: f32[2,5,8], index: 3, kind: input, shape index: {}]   ;;  %s8114_s4 = inlined_call_operand.vmem [shape: s32[2,1], index: 4, kind: input, shape index: {}]   ;;  %s8115_s5 = inlined_call_operand.vmem [shape: f32[256,256], index: 5, kind: input, shape index: {}]   ;;  %s8116_s6 = inlined_call_operand.hbm [shape: f32[256,256], index: 6, kind: input, shape index: {}]   ;;  %s8117_s7 = inlined_call_operand.hbm [shape: f32[256,256], index: 7, kind: input, shape index: {}]   ;;  %s8118_s8 = inlined_call_operand.vmem [shape: f32[1,256], index: 8, kind: input, shape index: {}]   ;;  %s8119_s9 = inlined_call_operand.hbm [shape: f32[256,256], index: 9, kind: input, shape index: {}]   ;;  %s8120_s10 = inlined_call_operand.hbm [shape: f32[1,256], index: 10, kind: input, shape index: {}]   ;;  %s8121_s11 = inlined_call_operand.hbm [shape: f32[256,256], index: 11, kind: input, shape index: {}]   ;;  %s8122_s12 = inlined_call_operand.hbm [shape: f32[1,256], index: 12, kind: input, shape index: {}]   ;;  %s8123_s13 = inlined_call_operand.vmem [shape: f32[256,1], index: 13, kind: input, shape index: {}]   ;;  %s8124_s14 = inlined_call_operand.<no memory space> [shape: f32[1,1], index: 14, kind: input, shape index: {}]   ;;  %s8125_s15 = inlined_call_operand.hbm [shape: f32[256,256], index: 15, kind: input, shape index: {}]   ;;  %s8126_s16 = inlined_call_operand.hbm [shape: f32[256,256], index: 16, kind: input, shape index: {}]   ;;  %s8127_s17 = inlined_call_operand.hbm [shape: f32[256,256], index: 17, kind: input, shape index: {}]   ;;  %s8128_s18 = inlined_call_operand.vmem [shape: f32[4,256], index: 18, kind: input, shape index: {}]   ;;  %s8129_s19 = inlined_call_operand.hbm [shape: f32[1,256], index: 19, kind: input, shape index: {}]   ;;  %s8130_s20 = inlined_call_operand.hbm [shape: f32[256,256], index: 20, kind: input, shape index: {}]   ;;  %s8131_s21 = inlined_call_operand.hbm [shape: f32[1,256], index: 21, kind: input, shape index: {}]   ;;  %s8132_s22 = inlined_call_operand.hbm [shape: f32[256,256], index: 22, kind: input, shape index: {}]   ;;  %s8133_s23 = inlined_call_operand.hbm [shape: f32[1,256], index: 23, kind: input, shape index: {}]   ;;  %s8134_s24 = inlined_call_operand.vmem [shape: f32[256,3], index: 24, kind: input, shape index: {}]   ;;  %s8135_s25 = inlined_call_operand.vmem [shape: f32[1,3], index: 25, kind: input, shape index: {}]   ;;  %s8136_s26 = inlined_call_operand.hbm [shape: f32[2,3], index: 26, kind: output, shape index: {0}]   ;;  %s8137_s27 = inlined_call_operand.vmem [shape: f32[2,1], index: 27, kind: output, shape index: {1}]  }
   0x1   :  { %8485 = sst [smem:[#allocation282_spill]] %s8110_s0  ;;  %v33_v0 = vstv %s8124_s14 }
   0x2   :  { %8486 = sst [smem:[#allocation283_spill]] %s8111_s1  ;;  %34 = vst [vmem:[#allocation2] sm:$0x1] %v33_v0 }
   0x3   :  { %8487 = sst [smem:[#allocation284_spill]] %s8112_s2 }
   0x4   :  { %8488 = sst [smem:[#allocation285_spill]] %s8113_s3 }
   0x5   :  { %8489 = sst [smem:[#allocation286_spill]] %s8114_s4 }
   0x6   :  { %8490 = sst [smem:[#allocation287_spill]] %s8115_s5 }
   0x7   :  { %8491 = sst [smem:[#allocation288_spill]] %s8116_s6 }
   0x8   :  { %8492 = sst [smem:[#allocation289_spill]] %s8117_s7 }
   0x9   :  { %8493 = sst [smem:[#allocation290_spill]] %s8118_s8 }
   0xa   :  { %8494 = sst [smem:[#allocation291_spill]] %s8119_s9 }
   0xb   :  { %8495 = sst [smem:[#allocation292_spill]] %s8120_s10 }
   0xc   :  { %8496 = sst [smem:[#allocation293_spill]] %s8121_s11 }
   0xd   :  { %35 = vsyncpa [#allocation4], 0 }
   0xe   :  { %36 = vsyncpa [#allocation7], 0 }
   0xf   :  { %37 = vsyncpa [#allocation10], 0 }
  0x10   :  { %38 = vsyncpa [#allocation13], 0 }
  0x11   :  { %39 = vsyncpa [#allocation16], 0 }
  0x12   :  { %40 = vsyncpa [#allocation19], 0 }
  0x13   :  { %41 = vsyncpa [#allocation22], 0 }
  0x14   :  { %42 = vsyncpa [#allocation25], 0 }
  0x15   :  { %43 = vsyncpa [#allocation5], 0  ;;  %s8497_s9 = sld [smem:[#allocation289_spill]]  ;;  %s4796_s28 = smov [#allocation6]  }
  0x16   :  { %s75_s0 = sshll.u32 %s4796_s28, 4  ;;  %s8498_s29 = sld [smem:[#allocation292_spill]]  ;;  %s76_s0 = int_to_ptr.vmem [resolvable:$true] %s75_s0 }
  0x17   :  { %s8143_s6 = smov 256   ;;  %s4798_s11 = smov 16  }
  0x18   :  { %s4799_s2 = smov [#allocation9]   ;;  %s126_s8 = sshll.u32 %s8122_s12, 4  ;;  %s127_s8 = int_to_ptr.hbm [resolvable:$true] %s126_s8 }
  0x19   :  { %s104_s3 = sshll.u32 %s4799_s2, 4  ;;  %s153_s28 = sshll.u32 %s8126_s16, 4  ;;  %s105_s3 = int_to_ptr.vmem [resolvable:$true] %s104_s3  ;;  %s154_s28 = int_to_ptr.hbm [resolvable:$true] %s153_s28 }
  0x1a   :  { %s4800_s10 = smov [#allocation12]   ;;  %s8499_s12 = smov 256  }
  0x1b   :  { %s73_s5 = sshll.u32 %s8497_s9, 4  ;;  %s128_s14 = sshll.u32 %s4800_s10, 4  ;;  %s74_s5 = int_to_ptr.hbm [resolvable:$true] %s73_s5  ;;  %s129_s14 = int_to_ptr.vmem [resolvable:$true] %s128_s14 }
  0x1c   :  { %s102_s1 = sshll.u32 %s8498_s29, 4  ;;  %s206_s16 = sshll.u32 %s8131_s21, 4  ;;  %s103_s1 = int_to_ptr.hbm [resolvable:$true] %s102_s1  ;;  %s207_s16 = int_to_ptr.hbm [resolvable:$true] %s206_s16 }
  0x1d   :  { %81 = dma.hbm_to_vmem [thread:$0]  %s74_s5, 8192, %s76_s0, [#allocation7], %s8143_s6, %s8143_s6, %s4798_s11  }
  0x1e   :  { %107 = dma.hbm_to_vmem [thread:$0]  %s103_s1, 32, %s105_s3, [#allocation10]  }
  0x1f   :  { %131 = dma.hbm_to_vmem [thread:$0]  %s127_s8, 32, %s129_s14, [#allocation13]  }
  0x20   :  { %s4801_s5 = smov [#allocation15]   ;;  %s182_s6 = sshll.u32 %s8129_s19, 4  ;;  %s183_s6 = int_to_ptr.hbm [resolvable:$true] %s182_s6 }
  0x21   :  { %s155_s0 = sshll.u32 %s4801_s5, 4  ;;  %s4802_s7 = smov [#allocation18]   ;;  %s156_s0 = int_to_ptr.vmem [resolvable:$true] %s155_s0 }
  0x22   :  { %161 = dma.hbm_to_vmem [thread:$0]  %s154_s28, 8192, %s156_s0, [#allocation16], %s8499_s12, %s8499_s12, %s4798_s11  }
  0x23   :  { %s184_s4 = sshll.u32 %s4802_s7, 4  ;;  %s4803_s8 = smov [#allocation21]   ;;  %s185_s4 = int_to_ptr.vmem [resolvable:$true] %s184_s4 }
  0x24   :  { %187 = dma.hbm_to_vmem [thread:$0]  %s183_s6, 32, %s185_s4, [#allocation19]  }
  0x25   :  { %s208_s30 = sshll.u32 %s4803_s8, 4  ;;  %s8500_s19 = sld [smem:[#allocation288_spill]]  ;;  %s209_s30 = int_to_ptr.vmem [resolvable:$true] %s208_s30 }
  0x26   :  { %211 = dma.hbm_to_vmem [thread:$0]  %s207_s16, 32, %s209_s30, [#allocation22]  }
  0x27   :  { %s8501_s0 = sld [smem:[#allocation291_spill]]  ;;  %s4804_s2 = smov [#allocation3]  }
  0x28   :  { %s62_s21 = sshll.u32 %s4804_s2, 4  ;;  %s4805_s6 = smov [#allocation8]   ;;  %s63_s21 = int_to_ptr.vmem [resolvable:$true] %s62_s21 }
  0x29   :  { %s90_s1 = sshll.u32 %s4805_s6, 4  ;;  %s8502_s4 = sld [smem:[#allocation293_spill]]  ;;  %s91_s1 = int_to_ptr.vmem [resolvable:$true] %s90_s1 }
  0x2a   :  { %s140_s9 = sshll.u32 %s8125_s15, 4  ;;  %s4806_s10 = smov [#allocation11]   ;;  %s141_s9 = int_to_ptr.hbm [resolvable:$true] %s140_s9 }
  0x2b   :  { %s60_s14 = sshll.u32 %s8500_s19, 4  ;;  %s114_s19 = sshll.u32 %s4806_s10, 4  ;;  %s61_s14 = int_to_ptr.hbm [resolvable:$true] %s60_s14  ;;  %s115_s19 = int_to_ptr.vmem [resolvable:$true] %s114_s19 }
  0x2c   :  { %68 = dma.hbm_to_vmem [thread:$0]  %s61_s14, 8192, %s63_s21, [#allocation4], %s8499_s12, %s8499_s12, %s4798_s11  }
  0x2d   :  { %s88_s29 = sshll.u32 %s8501_s0, 4  ;;  %s4807_s14 = smov [#allocation14]   ;;  %s89_s29 = int_to_ptr.hbm [resolvable:$true] %s88_s29 }
  0x2e   :  { %96 = dma.hbm_to_vmem [thread:$0]  %s89_s29, 8192, %s91_s1, [#allocation7], %s8499_s12, %s8499_s12, %s4798_s11  }
  0x2f   :  { %s112_s8 = sshll.u32 %s8502_s4, 4  ;;  %s142_s5 = sshll.u32 %s4807_s14, 4  ;;  %s113_s8 = int_to_ptr.hbm [resolvable:$true] %s112_s8  ;;  %s143_s5 = int_to_ptr.vmem [resolvable:$true] %s142_s5 }
  0x30   :  { %120 = dma.hbm_to_vmem [thread:$0]  %s113_s8, 8192, %s115_s19, [#allocation10], %s8499_s12, %s8499_s12, %s4798_s11  }
  0x31   :  { %s166_s2 = sshll.u32 %s8127_s17, 4  ;;  %s192_s21 = sshll.u32 %s8130_s20, 4  ;;  %s167_s2 = int_to_ptr.hbm [resolvable:$true] %s166_s2  ;;  %s193_s21 = int_to_ptr.hbm [resolvable:$true] %s192_s21 }
  0x32   :  { %148 = dma.hbm_to_vmem [thread:$0]  %s141_s9, 8192, %s143_s5, [#allocation13], %s8499_s12, %s8499_s12, %s4798_s11  }
  0x33   :  { %s4808_s6 = smov [#allocation17]   ;;  %s4809_s3 = smov [#allocation20]  }
  0x34   :  { %s168_s1 = sshll.u32 %s4808_s6, 4  ;;  %s194_s17 = sshll.u32 %s4809_s3, 4  ;;  %s169_s1 = int_to_ptr.vmem [resolvable:$true] %s168_s1  ;;  %s195_s17 = int_to_ptr.vmem [resolvable:$true] %s194_s17 }
  0x35   :  { %174 = dma.hbm_to_vmem [thread:$0]  %s167_s2, 8192, %s169_s1, [#allocation16], %s8499_s12, %s8499_s12, %s4798_s11  }
  0x36   :  { %s216_s8 = sshll.u32 %s8132_s22, 4  ;;  %s230_s30 = sshll.u32 %s8133_s23, 4  ;;  %s217_s8 = int_to_ptr.hbm [resolvable:$true] %s216_s8  ;;  %s231_s30 = int_to_ptr.hbm [resolvable:$true] %s230_s30 }
  0x37   :  { %200 = dma.hbm_to_vmem [thread:$0]  %s193_s21, 8192, %s195_s17, [#allocation19], %s8499_s12, %s8499_s12, %s4798_s11  }
  0x38   :  { %s4810_s9 = smov [#allocation23]   ;;  %s4811_s19 = smov [#allocation24]  }
  0x39   :  { %s218_s10 = sshll.u32 %s4810_s9, 4  ;;  %s232_s22 = sshll.u32 %s4811_s19, 4  ;;  %s219_s10 = int_to_ptr.vmem [resolvable:$true] %s218_s10  ;;  %s233_s22 = int_to_ptr.vmem [resolvable:$true] %s232_s22 }
  0x3a   :  { %224 = dma.hbm_to_vmem [thread:$0]  %s217_s8, 8192, %s219_s10, [#allocation22], %s8499_s12, %s8499_s12, %s4798_s11  }
  0x3b   :  { %235 = dma.hbm_to_vmem [thread:$0]  %s231_s30, 32, %s233_s22, [#allocation25]  }
  0x3c   :  { %4778 = dma.done.wait [#allocation4], 8192  }
  0x3d   :  { %4779 = vsyncadd [#allocation4], 4294959104 }
  0x3e   :  { %4780 = dma.done.wait [#allocation7], 16384  }
  0x3f   :  { %4781 = vsyncadd [#allocation7], 4294950912 }
  0x40   :  { %4782 = dma.done.wait [#allocation10], 8224  }
  0x41   :  { %4783 = vsyncadd [#allocation10], 4294959072 }
  0x42   :  { %4784 = dma.done.wait [#allocation13], 8224  }
  0x43   :  { %4785 = vsyncadd [#allocation13], 4294959072 }
  0x44   :  { %4786 = dma.done.wait [#allocation16], 16384  }
  0x45   :  { %4787 = vsyncadd [#allocation16], 4294950912 }
  0x46   :  { %4788 = dma.done.wait [#allocation19], 8224  }
  0x47   :  { %4789 = vsyncadd [#allocation19], 4294959072 }
  0x48   :  { %4790 = dma.done.wait [#allocation22], 8224  }
  0x49   :  { %4791 = vsyncadd [#allocation22], 4294959072 }
  0x4a   :  { %4792 = dma.done.wait [#allocation25], 32  }
  0x4b   :  { %4793 = vsyncadd [#allocation25], 4294967264  ;;  %vm302_vm0 = vcmask 64512   ;;  %s8503_s12 = sld [smem:[#allocation282_spill]]  ;;  %v575_v8 = vld [vmem:[#allocation3 + $0xf0] sm:$0xff]  ;;  %v573_v10 = vld [vmem:[#allocation3 + $0xe0] sm:$0xff] }
  0x4c   :  { %s8504_s2 = sld [smem:[#allocation284_spill]]  ;;  %v607_v9 = vld [vmem:[#allocation3 + $0x1f0] sm:$0xff]  ;;  %620 = vmatpush.msra.mxu0 %v575_v8  ;;  %v605_v11 = vld [vmem:[#allocation3 + $0x1e0] sm:$0xff]  ;;  %v576_v24 = vld [vmem:[#allocation3 + $0xf8] sm:$0xff]  ;;  %vm614_vm1 = vcmask 1041409   ;;  %vm3667_vm2 = vcmask 17408  }
  0x4d   :  { %s8505_s17 = sld [smem:[#allocation283_spill]]  ;;  %640 = vmatpush.msra.mxu1 %v607_v9  ;;  %v571_v12 = vld [vmem:[#allocation3 + $0xd0] sm:$0xff]  ;;  %v569_v17 = vld [vmem:[#allocation3 + $0xc0] sm:$0xff]  ;;  %v608_v25 = vld [vmem:[#allocation3 + $0x1f8] sm:$0xff]  ;;  %s3704_s21 = sshll.u32 %s8136_s26, 4  ;;  %vm3695_vm4 = vcmask 1024   ;;  %s3705_s21 = int_to_ptr.hbm [resolvable:$true] %s3704_s21 }
  0x4e   :  { %621 = vmatpush.msra.mxu0 %v573_v10  ;;  %v603_v14 = vld [vmem:[#allocation3 + $0x1d0] sm:$0xff]  ;;  %v601_v18 = vld [vmem:[#allocation3 + $0x1c0] sm:$0xff]  ;;  %s8506_s23 = sld [smem:[#allocation285_spill]]  ;;  %v574_v28 = vld [vmem:[#allocation3 + $0xe8] sm:$0xff] }
  0x4f   :  { %641 = vmatpush.msra.mxu1 %v605_v11  ;;  %v567_v19 = vld [vmem:[#allocation3 + $0xb0] sm:$0xff]  ;;  %v565_v21 = vld [vmem:[#allocation3 + $0xa0] sm:$0xff]  ;;  %v606_v29 = vld [vmem:[#allocation3 + $0x1e8] sm:$0xff]  ;;  %s8507_s28 = sld [smem:[#allocation287_spill]] }
  0x50   :  { %622 = vmatpush.msra.mxu0 %v571_v12  ;;  %v599_v20 = vld [vmem:[#allocation3 + $0x1b0] sm:$0xff]  ;;  %v597_v22 = vld [vmem:[#allocation3 + $0x1a0] sm:$0xff]  ;;  %v572_v32 = vld [vmem:[#allocation3 + $0xd8] sm:$0xff]  ;;  %s9172_s0 = sld [smem:[#allocation286_spill]] }
  0x51   :  { %v298_v1 = vld [vmem:[%s8503_s12] sm:$0xff]  ;;  %v299_v2 = vld [vmem:[%s8503_s12 + $0x8] sm:$0xff]  ;;  %v300_v4 = vld [vmem:[%s8503_s12 + $0x10] sm:$0xff]  ;;  %642 = vmatpush.msra.mxu1 %v603_v14 }
  0x52   :  { %v296_v3 = vld [vmem:[%s8504_s2] sm:$0x1f]  ;;  %321 = vmatpush.msra.mxu2 %v298_v1  ;;  %341 = vmatpush.msra.mxu3 %v299_v2  ;;  %v301_v5 = vld [vmem:[%s8503_s12 + $0x18] sm:$0xff]  ;;  %v297_v13 = vld [vmem:[%s8504_s2 + $0x8] sm:$0x1f] }
  0x53   :  { %3725 = vmatmul.msk.f32.vlgmr.msra.gmra.mxu2 %vm302_vm0, %v296_v3  ;;  %3726 = vmatmul.msk.f32.vlgmr.msra.gmra.mxu3 %vm302_vm0, %v296_v3  ;;  %v391_v6 = vld [vmem:[%s8505_s17] sm:$0xff]  ;;  %v392_v7 = vld [vmem:[%s8505_s17 + $0x8] sm:$0xff]  ;;  %v393_v15 = vld [vmem:[%s8505_s17 + $0x10] sm:$0xff] }
  0x54   :  { %364 = vmatpush.msrb.mxu2 %v300_v4  ;;  %384 = vmatpush.msrb.mxu3 %v301_v5  ;;  %v394_v16 = vld [vmem:[%s8505_s17 + $0x18] sm:$0xff]  ;;  %v389_v23 = vld [vmem:[%s8506_s23] sm:$0x1f]  ;;  %v570_v36 = vld [vmem:[#allocation3 + $0xc8] sm:$0xff]  ;;  %s8540_s17 = sld [smem:[#allocation290_spill]] }
  0x55   :  { %623 = vmatpush.msra.mxu0 %v569_v17  ;;  %643 = vmatpush.msra.mxu1 %v601_v18  ;;  %v563_v26 = vld [vmem:[#allocation3 + $0x90] sm:$0xff]  ;;  %v561_v30 = vld [vmem:[#allocation3 + $0x80] sm:$0xff]  ;;  %v604_v33 = vld [vmem:[#allocation3 + $0x1d8] sm:$0xff] }
  0x56   :  { %413 = vmatpush.msra.mxu2 %v391_v6  ;;  %433 = vmatpush.msra.mxu3 %v392_v7  ;;  %v595_v27 = vld [vmem:[#allocation3 + $0x190] sm:$0xff]  ;;  %v593_v31 = vld [vmem:[#allocation3 + $0x180] sm:$0xff]  ;;  %v602_v37 = vld [vmem:[#allocation3 + $0x1c8] sm:$0xff] }
  0x57   :  { %624 = vmatpush.msra.mxu0 %v567_v19  ;;  %644 = vmatpush.msra.mxu1 %v599_v20  ;;  %v559_v34 = vld [vmem:[#allocation3 + $0x70] sm:$0xff]  ;;  %v390_v38 = vld [vmem:[%s8506_s23 + $0x8] sm:$0x1f]  ;;  %v568_v39 = vld [vmem:[#allocation3 + $0xb8] sm:$0xff] }
  0x58   :  { %v591_v35 = vld [vmem:[#allocation3 + $0x170] sm:$0xff]  ;;  %v600_v40 = vld [vmem:[#allocation3 + $0x1b8] sm:$0xff]  ;;  %v557_v41 = vld [vmem:[#allocation3 + $0x60] sm:$0xff] }
  0x59   :  { %625 = vmatpush.msra.mxu0 %v565_v21  ;;  %645 = vmatpush.msra.mxu1 %v597_v22  ;;  %v589_v42 = vld [vmem:[#allocation3 + $0x160] sm:$0xff]  ;;  %v566_v43 = vld [vmem:[#allocation3 + $0xa8] sm:$0xff]  ;;  %v555_v45 = vld [vmem:[#allocation3 + $0x50] sm:$0xff] }
  0x5a   :  { %v598_v44 = vld [vmem:[#allocation3 + $0x1a8] sm:$0xff]  ;;  %v587_v46 = vld [vmem:[#allocation3 + $0x150] sm:$0xff]  ;;  %v564_v47 = vld [vmem:[#allocation3 + $0x98] sm:$0xff] }
  0x5b   :  { %3727 = vmatmul.msk.f32.vlgmr.msrb.gmra.mxu2 %vm302_vm0, %v297_v13  ;;  %3728 = vmatmul.msk.f32.vlgmr.msrb.gmra.mxu3 %vm302_vm0, %v297_v13  ;;  %v596_v48 = vld [vmem:[#allocation3 + $0x198] sm:$0xff]  ;;  %v553_v49 = vld [vmem:[#allocation3 + $0x40] sm:$0xff]  ;;  %v562_v51 = vld [vmem:[#allocation3 + $0x88] sm:$0xff] }
  0x5c   :  { %456 = vmatpush.msrb.mxu2 %v393_v15  ;;  %476 = vmatpush.msrb.mxu3 %v394_v16  ;;  %v585_v50 = vld [vmem:[#allocation3 + $0x140] sm:$0xff]  ;;  %v594_v52 = vld [vmem:[#allocation3 + $0x188] sm:$0xff]  ;;  %v551_v53 = vld [vmem:[#allocation3 + $0x30] sm:$0xff] }
  0x5d   :  { %626 = vmatpush.msra.mxu0 %v563_v26  ;;  %646 = vmatpush.msra.mxu1 %v595_v27  ;;  %v583_v54 = vld [vmem:[#allocation3 + $0x130] sm:$0xff]  ;;  %v560_v55 = vld [vmem:[#allocation3 + $0x78] sm:$0xff]  ;;  %v549_v57 = vld [vmem:[#allocation3 + $0x20] sm:$0xff] }
  0x5e   :  { %v592_v56 = vld [vmem:[#allocation3 + $0x178] sm:$0xff]  ;;  %v581_v58 = vld [vmem:[#allocation3 + $0x120] sm:$0xff]  ;;  %v558_v59 = vld [vmem:[#allocation3 + $0x68] sm:$0xff] }
  0x5f   :  { %627 = vmatpush.msra.mxu0 %v561_v30  ;;  %647 = vmatpush.msra.mxu1 %v593_v31  ;;  %v590_v60 = vld [vmem:[#allocation3 + $0x168] sm:$0xff]  ;;  %v547_v61 = vld [vmem:[#allocation3 + $0x10] sm:$0xff]  ;;  %v556_v63 = vld [vmem:[#allocation3 + $0x58] sm:$0xff] }
  0x60   :  { %v579_v62 = vld [vmem:[#allocation3 + $0x110] sm:$0xff]  ;;  %v588_v0 = vld [vmem:[#allocation3 + $0x158] sm:$0xff]  ;;  %v545_v1 = vld [vmem:[#allocation3] sm:$0xff] }
  0x61   :  { %628 = vmatpush.msra.mxu0 %v559_v34  ;;  %648 = vmatpush.msra.mxu1 %v591_v35  ;;  %v577_v2 = vld [vmem:[#allocation3 + $0x100] sm:$0xff]  ;;  %v554_v3 = vld [vmem:[#allocation3 + $0x48] sm:$0xff]  ;;  %v552_v7 = vld [vmem:[#allocation3 + $0x38] sm:$0xff] }
  0x62   :  { %v586_v4 = vld [vmem:[#allocation3 + $0x148] sm:$0xff]  ;;  %v584_v8 = vld [vmem:[#allocation3 + $0x138] sm:$0xff] }
  0x63   :  { %3729 = vmatmul.msk.f32.vlgmr.msra.gmra.mxu2 %vm302_vm0, %v389_v23  ;;  %3730 = vmatmul.msk.f32.vlgmr.msra.gmra.mxu3 %vm302_vm0, %v389_v23  ;;  %v511_v5 = vld [vmem:[%s8507_s28 + $0xf0] sm:$0xff]  ;;  %v509_v9 = vld [vmem:[%s8507_s28 + $0xe0] sm:$0xff]  ;;  %v512_v19 = vld [vmem:[%s8507_s28 + $0xf8] sm:$0xff] }
  0x64   :  { %660 = vmatpush.msra.mxu2 %v576_v24  ;;  %680 = vmatpush.msra.mxu3 %v608_v25  ;;  %v543_v6 = vld [vmem:[%s8507_s28 + $0x1f0] sm:$0xff]  ;;  %v541_v10 = vld [vmem:[%s8507_s28 + $0x1e0] sm:$0xff]  ;;  %v544_v20 = vld [vmem:[%s8507_s28 + $0x1f8] sm:$0xff] }
  0x65   :  { %629 = vmatpush.msra.mxu0 %v557_v41  ;;  %649 = vmatpush.msra.mxu1 %v589_v42  ;;  %v550_v11 = vld [vmem:[#allocation3 + $0x28] sm:$0xff]  ;;  %v548_v15 = vld [vmem:[#allocation3 + $0x18] sm:$0xff] }
  0x66   :  { %661 = vmatpush.msra.mxu2 %v574_v28  ;;  %681 = vmatpush.msra.mxu3 %v606_v29  ;;  %v582_v12 = vld [vmem:[#allocation3 + $0x128] sm:$0xff]  ;;  %v580_v16 = vld [vmem:[#allocation3 + $0x118] sm:$0xff] }
  0x67   :  { %630 = vmatpush.msra.mxu0 %v555_v45  ;;  %650 = vmatpush.msra.mxu1 %v587_v46  ;;  %v507_v13 = vld [vmem:[%s8507_s28 + $0xd0] sm:$0xff]  ;;  %v510_v21 = vld [vmem:[%s8507_s28 + $0xe8] sm:$0xff]  ;;  %v508_v23 = vld [vmem:[%s8507_s28 + $0xd8] sm:$0xff] }
  0x68   :  { %662 = vmatpush.msra.mxu2 %v572_v32  ;;  %682 = vmatpush.msra.mxu3 %v604_v33  ;;  %v539_v14 = vld [vmem:[%s8507_s28 + $0x1d0] sm:$0xff]  ;;  %v542_v22 = vld [vmem:[%s8507_s28 + $0x1e8] sm:$0xff]  ;;  %v540_v24 = vld [vmem:[%s8507_s28 + $0x1d8] sm:$0xff] }
  0x69   :  { %631 = vmatpush.msra.mxu0 %v553_v49  ;;  %651 = vmatpush.msra.mxu1 %v585_v50  ;;  %v546_v17 = vld [vmem:[#allocation3 + $0x8] sm:$0xff]  ;;  %v505_v25 = vld [vmem:[%s8507_s28 + $0xc0] sm:$0xff]  ;;  %v504_v31 = vld [vmem:[%s8507_s28 + $0xb8] sm:$0xff] }
  0x6a   :  { %663 = vmatpush.msra.mxu2 %v570_v36  ;;  %683 = vmatpush.msra.mxu3 %v602_v37  ;;  %v578_v18 = vld [vmem:[#allocation3 + $0x108] sm:$0xff]  ;;  %v537_v26 = vld [vmem:[%s8507_s28 + $0x1c0] sm:$0xff]  ;;  %v536_v32 = vld [vmem:[%s8507_s28 + $0x1b8] sm:$0xff] }
  0x6b   :  { %3731 = vmatmul.msk.f32.vlgmr.msrb.gmra.mxu2 %vm302_vm0, %v390_v38  ;;  %3732 = vmatmul.msk.f32.vlgmr.msrb.gmra.mxu3 %vm302_vm0, %v390_v38  ;;  %v506_v27 = vld [vmem:[%s8507_s28 + $0xc8] sm:$0xff]  ;;  %v503_v29 = vld [vmem:[%s8507_s28 + $0xb0] sm:$0xff]  ;;  %v501_v33 = vld [vmem:[%s8507_s28 + $0xa0] sm:$0xff] }
  0x6c   :  { %664 = vmatpush.msra.mxu2 %v568_v39  ;;  %684 = vmatpush.msra.mxu3 %v600_v40  ;;  %v538_v28 = vld [vmem:[%s8507_s28 + $0x1c8] sm:$0xff]  ;;  %v535_v30 = vld [vmem:[%s8507_s28 + $0x1b0] sm:$0xff]  ;;  %v533_v34 = vld [vmem:[%s8507_s28 + $0x1a0] sm:$0xff] }
  0x6d   :  { %632 = vmatpush.msra.mxu0 %v551_v53  ;;  %652 = vmatpush.msra.mxu1 %v583_v54  ;;  %v502_v35 = vld [vmem:[%s8507_s28 + $0xa8] sm:$0xff]  ;;  %v499_v37 = vld [vmem:[%s8507_s28 + $0x90] sm:$0xff]  ;;  %v500_v39 = vld [vmem:[%s8507_s28 + $0x98] sm:$0xff] }
  0x6e   :  { %665 = vmatpush.msra.mxu2 %v566_v43  ;;  %685 = vmatpush.msra.mxu3 %v598_v44  ;;  %v534_v36 = vld [vmem:[%s8507_s28 + $0x1a8] sm:$0xff]  ;;  %v531_v38 = vld [vmem:[%s8507_s28 + $0x190] sm:$0xff]  ;;  %v532_v40 = vld [vmem:[%s8507_s28 + $0x198] sm:$0xff] }
  0x6f   :  { %633 = vmatpush.msra.mxu0 %v549_v57  ;;  %653 = vmatpush.msra.mxu1 %v581_v58  ;;  %v497_v41 = vld [vmem:[%s8507_s28 + $0x80] sm:$0xff]  ;;  %v498_v43 = vld [vmem:[%s8507_s28 + $0x88] sm:$0xff]  ;;  %v495_v45 = vld [vmem:[%s8507_s28 + $0x70] sm:$0xff] }
  0x70   :  { %666 = vmatpush.msra.mxu2 %v564_v47  ;;  %686 = vmatpush.msra.mxu3 %v596_v48  ;;  %v529_v42 = vld [vmem:[%s8507_s28 + $0x180] sm:$0xff]  ;;  %v530_v44 = vld [vmem:[%s8507_s28 + $0x188] sm:$0xff]  ;;  %v527_v46 = vld [vmem:[%s8507_s28 + $0x170] sm:$0xff] }
  0x71   :  { %634 = vmatpush.msra.mxu0 %v547_v61  ;;  %654 = vmatpush.msra.mxu1 %v579_v62  ;;  %v496_v47 = vld [vmem:[%s8507_s28 + $0x78] sm:$0xff]  ;;  %v493_v49 = vld [vmem:[%s8507_s28 + $0x60] sm:$0xff]  ;;  %v491_v53 = vld [vmem:[%s8507_s28 + $0x50] sm:$0xff] }
  0x72   :  { %667 = vmatpush.msra.mxu2 %v562_v51  ;;  %687 = vmatpush.msra.mxu3 %v594_v52  ;;  %v528_v48 = vld [vmem:[%s8507_s28 + $0x178] sm:$0xff]  ;;  %v525_v50 = vld [vmem:[%s8507_s28 + $0x160] sm:$0xff]  ;;  %v494_v51 = vld [vmem:[%s8507_s28 + $0x68] sm:$0xff] }
  0x73   :  { %635 = vmatpush.msra.mxu0 %v545_v1  ;;  %655 = vmatpush.msra.mxu1 %v577_v2  ;;  %v526_v52 = vld [vmem:[%s8507_s28 + $0x168] sm:$0xff]  ;;  %v523_v54 = vld [vmem:[%s8507_s28 + $0x150] sm:$0xff]  ;;  %v489_v57 = vld [vmem:[%s8507_s28 + $0x40] sm:$0xff] }
  0x74   :  { %668 = vmatpush.msra.mxu2 %v560_v55  ;;  %688 = vmatpush.msra.mxu3 %v592_v56  ;;  %v492_v55 = vld [vmem:[%s8507_s28 + $0x58] sm:$0xff]  ;;  %v521_v58 = vld [vmem:[%s8507_s28 + $0x140] sm:$0xff]  ;;  %v487_v61 = vld [vmem:[%s8507_s28 + $0x30] sm:$0xff] }
  0x75   :  { %710 = vmatpush.msrb.mxu0 %v511_v5  ;;  %730 = vmatpush.msrb.mxu1 %v543_v6  ;;  %v524_v56 = vld [vmem:[%s8507_s28 + $0x158] sm:$0xff]  ;;  %v519_v62 = vld [vmem:[%s8507_s28 + $0x130] sm:$0xff]  ;;  %v485_v1 = vld [vmem:[%s8507_s28 + $0x20] sm:$0xff] }
  0x76   :  { %669 = vmatpush.msra.mxu2 %v558_v59  ;;  %689 = vmatpush.msra.mxu3 %v590_v60  ;;  %v490_v59 = vld [vmem:[%s8507_s28 + $0x48] sm:$0xff]  ;;  %v517_v2 = vld [vmem:[%s8507_s28 + $0x120] sm:$0xff]  ;;  %v483_v5 = vld [vmem:[%s8507_s28 + $0x10] sm:$0xff] }
  0x77   :  { %711 = vmatpush.msrb.mxu0 %v509_v9  ;;  %731 = vmatpush.msrb.mxu1 %v541_v10  ;;  %v522_v60 = vld [vmem:[%s8507_s28 + $0x148] sm:$0xff]  ;;  %v515_v6 = vld [vmem:[%s8507_s28 + $0x110] sm:$0xff]  ;;  %v481_v9 = vld [vmem:[%s8507_s28] sm:$0xff] }
  0x78   :  { %670 = vmatpush.msra.mxu2 %v556_v63  ;;  %690 = vmatpush.msra.mxu3 %v588_v0  ;;  %v488_v63 = vld [vmem:[%s8507_s28 + $0x38] sm:$0xff]  ;;  %v513_v10 = vld [vmem:[%s8507_s28 + $0x100] sm:$0xff] }
  0x79   :  { %712 = vmatpush.msrb.mxu0 %v507_v13  ;;  %732 = vmatpush.msrb.mxu1 %v539_v14  ;;  %v520_v0 = vld [vmem:[%s8507_s28 + $0x138] sm:$0xff] }
  0x7a   :  { %671 = vmatpush.msra.mxu2 %v554_v3  ;;  %691 = vmatpush.msra.mxu3 %v586_v4  ;;  %v486_v3 = vld [vmem:[%s8507_s28 + $0x28] sm:$0xff] }
  0x7b   :  { %713 = vmatpush.msrb.mxu0 %v505_v25  ;;  %733 = vmatpush.msrb.mxu1 %v537_v26  ;;  %v518_v4 = vld [vmem:[%s8507_s28 + $0x128] sm:$0xff] }
  0x7c   :  { %672 = vmatpush.msra.mxu2 %v552_v7  ;;  %692 = vmatpush.msra.mxu3 %v584_v8  ;;  %v484_v7 = vld [vmem:[%s8507_s28 + $0x18] sm:$0xff] }
  0x7d   :  { %714 = vmatpush.msrb.mxu0 %v503_v29  ;;  %734 = vmatpush.msrb.mxu1 %v535_v30  ;;  %v516_v8 = vld [vmem:[%s8507_s28 + $0x118] sm:$0xff] }
  0x7e   :  { %673 = vmatpush.msra.mxu2 %v550_v11  ;;  %693 = vmatpush.msra.mxu3 %v582_v12  ;;  %v482_v11 = vld [vmem:[%s8507_s28 + $0x8] sm:$0xff]  ;;  %v824_v29 = vld [vmem:[#allocation6 + $0xf0] sm:$0xff] }
  0x7f   :  { %715 = vmatpush.msrb.mxu0 %v501_v33  ;;  %735 = vmatpush.msrb.mxu1 %v533_v34  ;;  %v514_v12 = vld [vmem:[%s8507_s28 + $0x108] sm:$0xff]  ;;  %v856_v30 = vld [vmem:[#allocation6 + $0x1f0] sm:$0xff] }
  0x80   :  { %674 = vmatpush.msra.mxu2 %v548_v15  ;;  %694 = vmatpush.msra.mxu3 %v580_v16  ;;  %v822_v33 = vld [vmem:[#allocation6 + $0xe0] sm:$0xff] }
  0x81   :  { %716 = vmatpush.msrb.mxu0 %v499_v37  ;;  %736 = vmatpush.msrb.mxu1 %v531_v38  ;;  %v854_v34 = vld [vmem:[#allocation6 + $0x1e0] sm:$0xff] }
  0x82   :  { %675 = vmatpush.msra.mxu2 %v546_v17  ;;  %695 = vmatpush.msra.mxu3 %v578_v18 }
  0x83   :  { %717 = vmatpush.msrb.mxu0 %v497_v41  ;;  %737 = vmatpush.msrb.mxu1 %v529_v42 }
  0x84   :  { %750 = vmatpush.msrb.mxu2 %v512_v19  ;;  %770 = vmatpush.msrb.mxu3 %v544_v20 }
  0x85   :  { %718 = vmatpush.msrb.mxu0 %v495_v45  ;;  %738 = vmatpush.msrb.mxu1 %v527_v46 }
  0x86   :  { %751 = vmatpush.msrb.mxu2 %v510_v21  ;;  %771 = vmatpush.msrb.mxu3 %v542_v22 }
  0x87   :  { %719 = vmatpush.msrb.mxu0 %v493_v49  ;;  %739 = vmatpush.msrb.mxu1 %v525_v50  ;;  %v821_v49 = vld [vmem:[#allocation6 + $0xd8] sm:$0xff] }
  0x88   :  { %752 = vmatpush.msrb.mxu2 %v508_v23  ;;  %772 = vmatpush.msrb.mxu3 %v540_v24  ;;  %v853_v50 = vld [vmem:[#allocation6 + $0x1d8] sm:$0xff] }
  0x89   :  { %720 = vmatpush.msrb.mxu0 %v491_v53  ;;  %740 = vmatpush.msrb.mxu1 %v523_v54  ;;  %v818_v53 = vld [vmem:[#allocation6 + $0xc0] sm:$0xff] }
  0x8a   :  { %753 = vmatpush.msrb.mxu2 %v506_v27  ;;  %773 = vmatpush.msrb.mxu3 %v538_v28  ;;  %v850_v54 = vld [vmem:[#allocation6 + $0x1c0] sm:$0xff] }
  0x8b   :  { %721 = vmatpush.msrb.mxu0 %v489_v57  ;;  %741 = vmatpush.msrb.mxu1 %v521_v58 }
  0x8c   :  { %754 = vmatpush.msrb.mxu2 %v504_v31  ;;  %774 = vmatpush.msrb.mxu3 %v536_v32  ;;  %v825_v31 = vld [vmem:[#allocation6 + $0xf8] sm:$0xff] }
  0x8d   :  { %722 = vmatpush.msrb.mxu0 %v487_v61  ;;  %742 = vmatpush.msrb.mxu1 %v519_v62  ;;  %v857_v32 = vld [vmem:[#allocation6 + $0x1f8] sm:$0xff] }
  0x8e   :  { %755 = vmatpush.msrb.mxu2 %v502_v35  ;;  %775 = vmatpush.msrb.mxu3 %v534_v36 }
  0x8f   :  { %723 = vmatpush.msrb.mxu0 %v485_v1  ;;  %743 = vmatpush.msrb.mxu1 %v517_v2 }
  0x90   :  { %756 = vmatpush.msrb.mxu2 %v500_v39  ;;  %776 = vmatpush.msrb.mxu3 %v532_v40  ;;  %v823_v39 = vld [vmem:[#allocation6 + $0xe8] sm:$0xff] }
  0x91   :  { %724 = vmatpush.msrb.mxu0 %v483_v5  ;;  %744 = vmatpush.msrb.mxu1 %v515_v6  ;;  %v855_v40 = vld [vmem:[#allocation6 + $0x1e8] sm:$0xff]  ;;  %v5339_v5 = vld [vmem:[#allocation6 + $0xb0] sm:$0xff] }
  0x92   :  { %757 = vmatpush.msrb.mxu2 %v498_v43  ;;  %777 = vmatpush.msrb.mxu3 %v530_v44  ;;  %v820_v43 = vld [vmem:[#allocation6 + $0xd0] sm:$0xff] }
  0x93   :  { %725 = vmatpush.msrb.mxu0 %v481_v9  ;;  %745 = vmatpush.msrb.mxu1 %v513_v10  ;;  %v852_v44 = vld [vmem:[#allocation6 + $0x1d0] sm:$0xff]  ;;  %v817_v9 = vld [vmem:[#allocation6 + $0xb8] sm:$0xff] }
  0x94   :  { %758 = vmatpush.msrb.mxu2 %v496_v47  ;;  %778 = vmatpush.msrb.mxu3 %v528_v48  ;;  %v848_v6 = vld [vmem:[#allocation6 + $0x1b0] sm:$0xff]  ;;  %v849_v10 = vld [vmem:[#allocation6 + $0x1b8] sm:$0xff] }
  0x96   :  { %759 = vmatpush.msrb.mxu2 %v494_v51  ;;  %779 = vmatpush.msrb.mxu3 %v526_v52 }
  0x98   :  { %760 = vmatpush.msrb.mxu2 %v492_v55  ;;  %780 = vmatpush.msrb.mxu3 %v524_v56 }
  0x9a   :  { %761 = vmatpush.msrb.mxu2 %v490_v59  ;;  %781 = vmatpush.msrb.mxu3 %v522_v60  ;;  %v819_v59 = vld [vmem:[#allocation6 + $0xc8] sm:$0xff] }
  0x9b   :  { %v851_v60 = vld [vmem:[#allocation6 + $0x1c8] sm:$0xff] }
  0x9c   :  { %762 = vmatpush.msrb.mxu2 %v488_v63  ;;  %782 = vmatpush.msrb.mxu3 %v520_v0 }
  0x9e   :  { %763 = vmatpush.msrb.mxu2 %v486_v3  ;;  %783 = vmatpush.msrb.mxu3 %v518_v4 }
  0xa0   :  { %764 = vmatpush.msrb.mxu2 %v484_v7  ;;  %784 = vmatpush.msrb.mxu3 %v516_v8 }
  0xa2   :  { %765 = vmatpush.msrb.mxu2 %v482_v11  ;;  %785 = vmatpush.msrb.mxu3 %v514_v12  ;;  %v5349_v11 = vld [vmem:[#allocation6 + $0xa0] sm:$0xff] }
  0xa3   :  { %v846_v12 = vld [vmem:[#allocation6 + $0x1a0] sm:$0xff] }
  0xd6   :  { %v5263_v13 = vpop.f32.mrf.mxu2  ;;  %v5265_v14 = vpop.f32.mrf.mxu3 }
  0xd7   :  { %8508 = vst [vmem:[#allocation36_spill] sm:$0xff] %v5263_v13  ;;  %v704_v61 = vrot.slane %v5263_v13, 1  ;;  %v706_v63 = vrot.slane %v5265_v14, 1 }
  0xd8   :  { %8509 = vst [vmem:[#allocation37_spill] sm:$0xff] %v5265_v14 }
  0xde   :  { %v5267_v15 = vpop.f32.mrf.mxu2  ;;  %v5269_v16 = vpop.f32.mrf.mxu3 }
  0xdf   :  { %8510 = vst [vmem:[#allocation38_spill] sm:$0xff] %v5267_v15  ;;  %v705_v3 = vsel %vm614_vm1, %v5267_v15, %v704_v61  ;;  %v707_v4 = vsel %vm614_vm1, %v5269_v16, %v706_v63  ;;  %v799_v61 = vld [vmem:[#allocation6 + $0x28] sm:$0xff] }
  0xe0   :  { %8511 = vst [vmem:[#allocation39_spill] sm:$0xff] %v5269_v16  ;;  %v831_v63 = vld [vmem:[#allocation6 + $0x128] sm:$0xff] }
  0xe6   :  { %v5271_v17 = vpop.f32.mrf.mxu2  ;;  %v5273_v18 = vpop.f32.mrf.mxu3 }
  0xe7   :  { %8512 = vst [vmem:[#allocation40_spill] sm:$0xff] %v5271_v17  ;;  %v5277_v19 = vmul.f32 %v5271_v17, %v5263_v13  ;;  %v5281_v20 = vmul.f32 %v5273_v18, %v5265_v14  ;;  %v613_v21 = vrot.slane %v5271_v17, 1  ;;  %v616_v22 = vrot.slane %v5273_v18, 1 }
  0xe8   :  { %8513 = vst [vmem:[#allocation41_spill] sm:$0xff] %v5273_v18 }
  0xe9   :  { %v1516_v35 = vrot.slane %v5277_v19, 2  ;;  %v1519_v37 = vrot.slane %v5281_v20, 2  ;;  %v1993_v41 = vrot.slane %v5281_v20, 3  ;;  %v1990_v42 = vrot.slane %v5277_v19, 3 }
  0xea   :  { %v2464_v51 = vrot.slane %v5277_v19, 4  ;;  %v2467_v57 = vrot.slane %v5281_v20, 4 }
  0xee   :  { %v5285_v23 = vpop.f32.mrf.mxu2  ;;  %v5287_v24 = vpop.f32.mrf.mxu3 }
  0xef   :  { %8514 = vst [vmem:[#allocation42_spill] sm:$0xff] %v5285_v23  ;;  %v5291_v25 = vmul.f32 %v5285_v23, %v5267_v15  ;;  %v5295_v26 = vmul.f32 %v5287_v24, %v5269_v16  ;;  %v615_v27 = vsel %vm614_vm1, %v5285_v23, %v613_v21  ;;  %v617_v28 = vsel %vm614_vm1, %v5287_v24, %v616_v22  ;;  %v815_v21 = vld [vmem:[#allocation6 + $0xa8] sm:$0xff] }
  0xf0   :  { %8515 = vst [vmem:[#allocation43_spill] sm:$0xff] %v5287_v24  ;;  %636 = vmatmul.f32.vlgmr.msra.gmra.mxu0 %v615_v27  ;;  %656 = vmatmul.f32.vlgmr.msra.gmra.mxu1 %v617_v28  ;;  %v847_v22 = vld [vmem:[#allocation6 + $0x1a8] sm:$0xff] }
  0xf1   :  { %676 = vmatmul.f32.vlgmr.msra.gmra.mxu2 %v615_v27  ;;  %696 = vmatmul.f32.vlgmr.msra.gmra.mxu3 %v617_v28  ;;  %v1517_v36 = vrot.slane %v5291_v25, 1  ;;  %v1520_v38 = vrot.slane %v5295_v26, 1  ;;  %v1994_v47 = vrot.slane %v5295_v26, 2  ;;  %v1991_v48 = vrot.slane %v5291_v25, 2  ;;  %v5352_v27 = vld [vmem:[#allocation6 + $0x90] sm:$0xff] }
  0xf2   :  { %868 = vmatpush.msra.mxu0 %v824_v29  ;;  %888 = vmatpush.msra.mxu1 %v856_v30  ;;  %v2465_v52 = vrot.slane %v5291_v25, 3  ;;  %v2468_v58 = vrot.slane %v5295_v26, 3  ;;  %v3189_v1 = vrot.slane %v5295_v26, 7  ;;  %v3187_v2 = vrot.slane %v5291_v25, 7  ;;  %v844_v28 = vld [vmem:[#allocation6 + $0x190] sm:$0xff]  ;;  %v813_v29 = vld [vmem:[#allocation6 + $0x98] sm:$0xff] }
  0xf3   :  { %908 = vmatpush.msra.mxu2 %v825_v31  ;;  %928 = vmatpush.msra.mxu3 %v857_v32  ;;  %v5308_v45 = vsel %vm614_vm1, %v1517_v36, %v1516_v35  ;;  %v5311_v46 = vsel %vm614_vm1, %v1520_v38, %v1519_v37  ;;  %v5318_v55 = vsel %vm614_vm1, %v1994_v47, %v1993_v41  ;;  %v845_v30 = vld [vmem:[#allocation6 + $0x198] sm:$0xff]  ;;  %v5355_v31 = vld [vmem:[#allocation6 + $0x80] sm:$0xff]  ;;  %v5358_v35 = vld [vmem:[#allocation6 + $0x70] sm:$0xff] }
  0xf4   :  { %869 = vmatpush.msra.mxu0 %v822_v33  ;;  %889 = vmatpush.msra.mxu1 %v854_v34  ;;  %8516 = vst [vmem:[#allocation44_spill] sm:$0xff] %v5318_v55  ;;  %v5321_v56 = vsel %vm614_vm1, %v1991_v48, %v1990_v42  ;;  %v5327_v62 = vsel %vm614_vm1, %v2465_v52, %v2464_v51  ;;  %v842_v32 = vld [vmem:[#allocation6 + $0x180] sm:$0xff]  ;;  %v811_v33 = vld [vmem:[#allocation6 + $0x88] sm:$0xff]  ;;  %v840_v36 = vld [vmem:[#allocation6 + $0x170] sm:$0xff] }
  0xf5   :  { %909 = vmatpush.msra.mxu2 %v823_v39  ;;  %929 = vmatpush.msra.mxu3 %v855_v40  ;;  %8517 = vst [vmem:[#allocation45_spill] sm:$0xff] %v5321_v56  ;;  %v5331_v0 = vsel %vm614_vm1, %v2468_v58, %v2467_v57  ;;  %v5343_v7 = vsel %vm614_vm1, %v3189_v1, %v5281_v20  ;;  %v843_v34 = vld [vmem:[#allocation6 + $0x188] sm:$0xff]  ;;  %v809_v37 = vld [vmem:[#allocation6 + $0x78] sm:$0xff]  ;;  %v5361_v39 = vld [vmem:[#allocation6 + $0x60] sm:$0xff] }
  0xf6   :  { %870 = vmatpush.msra.mxu0 %v820_v43  ;;  %890 = vmatpush.msra.mxu1 %v852_v44  ;;  %8518 = vst [vmem:[#allocation46_spill] sm:$0xff] %v5327_v62  ;;  %v5347_v8 = vsel %vm614_vm1, %v3187_v2, %v5277_v19  ;;  %v841_v38 = vld [vmem:[#allocation6 + $0x178] sm:$0xff]  ;;  %v838_v40 = vld [vmem:[#allocation6 + $0x160] sm:$0xff]  ;;  %v807_v41 = vld [vmem:[#allocation6 + $0x68] sm:$0xff] }
  0xf7   :  { %910 = vmatpush.msra.mxu2 %v821_v49  ;;  %930 = vmatpush.msra.mxu3 %v853_v50  ;;  %8519 = vst [vmem:[#allocation47_spill] sm:$0xff] %v5331_v0  ;;  %v839_v42 = vld [vmem:[#allocation6 + $0x168] sm:$0xff]  ;;  %v5364_v43 = vld [vmem:[#allocation6 + $0x50] sm:$0xff]  ;;  %v805_v47 = vld [vmem:[#allocation6 + $0x58] sm:$0xff] }
  0xf8   :  { %871 = vmatpush.msra.mxu0 %v818_v53  ;;  %891 = vmatpush.msra.mxu1 %v850_v54  ;;  %8520 = vst [vmem:[#allocation48_spill] sm:$0xff] %v5343_v7  ;;  %v836_v44 = vld [vmem:[#allocation6 + $0x150] sm:$0xff]  ;;  %v837_v48 = vld [vmem:[#allocation6 + $0x158] sm:$0xff]  ;;  %v5367_v49 = vld [vmem:[#allocation6 + $0x40] sm:$0xff] }
  0xf9   :  { %911 = vmatpush.msra.mxu2 %v819_v59  ;;  %931 = vmatpush.msra.mxu3 %v851_v60  ;;  %8521 = vst [vmem:[#allocation49_spill] sm:$0xff] %v5347_v8  ;;  %v834_v50 = vld [vmem:[#allocation6 + $0x140] sm:$0xff]  ;;  %v803_v51 = vld [vmem:[#allocation6 + $0x48] sm:$0xff]  ;;  %v5370_v53 = vld [vmem:[#allocation6 + $0x30] sm:$0xff] }
  0xfa   :  { %726 = vmatmul.f32.vlgmr.msrb.gmra.mxu0 %v705_v3  ;;  %746 = vmatmul.f32.vlgmr.msrb.gmra.mxu1 %v707_v4  ;;  %v835_v52 = vld [vmem:[#allocation6 + $0x148] sm:$0xff]  ;;  %v5372_v54 = vld [vmem:[#allocation6 + $0x130] sm:$0xff]  ;;  %v801_v57 = vld [vmem:[#allocation6 + $0x38] sm:$0xff] }
  0xfb   :  { %766 = vmatmul.f32.vlgmr.msrb.gmra.mxu2 %v705_v3  ;;  %786 = vmatmul.f32.vlgmr.msrb.gmra.mxu3 %v707_v4  ;;  %v833_v58 = vld [vmem:[#allocation6 + $0x138] sm:$0xff]  ;;  %v5375_v59 = vld [vmem:[#allocation6 + $0x20] sm:$0xff]  ;;  %v5381_v1 = vld [vmem:[#allocation6 + $0x10] sm:$0xff] }
  0xfc   :  { %872 = vmatpush.msra.mxu0 %v5339_v5  ;;  %892 = vmatpush.msra.mxu1 %v848_v6  ;;  %v5377_v60 = vld [vmem:[#allocation6 + $0x120] sm:$0xff]  ;;  %v5383_v2 = vld [vmem:[#allocation6 + $0x110] sm:$0xff]  ;;  %v797_v3 = vld [vmem:[#allocation6 + $0x18] sm:$0xff] }
  0xfd   :  { %912 = vmatpush.msra.mxu2 %v817_v9  ;;  %932 = vmatpush.msra.mxu3 %v849_v10  ;;  %v829_v4 = vld [vmem:[#allocation6 + $0x118] sm:$0xff]  ;;  %v5387_v6 = vld [vmem:[#allocation6] sm:$0xff]  ;;  %v795_v10 = vld [vmem:[#allocation6 + $0x8] sm:$0xff] }
  0xfe   :  { %873 = vmatpush.msra.mxu0 %v5349_v11  ;;  %893 = vmatpush.msra.mxu1 %v846_v12  ;;  %v5389_v9 = vld [vmem:[#allocation6 + $0x100] sm:$0xff]  ;;  %v827_v12 = vld [vmem:[#allocation6 + $0x108] sm:$0xff]  ;;  %v5484_v8 = vld [vmem:[#allocation8 + $0x130] sm:$0xff] }
  0xff   :  { %913 = vmatpush.msra.mxu2 %v815_v21  ;;  %933 = vmatpush.msra.mxu3 %v847_v22  ;;  %v862_v21 = vrot.slane %v5277_v19, 1  ;;  %v864_v22 = vrot.slane %v5281_v20, 1  ;;  %v991_v19 = vld [vmem:[#allocation8 + $0xf8] sm:$0xff]  ;;  %v5404_v20 = vld [vmem:[#allocation8 + $0xe0] sm:$0xff]  ;;  %8536 = vst [vmem:[#allocation64_spill] sm:$0xff] %v5484_v8  ;;  %v961_v7 = vld [vmem:[#allocation8 + $0x8] sm:$0xff] }
 0x100   :  { %874 = vmatpush.msra.mxu0 %v5352_v27  ;;  %894 = vmatpush.msra.mxu1 %v844_v28  ;;  %v5488_v62 = vld [vmem:[#allocation8 + $0x120] sm:$0xff]  ;;  %v997_v56 = vld [vmem:[#allocation8 + $0x128] sm:$0xff]  ;;  %v5490_v55 = vld [vmem:[#allocation8 + $0x110] sm:$0xff] }
 0x101   :  { %914 = vmatpush.msra.mxu2 %v813_v29  ;;  %934 = vmatpush.msra.mxu3 %v845_v30  ;;  %v863_v28 = vsel %vm614_vm1, %v5291_v25, %v862_v21  ;;  %v865_v29 = vsel %vm614_vm1, %v5295_v26, %v864_v22  ;;  %v5401_v30 = vld [vmem:[#allocation8 + $0xf0] sm:$0xff]  ;;  %v5411_v26 = vld [vmem:[#allocation8 + $0xc0] sm:$0xff]  ;;  %v975_v22 = vld [vmem:[#allocation8 + $0x78] sm:$0xff]  ;;  %8537 = vst [vmem:[#allocation65_spill] sm:$0xff] %v5488_v62 }
 0x102   :  { %875 = vmatpush.msra.mxu0 %v5355_v31  ;;  %895 = vmatpush.msra.mxu1 %v842_v32  ;;  %v989_v32 = vld [vmem:[#allocation8 + $0xe8] sm:$0xff]  ;;  %v5408_v25 = vld [vmem:[#allocation8 + $0x1f0] sm:$0xff]  ;;  %8538 = vst [vmem:[#allocation66_spill] sm:$0xff] %v5490_v55 }
 0x103   :  { %915 = vmatpush.msra.mxu2 %v811_v33  ;;  %935 = vmatpush.msra.mxu3 %v843_v34  ;;  %v5406_v33 = vld [vmem:[#allocation8 + $0xd0] sm:$0xff]  ;;  %v987_v34 = vld [vmem:[#allocation8 + $0xd8] sm:$0xff] }
 0x104   :  { %876 = vmatpush.msra.mxu0 %v5358_v35  ;;  %896 = vmatpush.msra.mxu1 %v840_v36  ;;  %v1023_v36 = vld [vmem:[#allocation8 + $0x1f8] sm:$0xff]  ;;  %v5441_v21 = vld [vmem:[#allocation8 + $0x70] sm:$0xff] }
 0x105   :  { %916 = vmatpush.msra.mxu2 %v809_v37  ;;  %936 = vmatpush.msra.mxu3 %v841_v38  ;;  %v985_v37 = vld [vmem:[#allocation8 + $0xc8] sm:$0xff]  ;;  %v5414_v38 = vld [vmem:[#allocation8 + $0x1e0] sm:$0xff]  ;;  %8522 = vst [vmem:[#allocation50_spill] sm:$0xff] %v5441_v21 }
 0x106   :  { %877 = vmatpush.msra.mxu0 %v5361_v39  ;;  %897 = vmatpush.msra.mxu1 %v838_v40  ;;  %v1021_v40 = vld [vmem:[#allocation8 + $0x1e8] sm:$0xff] }
 0x107   :  { %917 = vmatpush.msra.mxu2 %v807_v41  ;;  %937 = vmatpush.msra.mxu3 %v839_v42  ;;  %v5417_v41 = vld [vmem:[#allocation8 + $0x1d0] sm:$0xff] }
 0x108   :  { %878 = vmatpush.msra.mxu0 %v5364_v43  ;;  %898 = vmatpush.msra.mxu1 %v836_v44  ;;  %v5419_v42 = vld [vmem:[#allocation8 + $0xb0] sm:$0xff]  ;;  %v983_v44 = vld [vmem:[#allocation8 + $0xb8] sm:$0xff] }
 0x109   :  { %918 = vmatpush.msra.mxu2 %v805_v47  ;;  %938 = vmatpush.msra.mxu3 %v837_v48  ;;  %v1019_v47 = vld [vmem:[#allocation8 + $0x1d8] sm:$0xff]  ;;  %v5423_v48 = vld [vmem:[#allocation8 + $0x1c0] sm:$0xff] }
 0x10a   :  { %879 = vmatpush.msra.mxu0 %v5367_v49  ;;  %899 = vmatpush.msra.mxu1 %v834_v50  ;;  %v1017_v50 = vld [vmem:[#allocation8 + $0x1c8] sm:$0xff] }
 0x10b   :  { %919 = vmatpush.msra.mxu2 %v803_v51  ;;  %939 = vmatpush.msra.mxu3 %v835_v52  ;;  %v5425_v51 = vld [vmem:[#allocation8 + $0xa0] sm:$0xff]  ;;  %v981_v52 = vld [vmem:[#allocation8 + $0xa8] sm:$0xff] }
 0x10c   :  { %880 = vmatpush.msra.mxu0 %v5370_v53  ;;  %900 = vmatpush.msra.mxu1 %v5372_v54 }
 0x10d   :  { %920 = vmatpush.msra.mxu2 %v801_v57  ;;  %940 = vmatpush.msra.mxu3 %v833_v58  ;;  %v5429_v57 = vld [vmem:[#allocation8 + $0x1b0] sm:$0xff]  ;;  %v1015_v58 = vld [vmem:[#allocation8 + $0x1b8] sm:$0xff] }
 0x10e   :  { %881 = vmatpush.msra.mxu0 %v5375_v59  ;;  %901 = vmatpush.msra.mxu1 %v5377_v60 }
 0x10f   :  { %921 = vmatpush.msra.mxu2 %v799_v61  ;;  %941 = vmatpush.msra.mxu3 %v831_v63  ;;  %v5431_v61 = vld [vmem:[#allocation8 + $0x90] sm:$0xff]  ;;  %v979_v63 = vld [vmem:[#allocation8 + $0x98] sm:$0xff] }
 0x110   :  { %882 = vmatpush.msra.mxu0 %v5381_v1  ;;  %902 = vmatpush.msra.mxu1 %v5383_v2 }
 0x111   :  { %922 = vmatpush.msra.mxu2 %v797_v3  ;;  %942 = vmatpush.msra.mxu3 %v829_v4  ;;  %v5435_v3 = vld [vmem:[#allocation8 + $0x1a0] sm:$0xff]  ;;  %v1013_v4 = vld [vmem:[#allocation8 + $0x1a8] sm:$0xff] }
 0x112   :  { %883 = vmatpush.msra.mxu0 %v5387_v6  ;;  %903 = vmatpush.msra.mxu1 %v5389_v9 }
 0x113   :  { %923 = vmatpush.msra.mxu2 %v795_v10  ;;  %943 = vmatpush.msra.mxu3 %v827_v12  ;;  %v5437_v10 = vld [vmem:[#allocation8 + $0x80] sm:$0xff]  ;;  %v977_v12 = vld [vmem:[#allocation8 + $0x88] sm:$0xff] }
 0x114   :  { %884 = vmatmul.f32.vlgmr.msra.gmra.mxu0 %v863_v28  ;;  %904 = vmatmul.f32.vlgmr.msra.gmra.mxu1 %v865_v29 }
 0x115   :  { %924 = vmatmul.f32.vlgmr.msra.gmra.mxu2 %v863_v28  ;;  %944 = vmatmul.f32.vlgmr.msra.gmra.mxu3 %v865_v29  ;;  %v5446_v28 = vld [vmem:[#allocation8 + $0x60] sm:$0xff]  ;;  %v5448_v29 = vld [vmem:[#allocation8 + $0x190] sm:$0xff] }
 0x116   :  { %1030 = vmatpush.msrb.mxu0 %v5401_v30  ;;  %1070 = vmatpush.msrb.mxu2 %v991_v19  ;;  %8523 = vst [vmem:[#allocation51_spill] sm:$0xff] %v5446_v28  ;;  %v973_v19 = vld [vmem:[#allocation8 + $0x68] sm:$0xff] }
 0x117   :  { %1050 = vmatpush.msrb.mxu1 %v5408_v25  ;;  %1090 = vmatpush.msrb.mxu3 %v1023_v36  ;;  %8524 = vst [vmem:[#allocation52_spill] sm:$0xff] %v5448_v29  ;;  %v5454_v36 = vld [vmem:[#allocation8 + $0x180] sm:$0xff] }
 0x118   :  { %1031 = vmatpush.msrb.mxu0 %v5404_v20  ;;  %1071 = vmatpush.msrb.mxu2 %v989_v32  ;;  %v1011_v32 = vld [vmem:[#allocation8 + $0x198] sm:$0xff]  ;;  %8526 = vst [vmem:[#allocation54_spill] sm:$0xff] %v5454_v36 }
 0x119   :  { %1051 = vmatpush.msrb.mxu1 %v5414_v38  ;;  %1091 = vmatpush.msrb.mxu3 %v1021_v40  ;;  %v1009_v40 = vld [vmem:[#allocation8 + $0x188] sm:$0xff] }
 0x11a   :  { %1032 = vmatpush.msrb.mxu0 %v5406_v33  ;;  %1072 = vmatpush.msrb.mxu2 %v987_v34  ;;  %v5452_v34 = vld [vmem:[#allocation8 + $0x50] sm:$0xff] }
 0x11b   :  { %1052 = vmatpush.msrb.mxu1 %v5417_v41  ;;  %1092 = vmatpush.msrb.mxu3 %v1019_v47  ;;  %8525 = vst [vmem:[#allocation53_spill] sm:$0xff] %v5452_v34  ;;  %v5460_v47 = vld [vmem:[#allocation8 + $0x170] sm:$0xff] }
 0x11c   :  { %1033 = vmatpush.msrb.mxu0 %v5411_v26  ;;  %1073 = vmatpush.msrb.mxu2 %v985_v37  ;;  %v971_v37 = vld [vmem:[#allocation8 + $0x58] sm:$0xff]  ;;  %8528 = vst [vmem:[#allocation56_spill] sm:$0xff] %v5460_v47 }
 0x11d   :  { %1053 = vmatpush.msrb.mxu1 %v5423_v48  ;;  %1093 = vmatpush.msrb.mxu3 %v1017_v50  ;;  %v969_v50 = vld [vmem:[#allocation8 + $0x48] sm:$0xff] }
 0x11e   :  { %1034 = vmatpush.msrb.mxu0 %v5419_v42  ;;  %1074 = vmatpush.msrb.mxu2 %v983_v44  ;;  %v5458_v44 = vld [vmem:[#allocation8 + $0x40] sm:$0xff] }
 0x11f   :  { %1054 = vmatpush.msrb.mxu1 %v5429_v57  ;;  %1094 = vmatpush.msrb.mxu3 %v1015_v58  ;;  %8527 = vst [vmem:[#allocation55_spill] sm:$0xff] %v5458_v44  ;;  %v5464_v58 = vld [vmem:[#allocation8 + $0x30] sm:$0xff] }
 0x120   :  { %1035 = vmatpush.msrb.mxu0 %v5425_v51  ;;  %1075 = vmatpush.msrb.mxu2 %v981_v52  ;;  %v1007_v52 = vld [vmem:[#allocation8 + $0x178] sm:$0xff]  ;;  %8529 = vst [vmem:[#allocation57_spill] sm:$0xff] %v5464_v58 }
 0x121   :  { %1055 = vmatpush.msrb.mxu1 %v5435_v3  ;;  %1095 = vmatpush.msrb.mxu3 %v1013_v4  ;;  %v967_v4 = vld [vmem:[#allocation8 + $0x38] sm:$0xff] }
 0x122   :  { %1036 = vmatpush.msrb.mxu0 %v5431_v61  ;;  %1076 = vmatpush.msrb.mxu2 %v979_v63  ;;  %v5466_v63 = vld [vmem:[#allocation8 + $0x160] sm:$0xff] }
 0x123   :  { %1056 = vmatpush.msrb.mxu1 %v5448_v29  ;;  %1096 = vmatpush.msrb.mxu3 %v1011_v32  ;;  %8530 = vst [vmem:[#allocation58_spill] sm:$0xff] %v5466_v63  ;;  %v965_v32 = vld [vmem:[#allocation8 + $0x28] sm:$0xff] }
 0x124   :  { %1037 = vmatpush.msrb.mxu0 %v5437_v10  ;;  %1077 = vmatpush.msrb.mxu2 %v977_v12  ;;  %v1005_v12 = vld [vmem:[#allocation8 + $0x168] sm:$0xff] }
 0x125   :  { %1057 = vmatpush.msrb.mxu1 %v5454_v36  ;;  %1097 = vmatpush.msrb.mxu3 %v1009_v40  ;;  %v5476_v40 = vld [vmem:[#allocation8 + $0x10] sm:$0xff] }
 0x126   :  { %1038 = vmatpush.msrb.mxu0 %v5441_v21  ;;  %1078 = vmatpush.msrb.mxu2 %v975_v22  ;;  %v5470_v22 = vld [vmem:[#allocation8 + $0x20] sm:$0xff]  ;;  %8533 = vst [vmem:[#allocation61_spill] sm:$0xff] %v5476_v40  ;;  %v1129_v36 = vld [vmem:[#allocation11 + $0x88] sm:$0xff] }
 0x127   :  { %1058 = vmatpush.msrb.mxu1 %v5460_v47  ;;  %1098 = vmatpush.msrb.mxu3 %v1007_v52  ;;  %8531 = vst [vmem:[#allocation59_spill] sm:$0xff] %v5470_v22  ;;  %v963_v52 = vld [vmem:[#allocation8 + $0x18] sm:$0xff]  ;;  %v1133_v47 = vld [vmem:[#allocation11 + $0xa8] sm:$0xff]  ;;  %v5514_v21 = vld [vmem:[#allocation11 + $0xc0] sm:$0xff] }
 0x128   :  { %1039 = vmatpush.msrb.mxu0 %v5446_v28  ;;  %1079 = vmatpush.msrb.mxu2 %v973_v19  ;;  %v5472_v19 = vld [vmem:[#allocation8 + $0x150] sm:$0xff]  ;;  %8543 = vst [vmem:[#allocation70_spill] sm:$0xff] %v5514_v21 }
 0x129   :  { %1059 = vmatpush.msrb.mxu1 %v5466_v63  ;;  %1099 = vmatpush.msrb.mxu3 %v1005_v12  ;;  %8532 = vst [vmem:[#allocation60_spill] sm:$0xff] %v5472_v19  ;;  %v5482_v12 = vld [vmem:[#allocation8] sm:$0xff]  ;;  %v1137_v63 = vld [vmem:[#allocation11 + $0xc8] sm:$0xff]  ;;  %v5510_v28 = vld [vmem:[#allocation11 + $0x1f0] sm:$0xff] }
 0x12a   :  { %1040 = vmatpush.msrb.mxu0 %v5452_v34  ;;  %1080 = vmatpush.msrb.mxu2 %v971_v37  ;;  %v1003_v37 = vld [vmem:[#allocation8 + $0x158] sm:$0xff]  ;;  %8535 = vst [vmem:[#allocation63_spill] sm:$0xff] %v5482_v12  ;;  %v1161_v29 = vld [vmem:[#allocation11 + $0x188] sm:$0xff] }
 0x12b   :  { %1060 = vmatpush.msrb.mxu1 %v5472_v19  ;;  %1100 = vmatpush.msrb.mxu3 %v1003_v37  ;;  %v999_v37 = vld [vmem:[#allocation8 + $0x138] sm:$0xff] }
 0x12c   :  { %1041 = vmatpush.msrb.mxu0 %v5458_v44  ;;  %1081 = vmatpush.msrb.mxu2 %v969_v50  ;;  %v5478_v50 = vld [vmem:[#allocation8 + $0x140] sm:$0xff] }
 0x12d   :  { %8534 = vst [vmem:[#allocation62_spill] sm:$0xff] %v5478_v50  ;;  %1061 = vmatpush.msrb.mxu1 %v5478_v50  ;;  %v1143_v50 = vld [vmem:[#allocation11 + $0xf8] sm:$0xff] }
 0x12e   :  { %1042 = vmatpush.msrb.mxu0 %v5464_v58  ;;  %1082 = vmatpush.msrb.mxu2 %v967_v4  ;;  %v1001_v4 = vld [vmem:[#allocation8 + $0x148] sm:$0xff]  ;;  %v1171_v58 = vld [vmem:[#allocation11 + $0x1d8] sm:$0xff] }
 0x12f   :  { %1101 = vmatpush.msrb.mxu3 %v1001_v4  ;;  %1062 = vmatpush.msrb.mxu1 %v5484_v8  ;;  %v5493_v4 = vld [vmem:[#allocation8 + $0x100] sm:$0xff] }
 0x130   :  { %1043 = vmatpush.msrb.mxu0 %v5470_v22  ;;  %1083 = vmatpush.msrb.mxu2 %v965_v32  ;;  %8539 = vst [vmem:[#allocation67_spill] sm:$0xff] %v5493_v4  ;;  %v1139_v22 = vld [vmem:[#allocation11 + $0xd8] sm:$0xff] }
 0x131   :  { %1102 = vmatpush.msrb.mxu3 %v999_v37  ;;  %1063 = vmatpush.msrb.mxu1 %v5488_v62  ;;  %v1175_v37 = vld [vmem:[#allocation11 + $0x1f8] sm:$0xff]  ;;  %v1173_v62 = vld [vmem:[#allocation11 + $0x1e8] sm:$0xff] }
 0x132   :  { %1044 = vmatpush.msrb.mxu0 %v5476_v40  ;;  %1084 = vmatpush.msrb.mxu2 %v963_v52  ;;  %v995_v52 = vld [vmem:[#allocation8 + $0x118] sm:$0xff]  ;;  %v993_v40 = vld [vmem:[#allocation8 + $0x108] sm:$0xff] }
 0x133   :  { %1103 = vmatpush.msrb.mxu3 %v997_v56  ;;  %1064 = vmatpush.msrb.mxu1 %v5490_v55 }
 0x134   :  { %1045 = vmatpush.msrb.mxu0 %v5482_v12  ;;  %1085 = vmatpush.msrb.mxu2 %v961_v7  ;;  %v1141_v7 = vld [vmem:[#allocation11 + $0xe8] sm:$0xff] }
 0x135   :  { %1104 = vmatpush.msrb.mxu3 %v995_v52  ;;  %1065 = vmatpush.msrb.mxu1 %v5493_v4  ;;  %v1169_v52 = vld [vmem:[#allocation11 + $0x1c8] sm:$0xff]  ;;  %v1135_v4 = vld [vmem:[#allocation11 + $0xb8] sm:$0xff] }
 0x136   :  { %1222 = vmatpush.msra.mxu2 %v1143_v50  ;;  %v950_v50 = vld [vmem:[%s8540_s17] sm:$0x3] }
 0x137   :  { %1105 = vmatpush.msrb.mxu3 %v993_v40  ;;  %v1167_v40 = vld [vmem:[#allocation11 + $0x1b8] sm:$0xff]  ;;  %1202 = vmatpush.msra.mxu1 %v5510_v28 }
 0x138   :  { %1223 = vmatpush.msra.mxu2 %v1141_v7  ;;  %v5500_v7 = vld [vmem:[#allocation11 + $0xf0] sm:$0xff] }
 0x139   :  { %1242 = vmatpush.msra.mxu3 %v1175_v37  ;;  %v1165_v37 = vld [vmem:[#allocation11 + $0x1a8] sm:$0xff]  ;;  %8541 = vst [vmem:[#allocation68_spill] sm:$0xff] %v5500_v7  ;;  %1182 = vmatpush.msra.mxu0 %v5500_v7 }
 0x13a   :  { %1224 = vmatpush.msra.mxu2 %v1139_v22  ;;  %v1131_v22 = vld [vmem:[#allocation11 + $0x98] sm:$0xff] }
 0x13b   :  { %1243 = vmatpush.msra.mxu3 %v1173_v62 }
 0x13c   :  { %1225 = vmatpush.msra.mxu2 %v1137_v63  ;;  %v1163_v63 = vld [vmem:[#allocation11 + $0x198] sm:$0xff] }
 0x13d   :  { %1244 = vmatpush.msra.mxu3 %v1171_v58 }
 0x13e   :  { %1226 = vmatpush.msra.mxu2 %v1135_v4  ;;  %v5507_v4 = vperm.slane %v950_v50, 0 }
 0x13f   :  { %1245 = vmatpush.msra.mxu3 %v1169_v52 }
 0x140   :  { %1227 = vmatpush.msra.mxu2 %v1133_v47  ;;  %8542 = vst [vmem:[#allocation69_spill] sm:$0xff] %v5507_v4 }
 0x141   :  { %1246 = vmatpush.msra.mxu3 %v1167_v40  ;;  %v5512_v40 = vld [vmem:[#allocation11 + $0x1e0] sm:$0xff] }
 0x142   :  { %1228 = vmatpush.msra.mxu2 %v1131_v22  ;;  %1203 = vmatpush.msra.mxu1 %v5512_v40  ;;  %v5525_v22 = vld [vmem:[#allocation11 + $0x1c0] sm:$0xff] }
 0x143   :  { %1247 = vmatpush.msra.mxu3 %v1165_v37 }
 0x144   :  { %1229 = vmatpush.msra.mxu2 %v1129_v36 }
 0x145   :  { %1248 = vmatpush.msra.mxu3 %v1163_v63  ;;  %v1157_v63 = vld [vmem:[#allocation11 + $0x168] sm:$0xff] }
 0x147   :  { %1249 = vmatpush.msra.mxu3 %v1161_v29 }
 0x16d   :  { %v637_v0 = vpop.f32.mrf.mxu0  ;;  %v657_v32 = vpop.f32.mrf.mxu1 }
 0x16e   :  { %v658_v55 = vadd.f32 %v657_v32, %v637_v0  ;;  %v5503_v0 = vld [vmem:[#allocation11 + $0xe0] sm:$0xff] }
 0x16f   :  { %1183 = vmatpush.msra.mxu0 %v5503_v0 }
 0x174   :  { %v677_v12 = vpop.f32.mrf.mxu2  ;;  %v697_v8 = vpop.f32.mrf.mxu3 }
 0x175   :  { %v698_v7 = vadd.f32 %v697_v8, %v677_v12  ;;  %v1125_v12 = vld [vmem:[#allocation11 + $0x68] sm:$0xff] }
 0x177   :  { %v727_v19 = vpop.f32.mrf.mxu0  ;;  %v747_v56 = vpop.f32.mrf.mxu1 }
 0x178   :  { %v728_v44 = vadd.f32 %v727_v19, %v658_v55  ;;  %v5505_v19 = vld [vmem:[#allocation11 + $0xd0] sm:$0xff] }
 0x179   :  { %1184 = vmatpush.msra.mxu0 %v5505_v19 }
 0x17a   :  { %v748_v32 = vadd.f32 %v747_v56, %v728_v44  ;;  %v1127_v44 = vld [vmem:[#allocation11 + $0x78] sm:$0xff]  ;;  %v5518_v56 = vld [vmem:[#allocation11 + $0x1d0] sm:$0xff] }
 0x17b   :  { %8544 = vst [vmem:[#allocation71_spill] sm:$0xff] %v5518_v56  ;;  %1185 = vmatpush.msra.mxu0 %v5514_v21  ;;  %1230 = vmatpush.msra.mxu2 %v1127_v44  ;;  %v1155_v44 = vld [vmem:[#allocation11 + $0x158] sm:$0xff]  ;;  %v5535_v21 = vld [vmem:[#allocation11 + $0x90] sm:$0xff] }
 0x17c   :  { %1204 = vmatpush.msra.mxu1 %v5518_v56  ;;  %v1121_v56 = vld [vmem:[#allocation11 + $0x48] sm:$0xff] }
 0x17d   :  { %1231 = vmatpush.msra.mxu2 %v1125_v12 }
 0x17e   :  { %v767_v34 = vpop.f32.mrf.mxu2  ;;  %v787_v62 = vpop.f32.mrf.mxu3  ;;  %1205 = vmatpush.msra.mxu1 %v5525_v22 }
 0x17f   :  { %v768_v37 = vadd.f32 %v767_v34, %v698_v7  ;;  %v1123_v7 = vld [vmem:[#allocation11 + $0x58] sm:$0xff] }
 0x180   :  { %1232 = vmatpush.msra.mxu2 %v1123_v7  ;;  %v1147_v7 = vld [vmem:[#allocation11 + $0x118] sm:$0xff] }
 0x181   :  { %v788_v29 = vadd.f32 %v787_v62, %v768_v37  ;;  %v1119_v62 = vld [vmem:[#allocation11 + $0x38] sm:$0xff] }
 0x182   :  { %1233 = vmatpush.msra.mxu2 %v1121_v56  ;;  %v1151_v37 = vld [vmem:[#allocation11 + $0x138] sm:$0xff]  ;;  %v1145_v56 = vld [vmem:[#allocation11 + $0x108] sm:$0xff] }
 0x184   :  { %1234 = vmatpush.msra.mxu2 %v1119_v62  ;;  %v3829_v62 = vld [vmem:[#allocation3 + $0xd0] sm:$0xff] }
 0x191   :  { %v885_v58 = vpop.f32.mrf.mxu0  ;;  %v905_v55 = vpop.f32.mrf.mxu1 }
 0x192   :  { %v906_v52 = vadd.f32 %v905_v55, %v885_v58  ;;  %v1159_v58 = vld [vmem:[#allocation11 + $0x178] sm:$0xff]  ;;  %v5520_v55 = vld [vmem:[#allocation11 + $0xb0] sm:$0xff] }
 0x193   :  { %8545 = vst [vmem:[#allocation72_spill] sm:$0xff] %v5520_v55  ;;  %1250 = vmatpush.msra.mxu3 %v1159_v58  ;;  %1186 = vmatpush.msra.mxu0 %v5520_v55  ;;  %v1153_v58 = vld [vmem:[#allocation11 + $0x148] sm:$0xff]  ;;  %v5539_v55 = vld [vmem:[#allocation11 + $0x80] sm:$0xff] }
 0x194   :  { %v948_v47 = vadd.f32 %v906_v52, %v748_v32  ;;  %v5527_v32 = vld [vmem:[#allocation11 + $0xa0] sm:$0xff]  ;;  %v5531_v52 = vld [vmem:[#allocation11 + $0x1b0] sm:$0xff] }
 0x195   :  { %1251 = vmatpush.msra.mxu3 %v1157_v63  ;;  %1187 = vmatpush.msra.mxu0 %v5527_v32  ;;  %v1117_v63 = vld [vmem:[#allocation11 + $0x28] sm:$0xff] }
 0x196   :  { %v956_v8 = vadd.f32 %v5507_v4, %v948_v47  ;;  %v5533_v4 = vperm.slane %v950_v50, 1  ;;  %1206 = vmatpush.msra.mxu1 %v5531_v52  ;;  %1235 = vmatpush.msra.mxu2 %v1117_v63  ;;  %v3832_v63 = vld [vmem:[#allocation3 + $0x1c0] sm:$0xff] }
 0x197   :  { %1252 = vmatpush.msra.mxu3 %v1155_v44  ;;  %1188 = vmatpush.msra.mxu0 %v5535_v21  ;;  %v3825_v44 = vld [vmem:[#allocation3 + $0xf0] sm:$0xff] }
 0x198   :  { %3761 = vtanh.f32 %v956_v8  ;;  %v925_v34 = vpop.f32.mrf.mxu2  ;;  %v945_v36 = vpop.f32.mrf.mxu3  ;;  %8546 = vst [vmem:[#allocation73_spill] sm:$0xff] %v5533_v4 }
 0x199   :  { %v946_v47 = vadd.f32 %v945_v36, %v925_v34  ;;  %1253 = vmatpush.msra.mxu3 %v1153_v58  ;;  %1189 = vmatpush.msra.mxu0 %v5539_v55  ;;  %v1149_v34 = vld [vmem:[#allocation11 + $0x128] sm:$0xff]  ;;  %v1115_v36 = vld [vmem:[#allocation11 + $0x18] sm:$0xff] }
 0x19a   :  { %1236 = vmatpush.msra.mxu2 %v1115_v36  ;;  %v3827_v58 = vld [vmem:[#allocation3 + $0xe0] sm:$0xff]  ;;  %v3834_v36 = vld [vmem:[#allocation3 + $0x1b0] sm:$0xff] }
 0x19b   :  { %v949_v8 = vadd.f32 %v946_v47, %v788_v29  ;;  %1254 = vmatpush.msra.mxu3 %v1151_v37  ;;  %v1113_v29 = vld [vmem:[#allocation11 + $0x8] sm:$0xff] }
 0x19c   :  { %1237 = vmatpush.msra.mxu2 %v1113_v29  ;;  %v3830_v37 = vld [vmem:[#allocation3 + $0x1d0] sm:$0xff]  ;;  %v3836_v29 = vld [vmem:[#allocation3 + $0x1a0] sm:$0xff] }
 0x19d   :  { %v957_v50 = vadd.f32 %v5533_v4, %v949_v8  ;;  %1255 = vmatpush.msra.mxu3 %v1149_v34  ;;  %v3826_v8 = vld [vmem:[#allocation3 + $0x1f0] sm:$0xff] }
 0x19e   :  { %v3762_v12 = vpop.eup %3761  ;;  %v3833_v34 = vld [vmem:[#allocation3 + $0xb0] sm:$0xff] }
 0x19f   :  { %3763 = vtanh.f32 %v957_v50  ;;  %1046 = vmatmul.f32.vlgmr.msrb.gmra.mxu0 %v3762_v12  ;;  %1086 = vmatmul.f32.vlgmr.msrb.gmra.mxu2 %v3762_v12  ;;  %v3828_v50 = vld [vmem:[#allocation3 + $0x1e0] sm:$0xff]  ;;  %v5586_v4 = vld [vmem:[#allocation11 + $0x150] sm:$0xff] }
 0x1a0   :  { %1256 = vmatpush.msra.mxu3 %v1147_v7  ;;  %1348 = vmatpush.msrb.mxu2 %v3825_v44  ;;  %v3831_v12 = vld [vmem:[#allocation3 + $0xc0] sm:$0xff]  ;;  %8559 = vst [vmem:[#allocation86_spill] sm:$0xff] %v5586_v4 }
 0x1a1   :  { %v3835_v7 = vld [vmem:[#allocation3 + $0xa0] sm:$0xff] }
 0x1a2   :  { %1257 = vmatpush.msra.mxu3 %v1145_v56  ;;  %1349 = vmatpush.msrb.mxu2 %v3827_v58  ;;  %v3837_v56 = vld [vmem:[#allocation3 + $0x90] sm:$0xff]  ;;  %v3839_v44 = vld [vmem:[#allocation3 + $0x80] sm:$0xff] }
 0x1a3   :  { %v3841_v58 = vld [vmem:[#allocation3 + $0x70] sm:$0xff] }
 0x1a4   :  { %1350 = vmatpush.msrb.mxu2 %v3829_v62  ;;  %v3843_v62 = vld [vmem:[#allocation3 + $0x60] sm:$0xff] }
 0x1a5   :  { %v3764_v47 = vpop.eup %3763 }
 0x1a6   :  { %1066 = vmatmul.f32.vlgmr.msrb.gmra.mxu1 %v3764_v47  ;;  %1106 = vmatmul.f32.vlgmr.msrb.gmra.mxu3 %v3764_v47  ;;  %v3838_v47 = vld [vmem:[#allocation3 + $0x190] sm:$0xff] }
 0x1a7   :  { %1368 = vmatpush.msrb.mxu3 %v3826_v8  ;;  %1351 = vmatpush.msrb.mxu2 %v3831_v12  ;;  %v3840_v8 = vld [vmem:[#allocation3 + $0x180] sm:$0xff]  ;;  %v3845_v12 = vld [vmem:[#allocation3 + $0x50] sm:$0xff] }
 0x1a9   :  { %1369 = vmatpush.msrb.mxu3 %v3828_v50  ;;  %1352 = vmatpush.msrb.mxu2 %v3833_v34  ;;  %v3842_v50 = vld [vmem:[#allocation3 + $0x170] sm:$0xff]  ;;  %v3847_v34 = vld [vmem:[#allocation3 + $0x40] sm:$0xff] }
 0x1ab   :  { %1370 = vmatpush.msrb.mxu3 %v3830_v37  ;;  %1353 = vmatpush.msrb.mxu2 %v3835_v7  ;;  %v3844_v37 = vld [vmem:[#allocation3 + $0x160] sm:$0xff]  ;;  %v3849_v7 = vld [vmem:[#allocation3 + $0x30] sm:$0xff] }
 0x1ad   :  { %1371 = vmatpush.msrb.mxu3 %v3832_v63  ;;  %1354 = vmatpush.msrb.mxu2 %v3837_v56  ;;  %v3846_v63 = vld [vmem:[#allocation3 + $0x150] sm:$0xff]  ;;  %v5545_v56 = vld [vmem:[#allocation3 + $0x20] sm:$0xff] }
 0x1ae   :  { %8547 = vst [vmem:[#allocation74_spill] sm:$0xff] %v5545_v56 }
 0x1af   :  { %1372 = vmatpush.msrb.mxu3 %v3834_v36  ;;  %1355 = vmatpush.msrb.mxu2 %v3839_v44  ;;  %v3848_v36 = vld [vmem:[#allocation3 + $0x140] sm:$0xff]  ;;  %v5548_v44 = vld [vmem:[#allocation3 + $0x10] sm:$0xff] }
 0x1b0   :  { %8548 = vst [vmem:[#allocation75_spill] sm:$0xff] %v5548_v44 }
 0x1b1   :  { %1373 = vmatpush.msrb.mxu3 %v3836_v29  ;;  %1356 = vmatpush.msrb.mxu2 %v3841_v58  ;;  %v3850_v29 = vld [vmem:[#allocation3 + $0x130] sm:$0xff]  ;;  %v5551_v58 = vld [vmem:[#allocation3] sm:$0xff] }
 0x1b2   :  { %8549 = vst [vmem:[#allocation76_spill] sm:$0xff] %v5551_v58 }
 0x1b3   :  { %1374 = vmatpush.msrb.mxu3 %v3838_v47  ;;  %1357 = vmatpush.msrb.mxu2 %v3843_v62  ;;  %v3852_v47 = vld [vmem:[#allocation3 + $0x120] sm:$0xff]  ;;  %v5554_v62 = vld [vmem:[#allocation11 + $0x70] sm:$0xff] }
 0x1b4   :  { %8550 = vst [vmem:[#allocation77_spill] sm:$0xff] %v5554_v62  ;;  %1190 = vmatpush.msra.mxu0 %v5554_v62 }
 0x1b5   :  { %1375 = vmatpush.msrb.mxu3 %v3840_v8  ;;  %1358 = vmatpush.msrb.mxu2 %v3845_v12  ;;  %v3854_v8 = vld [vmem:[#allocation3 + $0x110] sm:$0xff]  ;;  %v5558_v12 = vld [vmem:[#allocation11 + $0x60] sm:$0xff] }
 0x1b6   :  { %8551 = vst [vmem:[#allocation78_spill] sm:$0xff] %v5558_v12  ;;  %1191 = vmatpush.msra.mxu0 %v5558_v12 }
 0x1b7   :  { %1376 = vmatpush.msrb.mxu3 %v3842_v50  ;;  %1359 = vmatpush.msrb.mxu2 %v3847_v34  ;;  %v3856_v50 = vld [vmem:[#allocation3 + $0x100] sm:$0xff]  ;;  %v5564_v34 = vld [vmem:[#allocation11 + $0x50] sm:$0xff] }
 0x1b8   :  { %8552 = vst [vmem:[#allocation79_spill] sm:$0xff] %v5564_v34  ;;  %1192 = vmatpush.msra.mxu0 %v5564_v34 }
 0x1b9   :  { %1377 = vmatpush.msrb.mxu3 %v3844_v37  ;;  %1360 = vmatpush.msrb.mxu2 %v3849_v7  ;;  %v5556_v37 = vld [vmem:[#allocation11 + $0x1a0] sm:$0xff] }
 0x1ba   :  { %1207 = vmatpush.msra.mxu1 %v5556_v37  ;;  %v5572_v7 = vld [vmem:[#allocation11 + $0x40] sm:$0xff] }
 0x1bb   :  { %1378 = vmatpush.msrb.mxu3 %v3846_v63  ;;  %1361 = vmatpush.msrb.mxu2 %v5545_v56  ;;  %v5562_v63 = vld [vmem:[#allocation11 + $0x190] sm:$0xff]  ;;  %8554 = vst [vmem:[#allocation81_spill] sm:$0xff] %v5572_v7  ;;  %v5596_v56 = vld [vmem:[#allocation11] sm:$0xff] }
 0x1bc   :  { %1208 = vmatpush.msra.mxu1 %v5562_v63  ;;  %1193 = vmatpush.msra.mxu0 %v5572_v7  ;;  %8562 = vst [vmem:[#allocation89_spill] sm:$0xff] %v5596_v56  ;;  %v5602_v7 = vld [vmem:[#allocation11 + $0x120] sm:$0xff] }
 0x1bd   :  { %1379 = vmatpush.msrb.mxu3 %v3848_v36  ;;  %1362 = vmatpush.msrb.mxu2 %v5548_v44  ;;  %v5566_v36 = vld [vmem:[#allocation11 + $0x180] sm:$0xff]  ;;  %8564 = vst [vmem:[#allocation91_spill] sm:$0xff] %v5602_v7 }
 0x1be   :  { %8553 = vst [vmem:[#allocation80_spill] sm:$0xff] %v5566_v36  ;;  %1209 = vmatpush.msra.mxu1 %v5566_v36  ;;  %v5592_v44 = vld [vmem:[#allocation11 + $0x140] sm:$0xff] }
 0x1bf   :  { %1380 = vmatpush.msrb.mxu3 %v3850_v29  ;;  %1363 = vmatpush.msrb.mxu2 %v5551_v58  ;;  %v5574_v29 = vld [vmem:[#allocation11 + $0x170] sm:$0xff]  ;;  %8561 = vst [vmem:[#allocation88_spill] sm:$0xff] %v5592_v44 }
 0x1c0   :  { %8555 = vst [vmem:[#allocation82_spill] sm:$0xff] %v5574_v29  ;;  %1210 = vmatpush.msra.mxu1 %v5574_v29  ;;  %v5590_v58 = vld [vmem:[#allocation11 + $0x10] sm:$0xff] }
 0x1c1   :  { %1381 = vmatpush.msrb.mxu3 %v3852_v47  ;;  %v5578_v47 = vld [vmem:[#allocation11 + $0x30] sm:$0xff]  ;;  %8560 = vst [vmem:[#allocation87_spill] sm:$0xff] %v5590_v58 }
 0x1c2   :  { %8556 = vst [vmem:[#allocation83_spill] sm:$0xff] %v5578_v47  ;;  %1194 = vmatpush.msra.mxu0 %v5578_v47  ;;  %v5598_v47 = vld [vmem:[#allocation11 + $0x130] sm:$0xff] }
 0x1c3   :  { %1382 = vmatpush.msrb.mxu3 %v3854_v8  ;;  %v5580_v8 = vld [vmem:[#allocation11 + $0x160] sm:$0xff]  ;;  %8563 = vst [vmem:[#allocation90_spill] sm:$0xff] %v5598_v47 }
 0x1c4   :  { %8557 = vst [vmem:[#allocation84_spill] sm:$0xff] %v5580_v8  ;;  %1211 = vmatpush.msra.mxu1 %v5580_v8 }
 0x1c5   :  { %1383 = vmatpush.msrb.mxu3 %v3856_v50  ;;  %v5584_v50 = vld [vmem:[#allocation11 + $0x20] sm:$0xff] }
 0x1c6   :  { %8558 = vst [vmem:[#allocation85_spill] sm:$0xff] %v5584_v50  ;;  %1195 = vmatpush.msra.mxu0 %v5584_v50  ;;  %1212 = vmatpush.msra.mxu1 %v5586_v4  ;;  %v5605_v50 = vld [vmem:[#allocation11 + $0x110] sm:$0xff]  ;;  %v5608_v4 = vld [vmem:[#allocation11 + $0x100] sm:$0xff] }
 0x1c7   :  { %8565 = vst [vmem:[#allocation92_spill] sm:$0xff] %v5605_v50 }
 0x1c8   :  { %1196 = vmatpush.msra.mxu0 %v5590_v58  ;;  %1213 = vmatpush.msra.mxu1 %v5592_v44  ;;  %8566 = vst [vmem:[#allocation93_spill] sm:$0xff] %v5608_v4  ;;  %v1024_v58 = vld [vmem:[#allocation9] sm:$0x3] }
 0x1c9   :  { %v5611_v44 = vperm.slane %v1024_v58, 0  ;;  %v5614_v29 = vperm.slane %v1024_v58, 1  ;;  %v1341_v58 = vrot.slane %v5285_v23, 1  ;;  %v1428_v23 = vrot.slane %v5263_v13, 2 }
 0x1ca   :  { %1197 = vmatpush.msra.mxu0 %v5596_v56  ;;  %1214 = vmatpush.msra.mxu1 %v5598_v47  ;;  %v1432_v13 = vrot.slane %v5269_v16, 1  ;;  %v3895_v16 = vld [vmem:[#allocation6 + $0x1d0] sm:$0xff] }
 0x1cb   :  { %8567 = vst [vmem:[#allocation94_spill] sm:$0xff] %v5611_v44 }
 0x1cc   :  { %1215 = vmatpush.msra.mxu1 %v5602_v7  ;;  %8568 = vst [vmem:[#allocation95_spill] sm:$0xff] %v5614_v29 }
 0x1ce   :  { %1216 = vmatpush.msra.mxu1 %v5605_v50 }
 0x1d0   :  { %1217 = vmatpush.msra.mxu1 %v5608_v4  ;;  %v3857_v4 = vld [vmem:[%s8507_s28 + $0xf0] sm:$0xff] }
 0x21c   :  { %v1047_v8 = vpop.f32.mrf.mxu0 }
 0x21d   :  { %v1048_v56 = vadd.f32 %v1047_v8, %v5611_v44  ;;  %v5647_v8 = vld [vmem:[%s8507_s28 + $0x1e0] sm:$0xff] }
 0x21e   :  { %8570 = vst [vmem:[#allocation97_spill] sm:$0xff] %v5647_v8  ;;  %v5912_v44 = vld [vmem:[%s8123_s13 + $0xa0] sm:$0xff] }
 0x222   :  { %v1087_v12 = vpop.f32.mrf.mxu2 }
 0x223   :  { %v1067_v34 = vpop.f32.mrf.mxu1  ;;  %v1088_v7 = vadd.f32 %v1087_v12, %v5614_v29  ;;  %v3859_v12 = vld [vmem:[%s8507_s28 + $0xd0] sm:$0xff]  ;;  %v5930_v29 = vld [vmem:[%s8123_s13 + $0x98] sm:$0xff] }
 0x224   :  { %v1068_v47 = vadd.f32 %v1067_v34, %v1048_v56  ;;  %v3858_v56 = vld [vmem:[%s8507_s28 + $0xe0] sm:$0xff]  ;;  %8579 = vst [vmem:[#allocation106_spill] sm:$0xff] %v5930_v29 }
 0x226   :  { %3765 = vtanh.f32 %v1068_v47  ;;  %v3862_v47 = vld [vmem:[%s8507_s28 + $0xb0] sm:$0xff] }
 0x229   :  { %v1107_v36 = vpop.f32.mrf.mxu3 }
 0x22a   :  { %v1108_v50 = vadd.f32 %v1107_v36, %v1088_v7  ;;  %v5634_v36 = vld [vmem:[%s8507_s28 + $0x1f0] sm:$0xff] }
 0x22b   :  { %8569 = vst [vmem:[#allocation96_spill] sm:$0xff] %v5634_v36 }
 0x22c   :  { %v3766_v62 = vpop.eup %3765  ;;  %3767 = vtanh.f32 %v1108_v50  ;;  %v1344_v50 = vrot.slane %v5287_v24, 1  ;;  %v5853_v24 = vld [vmem:[#allocation6 + $0x180] sm:$0xff] }
 0x22d   :  { %1198 = vmatmul.f32.vlgmr.msra.gmra.mxu0 %v3766_v62  ;;  %1238 = vmatmul.f32.vlgmr.msra.gmra.mxu2 %v3766_v62  ;;  %v1340_v62 = vrot.slane %v5271_v17, 2  ;;  %v3874_v17 = vld [vmem:[%s8507_s28 + $0x50] sm:$0xff]  ;;  %8574 = vst [vmem:[#allocation101_spill] sm:$0xff] %v5853_v24 }
 0x22e   :  { %1436 = vmatpush.msra.mxu2 %v3857_v4  ;;  %v3860_v4 = vld [vmem:[%s8507_s28 + $0xc0] sm:$0xff] }
 0x22f   :  { %v5638_v7 = vsel %vm614_vm1, %v1341_v58, %v1340_v62  ;;  %v5657_v58 = vld [vmem:[%s8507_s28 + $0x1d0] sm:$0xff]  ;;  %v5667_v62 = vld [vmem:[%s8507_s28 + $0x1c0] sm:$0xff] }
 0x230   :  { %1437 = vmatpush.msra.mxu2 %v3858_v56  ;;  %v3864_v56 = vld [vmem:[%s8507_s28 + $0xa0] sm:$0xff]  ;;  %8571 = vst [vmem:[#allocation98_spill] sm:$0xff] %v5657_v58 }
 0x231   :  { %8572 = vst [vmem:[#allocation99_spill] sm:$0xff] %v5667_v62 }
 0x232   :  { %v3768_v34 = vpop.eup %3767  ;;  %1438 = vmatpush.msra.mxu2 %v3859_v12  ;;  %v3866_v12 = vld [vmem:[%s8507_s28 + $0x90] sm:$0xff] }
 0x233   :  { %1218 = vmatmul.f32.vlgmr.msra.gmra.mxu1 %v3768_v34  ;;  %1258 = vmatmul.f32.vlgmr.msra.gmra.mxu3 %v3768_v34  ;;  %v1343_v34 = vrot.slane %v5273_v18, 2  ;;  %v3898_v18 = vld [vmem:[#allocation6 + $0x1a0] sm:$0xff] }
 0x234   :  { %1439 = vmatpush.msra.mxu2 %v3860_v4  ;;  %1456 = vmatpush.msra.mxu3 %v5634_v36  ;;  %v5896_v36 = vld [vmem:[%s8123_s13 + $0xa8] sm:$0xff] }
 0x235   :  { %1364 = vmatmul.f32.vlgmr.msrb.gmra.mxu2 %v5638_v7  ;;  %v5671_v4 = vsel %vm614_vm1, %v1344_v50, %v1343_v34  ;;  %v3871_v50 = vld [vmem:[%s8507_s28 + $0x1a0] sm:$0xff] }
 0x236   :  { %1440 = vmatpush.msra.mxu2 %v3862_v47  ;;  %1457 = vmatpush.msra.mxu3 %v5647_v8  ;;  %v3868_v47 = vld [vmem:[%s8507_s28 + $0x80] sm:$0xff]  ;;  %v5880_v8 = vld [vmem:[%s8123_s13 + $0xb0] sm:$0xff] }
 0x237   :  { %v3872_v34 = vld [vmem:[%s8507_s28 + $0x60] sm:$0xff] }
 0x238   :  { %1441 = vmatpush.msra.mxu2 %v3864_v56  ;;  %1458 = vmatpush.msra.mxu3 %v5657_v58  ;;  %v5680_v56 = vld [vmem:[%s8507_s28 + $0x1b0] sm:$0xff] }
 0x239   :  { %8573 = vst [vmem:[#allocation100_spill] sm:$0xff] %v5680_v56  ;;  %v3899_v58 = vld [vmem:[#allocation6 + $0x190] sm:$0xff] }
 0x23a   :  { %1442 = vmatpush.msra.mxu2 %v3866_v12  ;;  %1459 = vmatpush.msra.mxu3 %v5667_v62  ;;  %v3870_v12 = vld [vmem:[%s8507_s28 + $0x70] sm:$0xff] }
 0x23b   :  { %1384 = vmatmul.f32.vlgmr.msrb.gmra.mxu3 %v5671_v4  ;;  %v3897_v62 = vld [vmem:[#allocation6 + $0x1b0] sm:$0xff] }
 0x23c   :  { %1443 = vmatpush.msra.mxu2 %v3868_v47  ;;  %1460 = vmatpush.msra.mxu3 %v5680_v56  ;;  %v3873_v47 = vld [vmem:[%s8507_s28 + $0x190] sm:$0xff]  ;;  %v3896_v56 = vld [vmem:[#allocation6 + $0x1c0] sm:$0xff] }
 0x23e   :  { %1444 = vmatpush.msra.mxu2 %v3870_v12  ;;  %1461 = vmatpush.msra.mxu3 %v3871_v50  ;;  %v3875_v12 = vld [vmem:[%s8507_s28 + $0x180] sm:$0xff] }
 0x23f   :  { %v3876_v50 = vld [vmem:[%s8507_s28 + $0x40] sm:$0xff] }
 0x240   :  { %1445 = vmatpush.msra.mxu2 %v3872_v34  ;;  %1462 = vmatpush.msra.mxu3 %v3873_v47  ;;  %v3877_v34 = vld [vmem:[%s8507_s28 + $0x170] sm:$0xff] }
 0x241   :  { %v3878_v47 = vld [vmem:[%s8507_s28 + $0x30] sm:$0xff] }
 0x242   :  { %1446 = vmatpush.msra.mxu2 %v3874_v17  ;;  %1463 = vmatpush.msra.mxu3 %v3875_v12  ;;  %v3879_v17 = vld [vmem:[%s8507_s28 + $0x160] sm:$0xff] }
 0x243   :  { %v3880_v12 = vld [vmem:[%s8507_s28 + $0x20] sm:$0xff] }
 0x244   :  { %1447 = vmatpush.msra.mxu2 %v3876_v50  ;;  %1464 = vmatpush.msra.mxu3 %v3877_v34  ;;  %v3881_v50 = vld [vmem:[%s8507_s28 + $0x150] sm:$0xff]  ;;  %v1429_v34 = vrot.slane %v5267_v15, 1 }
 0x246   :  { %1448 = vmatpush.msra.mxu2 %v3878_v47  ;;  %1465 = vmatpush.msra.mxu3 %v3879_v17  ;;  %v3882_v47 = vld [vmem:[%s8507_s28 + $0x10] sm:$0xff]  ;;  %v3883_v17 = vld [vmem:[%s8507_s28 + $0x140] sm:$0xff]  ;;  %v5734_v15 = vsel %vm614_vm1, %v1429_v34, %v1428_v23  ;;  %v1431_v23 = vrot.slane %v5265_v14, 2 }
 0x247   :  { %v3890_v34 = vld [vmem:[#allocation6 + $0xd0] sm:$0xff] }
 0x248   :  { %1449 = vmatpush.msra.mxu2 %v3880_v12  ;;  %1466 = vmatpush.msra.mxu3 %v3881_v50  ;;  %v3884_v12 = vld [vmem:[%s8507_s28] sm:$0xff]  ;;  %v3885_v50 = vld [vmem:[%s8507_s28 + $0x130] sm:$0xff] }
 0x249   :  { %v3893_v14 = vld [vmem:[#allocation6 + $0x1f0] sm:$0xff] }
 0x24a   :  { %1450 = vmatpush.msra.mxu2 %v3882_v47  ;;  %1467 = vmatpush.msra.mxu3 %v3883_v17  ;;  %v3886_v47 = vld [vmem:[#allocation6 + $0xf0] sm:$0xff]  ;;  %v3887_v17 = vld [vmem:[%s8507_s28 + $0x120] sm:$0xff] }
 0x24c   :  { %1451 = vmatpush.msra.mxu2 %v3884_v12  ;;  %1468 = vmatpush.msra.mxu3 %v3885_v50  ;;  %v3888_v12 = vld [vmem:[#allocation6 + $0xe0] sm:$0xff]  ;;  %v3889_v50 = vld [vmem:[%s8507_s28 + $0x110] sm:$0xff] }
 0x24d   :  { %1452 = vmatmul.f32.vlgmr.msra.gmra.mxu2 %v5734_v15 }
 0x24e   :  { %1524 = vmatpush.msrb.mxu2 %v3886_v47  ;;  %1469 = vmatpush.msra.mxu3 %v3887_v17  ;;  %v3891_v47 = vld [vmem:[%s8507_s28 + $0x100] sm:$0xff]  ;;  %v5749_v17 = vsel %vm614_vm1, %v1432_v13, %v1431_v23  ;;  %v5765_v13 = vld [vmem:[%s8123_s13 + $0xf8] sm:$0xff]  ;;  %v5772_v23 = vld [vmem:[%s8123_s13 + $0xf0] sm:$0xff] }
 0x24f   :  { %1320 = vmatpush.msrb.mxu1 %v5765_v13 }
 0x250   :  { %1525 = vmatpush.msrb.mxu2 %v3888_v12  ;;  %1470 = vmatpush.msra.mxu3 %v3889_v50  ;;  %v5755_v12 = vld [vmem:[%s8123_s13 + $0x78] sm:$0xff]  ;;  %v3892_v50 = vld [vmem:[#allocation6 + $0xc0] sm:$0xff] }
 0x251   :  { %1300 = vmatpush.msrb.mxu0 %v5755_v12  ;;  %1321 = vmatpush.msrb.mxu1 %v5772_v23 }
 0x252   :  { %1526 = vmatpush.msrb.mxu2 %v3890_v34  ;;  %1471 = vmatpush.msra.mxu3 %v3891_v47  ;;  %v5760_v34 = vld [vmem:[%s8123_s13 + $0x70] sm:$0xff]  ;;  %v5778_v47 = vld [vmem:[%s8123_s13 + $0x68] sm:$0xff] }
 0x253   :  { %1472 = vmatmul.f32.vlgmr.msra.gmra.mxu3 %v5749_v17  ;;  %1301 = vmatpush.msrb.mxu0 %v5760_v34 }
 0x254   :  { %1527 = vmatpush.msrb.mxu2 %v3892_v50  ;;  %1544 = vmatpush.msrb.mxu3 %v3893_v14  ;;  %v3894_v14 = vld [vmem:[#allocation6 + $0x1e0] sm:$0xff] }
 0x255   :  { %v5783_v50 = vld [vmem:[%s8123_s13 + $0xe8] sm:$0xff]  ;;  %1302 = vmatpush.msrb.mxu0 %v5778_v47 }
 0x256   :  { %1528 = vmatpush.msrb.mxu2 %v5339_v5  ;;  %1545 = vmatpush.msrb.mxu3 %v3894_v14  ;;  %v5791_v5 = vld [vmem:[%s8123_s13 + $0x60] sm:$0xff] }
 0x257   :  { %v5796_v14 = vld [vmem:[%s8123_s13 + $0xe0] sm:$0xff]  ;;  %1322 = vmatpush.msrb.mxu1 %v5783_v50  ;;  %1303 = vmatpush.msrb.mxu0 %v5791_v5 }
 0x258   :  { %1529 = vmatpush.msrb.mxu2 %v5349_v11  ;;  %1546 = vmatpush.msrb.mxu3 %v3895_v16  ;;  %v5804_v16 = vld [vmem:[%s8123_s13 + $0x58] sm:$0xff] }
 0x259   :  { %v5809_v11 = vld [vmem:[%s8123_s13 + $0xd8] sm:$0xff]  ;;  %1323 = vmatpush.msrb.mxu1 %v5796_v14  ;;  %1304 = vmatpush.msrb.mxu0 %v5804_v16 }
 0x25a   :  { %1530 = vmatpush.msrb.mxu2 %v5352_v27  ;;  %1547 = vmatpush.msrb.mxu3 %v3896_v56  ;;  %v5817_v27 = vld [vmem:[%s8123_s13 + $0x50] sm:$0xff] }
 0x25b   :  { %v5822_v56 = vld [vmem:[%s8123_s13 + $0xd0] sm:$0xff]  ;;  %1324 = vmatpush.msrb.mxu1 %v5809_v11  ;;  %1305 = vmatpush.msrb.mxu0 %v5817_v27 }
 0x25c   :  { %1531 = vmatpush.msrb.mxu2 %v5355_v31  ;;  %1548 = vmatpush.msrb.mxu3 %v3897_v62  ;;  %v5830_v31 = vld [vmem:[%s8123_s13 + $0x48] sm:$0xff] }
 0x25d   :  { %v5835_v62 = vld [vmem:[%s8123_s13 + $0xc8] sm:$0xff]  ;;  %1325 = vmatpush.msrb.mxu1 %v5822_v56  ;;  %1306 = vmatpush.msrb.mxu0 %v5830_v31 }
 0x25e   :  { %1532 = vmatpush.msrb.mxu2 %v5358_v35  ;;  %1549 = vmatpush.msrb.mxu3 %v3898_v18  ;;  %v5843_v18 = vld [vmem:[%s8123_s13 + $0x40] sm:$0xff] }
 0x25f   :  { %v5848_v35 = vld [vmem:[%s8123_s13 + $0xc0] sm:$0xff]  ;;  %1326 = vmatpush.msrb.mxu1 %v5835_v62  ;;  %1307 = vmatpush.msrb.mxu0 %v5843_v18 }
 0x260   :  { %1533 = vmatpush.msrb.mxu2 %v5361_v39  ;;  %1550 = vmatpush.msrb.mxu3 %v3899_v58  ;;  %v5859_v39 = vld [vmem:[%s8123_s13 + $0x38] sm:$0xff] }
 0x261   :  { %v5864_v58 = vld [vmem:[%s8123_s13 + $0xb8] sm:$0xff]  ;;  %1327 = vmatpush.msrb.mxu1 %v5848_v35  ;;  %1308 = vmatpush.msrb.mxu0 %v5859_v39 }
 0x262   :  { %1534 = vmatpush.msrb.mxu2 %v5364_v43  ;;  %1551 = vmatpush.msrb.mxu3 %v5853_v24  ;;  %v5869_v43 = vld [vmem:[#allocation6 + $0x170] sm:$0xff] }
 0x263   :  { %8575 = vst [vmem:[#allocation102_spill] sm:$0xff] %v5869_v43  ;;  %v5875_v24 = vld [vmem:[%s8123_s13 + $0x30] sm:$0xff]  ;;  %1328 = vmatpush.msrb.mxu1 %v5864_v58 }
 0x264   :  { %1535 = vmatpush.msrb.mxu2 %v5367_v49  ;;  %1552 = vmatpush.msrb.mxu3 %v5869_v43  ;;  %v5885_v49 = vld [vmem:[#allocation6 + $0x160] sm:$0xff] }
 0x265   :  { %8576 = vst [vmem:[#allocation103_spill] sm:$0xff] %v5885_v49  ;;  %v5891_v43 = vld [vmem:[%s8123_s13 + $0x28] sm:$0xff]  ;;  %1309 = vmatpush.msrb.mxu0 %v5875_v24  ;;  %1329 = vmatpush.msrb.mxu1 %v5880_v8 }
 0x266   :  { %1536 = vmatpush.msrb.mxu2 %v5370_v53  ;;  %1553 = vmatpush.msrb.mxu3 %v5885_v49  ;;  %v5901_v53 = vld [vmem:[#allocation6 + $0x150] sm:$0xff]  ;;  %v5907_v49 = vld [vmem:[%s8123_s13 + $0x20] sm:$0xff] }
 0x267   :  { %8577 = vst [vmem:[#allocation104_spill] sm:$0xff] %v5901_v53  ;;  %1310 = vmatpush.msrb.mxu0 %v5891_v43  ;;  %1330 = vmatpush.msrb.mxu1 %v5896_v36 }
 0x268   :  { %1537 = vmatpush.msrb.mxu2 %v5375_v59  ;;  %1554 = vmatpush.msrb.mxu3 %v5901_v53  ;;  %v5917_v59 = vld [vmem:[#allocation6 + $0x140] sm:$0xff]  ;;  %v5923_v53 = vld [vmem:[%s8123_s13 + $0x18] sm:$0xff] }
 0x269   :  { %8578 = vst [vmem:[#allocation105_spill] sm:$0xff] %v5917_v59  ;;  %1311 = vmatpush.msrb.mxu0 %v5907_v49  ;;  %1331 = vmatpush.msrb.mxu1 %v5912_v44 }
 0x26a   :  { %1538 = vmatpush.msrb.mxu2 %v5381_v1  ;;  %1555 = vmatpush.msrb.mxu3 %v5917_v59  ;;  %v5937_v1 = vld [vmem:[%s8123_s13 + $0x10] sm:$0xff] }
 0x26b   :  { %1312 = vmatpush.msrb.mxu0 %v5923_v53  ;;  %v5944_v59 = vld [vmem:[%s8123_s13 + $0x90] sm:$0xff]  ;;  %1332 = vmatpush.msrb.mxu1 %v5930_v29  ;;  %v5971_v29 = vld [vmem:[%s8123_s13 + $0x80] sm:$0xff] }
 0x26c   :  { %1539 = vmatpush.msrb.mxu2 %v5387_v6  ;;  %1556 = vmatpush.msrb.mxu3 %v5372_v54  ;;  %v5950_v54 = vld [vmem:[%s8123_s13 + $0x8] sm:$0xff] }
 0x26d   :  { %1540 = vmatmul.f32.vlgmr.msrb.gmra.mxu2 %v5308_v45  ;;  %1313 = vmatpush.msrb.mxu0 %v5937_v1  ;;  %v5957_v6 = vld [vmem:[%s8123_s13 + $0x88] sm:$0xff] }
 0x26e   :  { %1557 = vmatpush.msrb.mxu3 %v5377_v60  ;;  %1610 = vmatpush.msra.mxu2 %v5401_v30  ;;  %v5964_v60 = vld [vmem:[%s8123_s13] sm:$0xff] }
 0x26f   :  { %1333 = vmatpush.msrb.mxu1 %v5944_v59  ;;  %1314 = vmatpush.msrb.mxu0 %v5950_v54  ;;  %v5982_v30 = vld [vmem:[#allocation3 + $0x1f8] sm:$0xff] }
 0x270   :  { %1558 = vmatpush.msrb.mxu3 %v5383_v2  ;;  %1611 = vmatpush.msra.mxu2 %v5404_v20  ;;  %v5978_v2 = vld [vmem:[#allocation3 + $0xf8] sm:$0xff]  ;;  %8581 = vst [vmem:[#allocation108_spill] sm:$0xff] %v5982_v30  ;;  %v5986_v20 = vld [vmem:[#allocation3 + $0xe8] sm:$0xff] }
 0x271   :  { %1334 = vmatpush.msrb.mxu1 %v5957_v6  ;;  %1315 = vmatpush.msrb.mxu0 %v5964_v60  ;;  %8580 = vst [vmem:[#allocation107_spill] sm:$0xff] %v5978_v2 }
 0x272   :  { %1559 = vmatpush.msrb.mxu3 %v5389_v9  ;;  %1612 = vmatpush.msra.mxu2 %v5406_v33  ;;  %v5990_v9 = vld [vmem:[#allocation3 + $0x1e8] sm:$0xff] }
 0x273   :  { %1560 = vmatmul.f32.vlgmr.msrb.gmra.mxu3 %v5311_v46  ;;  %1388 = vmatpush.msra.mxu0 %v5978_v2  ;;  %v5994_v2 = vld [vmem:[#allocation3 + $0xd8] sm:$0xff]  ;;  %v6002_v33 = vld [vmem:[#allocation3 + $0xc8] sm:$0xff] }
 0x274   :  { %1335 = vmatpush.msrb.mxu1 %v5971_v29  ;;  %1630 = vmatpush.msra.mxu3 %v5408_v25  ;;  %v6006_v25 = vld [vmem:[#allocation3 + $0x1c8] sm:$0xff] }
 0x275   :  { %1389 = vmatpush.msra.mxu0 %v5986_v20  ;;  %1613 = vmatpush.msra.mxu2 %v5411_v26  ;;  %v6010_v26 = vld [vmem:[#allocation3 + $0xb8] sm:$0xff] }
 0x276   :  { %1408 = vmatpush.msra.mxu1 %v5982_v30  ;;  %1631 = vmatpush.msra.mxu3 %v5414_v38  ;;  %v5998_v30 = vld [vmem:[#allocation3 + $0x1d8] sm:$0xff]  ;;  %8582 = vst [vmem:[#allocation109_spill] sm:$0xff] %v6010_v26 }
 0x277   :  { %1390 = vmatpush.msra.mxu0 %v5994_v2  ;;  %1614 = vmatpush.msra.mxu2 %v5419_v42  ;;  %v6014_v38 = vld [vmem:[#allocation3 + $0x1b8] sm:$0xff]  ;;  %v6018_v42 = vld [vmem:[#allocation3 + $0xa8] sm:$0xff] }
 0x278   :  { %1409 = vmatpush.msra.mxu1 %v5990_v9  ;;  %1632 = vmatpush.msra.mxu3 %v5417_v41  ;;  %8583 = vst [vmem:[#allocation110_spill] sm:$0xff] %v6018_v42  ;;  %v6022_v41 = vld [vmem:[#allocation3 + $0x1a8] sm:$0xff] }
 0x279   :  { %1391 = vmatpush.msra.mxu0 %v6002_v33  ;;  %1615 = vmatpush.msra.mxu2 %v5425_v51  ;;  %v6026_v51 = vld [vmem:[#allocation3 + $0x98] sm:$0xff] }
 0x27a   :  { %1410 = vmatpush.msra.mxu1 %v5998_v30  ;;  %1633 = vmatpush.msra.mxu3 %v5423_v48  ;;  %8584 = vst [vmem:[#allocation111_spill] sm:$0xff] %v6026_v51  ;;  %v6030_v48 = vld [vmem:[#allocation3 + $0x198] sm:$0xff] }
 0x27b   :  { %1392 = vmatpush.msra.mxu0 %v6010_v26  ;;  %1616 = vmatpush.msra.mxu2 %v5431_v61  ;;  %8585 = vst [vmem:[#allocation112_spill] sm:$0xff] %v6030_v48  ;;  %v8586_v61 = vld [vmem:[#allocation50_spill] sm:$0xff]  ;;  %v6038_v26 = vld [vmem:[#allocation3 + $0x188] sm:$0xff] }
 0x27c   :  { %1411 = vmatpush.msra.mxu1 %v6006_v25  ;;  %1634 = vmatpush.msra.mxu3 %v5429_v57  ;;  %v8588_v57 = vld [vmem:[#allocation52_spill] sm:$0xff] }
 0x27d   :  { %1393 = vmatpush.msra.mxu0 %v6018_v42  ;;  %1617 = vmatpush.msra.mxu2 %v5437_v10  ;;  %v6034_v42 = vld [vmem:[#allocation3 + $0x88] sm:$0xff]  ;;  %8589 = vst [vmem:[#allocation52_spill] sm:$0xff] %v6038_v26 }
 0x27e   :  { %1412 = vmatpush.msra.mxu1 %v6014_v38  ;;  %1635 = vmatpush.msra.mxu3 %v5435_v3  ;;  %8587 = vst [vmem:[#allocation50_spill] sm:$0xff] %v6034_v42  ;;  %v8590_v10 = vld [vmem:[#allocation51_spill] sm:$0xff]  ;;  %v8592_v3 = vld [vmem:[#allocation54_spill] sm:$0xff] }
 0x27f   :  { %1394 = vmatpush.msra.mxu0 %v6026_v51  ;;  %1618 = vmatpush.msra.mxu2 %v8586_v61  ;;  %v6042_v51 = vld [vmem:[#allocation3 + $0x78] sm:$0xff] }
 0x280   :  { %1413 = vmatpush.msra.mxu1 %v6022_v41  ;;  %1636 = vmatpush.msra.mxu3 %v8588_v57  ;;  %8591 = vst [vmem:[#allocation51_spill] sm:$0xff] %v6042_v51  ;;  %v8594_v61 = vld [vmem:[#allocation53_spill] sm:$0xff]  ;;  %v8596_v57 = vld [vmem:[#allocation56_spill] sm:$0xff] }
 0x281   :  { %1395 = vmatpush.msra.mxu0 %v6034_v42  ;;  %1619 = vmatpush.msra.mxu2 %v8590_v10  ;;  %v6050_v42 = vld [vmem:[#allocation3 + $0x68] sm:$0xff] }
 0x282   :  { %1414 = vmatpush.msra.mxu1 %v6030_v48  ;;  %1637 = vmatpush.msra.mxu3 %v8592_v3  ;;  %v6046_v48 = vld [vmem:[#allocation3 + $0x178] sm:$0xff]  ;;  %8595 = vst [vmem:[#allocation53_spill] sm:$0xff] %v6050_v42  ;;  %v8598_v10 = vld [vmem:[#allocation55_spill] sm:$0xff] }
 0x283   :  { %1396 = vmatpush.msra.mxu0 %v6042_v51  ;;  %8593 = vst [vmem:[#allocation54_spill] sm:$0xff] %v6046_v48  ;;  %1620 = vmatpush.msra.mxu2 %v8594_v61  ;;  %v6058_v51 = vld [vmem:[#allocation3 + $0x58] sm:$0xff] }
 0x284   :  { %1415 = vmatpush.msra.mxu1 %v6038_v26  ;;  %1638 = vmatpush.msra.mxu3 %v8596_v57  ;;  %v6054_v26 = vld [vmem:[#allocation3 + $0x168] sm:$0xff]  ;;  %8599 = vst [vmem:[#allocation55_spill] sm:$0xff] %v6058_v51  ;;  %v8600_v3 = vld [vmem:[#allocation58_spill] sm:$0xff]  ;;  %v8602_v61 = vld [vmem:[#allocation57_spill] sm:$0xff] }
 0x285   :  { %1397 = vmatpush.msra.mxu0 %v6050_v42  ;;  %8597 = vst [vmem:[#allocation56_spill] sm:$0xff] %v6054_v26  ;;  %1621 = vmatpush.msra.mxu2 %v8598_v10  ;;  %v6066_v42 = vld [vmem:[#allocation3 + $0x48] sm:$0xff] }
 0x286   :  { %1416 = vmatpush.msra.mxu1 %v6046_v48  ;;  %1639 = vmatpush.msra.mxu3 %v8600_v3  ;;  %v6062_v48 = vld [vmem:[#allocation3 + $0x158] sm:$0xff]  ;;  %8603 = vst [vmem:[#allocation57_spill] sm:$0xff] %v6066_v42  ;;  %v8604_v57 = vld [vmem:[#allocation60_spill] sm:$0xff]  ;;  %v8606_v10 = vld [vmem:[#allocation59_spill] sm:$0xff] }
 0x287   :  { %1398 = vmatpush.msra.mxu0 %v6058_v51  ;;  %8601 = vst [vmem:[#allocation58_spill] sm:$0xff] %v6062_v48  ;;  %1622 = vmatpush.msra.mxu2 %v8602_v61  ;;  %v6074_v51 = vld [vmem:[#allocation3 + $0x38] sm:$0xff] }
 0x288   :  { %1417 = vmatpush.msra.mxu1 %v6054_v26  ;;  %1640 = vmatpush.msra.mxu3 %v8604_v57  ;;  %v6070_v26 = vld [vmem:[#allocation3 + $0x148] sm:$0xff]  ;;  %8607 = vst [vmem:[#allocation59_spill] sm:$0xff] %v6074_v51  ;;  %v8608_v3 = vld [vmem:[#allocation62_spill] sm:$0xff]  ;;  %v8610_v61 = vld [vmem:[#allocation61_spill] sm:$0xff] }
 0x289   :  { %1399 = vmatpush.msra.mxu0 %v6066_v42  ;;  %8605 = vst [vmem:[#allocation60_spill] sm:$0xff] %v6070_v26  ;;  %1623 = vmatpush.msra.mxu2 %v8606_v10  ;;  %v6082_v42 = vld [vmem:[#allocation3 + $0x28] sm:$0xff] }
 0x28a   :  { %1418 = vmatpush.msra.mxu1 %v6062_v48  ;;  %1641 = vmatpush.msra.mxu3 %v8608_v3  ;;  %v6078_v48 = vld [vmem:[#allocation3 + $0x138] sm:$0xff]  ;;  %8611 = vst [vmem:[#allocation61_spill] sm:$0xff] %v6082_v42  ;;  %v8612_v57 = vld [vmem:[#allocation64_spill] sm:$0xff]  ;;  %v8614_v10 = vld [vmem:[#allocation63_spill] sm:$0xff] }
 0x28b   :  { %1400 = vmatpush.msra.mxu0 %v6074_v51  ;;  %8609 = vst [vmem:[#allocation62_spill] sm:$0xff] %v6078_v48  ;;  %1624 = vmatpush.msra.mxu2 %v8610_v61  ;;  %v6090_v51 = vld [vmem:[#allocation3 + $0x18] sm:$0xff]  ;;  %v8616_v61 = vld [vmem:[#allocation68_spill] sm:$0xff] }
 0x28c   :  { %1419 = vmatpush.msra.mxu1 %v6070_v26  ;;  %1642 = vmatpush.msra.mxu3 %v8612_v57  ;;  %v6086_v26 = vld [vmem:[#allocation3 + $0x128] sm:$0xff]  ;;  %v8615_v3 = vld [vmem:[#allocation65_spill] sm:$0xff]  ;;  %v8618_v57 = vld [vmem:[#allocation66_spill] sm:$0xff] }
 0x28d   :  { %1401 = vmatpush.msra.mxu0 %v6082_v42  ;;  %8613 = vst [vmem:[#allocation64_spill] sm:$0xff] %v6086_v26  ;;  %1625 = vmatpush.msra.mxu2 %v8614_v10  ;;  %v6098_v42 = vld [vmem:[#allocation3 + $0x8] sm:$0xff] }
 0x28e   :  { %1420 = vmatpush.msra.mxu1 %v6078_v48  ;;  %1643 = vmatpush.msra.mxu3 %v8615_v3  ;;  %v6094_v48 = vld [vmem:[#allocation3 + $0x118] sm:$0xff]  ;;  %8617 = vst [vmem:[#allocation63_spill] sm:$0xff] %v6098_v42  ;;  %v8619_v10 = vld [vmem:[#allocation67_spill] sm:$0xff] }
 0x28f   :  { %1402 = vmatpush.msra.mxu0 %v6090_v51  ;;  %1692 = vmatpush.msrb.mxu2 %v8616_v61  ;;  %v8620_v3 = vld [vmem:[#allocation70_spill] sm:$0xff]  ;;  %v8621_v61 = vld [vmem:[#allocation71_spill] sm:$0xff] }
 0x290   :  { %1421 = vmatpush.msra.mxu1 %v6086_v26  ;;  %1644 = vmatpush.msra.mxu3 %v8618_v57  ;;  %v6102_v26 = vld [vmem:[#allocation3 + $0x108] sm:$0xff]  ;;  %v8634_v57 = vld [vmem:[#allocation85_spill] sm:$0xff] }
 0x291   :  { %1403 = vmatpush.msra.mxu0 %v6098_v42  ;;  %1693 = vmatpush.msrb.mxu2 %v5503_v0  ;;  %v8622_v42 = vld [vmem:[#allocation72_spill] sm:$0xff] }
 0x292   :  { %1422 = vmatpush.msra.mxu1 %v6094_v48  ;;  %1645 = vmatpush.msra.mxu3 %v8619_v10  ;;  %v8624_v0 = vld [vmem:[#allocation80_spill] sm:$0xff] }
 0x293   :  { %1694 = vmatpush.msrb.mxu2 %v5505_v19  ;;  %v8625_v19 = vld [vmem:[#allocation78_spill] sm:$0xff] }
 0x294   :  { %1423 = vmatpush.msra.mxu1 %v6102_v26  ;;  %1712 = vmatpush.msrb.mxu3 %v5510_v28  ;;  %v8623_v28 = vld [vmem:[#allocation77_spill] sm:$0xff] }
 0x295   :  { %1695 = vmatpush.msrb.mxu2 %v8620_v3  ;;  %v8635_v3 = vld [vmem:[#allocation90_spill] sm:$0xff] }
 0x296   :  { %1713 = vmatpush.msrb.mxu3 %v5512_v40  ;;  %v8626_v40 = vld [vmem:[#allocation82_spill] sm:$0xff] }
 0x297   :  { %1696 = vmatpush.msrb.mxu2 %v8622_v42  ;;  %v8633_v42 = vld [vmem:[#allocation88_spill] sm:$0xff] }
 0x298   :  { %1714 = vmatpush.msrb.mxu3 %v8621_v61  ;;  %v8636_v61 = vld [vmem:[#allocation87_spill] sm:$0xff] }
 0x299   :  { %1697 = vmatpush.msrb.mxu2 %v5527_v32  ;;  %v8628_v32 = vld [vmem:[#allocation84_spill] sm:$0xff] }
 0x29a   :  { %1715 = vmatpush.msrb.mxu3 %v5525_v22  ;;  %v8627_v22 = vld [vmem:[#allocation79_spill] sm:$0xff] }
 0x29b   :  { %1698 = vmatpush.msrb.mxu2 %v5535_v21  ;;  %v1176_v21 = vld [vmem:[#allocation12] sm:$0x3] }
 0x29c   :  { %1716 = vmatpush.msrb.mxu3 %v5531_v52  ;;  %v8629_v52 = vld [vmem:[#allocation81_spill] sm:$0xff] }
 0x29d   :  { %1699 = vmatpush.msrb.mxu2 %v5539_v55  ;;  %v8631_v55 = vld [vmem:[#allocation83_spill] sm:$0xff] }
 0x29e   :  { %1717 = vmatpush.msrb.mxu3 %v5556_v37  ;;  %v8630_v37 = vld [vmem:[#allocation86_spill] sm:$0xff] }
 0x29f   :  { %1700 = vmatpush.msrb.mxu2 %v8623_v28 }
 0x2a0   :  { %1718 = vmatpush.msrb.mxu3 %v5562_v63  ;;  %v6129_v63 = vperm.slane %v1176_v21, 0 }
 0x2a1   :  { %1701 = vmatpush.msrb.mxu2 %v8625_v19  ;;  %v8638_v19 = vld [vmem:[#allocation89_spill] sm:$0xff] }
 0x2a2   :  { %1719 = vmatpush.msrb.mxu3 %v8624_v0  ;;  %8632 = vst [vmem:[#allocation65_spill] sm:$0xff] %v6129_v63  ;;  %v8637_v0 = vld [vmem:[#allocation91_spill] sm:$0xff] }
 0x2a3   :  { %1702 = vmatpush.msrb.mxu2 %v8627_v22 }
 0x2a4   :  { %1720 = vmatpush.msrb.mxu3 %v8626_v40 }
 0x2a5   :  { %1703 = vmatpush.msrb.mxu2 %v8629_v52  ;;  %v8639_v52 = vld [vmem:[#allocation92_spill] sm:$0xff] }
 0x2a6   :  { %1721 = vmatpush.msrb.mxu3 %v8628_v32  ;;  %v6138_v32 = vperm.slane %v1176_v21, 1  ;;  %v6152_v21 = vld [vmem:[%s8507_s28 + $0xe8] sm:$0xff] }
 0x2a7   :  { %1704 = vmatpush.msrb.mxu2 %v8631_v55  ;;  %v8640_v55 = vld [vmem:[#allocation93_spill] sm:$0xff]  ;;  %8641 = vst [vmem:[#allocation68_spill] sm:$0xff] %v6152_v21 }
 0x2a8   :  { %1722 = vmatpush.msrb.mxu3 %v8630_v37 }
 0x2a9   :  { %1705 = vmatpush.msrb.mxu2 %v8634_v57 }
 0x2aa   :  { %1723 = vmatpush.msrb.mxu3 %v8633_v42  ;;  %v1199_v10 = vpop.f32.mrf.mxu0 }
 0x2ab   :  { %1706 = vmatpush.msrb.mxu2 %v8636_v61  ;;  %v1200_v28 = vadd.f32 %v1199_v10, %v6129_v63  ;;  %v6146_v10 = vld [vmem:[%s8507_s28 + $0xf8] sm:$0xff] }
 0x2ac   :  { %1724 = vmatpush.msrb.mxu3 %v8635_v3 }
 0x2ad   :  { %1707 = vmatpush.msrb.mxu2 %v8638_v19  ;;  %v6164_v19 = vld [vmem:[%s8507_s28 + $0xc8] sm:$0xff] }
 0x2ae   :  { %1725 = vmatpush.msrb.mxu3 %v8637_v0  ;;  %v6158_v0 = vld [vmem:[%s8507_s28 + $0xd8] sm:$0xff]  ;;  %8643 = vst [vmem:[#allocation67_spill] sm:$0xff] %v6164_v19 }
 0x2af   :  { %8642 = vst [vmem:[#allocation66_spill] sm:$0xff] %v6158_v0 }
 0x2b0   :  { %v1219_v40 = vpop.f32.mrf.mxu1  ;;  %1726 = vmatpush.msrb.mxu3 %v8639_v52  ;;  %v1239_v37 = vpop.f32.mrf.mxu2  ;;  %v6183_v52 = vld [vmem:[%s8507_s28 + $0x1e8] sm:$0xff] }
 0x2b1   :  { %v1220_v22 = vadd.f32 %v1219_v40, %v1200_v28  ;;  %v1240_v42 = vadd.f32 %v1239_v37, %v6138_v32  ;;  %v6170_v40 = vld [vmem:[%s8507_s28 + $0x1f8] sm:$0xff]  ;;  %v6189_v37 = vld [vmem:[%s8507_s28 + $0xa8] sm:$0xff] }
 0x2b2   :  { %1727 = vmatpush.msrb.mxu3 %v8640_v55  ;;  %8645 = vst [vmem:[#allocation71_spill] sm:$0xff] %v6189_v37  ;;  %v6201_v55 = vld [vmem:[%s8507_s28 + $0x98] sm:$0xff] }
 0x2b3   :  { %3769 = vtanh.f32 %v1220_v22  ;;  %v6177_v22 = vld [vmem:[%s8507_s28 + $0xb8] sm:$0xff]  ;;  %8646 = vst [vmem:[#allocation72_spill] sm:$0xff] %v6201_v55 }
 0x2b4   :  { %8644 = vst [vmem:[#allocation70_spill] sm:$0xff] %v6177_v22 }
 0x2b6   :  { %v1259_v57 = vpop.f32.mrf.mxu3 }
 0x2b7   :  { %v1260_v3 = vadd.f32 %v1259_v57, %v1240_v42  ;;  %v6207_v42 = vld [vmem:[%s8507_s28 + $0x1c8] sm:$0xff] }
 0x2b8   :  { %v6214_v57 = vld [vmem:[%s8507_s28 + $0x88] sm:$0xff] }
 0x2b9   :  { %v3770_v61 = vpop.eup %3769  ;;  %3771 = vtanh.f32 %v1260_v3  ;;  %8647 = vst [vmem:[#allocation77_spill] sm:$0xff] %v6214_v57  ;;  %v6220_v3 = vld [vmem:[%s8507_s28 + $0x1b8] sm:$0xff] }
 0x2ba   :  { %1316 = vmatmul.f32.vlgmr.msrb.gmra.mxu0 %v3770_v61  ;;  %8648 = vst [vmem:[#allocation80_spill] sm:$0xff] %v6220_v3  ;;  %v6226_v61 = vld [vmem:[%s8507_s28 + $0x78] sm:$0xff] }
 0x2bb   :  { %1476 = vmatpush.msrb.mxu0 %v6146_v10  ;;  %8649 = vst [vmem:[#allocation78_spill] sm:$0xff] %v6226_v61 }
 0x2bd   :  { %1477 = vmatpush.msrb.mxu0 %v6152_v21  ;;  %v6414_v21 = vld [vmem:[#allocation6 + $0x18] sm:$0xff] }
 0x2be   :  { %8691 = vst [vmem:[#allocation140_spill] sm:$0xff] %v6414_v21 }
 0x2bf   :  { %v3772_v28 = vpop.eup %3771  ;;  %1478 = vmatpush.msrb.mxu0 %v6158_v0  ;;  %v6405_v0 = vld [vmem:[#allocation6 + $0x168] sm:$0xff] }
 0x2c0   :  { %1336 = vmatmul.f32.vlgmr.msrb.gmra.mxu1 %v3772_v28  ;;  %v6238_v28 = vld [vmem:[%s8507_s28 + $0x68] sm:$0xff] }
 0x2c1   :  { %1479 = vmatpush.msrb.mxu0 %v6164_v19  ;;  %1496 = vmatpush.msrb.mxu1 %v6170_v40  ;;  %8651 = vst [vmem:[#allocation79_spill] sm:$0xff] %v6238_v28 }
 0x2c2   :  { %1404 = vmatmul.f32.vlgmr.msra.gmra.mxu0 %v5638_v7  ;;  %v6195_v7 = vld [vmem:[%s8507_s28 + $0x1d8] sm:$0xff] }
 0x2c3   :  { %1480 = vmatpush.msrb.mxu0 %v6177_v22  ;;  %1497 = vmatpush.msrb.mxu1 %v6183_v52  ;;  %v6360_v22 = vld [vmem:[#allocation6 + $0xa8] sm:$0xff] }
 0x2c4   :  { %8675 = vst [vmem:[#allocation124_spill] sm:$0xff] %v6360_v22 }
 0x2c5   :  { %1481 = vmatpush.msrb.mxu0 %v6189_v37  ;;  %1498 = vmatpush.msrb.mxu1 %v6195_v7  ;;  %v6268_v37 = vld [vmem:[%s8507_s28 + $0x178] sm:$0xff] }
 0x2c6   :  { %8656 = vst [vmem:[#allocation88_spill] sm:$0xff] %v6268_v37 }
 0x2c7   :  { %1482 = vmatpush.msrb.mxu0 %v6201_v55  ;;  %1499 = vmatpush.msrb.mxu1 %v6207_v42  ;;  %v6256_v55 = vld [vmem:[%s8507_s28 + $0x188] sm:$0xff] }
 0x2c8   :  { %1424 = vmatmul.f32.vlgmr.msra.gmra.mxu1 %v5671_v4  ;;  %v6232_v4 = vld [vmem:[%s8507_s28 + $0x1a8] sm:$0xff]  ;;  %8654 = vst [vmem:[#allocation86_spill] sm:$0xff] %v6256_v55 }
 0x2c9   :  { %1483 = vmatpush.msrb.mxu0 %v6214_v57  ;;  %1500 = vmatpush.msrb.mxu1 %v6220_v3  ;;  %8650 = vst [vmem:[#allocation82_spill] sm:$0xff] %v6232_v4  ;;  %v6244_v57 = vld [vmem:[%s8507_s28 + $0x198] sm:$0xff]  ;;  %v6408_v3 = vld [vmem:[#allocation6 + $0x28] sm:$0xff] }
 0x2ca   :  { %8652 = vst [vmem:[#allocation84_spill] sm:$0xff] %v6244_v57 }
 0x2cb   :  { %1484 = vmatpush.msrb.mxu0 %v6226_v61  ;;  %1501 = vmatpush.msrb.mxu1 %v6232_v4  ;;  %v6250_v61 = vld [vmem:[%s8507_s28 + $0x58] sm:$0xff]  ;;  %8690 = vst [vmem:[#allocation139_spill] sm:$0xff] %v6408_v3 }
 0x2cc   :  { %8653 = vst [vmem:[#allocation81_spill] sm:$0xff] %v6250_v61  ;;  %v6390_v4 = vld [vmem:[#allocation6 + $0x58] sm:$0xff] }
 0x2cd   :  { %1485 = vmatpush.msrb.mxu0 %v6238_v28  ;;  %1502 = vmatpush.msrb.mxu1 %v6244_v57  ;;  %v6262_v28 = vld [vmem:[%s8507_s28 + $0x48] sm:$0xff]  ;;  %v6366_v57 = vld [vmem:[#allocation6 + $0x98] sm:$0xff]  ;;  %8685 = vst [vmem:[#allocation134_spill] sm:$0xff] %v6390_v4 }
 0x2ce   :  { %8655 = vst [vmem:[#allocation83_spill] sm:$0xff] %v6262_v28 }
 0x2cf   :  { %1486 = vmatpush.msrb.mxu0 %v6250_v61  ;;  %1503 = vmatpush.msrb.mxu1 %v6256_v55  ;;  %v6274_v61 = vld [vmem:[%s8507_s28 + $0x38] sm:$0xff]  ;;  %v6280_v55 = vld [vmem:[%s8507_s28 + $0x168] sm:$0xff]  ;;  %8677 = vst [vmem:[#allocation126_spill] sm:$0xff] %v6366_v57 }
 0x2d0   :  { %8657 = vst [vmem:[#allocation85_spill] sm:$0xff] %v6274_v61 }
 0x2d1   :  { %1487 = vmatpush.msrb.mxu0 %v6262_v28  ;;  %1504 = vmatpush.msrb.mxu1 %v6268_v37  ;;  %8658 = vst [vmem:[#allocation90_spill] sm:$0xff] %v6280_v55  ;;  %v6286_v28 = vld [vmem:[%s8507_s28 + $0x28] sm:$0xff]  ;;  %v6292_v37 = vld [vmem:[%s8507_s28 + $0x158] sm:$0xff] }
 0x2d2   :  { %8659 = vst [vmem:[#allocation87_spill] sm:$0xff] %v6286_v28 }
 0x2d3   :  { %1488 = vmatpush.msrb.mxu0 %v6274_v61  ;;  %1505 = vmatpush.msrb.mxu1 %v6280_v55  ;;  %8660 = vst [vmem:[#allocation91_spill] sm:$0xff] %v6292_v37  ;;  %v6298_v61 = vld [vmem:[%s8507_s28 + $0x18] sm:$0xff]  ;;  %v6304_v55 = vld [vmem:[%s8507_s28 + $0x148] sm:$0xff] }
 0x2d4   :  { %8661 = vst [vmem:[#allocation89_spill] sm:$0xff] %v6298_v61 }
 0x2d5   :  { %1489 = vmatpush.msrb.mxu0 %v6286_v28  ;;  %1506 = vmatpush.msrb.mxu1 %v6292_v37  ;;  %8662 = vst [vmem:[#allocation92_spill] sm:$0xff] %v6304_v55  ;;  %v6310_v28 = vld [vmem:[%s8507_s28 + $0x8] sm:$0xff]  ;;  %v6316_v37 = vld [vmem:[%s8507_s28 + $0x138] sm:$0xff] }
 0x2d6   :  { %8663 = vst [vmem:[#allocation93_spill] sm:$0xff] %v6310_v28 }
 0x2d7   :  { %1490 = vmatpush.msrb.mxu0 %v6298_v61  ;;  %1507 = vmatpush.msrb.mxu1 %v6304_v55  ;;  %8664 = vst [vmem:[#allocation113_spill] sm:$0xff] %v6316_v37  ;;  %v6320_v61 = vld [vmem:[#allocation6 + $0xf8] sm:$0xff]  ;;  %v6326_v55 = vld [vmem:[%s8507_s28 + $0x128] sm:$0xff] }
 0x2d8   :  { %8665 = vst [vmem:[#allocation114_spill] sm:$0xff] %v6320_v61 }
 0x2d9   :  { %1491 = vmatpush.msrb.mxu0 %v6310_v28  ;;  %1508 = vmatpush.msrb.mxu1 %v6316_v37  ;;  %8666 = vst [vmem:[#allocation115_spill] sm:$0xff] %v6326_v55  ;;  %v6329_v28 = vld [vmem:[#allocation6 + $0xe8] sm:$0xff]  ;;  %v6335_v37 = vld [vmem:[%s8507_s28 + $0x118] sm:$0xff] }
 0x2da   :  { %1492 = vmatmul.f32.vlgmr.msrb.gmra.mxu0 %v5734_v15  ;;  %8667 = vst [vmem:[#allocation116_spill] sm:$0xff] %v6329_v28  ;;  %v6338_v15 = vld [vmem:[#allocation6 + $0xd8] sm:$0xff] }
 0x2db   :  { %1564 = vmatpush.msra.mxu0 %v6320_v61  ;;  %1509 = vmatpush.msrb.mxu1 %v6326_v55  ;;  %8668 = vst [vmem:[#allocation117_spill] sm:$0xff] %v6335_v37  ;;  %v6344_v61 = vld [vmem:[%s8507_s28 + $0x108] sm:$0xff]  ;;  %v6351_v55 = vld [vmem:[#allocation6 + $0x1f8] sm:$0xff] }
 0x2dc   :  { %8669 = vst [vmem:[#allocation118_spill] sm:$0xff] %v6338_v15 }
 0x2dd   :  { %1565 = vmatpush.msra.mxu0 %v6329_v28  ;;  %1510 = vmatpush.msrb.mxu1 %v6335_v37  ;;  %8670 = vst [vmem:[#allocation119_spill] sm:$0xff] %v6344_v61  ;;  %v6348_v28 = vld [vmem:[#allocation6 + $0xc8] sm:$0xff]  ;;  %v6354_v37 = vld [vmem:[#allocation6 + $0xb8] sm:$0xff] }
 0x2de   :  { %8671 = vst [vmem:[#allocation120_spill] sm:$0xff] %v6348_v28 }
 0x2df   :  { %1566 = vmatpush.msra.mxu0 %v6338_v15  ;;  %1511 = vmatpush.msrb.mxu1 %v6344_v61  ;;  %8672 = vst [vmem:[#allocation121_spill] sm:$0xff] %v6351_v55  ;;  %v6357_v15 = vld [vmem:[#allocation6 + $0x1e8] sm:$0xff]  ;;  %v1385_v61 = vpop.f32.mrf.mxu3 }
 0x2e0   :  { %1512 = vmatmul.f32.vlgmr.msrb.gmra.mxu1 %v5749_v17  ;;  %8673 = vst [vmem:[#allocation122_spill] sm:$0xff] %v6354_v37  ;;  %v6363_v17 = vld [vmem:[#allocation6 + $0x1d8] sm:$0xff] }
 0x2e1   :  { %1567 = vmatpush.msra.mxu0 %v6348_v28  ;;  %1584 = vmatpush.msra.mxu1 %v6351_v55  ;;  %8674 = vst [vmem:[#allocation123_spill] sm:$0xff] %v6357_v15  ;;  %v1365_v28 = vpop.f32.mrf.mxu2  ;;  %v6369_v55 = vld [vmem:[#allocation6 + $0x1c8] sm:$0xff] }
 0x2e2   :  { %8676 = vst [vmem:[#allocation125_spill] sm:$0xff] %v6363_v17 }
 0x2e3   :  { %1568 = vmatpush.msra.mxu0 %v6354_v37  ;;  %1585 = vmatpush.msra.mxu1 %v6357_v15  ;;  %8678 = vst [vmem:[#allocation127_spill] sm:$0xff] %v6369_v55  ;;  %v6372_v37 = vld [vmem:[#allocation6 + $0x88] sm:$0xff]  ;;  %v6375_v15 = vld [vmem:[#allocation6 + $0x1b8] sm:$0xff] }
 0x2e4   :  { %8679 = vst [vmem:[#allocation128_spill] sm:$0xff] %v6372_v37 }
 0x2e5   :  { %1569 = vmatpush.msra.mxu0 %v6360_v22  ;;  %1586 = vmatpush.msra.mxu1 %v6363_v17  ;;  %8680 = vst [vmem:[#allocation129_spill] sm:$0xff] %v6375_v15  ;;  %v6378_v22 = vld [vmem:[#allocation6 + $0x78] sm:$0xff]  ;;  %v6381_v17 = vld [vmem:[#allocation6 + $0x1a8] sm:$0xff] }
 0x2e6   :  { %8681 = vst [vmem:[#allocation130_spill] sm:$0xff] %v6378_v22 }
 0x2e7   :  { %1570 = vmatpush.msra.mxu0 %v6366_v57  ;;  %1587 = vmatpush.msra.mxu1 %v6369_v55  ;;  %8682 = vst [vmem:[#allocation131_spill] sm:$0xff] %v6381_v17  ;;  %v6384_v57 = vld [vmem:[#allocation6 + $0x68] sm:$0xff]  ;;  %v6387_v55 = vld [vmem:[#allocation6 + $0x198] sm:$0xff]  ;;  %v1473_v19 = vpop.f32.mrf.mxu3 }
 0x2e8   :  { %8683 = vst [vmem:[#allocation132_spill] sm:$0xff] %v6384_v57 }
 0x2e9   :  { %1571 = vmatpush.msra.mxu0 %v6372_v37  ;;  %1588 = vmatpush.msra.mxu1 %v6375_v15  ;;  %8684 = vst [vmem:[#allocation133_spill] sm:$0xff] %v6387_v55  ;;  %v1453_v37 = vpop.f32.mrf.mxu2  ;;  %v6393_v15 = vld [vmem:[#allocation6 + $0x188] sm:$0xff] }
 0x2ea   :  { %8686 = vst [vmem:[#allocation135_spill] sm:$0xff] %v6393_v15 }
 0x2eb   :  { %1572 = vmatpush.msra.mxu0 %v6378_v22  ;;  %1589 = vmatpush.msra.mxu1 %v6381_v17  ;;  %v6396_v22 = vld [vmem:[#allocation6 + $0x48] sm:$0xff]  ;;  %v6399_v17 = vld [vmem:[#allocation6 + $0x178] sm:$0xff] }
 0x2ec   :  { %8687 = vst [vmem:[#allocation136_spill] sm:$0xff] %v6396_v22 }
 0x2ed   :  { %1573 = vmatpush.msra.mxu0 %v6384_v57  ;;  %1590 = vmatpush.msra.mxu1 %v6387_v55  ;;  %8688 = vst [vmem:[#allocation137_spill] sm:$0xff] %v6399_v17  ;;  %v1386_v57 = vadd.f32 %v1385_v61, %v1365_v28  ;;  %v6402_v55 = vld [vmem:[#allocation6 + $0x38] sm:$0xff] }
 0x2ee   :  { %8689 = vst [vmem:[#allocation138_spill] sm:$0xff] %v6402_v55 }
 0x2ef   :  { %1574 = vmatpush.msra.mxu0 %v6390_v4  ;;  %1591 = vmatpush.msra.mxu1 %v6393_v15  ;;  %v1454_v4 = vadd.f32 %v1453_v37, %v1386_v57  ;;  %v6411_v15 = vld [vmem:[#allocation6 + $0x158] sm:$0xff]  ;;  %v6420_v57 = vld [vmem:[#allocation6 + $0x8] sm:$0xff] }
 0x2f0   :  { %8692 = vst [vmem:[#allocation141_spill] sm:$0xff] %v6420_v57 }
 0x2f1   :  { %1575 = vmatpush.msra.mxu0 %v6396_v22  ;;  %1592 = vmatpush.msra.mxu1 %v6399_v17  ;;  %v1541_v22 = vpop.f32.mrf.mxu2  ;;  %v1474_v61 = vadd.f32 %v1473_v19, %v1454_v4  ;;  %v8693_v19 = vld [vmem:[#allocation69_spill] sm:$0xff] }
 0x2f2   :  { %v6428_v4 = vld [vmem:[#allocation8 + $0xf8] sm:$0xff] }
 0x2f3   :  { %1576 = vmatpush.msra.mxu0 %v6402_v55  ;;  %1593 = vmatpush.msra.mxu1 %v6405_v0  ;;  %v6417_v55 = vld [vmem:[#allocation6 + $0x148] sm:$0xff]  ;;  %8694 = vst [vmem:[#allocation69_spill] sm:$0xff] %v6428_v4 }
 0x2f5   :  { %1577 = vmatpush.msra.mxu0 %v6408_v3  ;;  %1594 = vmatpush.msra.mxu1 %v6411_v15  ;;  %v6423_v3 = vld [vmem:[#allocation6 + $0x138] sm:$0xff] }
 0x2f6   :  { %v1561_v17 = vpop.f32.mrf.mxu3 }
 0x2f7   :  { %v1562_v28 = vadd.f32 %v1561_v17, %v1541_v22  ;;  %1578 = vmatpush.msra.mxu0 %v6414_v21  ;;  %1595 = vmatpush.msra.mxu1 %v6417_v55  ;;  %v6431_v17 = vld [vmem:[#allocation6 + $0x128] sm:$0xff] }
 0x2f8   :  { %v6459_v21 = vld [vmem:[#allocation8 + $0xa8] sm:$0xff] }
 0x2f9   :  { %v1604_v37 = vadd.f32 %v1562_v28, %v1474_v61  ;;  %1579 = vmatpush.msra.mxu0 %v6420_v57  ;;  %1596 = vmatpush.msra.mxu1 %v6423_v3  ;;  %v6434_v61 = vld [vmem:[#allocation8 + $0xe8] sm:$0xff]  ;;  %v6437_v28 = vld [vmem:[#allocation6 + $0x118] sm:$0xff]  ;;  %8700 = vst [vmem:[#allocation147_spill] sm:$0xff] %v6459_v21 }
 0x2fa   :  { %1580 = vmatmul.f32.vlgmr.msra.gmra.mxu0 %v5308_v45  ;;  %8695 = vst [vmem:[#allocation142_spill] sm:$0xff] %v6434_v61  ;;  %v6440_v45 = vld [vmem:[#allocation8 + $0xd8] sm:$0xff] }
 0x2fb   :  { %v1606_v22 = vadd.f32 %v1604_v37, %v8693_v19  ;;  %1650 = vmatpush.msrb.mxu0 %v6428_v4  ;;  %1597 = vmatpush.msra.mxu1 %v6431_v17  ;;  %8696 = vst [vmem:[#allocation143_spill] sm:$0xff] %v6440_v45  ;;  %v6443_v37 = vld [vmem:[#allocation6 + $0x108] sm:$0xff]  ;;  %v6453_v57 = vld [vmem:[#allocation8 + $0xb8] sm:$0xff] }
 0x2fc   :  { %v6447_v4 = vld [vmem:[#allocation8 + $0xc8] sm:$0xff]  ;;  %8698 = vst [vmem:[#allocation145_spill] sm:$0xff] %v6453_v57 }
 0x2fd   :  { %3773 = vtanh.f32 %v1606_v22  ;;  %1651 = vmatpush.msrb.mxu0 %v6434_v61  ;;  %1598 = vmatpush.msra.mxu1 %v6437_v28  ;;  %8697 = vst [vmem:[#allocation144_spill] sm:$0xff] %v6447_v4  ;;  %v6450_v22 = vld [vmem:[#allocation8 + $0x1f8] sm:$0xff] }
 0x2ff   :  { %1652 = vmatpush.msrb.mxu0 %v6440_v45  ;;  %1599 = vmatpush.msra.mxu1 %v6443_v37  ;;  %v6456_v45 = vld [vmem:[#allocation8 + $0x1e8] sm:$0xff] }
 0x300   :  { %1600 = vmatmul.f32.vlgmr.msra.gmra.mxu1 %v5311_v46  ;;  %8699 = vst [vmem:[#allocation146_spill] sm:$0xff] %v6456_v45  ;;  %v6462_v46 = vld [vmem:[#allocation8 + $0x1d8] sm:$0xff] }
 0x301   :  { %1653 = vmatpush.msrb.mxu0 %v6447_v4  ;;  %1670 = vmatpush.msrb.mxu1 %v6450_v22  ;;  %v6466_v4 = vld [vmem:[#allocation8 + $0x98] sm:$0xff] }
 0x302   :  { %8701 = vst [vmem:[#allocation148_spill] sm:$0xff] %v6466_v4 }
 0x303   :  { %v3774_v61 = vpop.eup %3773  ;;  %1654 = vmatpush.msrb.mxu0 %v6453_v57  ;;  %1671 = vmatpush.msrb.mxu1 %v6456_v45  ;;  %v6469_v57 = vld [vmem:[#allocation8 + $0x1c8] sm:$0xff] }
 0x304   :  { %1626 = vmatmul.f32.vlgmr.msra.gmra.mxu2 %v3774_v61  ;;  %v6473_v45 = vld [vmem:[#allocation8 + $0x88] sm:$0xff] }
 0x305   :  { %1655 = vmatpush.msrb.mxu0 %v6459_v21  ;;  %1672 = vmatpush.msrb.mxu1 %v6462_v46  ;;  %8702 = vst [vmem:[#allocation149_spill] sm:$0xff] %v6473_v45  ;;  %v6476_v21 = vld [vmem:[#allocation8 + $0x1b8] sm:$0xff] }
 0x306   :  { %1774 = vmatpush.msra.mxu2 %v5755_v12  ;;  %v6480_v12 = vld [vmem:[#allocation8 + $0x78] sm:$0xff] }
 0x307   :  { %1656 = vmatpush.msrb.mxu0 %v6466_v4  ;;  %1673 = vmatpush.msrb.mxu1 %v6469_v57  ;;  %8703 = vst [vmem:[#allocation150_spill] sm:$0xff] %v6480_v12  ;;  %v6483_v4 = vld [vmem:[#allocation8 + $0x1a8] sm:$0xff] }
 0x308   :  { %1775 = vmatpush.msra.mxu2 %v5760_v34  ;;  %v6487_v34 = vld [vmem:[#allocation8 + $0x68] sm:$0xff] }
 0x309   :  { %1657 = vmatpush.msrb.mxu0 %v6473_v45  ;;  %1674 = vmatpush.msrb.mxu1 %v6476_v21  ;;  %8704 = vst [vmem:[#allocation151_spill] sm:$0xff] %v6487_v34  ;;  %v6490_v45 = vld [vmem:[#allocation8 + $0x198] sm:$0xff] }
 0x30a   :  { %1776 = vmatpush.msra.mxu2 %v5778_v47  ;;  %v6494_v47 = vld [vmem:[#allocation8 + $0x58] sm:$0xff] }
 0x30b   :  { %1658 = vmatpush.msrb.mxu0 %v6480_v12  ;;  %1675 = vmatpush.msrb.mxu1 %v6483_v4  ;;  %8705 = vst [vmem:[#allocation152_spill] sm:$0xff] %v6494_v47  ;;  %v6497_v12 = vld [vmem:[#allocation8 + $0x188] sm:$0xff] }
 0x30c   :  { %1777 = vmatpush.msra.mxu2 %v5791_v5  ;;  %8706 = vst [vmem:[#allocation153_spill] sm:$0xff] %v6497_v12  ;;  %v6501_v5 = vld [vmem:[#allocation8 + $0x48] sm:$0xff] }
 0x30d   :  { %1659 = vmatpush.msrb.mxu0 %v6487_v34  ;;  %1676 = vmatpush.msrb.mxu1 %v6490_v45  ;;  %8707 = vst [vmem:[#allocation154_spill] sm:$0xff] %v6501_v5  ;;  %v6504_v34 = vld [vmem:[#allocation8 + $0x178] sm:$0xff] }
 0x30e   :  { %1778 = vmatpush.msra.mxu2 %v5804_v16  ;;  %8708 = vst [vmem:[#allocation155_spill] sm:$0xff] %v6504_v34  ;;  %v6508_v16 = vld [vmem:[#allocation8 + $0x38] sm:$0xff] }
 0x30f   :  { %1660 = vmatpush.msrb.mxu0 %v6494_v47  ;;  %1677 = vmatpush.msrb.mxu1 %v6497_v12  ;;  %8709 = vst [vmem:[#allocation156_spill] sm:$0xff] %v6508_v16  ;;  %v6511_v47 = vld [vmem:[#allocation8 + $0x168] sm:$0xff] }
 0x310   :  { %1779 = vmatpush.msra.mxu2 %v5817_v27  ;;  %8710 = vst [vmem:[#allocation157_spill] sm:$0xff] %v6511_v47  ;;  %v6515_v27 = vld [vmem:[#allocation8 + $0x28] sm:$0xff] }
 0x311   :  { %1661 = vmatpush.msrb.mxu0 %v6501_v5  ;;  %1678 = vmatpush.msrb.mxu1 %v6504_v34  ;;  %8711 = vst [vmem:[#allocation158_spill] sm:$0xff] %v6515_v27  ;;  %v6518_v5 = vld [vmem:[#allocation8 + $0x158] sm:$0xff] }
 0x312   :  { %1780 = vmatpush.msra.mxu2 %v5830_v31  ;;  %8712 = vst [vmem:[#allocation159_spill] sm:$0xff] %v6518_v5  ;;  %v6522_v31 = vld [vmem:[#allocation8 + $0x18] sm:$0xff] }
 0x313   :  { %1662 = vmatpush.msrb.mxu0 %v6508_v16  ;;  %1679 = vmatpush.msrb.mxu1 %v6511_v47  ;;  %8713 = vst [vmem:[#allocation160_spill] sm:$0xff] %v6522_v31  ;;  %v6525_v16 = vld [vmem:[#allocation8 + $0x148] sm:$0xff]  ;;  %v8769_v34 = vld [vmem:[#allocation73_spill] sm:$0xff] }
 0x314   :  { %1781 = vmatpush.msra.mxu2 %v5843_v18  ;;  %8714 = vst [vmem:[#allocation161_spill] sm:$0xff] %v6525_v16  ;;  %v6529_v18 = vld [vmem:[#allocation8 + $0x8] sm:$0xff] }
 0x315   :  { %1663 = vmatpush.msrb.mxu0 %v6515_v27  ;;  %1680 = vmatpush.msrb.mxu1 %v6518_v5  ;;  %8715 = vst [vmem:[#allocation162_spill] sm:$0xff] %v6529_v18  ;;  %v6532_v27 = vld [vmem:[#allocation8 + $0x138] sm:$0xff] }
 0x316   :  { %1782 = vmatpush.msra.mxu2 %v5859_v39  ;;  %8716 = vst [vmem:[#allocation163_spill] sm:$0xff] %v6532_v27  ;;  %v6536_v39 = vld [vmem:[#allocation8 + $0x128] sm:$0xff] }
 0x317   :  { %1664 = vmatpush.msrb.mxu0 %v6522_v31  ;;  %1681 = vmatpush.msrb.mxu1 %v6525_v16  ;;  %8717 = vst [vmem:[#allocation164_spill] sm:$0xff] %v6536_v39  ;;  %v6539_v31 = vld [vmem:[#allocation11 + $0xf8] sm:$0xff] }
 0x318   :  { %1783 = vmatpush.msra.mxu2 %v5875_v24  ;;  %8718 = vst [vmem:[#allocation165_spill] sm:$0xff] %v6539_v31  ;;  %v6543_v24 = vld [vmem:[#allocation8 + $0x118] sm:$0xff] }
 0x319   :  { %1665 = vmatpush.msrb.mxu0 %v6529_v18  ;;  %1682 = vmatpush.msrb.mxu1 %v6532_v27  ;;  %8719 = vst [vmem:[#allocation166_spill] sm:$0xff] %v6543_v24  ;;  %v6546_v18 = vld [vmem:[#allocation11 + $0xe8] sm:$0xff] }
 0x31a   :  { %1666 = vmatmul.f32.vlgmr.msrb.gmra.mxu0 %v3774_v61  ;;  %1784 = vmatpush.msra.mxu2 %v5891_v43  ;;  %8720 = vst [vmem:[#allocation167_spill] sm:$0xff] %v6546_v18  ;;  %v4812_v43 = vmov 0   ;;  %v6550_v61 = vld [vmem:[#allocation8 + $0x108] sm:$0xff] }
 0x31b   :  { %1683 = vmatpush.msrb.mxu1 %v6536_v39  ;;  %1732 = vmatpush.msra.mxu0 %v6539_v31  ;;  %8721 = vst [vmem:[#allocation168_spill] sm:$0xff] %v6550_v61  ;;  %v6553_v39 = vld [vmem:[#allocation11 + $0x1f8] sm:$0xff] }
 0x31c   :  { %1785 = vmatpush.msra.mxu2 %v5907_v49  ;;  %3756 = vset.pattern.permute.xlu0 %v4812_v43  ;;  %8722 = vst [vmem:[#allocation169_spill] sm:$0xff] %v6553_v39  ;;  %v6556_v49 = vld [vmem:[#allocation11 + $0xd8] sm:$0xff] }
 0x31d   :  { %1684 = vmatpush.msrb.mxu1 %v6543_v24  ;;  %1733 = vmatpush.msra.mxu0 %v6546_v18  ;;  %8723 = vst [vmem:[#allocation170_spill] sm:$0xff] %v6556_v49  ;;  %v6560_v18 = vld [vmem:[#allocation11 + $0x1e8] sm:$0xff]  ;;  %v6567_v31 = vld [vmem:[#allocation11 + $0x1d8] sm:$0xff] }
 0x31e   :  { %1786 = vmatpush.msra.mxu2 %v5923_v53  ;;  %3757 = vset.pattern.permute.xlu1 %v4812_v43  ;;  %8724 = vst [vmem:[#allocation171_spill] sm:$0xff] %v6560_v18  ;;  %v6563_v53 = vld [vmem:[#allocation11 + $0xc8] sm:$0xff] }
 0x31f   :  { %1685 = vmatpush.msrb.mxu1 %v6550_v61  ;;  %1734 = vmatpush.msra.mxu0 %v6556_v49  ;;  %8725 = vst [vmem:[#allocation172_spill] sm:$0xff] %v6563_v53  ;;  %v6577_v49 = vld [vmem:[#allocation11 + $0xa8] sm:$0xff] }
 0x320   :  { %1787 = vmatpush.msra.mxu2 %v5937_v1  ;;  %3758 = vset.pattern.permute.xlu2 %v4812_v43  ;;  %8726 = vst [vmem:[#allocation173_spill] sm:$0xff] %v6567_v31  ;;  %v6574_v1 = vld [vmem:[#allocation11 + $0x1c8] sm:$0xff]  ;;  %v6583_v43 = vld [vmem:[#allocation11 + $0x98] sm:$0xff] }
 0x321   :  { %1752 = vmatpush.msra.mxu1 %v6553_v39  ;;  %1735 = vmatpush.msra.mxu0 %v6563_v53  ;;  %v6570_v39 = vld [vmem:[#allocation11 + $0xb8] sm:$0xff]  ;;  %8728 = vst [vmem:[#allocation175_spill] sm:$0xff] %v6574_v1  ;;  %v6586_v53 = vld [vmem:[#allocation11 + $0x1a8] sm:$0xff] }
 0x322   :  { %1788 = vmatpush.msra.mxu2 %v5950_v54  ;;  %8727 = vst [vmem:[#allocation174_spill] sm:$0xff] %v6570_v39  ;;  %v6580_v54 = vld [vmem:[#allocation11 + $0x1b8] sm:$0xff]  ;;  %v6652_v61 = vld [vmem:[#allocation11 + $0x108] sm:$0xff] }
 0x323   :  { %1753 = vmatpush.msra.mxu1 %v6560_v18  ;;  %1736 = vmatpush.msra.mxu0 %v6570_v39  ;;  %8729 = vst [vmem:[#allocation176_spill] sm:$0xff] %v6577_v49  ;;  %v6592_v39 = vld [vmem:[#allocation11 + $0x198] sm:$0xff] }
 0x324   :  { %1789 = vmatpush.msra.mxu2 %v5964_v60  ;;  %8730 = vst [vmem:[#allocation177_spill] sm:$0xff] %v6580_v54  ;;  %v6589_v60 = vld [vmem:[#allocation11 + $0x88] sm:$0xff]  ;;  %v6649_v18 = vld [vmem:[#allocation3 + $0xe0] sm:$0xff] }
 0x325   :  { %1754 = vmatpush.msra.mxu1 %v6567_v31  ;;  %1737 = vmatpush.msra.mxu0 %v6577_v49  ;;  %8731 = vst [vmem:[#allocation178_spill] sm:$0xff] %v6583_v43  ;;  %v6595_v49 = vld [vmem:[#allocation11 + $0x78] sm:$0xff] }
 0x326   :  { %8732 = vst [vmem:[#allocation179_spill] sm:$0xff] %v6586_v53 }
 0x327   :  { %1755 = vmatpush.msra.mxu1 %v6574_v1  ;;  %1738 = vmatpush.msra.mxu0 %v6583_v43  ;;  %8733 = vst [vmem:[#allocation180_spill] sm:$0xff] %v6589_v60  ;;  %v6601_v43 = vld [vmem:[#allocation11 + $0x68] sm:$0xff]  ;;  %v6630_v1 = vld [vmem:[#allocation11 + $0x138] sm:$0xff] }
 0x328   :  { %8734 = vst [vmem:[#allocation181_spill] sm:$0xff] %v6592_v39 }
 0x329   :  { %1756 = vmatpush.msra.mxu1 %v6580_v54  ;;  %1739 = vmatpush.msra.mxu0 %v6589_v60  ;;  %8735 = vst [vmem:[#allocation182_spill] sm:$0xff] %v6595_v49  ;;  %v6598_v54 = vld [vmem:[#allocation11 + $0x188] sm:$0xff]  ;;  %v6607_v60 = vld [vmem:[#allocation11 + $0x58] sm:$0xff] }
 0x32a   :  { %8736 = vst [vmem:[#allocation183_spill] sm:$0xff] %v6598_v54 }
 0x32b   :  { %1757 = vmatpush.msra.mxu1 %v6586_v53  ;;  %1740 = vmatpush.msra.mxu0 %v6595_v49  ;;  %8737 = vst [vmem:[#allocation184_spill] sm:$0xff] %v6601_v43  ;;  %v6604_v53 = vld [vmem:[#allocation11 + $0x178] sm:$0xff]  ;;  %v6613_v49 = vld [vmem:[#allocation11 + $0x48] sm:$0xff] }
 0x32c   :  { %8738 = vst [vmem:[#allocation185_spill] sm:$0xff] %v6604_v53 }
 0x32d   :  { %1758 = vmatpush.msra.mxu1 %v6592_v39  ;;  %1741 = vmatpush.msra.mxu0 %v6601_v43  ;;  %8739 = vst [vmem:[#allocation186_spill] sm:$0xff] %v6607_v60  ;;  %v6610_v39 = vld [vmem:[#allocation11 + $0x168] sm:$0xff]  ;;  %v6619_v43 = vld [vmem:[#allocation11 + $0x38] sm:$0xff] }
 0x32e   :  { %8740 = vst [vmem:[#allocation187_spill] sm:$0xff] %v6610_v39 }
 0x32f   :  { %1759 = vmatpush.msra.mxu1 %v6598_v54  ;;  %1742 = vmatpush.msra.mxu0 %v6607_v60  ;;  %8741 = vst [vmem:[#allocation188_spill] sm:$0xff] %v6613_v49  ;;  %v6616_v54 = vld [vmem:[#allocation11 + $0x158] sm:$0xff]  ;;  %v6625_v60 = vld [vmem:[#allocation11 + $0x28] sm:$0xff] }
 0x330   :  { %8742 = vst [vmem:[#allocation189_spill] sm:$0xff] %v6616_v54 }
 0x331   :  { %1760 = vmatpush.msra.mxu1 %v6604_v53  ;;  %1743 = vmatpush.msra.mxu0 %v6613_v49  ;;  %8743 = vst [vmem:[#allocation190_spill] sm:$0xff] %v6619_v43  ;;  %v6622_v53 = vld [vmem:[#allocation11 + $0x148] sm:$0xff]  ;;  %v6633_v49 = vld [vmem:[#allocation11 + $0x18] sm:$0xff] }
 0x332   :  { %8744 = vst [vmem:[#allocation191_spill] sm:$0xff] %v6622_v53 }
 0x333   :  { %1761 = vmatpush.msra.mxu1 %v6610_v39  ;;  %1744 = vmatpush.msra.mxu0 %v6619_v43  ;;  %8745 = vst [vmem:[#allocation192_spill] sm:$0xff] %v6625_v60  ;;  %v6628_v39 = vld [vmem:[#allocation2] ss:$0 sm:$0xff]  ;;  %v6636_v43 = vld [vmem:[#allocation11 + $0x128] sm:$0xff] }
 0x334   :  { %8746 = vst [vmem:[#allocation193_spill] sm:$0xff] %v6628_v39 }
 0x335   :  { %1762 = vmatpush.msra.mxu1 %v6616_v54  ;;  %1745 = vmatpush.msra.mxu0 %v6625_v60  ;;  %8747 = vst [vmem:[#allocation194_spill] sm:$0xff] %v6630_v1  ;;  %v6642_v60 = vld [vmem:[#allocation3 + $0xf0] sm:$0xff] }
 0x336   :  { %8748 = vst [vmem:[#allocation195_spill] sm:$0xff] %v6633_v49 }
 0x337   :  { %1763 = vmatpush.msra.mxu1 %v6622_v53  ;;  %1746 = vmatpush.msra.mxu0 %v6633_v49  ;;  %v1317_v54 = vpop.f32.mrf.mxu0  ;;  %8749 = vst [vmem:[#allocation196_spill] sm:$0xff] %v6636_v43  ;;  %v6639_v53 = vld [vmem:[#allocation11 + $0x8] sm:$0xff] }
 0x338   :  { %8750 = vst [vmem:[#allocation197_spill] sm:$0xff] %v6639_v53  ;;  %v1318_v31 = vadd.f32 %v6628_v39, %v1317_v54  ;;  %v6658_v54 = vld [vmem:[#allocation3 + $0xc0] sm:$0xff]  ;;  %v6661_v39 = vld [vmem:[#allocation3 + $0xb0] sm:$0xff] }
 0x339   :  { %1764 = vmatpush.msra.mxu1 %v6630_v1  ;;  %1747 = vmatpush.msra.mxu0 %v6639_v53  ;;  %8751 = vst [vmem:[#allocation198_spill] sm:$0xff] %v6642_v60  ;;  %v6646_v1 = vld [vmem:[#allocation11 + $0x118] sm:$0xff]  ;;  %v6655_v53 = vld [vmem:[#allocation3 + $0xd0] sm:$0xff] }
 0x33a   :  { %8752 = vst [vmem:[#allocation199_spill] sm:$0xff] %v6646_v1 }
 0x33b   :  { %1765 = vmatpush.msra.mxu1 %v6636_v43  ;;  %1822 = vmatpush.msrb.mxu0 %v6642_v60  ;;  %8753 = vst [vmem:[#allocation200_spill] sm:$0xff] %v6649_v18  ;;  %v6664_v60 = vld [vmem:[#allocation3 + $0xa0] sm:$0xff] }
 0x33c   :  { %8754 = vst [vmem:[#allocation201_spill] sm:$0xff] %v6652_v61 }
 0x33d   :  { %1766 = vmatpush.msra.mxu1 %v6646_v1  ;;  %v1337_v49 = vpop.f32.mrf.mxu1  ;;  %1823 = vmatpush.msrb.mxu0 %v6649_v18  ;;  %8755 = vst [vmem:[#allocation202_spill] sm:$0xff] %v6655_v53 }
 0x33e   :  { %v1338_v43 = vadd.f32 %v1337_v49, %v1318_v31  ;;  %8756 = vst [vmem:[#allocation203_spill] sm:$0xff] %v6658_v54  ;;  %v6667_v31 = vld [vmem:[#allocation3 + $0x90] sm:$0xff]  ;;  %v6670_v49 = vld [vmem:[#allocation3 + $0x80] sm:$0xff] }
 0x33f   :  { %1767 = vmatpush.msra.mxu1 %v6652_v61  ;;  %1824 = vmatpush.msrb.mxu0 %v6655_v53  ;;  %8757 = vst [vmem:[#allocation204_spill] sm:$0xff] %v6661_v39  ;;  %v8767_v53 = vld [vmem:[#allocation75_spill] sm:$0xff]  ;;  %v1405_v18 = vpop.f32.mrf.mxu0 }
 0x340   :  { %2765 = vperm.xlu0 %3756, %v1338_v43   ;;  %8758 = vst [vmem:[#allocation205_spill] sm:$0xff] %v6664_v60  ;;  %v6673_v43 = vld [vmem:[#allocation3 + $0x70] sm:$0xff] }
 0x341   :  { %1825 = vmatpush.msrb.mxu0 %v6658_v54  ;;  %8759 = vst [vmem:[#allocation206_spill] sm:$0xff] %v6667_v31  ;;  %v6676_v54 = vld [vmem:[#allocation3 + $0x60] sm:$0xff] }
 0x342   :  { %8760 = vst [vmem:[#allocation207_spill] sm:$0xff] %v6670_v49 }
 0x343   :  { %1826 = vmatpush.msrb.mxu0 %v6661_v39  ;;  %8761 = vst [vmem:[#allocation208_spill] sm:$0xff] %v6673_v43  ;;  %v6679_v39 = vld [vmem:[#allocation3 + $0x50] sm:$0xff] }
 0x344   :  { %8762 = vst [vmem:[#allocation209_spill] sm:$0xff] %v6676_v54 }
 0x345   :  { %1827 = vmatpush.msrb.mxu0 %v6664_v60  ;;  %8763 = vst [vmem:[#allocation210_spill] sm:$0xff] %v6679_v39  ;;  %v6682_v60 = vld [vmem:[#allocation3 + $0x40] sm:$0xff] }
 0x346   :  { %8764 = vst [vmem:[#allocation211_spill] sm:$0xff] %v6682_v60 }
 0x347   :  { %1828 = vmatpush.msrb.mxu0 %v6667_v31  ;;  %v6685_v31 = vld [vmem:[#allocation3 + $0x30] sm:$0xff] }
 0x348   :  { %8765 = vst [vmem:[#allocation212_spill] sm:$0xff] %v6685_v31 }
 0x349   :  { %1829 = vmatpush.msrb.mxu0 %v6670_v49  ;;  %v8766_v49 = vld [vmem:[#allocation74_spill] sm:$0xff] }
 0x34b   :  { %1830 = vmatpush.msrb.mxu0 %v6673_v43  ;;  %v8768_v43 = vld [vmem:[#allocation76_spill] sm:$0xff] }
 0x34d   :  { %1831 = vmatpush.msrb.mxu0 %v6676_v54  ;;  %v1425_v54 = vpop.f32.mrf.mxu1 }
 0x34e   :  { %v1426_v24 = vadd.f32 %v1425_v54, %v1405_v18 }
 0x34f   :  { %1832 = vmatpush.msrb.mxu0 %v6679_v39 }
 0x351   :  { %1833 = vmatpush.msrb.mxu0 %v6682_v60 }
 0x353   :  { %1834 = vmatpush.msrb.mxu0 %v6685_v31 }
 0x355   :  { %1835 = vmatpush.msrb.mxu0 %v8766_v49  ;;  %v6696_v49 = vld [vmem:[#allocation3 + $0x1e0] sm:$0xff] }
 0x357   :  { %1836 = vmatpush.msrb.mxu0 %v8767_v53  ;;  %v1493_v61 = vpop.f32.mrf.mxu0  ;;  %v6692_v53 = vld [vmem:[#allocation3 + $0x1f0] sm:$0xff] }
 0x358   :  { %v1494_v39 = vadd.f32 %v1493_v61, %v1426_v24 }
 0x359   :  { %1837 = vmatpush.msrb.mxu0 %v8768_v43  ;;  %v8774_v43 = vld [vmem:[#allocation108_spill] sm:$0xff] }
 0x35d   :  { %v1513_v1 = vpop.f32.mrf.mxu1 }
 0x35e   :  { %v1514_v5 = vadd.f32 %v1513_v1, %v1494_v39 }
 0x377   :  { %v1581_v27 = vpop.f32.mrf.mxu0 }
 0x37d   :  { %v1601_v16 = vpop.f32.mrf.mxu1 }
 0x37e   :  { %v1602_v60 = vadd.f32 %v1601_v16, %v1581_v27  ;;  %v6700_v16 = vld [vmem:[#allocation3 + $0x1d0] sm:$0xff]  ;;  %v8771_v27 = vld [vmem:[#allocation95_spill] sm:$0xff] }
 0x380   :  { %v1605_v47 = vadd.f32 %v1602_v60, %v1514_v5  ;;  %v6744_v5 = vld [vmem:[#allocation3 + $0x120] sm:$0xff] }
 0x382   :  { %v1607_v12 = vadd.f32 %v1605_v47, %v8769_v34  ;;  %v6708_v47 = vld [vmem:[#allocation3 + $0x1b0] sm:$0xff] }
 0x384   :  { %3775 = vtanh.f32 %v1607_v12  ;;  %v6704_v12 = vld [vmem:[#allocation3 + $0x1c0] sm:$0xff] }
 0x387   :  { %v1627_v61 = vpop.f32.mrf.mxu2 }
 0x38a   :  { %v3776_v31 = vpop.eup %3775 }
 0x38b   :  { %1646 = vmatmul.f32.vlgmr.msra.gmra.mxu3 %v3776_v31  ;;  %1686 = vmatmul.f32.vlgmr.msrb.gmra.mxu1 %v3776_v31 }
 0x38c   :  { %1842 = vmatpush.msrb.mxu1 %v6692_v53  ;;  %1794 = vmatpush.msra.mxu3 %v5765_v13  ;;  %v6712_v13 = vld [vmem:[#allocation3 + $0x1a0] sm:$0xff] }
 0x38e   :  { %1843 = vmatpush.msrb.mxu1 %v6696_v49  ;;  %1795 = vmatpush.msra.mxu3 %v5772_v23  ;;  %v6716_v23 = vld [vmem:[#allocation3 + $0x190] sm:$0xff] }
 0x390   :  { %1844 = vmatpush.msrb.mxu1 %v6700_v16  ;;  %1796 = vmatpush.msra.mxu3 %v5783_v50  ;;  %v6720_v50 = vld [vmem:[#allocation3 + $0x180] sm:$0xff] }
 0x392   :  { %1845 = vmatpush.msrb.mxu1 %v6704_v12  ;;  %1797 = vmatpush.msra.mxu3 %v5796_v14  ;;  %v6724_v14 = vld [vmem:[#allocation3 + $0x170] sm:$0xff] }
 0x394   :  { %1846 = vmatpush.msrb.mxu1 %v6708_v47  ;;  %1798 = vmatpush.msra.mxu3 %v5809_v11  ;;  %v6728_v11 = vld [vmem:[#allocation3 + $0x160] sm:$0xff] }
 0x396   :  { %1847 = vmatpush.msrb.mxu1 %v6712_v13  ;;  %1799 = vmatpush.msra.mxu3 %v5822_v56  ;;  %v6732_v56 = vld [vmem:[#allocation3 + $0x150] sm:$0xff] }
 0x398   :  { %1848 = vmatpush.msrb.mxu1 %v6716_v23  ;;  %1800 = vmatpush.msra.mxu3 %v5835_v62  ;;  %v6736_v62 = vld [vmem:[#allocation3 + $0x140] sm:$0xff] }
 0x39a   :  { %1849 = vmatpush.msrb.mxu1 %v6720_v50  ;;  %1801 = vmatpush.msra.mxu3 %v5848_v35  ;;  %v6740_v35 = vld [vmem:[#allocation3 + $0x130] sm:$0xff] }
 0x39c   :  { %1850 = vmatpush.msrb.mxu1 %v6724_v14  ;;  %1802 = vmatpush.msra.mxu3 %v5864_v58  ;;  %v8770_v58 = vld [vmem:[#allocation106_spill] sm:$0xff] }
 0x39e   :  { %1851 = vmatpush.msrb.mxu1 %v6728_v11  ;;  %1803 = vmatpush.msra.mxu3 %v5880_v8  ;;  %v6748_v8 = vld [vmem:[#allocation3 + $0x110] sm:$0xff] }
 0x3a0   :  { %1852 = vmatpush.msrb.mxu1 %v6732_v56  ;;  %1804 = vmatpush.msra.mxu3 %v5896_v36  ;;  %v6752_v36 = vld [vmem:[#allocation3 + $0x100] sm:$0xff] }
 0x3a2   :  { %1853 = vmatpush.msrb.mxu1 %v6736_v62  ;;  %1805 = vmatpush.msra.mxu3 %v5912_v44  ;;  %v1667_v44 = vpop.f32.mrf.mxu0 }
 0x3a3   :  { %v1668_v18 = vadd.f32 %v1667_v44, %v8771_v27 }
 0x3a4   :  { %1854 = vmatpush.msrb.mxu1 %v6740_v35  ;;  %1806 = vmatpush.msra.mxu3 %v8770_v58  ;;  %v8776_v58 = vld [vmem:[#allocation43_spill] sm:$0xff] }
 0x3a5   :  { %v1818_v44 = vrot.slane %v8776_v58, 2 }
 0x3a6   :  { %1855 = vmatpush.msrb.mxu1 %v6744_v5  ;;  %1807 = vmatpush.msra.mxu3 %v5944_v59  ;;  %v8772_v59 = vld [vmem:[#allocation94_spill] sm:$0xff] }
 0x3a7   :  { %v1628_v1 = vadd.f32 %v1627_v61, %v8772_v59 }
 0x3a8   :  { %1856 = vmatpush.msrb.mxu1 %v6748_v8  ;;  %1808 = vmatpush.msra.mxu3 %v5957_v6  ;;  %v8773_v6 = vld [vmem:[#allocation96_spill] sm:$0xff] }
 0x3aa   :  { %1857 = vmatpush.msrb.mxu1 %v6752_v36  ;;  %1809 = vmatpush.msra.mxu3 %v5971_v29  ;;  %v8775_v29 = vld [vmem:[#allocation97_spill] sm:$0xff] }
 0x408   :  { %v1687_v39 = vpop.f32.mrf.mxu1 }
 0x409   :  { %v1688_v24 = vadd.f32 %v1687_v39, %v1668_v18  ;;  %v8777_v39 = vld [vmem:[#allocation98_spill] sm:$0xff] }
 0x40b   :  { %3777 = vtanh.f32 %v1688_v24  ;;  %v8778_v24 = vld [vmem:[#allocation41_spill] sm:$0xff] }
 0x40c   :  { %v1817_v61 = vrot.slane %v8778_v24, 3 }
 0x40e   :  { %v1647_v60 = vpop.f32.mrf.mxu3 }
 0x40f   :  { %v1648_v54 = vadd.f32 %v1647_v60, %v1628_v1  ;;  %v6769_v1 = vld [vmem:[%s8507_s28 + $0xf0] sm:$0xff]  ;;  %v8779_v60 = vld [vmem:[#allocation99_spill] sm:$0xff] }
 0x411   :  { %v3778_v31 = vpop.eup %3777  ;;  %3779 = vtanh.f32 %v1648_v54  ;;  %v8780_v54 = vld [vmem:[#allocation107_spill] sm:$0xff] }
 0x412   :  { %1728 = vmatmul.f32.vlgmr.msrb.gmra.mxu3 %v3778_v31  ;;  %1768 = vmatmul.f32.vlgmr.msra.gmra.mxu1 %v3778_v31  ;;  %v8781_v31 = vld [vmem:[#allocation100_spill] sm:$0xff] }
 0x413   :  { %1930 = vmatpush.msra.mxu1 %v8773_v6  ;;  %1882 = vmatpush.msrb.mxu3 %v8774_v43  ;;  %v8782_v6 = vld [vmem:[#allocation42_spill] sm:$0xff] }
 0x414   :  { %v1815_v43 = vrot.slane %v8782_v6, 2 }
 0x415   :  { %1931 = vmatpush.msra.mxu1 %v8775_v29  ;;  %1883 = vmatpush.msrb.mxu3 %v5990_v9  ;;  %v6774_v9 = vsel %vm614_vm1, %v1818_v44, %v1817_v61  ;;  %v6791_v29 = vld [vmem:[%s8507_s28 + $0xd0] sm:$0xff]  ;;  %v6797_v44 = vld [vmem:[%s8507_s28 + $0x1a0] sm:$0xff] }
 0x416   :  { %8783 = vst [vmem:[#allocation74_spill] sm:$0xff] %v6797_v44 }
 0x417   :  { %v3780_v18 = vpop.eup %3779  ;;  %1932 = vmatpush.msra.mxu1 %v8777_v39  ;;  %1884 = vmatpush.msrb.mxu3 %v5998_v30  ;;  %v6781_v30 = vld [vmem:[%s8507_s28 + $0xe0] sm:$0xff] }
 0x418   :  { %1708 = vmatmul.f32.vlgmr.msrb.gmra.mxu2 %v3780_v18  ;;  %1748 = vmatmul.f32.vlgmr.msra.gmra.mxu0 %v3780_v18  ;;  %v8784_v18 = vld [vmem:[#allocation40_spill] sm:$0xff] }
 0x419   :  { %1910 = vmatpush.msra.mxu0 %v6769_v1  ;;  %1933 = vmatpush.msra.mxu1 %v8779_v60  ;;  %v1814_v39 = vrot.slane %v8784_v18, 3  ;;  %v8787_v60 = vld [vmem:[#allocation112_spill] sm:$0xff] }
 0x41a   :  { %1858 = vmatmul.f32.vlgmr.msrb.gmra.mxu1 %v6774_v9  ;;  %1862 = vmatpush.msrb.mxu2 %v8780_v54  ;;  %v6843_v54 = vld [vmem:[%s8507_s28 + $0x170] sm:$0xff] }
 0x41b   :  { %1911 = vmatpush.msra.mxu0 %v6781_v30  ;;  %1934 = vmatpush.msra.mxu1 %v8781_v31  ;;  %v6816_v61 = vsel %vm614_vm1, %v1815_v43, %v1814_v39  ;;  %8789 = vst [vmem:[#allocation106_spill] sm:$0xff] %v6843_v54  ;;  %v8790_v31 = vld [vmem:[#allocation109_spill] sm:$0xff]  ;;  %v8791_v43 = vld [vmem:[#allocation52_spill] sm:$0xff]  ;;  %v6857_v39 = vld [vmem:[%s8507_s28 + $0x160] sm:$0xff] }
 0x41c   :  { %1885 = vmatpush.msrb.mxu3 %v6006_v25  ;;  %1863 = vmatpush.msrb.mxu2 %v5986_v20  ;;  %v6806_v20 = vld [vmem:[%s8507_s28 + $0xc0] sm:$0xff]  ;;  %v6812_v25 = vld [vmem:[%s8507_s28 + $0x190] sm:$0xff]  ;;  %8793 = vst [vmem:[#allocation94_spill] sm:$0xff] %v6857_v39 }
 0x41d   :  { %1912 = vmatpush.msra.mxu0 %v6791_v29  ;;  %1935 = vmatpush.msra.mxu1 %v6797_v44  ;;  %8785 = vst [vmem:[#allocation75_spill] sm:$0xff] %v6812_v25  ;;  %v8806_v44 = vld [vmem:[#allocation51_spill] sm:$0xff] }
 0x41e   :  { %1886 = vmatpush.msrb.mxu3 %v6014_v38  ;;  %1864 = vmatpush.msrb.mxu2 %v5994_v2  ;;  %v6823_v2 = vld [vmem:[%s8507_s28 + $0xb0] sm:$0xff]  ;;  %v6829_v38 = vld [vmem:[%s8507_s28 + $0x180] sm:$0xff] }
 0x41f   :  { %1913 = vmatpush.msra.mxu0 %v6806_v20  ;;  %1936 = vmatpush.msra.mxu1 %v6812_v25  ;;  %8786 = vst [vmem:[#allocation76_spill] sm:$0xff] %v6829_v38  ;;  %v8802_v25 = vld [vmem:[#allocation50_spill] sm:$0xff] }
 0x420   :  { %1838 = vmatmul.f32.vlgmr.msrb.gmra.mxu0 %v6816_v61  ;;  %1887 = vmatpush.msrb.mxu3 %v6022_v41  ;;  %v6837_v41 = vld [vmem:[%s8507_s28 + $0xa0] sm:$0xff] }
 0x421   :  { %1914 = vmatpush.msra.mxu0 %v6823_v2  ;;  %1937 = vmatpush.msra.mxu1 %v6829_v38  ;;  %8788 = vst [vmem:[#allocation73_spill] sm:$0xff] %v6837_v41  ;;  %v8798_v38 = vld [vmem:[#allocation111_spill] sm:$0xff] }
 0x422   :  { %1865 = vmatpush.msrb.mxu2 %v6002_v33  ;;  %1888 = vmatpush.msrb.mxu3 %v8787_v60  ;;  %v6851_v33 = vld [vmem:[%s8507_s28 + $0x90] sm:$0xff]  ;;  %v8794_v60 = vld [vmem:[#allocation110_spill] sm:$0xff] }
 0x423   :  { %1915 = vmatpush.msra.mxu0 %v6837_v41  ;;  %1938 = vmatpush.msra.mxu1 %v6843_v54  ;;  %8792 = vst [vmem:[#allocation95_spill] sm:$0xff] %v6851_v33  ;;  %v8795_v54 = vld [vmem:[#allocation54_spill] sm:$0xff] }
 0x424   :  { %1866 = vmatpush.msrb.mxu2 %v8790_v31  ;;  %1889 = vmatpush.msrb.mxu3 %v8791_v43  ;;  %v6865_v31 = vld [vmem:[%s8507_s28 + $0x80] sm:$0xff]  ;;  %v6871_v43 = vld [vmem:[%s8507_s28 + $0x150] sm:$0xff] }
 0x425   :  { %1916 = vmatpush.msra.mxu0 %v6851_v33  ;;  %1939 = vmatpush.msra.mxu1 %v6857_v39  ;;  %8796 = vst [vmem:[#allocation96_spill] sm:$0xff] %v6865_v31  ;;  %v8799_v39 = vld [vmem:[#allocation56_spill] sm:$0xff] }
 0x426   :  { %1867 = vmatpush.msrb.mxu2 %v8794_v60  ;;  %1890 = vmatpush.msrb.mxu3 %v8795_v54  ;;  %8797 = vst [vmem:[#allocation108_spill] sm:$0xff] %v6871_v43  ;;  %v6879_v54 = vld [vmem:[%s8507_s28 + $0x70] sm:$0xff]  ;;  %v6885_v60 = vld [vmem:[%s8507_s28 + $0x140] sm:$0xff] }
 0x427   :  { %1917 = vmatpush.msra.mxu0 %v6865_v31  ;;  %1940 = vmatpush.msra.mxu1 %v6871_v43  ;;  %8800 = vst [vmem:[#allocation97_spill] sm:$0xff] %v6879_v54  ;;  %v8803_v43 = vld [vmem:[#allocation58_spill] sm:$0xff]  ;;  %v8816_v31 = vld [vmem:[#allocation55_spill] sm:$0xff] }
 0x428   :  { %1868 = vmatpush.msrb.mxu2 %v8798_v38  ;;  %1891 = vmatpush.msrb.mxu3 %v8799_v39  ;;  %8801 = vst [vmem:[#allocation98_spill] sm:$0xff] %v6885_v60  ;;  %v6893_v38 = vld [vmem:[%s8507_s28 + $0x60] sm:$0xff]  ;;  %v6899_v39 = vld [vmem:[%s8507_s28 + $0x130] sm:$0xff] }
 0x429   :  { %1918 = vmatpush.msra.mxu0 %v6879_v54  ;;  %1941 = vmatpush.msra.mxu1 %v6885_v60  ;;  %8804 = vst [vmem:[#allocation99_spill] sm:$0xff] %v6893_v38  ;;  %v8807_v60 = vld [vmem:[#allocation60_spill] sm:$0xff]  ;;  %v8811_v54 = vld [vmem:[#allocation53_spill] sm:$0xff] }
 0x42a   :  { %1869 = vmatpush.msrb.mxu2 %v8802_v25  ;;  %1892 = vmatpush.msrb.mxu3 %v8803_v43  ;;  %8805 = vst [vmem:[#allocation107_spill] sm:$0xff] %v6899_v39  ;;  %v6907_v25 = vld [vmem:[%s8507_s28 + $0x50] sm:$0xff]  ;;  %v6913_v43 = vld [vmem:[%s8507_s28 + $0x120] sm:$0xff] }
 0x42b   :  { %1919 = vmatpush.msra.mxu0 %v6893_v38  ;;  %1942 = vmatpush.msra.mxu1 %v6899_v39  ;;  %8808 = vst [vmem:[#allocation100_spill] sm:$0xff] %v6907_v25  ;;  %v8810_v38 = vld [vmem:[#allocation39_spill] sm:$0xff] }
 0x42c   :  { %1870 = vmatpush.msrb.mxu2 %v8806_v44  ;;  %1893 = vmatpush.msrb.mxu3 %v8807_v60  ;;  %8809 = vst [vmem:[#allocation42_spill] sm:$0xff] %v6913_v43  ;;  %v1906_v39 = vrot.slane %v8810_v38, 2  ;;  %v8812_v44 = vld [vmem:[#allocation62_spill] sm:$0xff] }
 0x42d   :  { %1920 = vmatpush.msra.mxu0 %v6907_v25  ;;  %1943 = vmatpush.msra.mxu1 %v6913_v43  ;;  %v6922_v60 = vld [vmem:[%s8507_s28 + $0x40] sm:$0xff]  ;;  %v6928_v25 = vld [vmem:[%s8507_s28 + $0x110] sm:$0xff] }
 0x42e   :  { %1871 = vmatpush.msrb.mxu2 %v8811_v54  ;;  %1894 = vmatpush.msrb.mxu3 %v8812_v44  ;;  %8813 = vst [vmem:[#allocation40_spill] sm:$0xff] %v6922_v60  ;;  %v8815_v43 = vld [vmem:[#allocation37_spill] sm:$0xff]  ;;  %v8817_v54 = vld [vmem:[#allocation64_spill] sm:$0xff] }
 0x42f   :  { %1921 = vmatpush.msra.mxu0 %v6922_v60  ;;  %8814 = vst [vmem:[#allocation112_spill] sm:$0xff] %v6928_v25  ;;  %1944 = vmatpush.msra.mxu1 %v6928_v25  ;;  %v1905_v38 = vrot.slane %v8815_v43, 3  ;;  %v6937_v44 = vld [vmem:[%s8507_s28 + $0x30] sm:$0xff]  ;;  %v6943_v60 = vld [vmem:[%s8507_s28 + $0x100] sm:$0xff] }
 0x430   :  { %1872 = vmatpush.msrb.mxu2 %v8816_v31  ;;  %1895 = vmatpush.msrb.mxu3 %v8817_v54  ;;  %8818 = vst [vmem:[#allocation109_spill] sm:$0xff] %v6937_v44  ;;  %v8820_v31 = vld [vmem:[#allocation57_spill] sm:$0xff]  ;;  %v6957_v25 = vld [vmem:[%s8507_s28 + $0x20] sm:$0xff] }
 0x431   :  { %1922 = vmatpush.msra.mxu0 %v6937_v44  ;;  %8819 = vst [vmem:[#allocation52_spill] sm:$0xff] %v6943_v60  ;;  %1945 = vmatpush.msra.mxu1 %v6943_v60  ;;  %v6947_v43 = vsel %vm614_vm1, %v1906_v39, %v1905_v38  ;;  %v6951_v54 = vld [vmem:[#allocation6 + $0x1f0] sm:$0xff]  ;;  %v8823_v44 = vld [vmem:[#allocation38_spill] sm:$0xff]  ;;  %v8824_v38 = vld [vmem:[#allocation59_spill] sm:$0xff] }
 0x432   :  { %1946 = vmatmul.f32.vlgmr.msra.gmra.mxu1 %v6947_v43  ;;  %1873 = vmatpush.msrb.mxu2 %v8820_v31  ;;  %8821 = vst [vmem:[#allocation110_spill] sm:$0xff] %v6951_v54  ;;  %v1903_v60 = vrot.slane %v8823_v44, 2  ;;  %v6963_v39 = vld [vmem:[#allocation6 + $0x1e0] sm:$0xff]  ;;  %v6969_v31 = vld [vmem:[%s8507_s28 + $0x10] sm:$0xff] }
 0x433   :  { %2018 = vmatpush.msrb.mxu1 %v6951_v54  ;;  %8822 = vst [vmem:[#allocation54_spill] sm:$0xff] %v6957_v25  ;;  %1923 = vmatpush.msra.mxu0 %v6957_v25  ;;  %v8827_v54 = vld [vmem:[#allocation36_spill] sm:$0xff]  ;;  %v8828_v44 = vld [vmem:[#allocation61_spill] sm:$0xff] }
 0x434   :  { %1896 = vmatpush.msrb.mxu3 %v6094_v48  ;;  %1874 = vmatpush.msrb.mxu2 %v8824_v38  ;;  %8825 = vst [vmem:[#allocation111_spill] sm:$0xff] %v6963_v39  ;;  %v1902_v33 = vrot.slane %v8827_v54, 3  ;;  %v6975_v48 = vld [vmem:[#allocation6 + $0x1d0] sm:$0xff]  ;;  %v6981_v38 = vld [vmem:[%s8507_s28] sm:$0xff] }
 0x435   :  { %2019 = vmatpush.msrb.mxu1 %v6963_v39  ;;  %8826 = vst [vmem:[#allocation56_spill] sm:$0xff] %v6969_v31  ;;  %1924 = vmatpush.msra.mxu0 %v6969_v31  ;;  %v6996_v54 = vld [vmem:[#allocation6 + $0xe0] sm:$0xff] }
 0x436   :  { %1897 = vmatpush.msrb.mxu3 %v6102_v26  ;;  %1875 = vmatpush.msrb.mxu2 %v8828_v44  ;;  %8829 = vst [vmem:[#allocation50_spill] sm:$0xff] %v6975_v48  ;;  %v6985_v39 = vsel %vm614_vm1, %v1903_v60, %v1902_v33  ;;  %v6989_v26 = vld [vmem:[#allocation6 + $0xf0] sm:$0xff]  ;;  %v6992_v44 = vld [vmem:[#allocation6 + $0x1c0] sm:$0xff] }
 0x437   :  { %2020 = vmatpush.msrb.mxu1 %v6975_v48  ;;  %8830 = vst [vmem:[#allocation58_spill] sm:$0xff] %v6981_v38  ;;  %1925 = vmatpush.msra.mxu0 %v6981_v38  ;;  %v8833_v48 = vld [vmem:[#allocation63_spill] sm:$0xff]  ;;  %v6999_v33 = vld [vmem:[#allocation6 + $0x1b0] sm:$0xff] }
 0x438   :  { %1926 = vmatmul.f32.vlgmr.msra.gmra.mxu0 %v6985_v39  ;;  %1876 = vmatpush.msrb.mxu2 %v6090_v51  ;;  %8831 = vst [vmem:[#allocation51_spill] sm:$0xff] %v6989_v26  ;;  %v7002_v60 = vld [vmem:[#allocation6 + $0xd0] sm:$0xff]  ;;  %v7005_v51 = vld [vmem:[#allocation6 + $0x1a0] sm:$0xff] }
 0x439   :  { %1998 = vmatpush.msrb.mxu0 %v6989_v26  ;;  %8832 = vst [vmem:[#allocation60_spill] sm:$0xff] %v6992_v44  ;;  %2021 = vmatpush.msrb.mxu1 %v6992_v44  ;;  %v7008_v26 = vld [vmem:[#allocation6 + $0xc0] sm:$0xff]  ;;  %v7014_v44 = vld [vmem:[#allocation6 + $0xb0] sm:$0xff] }
 0x43a   :  { %1877 = vmatpush.msrb.mxu2 %v8833_v48  ;;  %8834 = vst [vmem:[#allocation53_spill] sm:$0xff] %v6996_v54  ;;  %v7011_v48 = vld [vmem:[#allocation6 + $0x190] sm:$0xff]  ;;  %v7026_v38 = vld [vmem:[#allocation6 + $0x80] sm:$0xff] }
 0x43b   :  { %1999 = vmatpush.msrb.mxu0 %v6996_v54  ;;  %8835 = vst [vmem:[#allocation62_spill] sm:$0xff] %v6999_v33  ;;  %2022 = vmatpush.msrb.mxu1 %v6999_v33  ;;  %v8841_v33 = vld [vmem:[#allocation101_spill] sm:$0xff]  ;;  %v7018_v54 = vld [vmem:[#allocation6 + $0xa0] sm:$0xff] }
 0x43c   :  { %8836 = vst [vmem:[#allocation55_spill] sm:$0xff] %v7002_v60 }
 0x43d   :  { %2000 = vmatpush.msrb.mxu0 %v7002_v60  ;;  %8837 = vst [vmem:[#allocation64_spill] sm:$0xff] %v7005_v51  ;;  %2023 = vmatpush.msrb.mxu1 %v7005_v51  ;;  %v8843_v60 = vld [vmem:[#allocation102_spill] sm:$0xff]  ;;  %v7022_v51 = vld [vmem:[#allocation6 + $0x90] sm:$0xff] }
 0x43e   :  { %8838 = vst [vmem:[#allocation57_spill] sm:$0xff] %v7008_v26 }
 0x43f   :  { %2001 = vmatpush.msrb.mxu0 %v7008_v26  ;;  %8839 = vst [vmem:[#allocation59_spill] sm:$0xff] %v7011_v48  ;;  %2024 = vmatpush.msrb.mxu1 %v7011_v48  ;;  %v8845_v26 = vld [vmem:[#allocation103_spill] sm:$0xff]  ;;  %v8847_v48 = vld [vmem:[#allocation104_spill] sm:$0xff] }
 0x440   :  { %8840 = vst [vmem:[#allocation61_spill] sm:$0xff] %v7014_v44 }
 0x441   :  { %2002 = vmatpush.msrb.mxu0 %v7014_v44  ;;  %2025 = vmatpush.msrb.mxu1 %v8841_v33  ;;  %8842 = vst [vmem:[#allocation63_spill] sm:$0xff] %v7018_v54  ;;  %v7030_v44 = vld [vmem:[#allocation6 + $0x70] sm:$0xff] }
 0x442   :  { %8844 = vst [vmem:[#allocation101_spill] sm:$0xff] %v7022_v51  ;;  %v8849_v33 = vld [vmem:[#allocation105_spill] sm:$0xff] }
 0x443   :  { %2003 = vmatpush.msrb.mxu0 %v7018_v54  ;;  %2026 = vmatpush.msrb.mxu1 %v8843_v60  ;;  %8846 = vst [vmem:[#allocation102_spill] sm:$0xff] %v7026_v38  ;;  %v7034_v54 = vld [vmem:[#allocation6 + $0x60] sm:$0xff]  ;;  %v7037_v60 = vld [vmem:[#allocation6 + $0x130] sm:$0xff] }
 0x444   :  { %8848 = vst [vmem:[#allocation103_spill] sm:$0xff] %v7030_v44 }
 0x445   :  { %2004 = vmatpush.msrb.mxu0 %v7022_v51  ;;  %2027 = vmatpush.msrb.mxu1 %v8845_v26  ;;  %8850 = vst [vmem:[#allocation104_spill] sm:$0xff] %v7034_v54  ;;  %v7040_v26 = vld [vmem:[#allocation6 + $0x50] sm:$0xff] }
 0x446   :  { %8851 = vst [vmem:[#allocation105_spill] sm:$0xff] %v7037_v60  ;;  %v7078_v51 = vld [vmem:[#allocation8 + $0xf0] sm:$0xff] }
 0x447   :  { %2005 = vmatpush.msrb.mxu0 %v7026_v38  ;;  %2028 = vmatpush.msrb.mxu1 %v8847_v48  ;;  %8852 = vst [vmem:[#allocation213_spill] sm:$0xff] %v7040_v26  ;;  %v7043_v38 = vld [vmem:[#allocation6 + $0x120] sm:$0xff] }
 0x448   :  { %8853 = vst [vmem:[#allocation214_spill] sm:$0xff] %v7043_v38  ;;  %v7046_v48 = vld [vmem:[#allocation6 + $0x40] sm:$0xff] }
 0x449   :  { %2006 = vmatpush.msrb.mxu0 %v7030_v44  ;;  %2029 = vmatpush.msrb.mxu1 %v8849_v33  ;;  %8854 = vst [vmem:[#allocation215_spill] sm:$0xff] %v7046_v48  ;;  %v7049_v33 = vld [vmem:[#allocation6 + $0x110] sm:$0xff]  ;;  %v7059_v44 = vld [vmem:[#allocation6 + $0x20] sm:$0xff] }
 0x44a   :  { %8855 = vst [vmem:[#allocation216_spill] sm:$0xff] %v7049_v33 }
 0x44b   :  { %2007 = vmatpush.msrb.mxu0 %v7034_v54  ;;  %2030 = vmatpush.msrb.mxu1 %v7037_v60  ;;  %v7052_v54 = vld [vmem:[#allocation6 + $0x30] sm:$0xff]  ;;  %v7055_v60 = vld [vmem:[#allocation6 + $0x100] sm:$0xff] }
 0x44c   :  { %8856 = vst [vmem:[#allocation217_spill] sm:$0xff] %v7052_v54 }
 0x44d   :  { %2008 = vmatpush.msrb.mxu0 %v7040_v26  ;;  %2031 = vmatpush.msrb.mxu1 %v7043_v38  ;;  %8857 = vst [vmem:[#allocation218_spill] sm:$0xff] %v7055_v60  ;;  %v8858_v26 = vld [vmem:[#allocation44_spill] sm:$0xff] }
 0x44e   :  { %8859 = vst [vmem:[#allocation44_spill] sm:$0xff] %v7059_v44  ;;  %v7062_v38 = vld [vmem:[#allocation8 + $0x1f0] sm:$0xff] }
 0x44f   :  { %2009 = vmatpush.msrb.mxu0 %v7046_v48  ;;  %2032 = vmatpush.msrb.mxu1 %v7049_v33  ;;  %8860 = vst [vmem:[#allocation219_spill] sm:$0xff] %v7062_v38  ;;  %v7065_v48 = vld [vmem:[#allocation6 + $0x10] sm:$0xff]  ;;  %v7068_v33 = vld [vmem:[#allocation8 + $0x1e0] sm:$0xff] }
 0x450   :  { %8861 = vst [vmem:[#allocation220_spill] sm:$0xff] %v7065_v48 }
 0x451   :  { %2010 = vmatpush.msrb.mxu0 %v7052_v54  ;;  %2033 = vmatpush.msrb.mxu1 %v7055_v60  ;;  %8862 = vst [vmem:[#allocation221_spill] sm:$0xff] %v7068_v33  ;;  %v7071_v54 = vld [vmem:[#allocation6] sm:$0xff]  ;;  %v7074_v60 = vld [vmem:[#allocation8 + $0x1d0] sm:$0xff] }
 0x452   :  { %2034 = vmatmul.f32.vlgmr.msrb.gmra.mxu1 %v8858_v26  ;;  %8863 = vst [vmem:[#allocation222_spill] sm:$0xff] %v7071_v54 }
 0x453   :  { %2011 = vmatpush.msrb.mxu0 %v7059_v44  ;;  %2104 = vmatpush.msra.mxu1 %v7062_v38  ;;  %8864 = vst [vmem:[#allocation223_spill] sm:$0xff] %v7074_v60  ;;  %v8865_v44 = vld [vmem:[#allocation45_spill] sm:$0xff]  ;;  %v7081_v38 = vld [vmem:[#allocation8 + $0x1c0] sm:$0xff] }
 0x454   :  { %8866 = vst [vmem:[#allocation45_spill] sm:$0xff] %v7078_v51 }
 0x455   :  { %2012 = vmatpush.msrb.mxu0 %v7065_v48  ;;  %2105 = vmatpush.msra.mxu1 %v7068_v33  ;;  %8867 = vst [vmem:[#allocation224_spill] sm:$0xff] %v7081_v38  ;;  %v7084_v48 = vld [vmem:[#allocation8 + $0xe0] sm:$0xff]  ;;  %v7087_v33 = vld [vmem:[#allocation8 + $0x1b0] sm:$0xff] }
 0x456   :  { %8868 = vst [vmem:[#allocation225_spill] sm:$0xff] %v7084_v48 }
 0x457   :  { %2013 = vmatpush.msrb.mxu0 %v7071_v54  ;;  %2106 = vmatpush.msra.mxu1 %v7074_v60  ;;  %8869 = vst [vmem:[#allocation226_spill] sm:$0xff] %v7087_v33  ;;  %v7090_v54 = vld [vmem:[#allocation8 + $0xd0] sm:$0xff]  ;;  %v7093_v60 = vld [vmem:[#allocation8 + $0x1a0] sm:$0xff] }
 0x458   :  { %2014 = vmatmul.f32.vlgmr.msrb.gmra.mxu0 %v8865_v44  ;;  %8870 = vst [vmem:[#allocation227_spill] sm:$0xff] %v7090_v54 }
 0x459   :  { %2084 = vmatpush.msra.mxu0 %v7078_v51  ;;  %2107 = vmatpush.msra.mxu1 %v7081_v38  ;;  %8871 = vst [vmem:[#allocation228_spill] sm:$0xff] %v7093_v60  ;;  %v7096_v51 = vld [vmem:[#allocation8 + $0xc0] sm:$0xff]  ;;  %v7099_v38 = vld [vmem:[#allocation8 + $0x190] sm:$0xff] }
 0x45a   :  { %8872 = vst [vmem:[#allocation229_spill] sm:$0xff] %v7096_v51 }
 0x45b   :  { %2085 = vmatpush.msra.mxu0 %v7084_v48  ;;  %2108 = vmatpush.msra.mxu1 %v7087_v33  ;;  %8873 = vst [vmem:[#allocation230_spill] sm:$0xff] %v7099_v38  ;;  %v7102_v48 = vld [vmem:[#allocation8 + $0xb0] sm:$0xff]  ;;  %v7105_v33 = vld [vmem:[#allocation8 + $0x180] sm:$0xff] }
 0x45c   :  { %8874 = vst [vmem:[#allocation231_spill] sm:$0xff] %v7102_v48 }
 0x45d   :  { %2086 = vmatpush.msra.mxu0 %v7090_v54  ;;  %2109 = vmatpush.msra.mxu1 %v7093_v60  ;;  %8875 = vst [vmem:[#allocation232_spill] sm:$0xff] %v7105_v33  ;;  %v7108_v54 = vld [vmem:[#allocation8 + $0xa0] sm:$0xff]  ;;  %v7111_v60 = vld [vmem:[#allocation8 + $0x170] sm:$0xff] }
 0x45e   :  { %8876 = vst [vmem:[#allocation233_spill] sm:$0xff] %v7108_v54 }
 0x45f   :  { %2087 = vmatpush.msra.mxu0 %v7096_v51  ;;  %2110 = vmatpush.msra.mxu1 %v7099_v38  ;;  %8877 = vst [vmem:[#allocation234_spill] sm:$0xff] %v7111_v60  ;;  %v7114_v51 = vld [vmem:[#allocation8 + $0x90] sm:$0xff]  ;;  %v7117_v38 = vld [vmem:[#allocation8 + $0x160] sm:$0xff] }
 0x460   :  { %8878 = vst [vmem:[#allocation235_spill] sm:$0xff] %v7114_v51 }
 0x461   :  { %2088 = vmatpush.msra.mxu0 %v7102_v48  ;;  %2111 = vmatpush.msra.mxu1 %v7105_v33  ;;  %8879 = vst [vmem:[#allocation236_spill] sm:$0xff] %v7117_v38  ;;  %v7120_v48 = vld [vmem:[#allocation8 + $0x80] sm:$0xff]  ;;  %v7123_v33 = vld [vmem:[#allocation8 + $0x150] sm:$0xff] }
 0x462   :  { %8880 = vst [vmem:[#allocation237_spill] sm:$0xff] %v7120_v48 }
 0x463   :  { %2089 = vmatpush.msra.mxu0 %v7108_v54  ;;  %2112 = vmatpush.msra.mxu1 %v7111_v60  ;;  %8881 = vst [vmem:[#allocation238_spill] sm:$0xff] %v7123_v33  ;;  %v7126_v54 = vld [vmem:[#allocation8 + $0x70] sm:$0xff]  ;;  %v7129_v60 = vld [vmem:[#allocation8 + $0x140] sm:$0xff] }
 0x464   :  { %8882 = vst [vmem:[#allocation239_spill] sm:$0xff] %v7126_v54 }
 0x465   :  { %2090 = vmatpush.msra.mxu0 %v7114_v51  ;;  %2113 = vmatpush.msra.mxu1 %v7117_v38  ;;  %8883 = vst [vmem:[#allocation240_spill] sm:$0xff] %v7129_v60  ;;  %v7132_v51 = vld [vmem:[#allocation8 + $0x60] sm:$0xff]  ;;  %v7135_v38 = vld [vmem:[#allocation8 + $0x130] sm:$0xff] }
 0x466   :  { %8884 = vst [vmem:[#allocation241_spill] sm:$0xff] %v7132_v51 }
 0x467   :  { %2091 = vmatpush.msra.mxu0 %v7120_v48  ;;  %2114 = vmatpush.msra.mxu1 %v7123_v33  ;;  %8885 = vst [vmem:[#allocation242_spill] sm:$0xff] %v7135_v38  ;;  %v7138_v48 = vld [vmem:[#allocation8 + $0x50] sm:$0xff]  ;;  %v7141_v33 = vld [vmem:[#allocation8 + $0x120] sm:$0xff] }
 0x468   :  { %8886 = vst [vmem:[#allocation243_spill] sm:$0xff] %v7138_v48 }
 0x469   :  { %2092 = vmatpush.msra.mxu0 %v7126_v54  ;;  %2115 = vmatpush.msra.mxu1 %v7129_v60  ;;  %8887 = vst [vmem:[#allocation244_spill] sm:$0xff] %v7141_v33  ;;  %v7144_v54 = vld [vmem:[#allocation8 + $0x40] sm:$0xff]  ;;  %v7147_v60 = vld [vmem:[#allocation8 + $0x110] sm:$0xff] }
 0x46a   :  { %8888 = vst [vmem:[#allocation245_spill] sm:$0xff] %v7144_v54 }
 0x46b   :  { %2093 = vmatpush.msra.mxu0 %v7132_v51  ;;  %2116 = vmatpush.msra.mxu1 %v7135_v38  ;;  %8889 = vst [vmem:[#allocation246_spill] sm:$0xff] %v7147_v60  ;;  %v7150_v51 = vld [vmem:[#allocation8 + $0x30] sm:$0xff]  ;;  %v7153_v38 = vld [vmem:[#allocation8 + $0x100] sm:$0xff] }
 0x46c   :  { %8890 = vst [vmem:[#allocation247_spill] sm:$0xff] %v7150_v51 }
 0x46d   :  { %2094 = vmatpush.msra.mxu0 %v7138_v48  ;;  %2117 = vmatpush.msra.mxu1 %v7141_v33  ;;  %8891 = vst [vmem:[#allocation248_spill] sm:$0xff] %v7153_v38  ;;  %v7156_v48 = vld [vmem:[#allocation11 + $0x1f0] sm:$0xff]  ;;  %v7159_v33 = vld [vmem:[#allocation8 + $0x20] sm:$0xff] }
 0x46e   :  { %8892 = vst [vmem:[#allocation249_spill] sm:$0xff] %v7156_v48 }
 0x46f   :  { %2095 = vmatpush.msra.mxu0 %v7144_v54  ;;  %2118 = vmatpush.msra.mxu1 %v7147_v60  ;;  %8893 = vst [vmem:[#allocation250_spill] sm:$0xff] %v7159_v33  ;;  %v7162_v54 = vld [vmem:[#allocation11 + $0x1e0] sm:$0xff]  ;;  %v7165_v60 = vld [vmem:[#allocation8 + $0x10] sm:$0xff] }
 0x470   :  { %8894 = vst [vmem:[#allocation251_spill] sm:$0xff] %v7162_v54 }
 0x471   :  { %2096 = vmatpush.msra.mxu0 %v7150_v51  ;;  %2119 = vmatpush.msra.mxu1 %v7153_v38  ;;  %8895 = vst [vmem:[#allocation252_spill] sm:$0xff] %v7165_v60  ;;  %v7168_v51 = vld [vmem:[#allocation11 + $0x1d0] sm:$0xff]  ;;  %v7171_v38 = vld [vmem:[#allocation8] sm:$0xff] }
 0x472   :  { %8896 = vst [vmem:[#allocation253_spill] sm:$0xff] %v7168_v51 }
 0x473   :  { %2186 = vmatpush.msrb.mxu1 %v7156_v48  ;;  %2097 = vmatpush.msra.mxu0 %v7159_v33  ;;  %8897 = vst [vmem:[#allocation254_spill] sm:$0xff] %v7171_v38  ;;  %v7174_v48 = vld [vmem:[#allocation11 + $0xf0] sm:$0xff]  ;;  %v7177_v33 = vld [vmem:[#allocation11 + $0x1c0] sm:$0xff] }
 0x474   :  { %8898 = vst [vmem:[#allocation255_spill] sm:$0xff] %v7174_v48 }
 0x475   :  { %2187 = vmatpush.msrb.mxu1 %v7162_v54  ;;  %2098 = vmatpush.msra.mxu0 %v7165_v60  ;;  %8899 = vst [vmem:[#allocation256_spill] sm:$0xff] %v7177_v33  ;;  %v7180_v54 = vld [vmem:[#allocation11 + $0xe0] sm:$0xff]  ;;  %v7183_v60 = vld [vmem:[#allocation11 + $0x1b0] sm:$0xff] }
 0x476   :  { %8900 = vst [vmem:[#allocation257_spill] sm:$0xff] %v7180_v54 }
 0x477   :  { %2188 = vmatpush.msrb.mxu1 %v7168_v51  ;;  %2099 = vmatpush.msra.mxu0 %v7171_v38  ;;  %8901 = vst [vmem:[#allocation258_spill] sm:$0xff] %v7183_v60  ;;  %v7186_v51 = vld [vmem:[#allocation11 + $0xd0] sm:$0xff]  ;;  %v7189_v38 = vld [vmem:[#allocation11 + $0x1a0] sm:$0xff] }
 0x478   :  { %8902 = vst [vmem:[#allocation259_spill] sm:$0xff] %v7186_v51 }
 0x479   :  { %2166 = vmatpush.msrb.mxu0 %v7174_v48  ;;  %2189 = vmatpush.msrb.mxu1 %v7177_v33  ;;  %8903 = vst [vmem:[#allocation260_spill] sm:$0xff] %v7189_v38  ;;  %v7192_v48 = vld [vmem:[#allocation11 + $0xc0] sm:$0xff]  ;;  %v7195_v33 = vld [vmem:[#allocation11 + $0x190] sm:$0xff] }
 0x47a   :  { %8904 = vst [vmem:[#allocation261_spill] sm:$0xff] %v7192_v48 }
 0x47b   :  { %2167 = vmatpush.msrb.mxu0 %v7180_v54  ;;  %2190 = vmatpush.msrb.mxu1 %v7183_v60  ;;  %8905 = vst [vmem:[#allocation262_spill] sm:$0xff] %v7195_v33  ;;  %v7198_v54 = vld [vmem:[#allocation11 + $0xb0] sm:$0xff]  ;;  %v7201_v60 = vld [vmem:[#allocation11 + $0x180] sm:$0xff] }
 0x47c   :  { %8906 = vst [vmem:[#allocation263_spill] sm:$0xff] %v7198_v54 }
 0x47d   :  { %2168 = vmatpush.msrb.mxu0 %v7186_v51  ;;  %2191 = vmatpush.msrb.mxu1 %v7189_v38  ;;  %8907 = vst [vmem:[#allocation264_spill] sm:$0xff] %v7201_v60  ;;  %v7204_v51 = vld [vmem:[#allocation11 + $0xa0] sm:$0xff]  ;;  %v7207_v38 = vld [vmem:[#allocation11 + $0x170] sm:$0xff] }
 0x47e   :  { %8908 = vst [vmem:[#allocation265_spill] sm:$0xff] %v7204_v51 }
 0x47f   :  { %2169 = vmatpush.msrb.mxu0 %v7192_v48  ;;  %2192 = vmatpush.msrb.mxu1 %v7195_v33  ;;  %8909 = vst [vmem:[#allocation266_spill] sm:$0xff] %v7207_v38  ;;  %v7210_v48 = vld [vmem:[#allocation11 + $0x90] sm:$0xff]  ;;  %v7213_v33 = vld [vmem:[#allocation11 + $0x160] sm:$0xff] }
 0x480   :  { %8910 = vst [vmem:[#allocation267_spill] sm:$0xff] %v7210_v48 }
 0x481   :  { %2170 = vmatpush.msrb.mxu0 %v7198_v54  ;;  %2193 = vmatpush.msrb.mxu1 %v7201_v60  ;;  %8911 = vst [vmem:[#allocation268_spill] sm:$0xff] %v7213_v33  ;;  %v7216_v54 = vld [vmem:[#allocation11 + $0x80] sm:$0xff]  ;;  %v7219_v60 = vld [vmem:[#allocation11 + $0x150] sm:$0xff] }
 0x482   :  { %8912 = vst [vmem:[#allocation269_spill] sm:$0xff] %v7216_v54 }
 0x483   :  { %2171 = vmatpush.msrb.mxu0 %v7204_v51  ;;  %2194 = vmatpush.msrb.mxu1 %v7207_v38  ;;  %8913 = vst [vmem:[#allocation270_spill] sm:$0xff] %v7219_v60  ;;  %v7222_v51 = vld [vmem:[#allocation11 + $0x70] sm:$0xff]  ;;  %v7225_v38 = vld [vmem:[#allocation11 + $0x140] sm:$0xff] }
 0x484   :  { %8914 = vst [vmem:[#allocation271_spill] sm:$0xff] %v7222_v51 }
 0x485   :  { %2172 = vmatpush.msrb.mxu0 %v7210_v48  ;;  %2195 = vmatpush.msrb.mxu1 %v7213_v33  ;;  %8915 = vst [vmem:[#allocation272_spill] sm:$0xff] %v7225_v38  ;;  %v7228_v48 = vld [vmem:[#allocation11 + $0x60] sm:$0xff]  ;;  %v7231_v33 = vld [vmem:[#allocation11 + $0x130] sm:$0xff] }
 0x486   :  { %8916 = vst [vmem:[#allocation273_spill] sm:$0xff] %v7228_v48 }
 0x487   :  { %2173 = vmatpush.msrb.mxu0 %v7216_v54  ;;  %2196 = vmatpush.msrb.mxu1 %v7219_v60  ;;  %8917 = vst [vmem:[#allocation274_spill] sm:$0xff] %v7231_v33  ;;  %v7234_v54 = vld [vmem:[#allocation11 + $0x50] sm:$0xff]  ;;  %v7237_v60 = vld [vmem:[#allocation11 + $0x120] sm:$0xff] }
 0x488   :  { %8918 = vst [vmem:[#allocation275_spill] sm:$0xff] %v7234_v54 }
 0x489   :  { %2174 = vmatpush.msrb.mxu0 %v7222_v51  ;;  %2197 = vmatpush.msrb.mxu1 %v7225_v38  ;;  %8919 = vst [vmem:[#allocation276_spill] sm:$0xff] %v7237_v60  ;;  %v7240_v51 = vld [vmem:[#allocation11 + $0x40] sm:$0xff]  ;;  %v7243_v38 = vld [vmem:[#allocation11 + $0x110] sm:$0xff] }
 0x48a   :  { %8920 = vst [vmem:[#allocation277_spill] sm:$0xff] %v7240_v51 }
 0x48b   :  { %2175 = vmatpush.msrb.mxu0 %v7228_v48  ;;  %2198 = vmatpush.msrb.mxu1 %v7231_v33  ;;  %8921 = vst [vmem:[#allocation278_spill] sm:$0xff] %v7243_v38  ;;  %v7246_v48 = vld [vmem:[#allocation11 + $0x30] sm:$0xff]  ;;  %v7249_v33 = vld [vmem:[#allocation11 + $0x100] sm:$0xff] }
 0x48c   :  { %8922 = vst [vmem:[#allocation279_spill] sm:$0xff] %v7246_v48 }
 0x48d   :  { %2176 = vmatpush.msrb.mxu0 %v7234_v54  ;;  %2199 = vmatpush.msrb.mxu1 %v7237_v60  ;;  %8923 = vst [vmem:[#allocation280_spill] sm:$0xff] %v7249_v33  ;;  %v7252_v54 = vld [vmem:[#allocation11 + $0x20] sm:$0xff]  ;;  %v7255_v60 = vld [vmem:[#allocation11 + $0x10] sm:$0xff] }
 0x48e   :  { %8924 = vst [vmem:[#allocation281_spill] sm:$0xff] %v7252_v54 }
 0x48f   :  { %2177 = vmatpush.msrb.mxu0 %v7240_v51  ;;  %2200 = vmatpush.msrb.mxu1 %v7243_v38  ;;  %v7259_v38 = vld [vmem:[#allocation11] sm:$0xff] }
 0x491   :  { %2178 = vmatpush.msrb.mxu0 %v7246_v48  ;;  %2201 = vmatpush.msrb.mxu1 %v7249_v33  ;;  %v1769_v48 = vpop.f32.mrf.mxu1 }
 0x493   :  { %2179 = vmatpush.msrb.mxu0 %v7252_v54 }
 0x495   :  { %2180 = vmatpush.msrb.mxu0 %v7255_v60  ;;  %v1749_v51 = vpop.f32.mrf.mxu0  ;;  %v1729_v41 = vpop.f32.mrf.mxu3 }
 0x496   :  { %v1750_v31 = vadd.f32 %v1749_v51, %v6138_v32 }
 0x497   :  { %2181 = vmatpush.msrb.mxu0 %v7259_v38 }
 0x498   :  { %v1770_v25 = vadd.f32 %v1769_v48, %v1750_v31  ;;  %v8936_v31 = vld [vmem:[#allocation90_spill] sm:$0xff]  ;;  %v8937_v48 = vld [vmem:[#allocation77_spill] sm:$0xff] }
 0x49a   :  { %3781 = vtanh.f32 %v1770_v25  ;;  %v8928_v25 = vld [vmem:[#allocation82_spill] sm:$0xff] }
 0x49b   :  { %v1709_v24 = vpop.f32.mrf.mxu2 }
 0x49c   :  { %v1710_v33 = vadd.f32 %v1709_v24, %v6129_v63  ;;  %v8925_v24 = vld [vmem:[#allocation68_spill] sm:$0xff] }
 0x49e   :  { %v1730_v58 = vadd.f32 %v1729_v41, %v1710_v33  ;;  %v8926_v41 = vld [vmem:[#allocation80_spill] sm:$0xff]  ;;  %v8938_v33 = vld [vmem:[#allocation91_spill] sm:$0xff] }
 0x4a0   :  { %v3782_v54 = vpop.eup %3781  ;;  %3783 = vtanh.f32 %v1730_v58  ;;  %v8927_v58 = vld [vmem:[#allocation66_spill] sm:$0xff] }
 0x4a1   :  { %1810 = vmatmul.f32.vlgmr.msra.gmra.mxu3 %v3782_v54  ;;  %v8935_v54 = vld [vmem:[#allocation72_spill] sm:$0xff] }
 0x4a2   :  { %1970 = vmatpush.msra.mxu3 %v6170_v40  ;;  %v8929_v40 = vld [vmem:[#allocation67_spill] sm:$0xff] }
 0x4a4   :  { %1971 = vmatpush.msra.mxu3 %v6183_v52  ;;  %v8930_v52 = vld [vmem:[#allocation84_spill] sm:$0xff] }
 0x4a6   :  { %v3784_v51 = vpop.eup %3783  ;;  %1972 = vmatpush.msra.mxu3 %v6195_v7  ;;  %v8931_v7 = vld [vmem:[#allocation70_spill] sm:$0xff] }
 0x4a7   :  { %1790 = vmatmul.f32.vlgmr.msra.gmra.mxu2 %v3784_v51  ;;  %v8939_v51 = vld [vmem:[#allocation78_spill] sm:$0xff] }
 0x4a8   :  { %1950 = vmatpush.msra.mxu2 %v6146_v10  ;;  %1973 = vmatpush.msra.mxu3 %v6207_v42  ;;  %v8932_v10 = vld [vmem:[#allocation86_spill] sm:$0xff]  ;;  %v8933_v42 = vld [vmem:[#allocation71_spill] sm:$0xff] }
 0x4a9   :  { %1898 = vmatmul.f32.vlgmr.msrb.gmra.mxu3 %v6774_v9  ;;  %v8934_v9 = vld [vmem:[#allocation88_spill] sm:$0xff] }
 0x4aa   :  { %1951 = vmatpush.msra.mxu2 %v8925_v24  ;;  %1974 = vmatpush.msra.mxu3 %v8926_v41  ;;  %v8940_v24 = vld [vmem:[#allocation92_spill] sm:$0xff]  ;;  %v8942_v41 = vld [vmem:[#allocation113_spill] sm:$0xff] }
 0x4ac   :  { %1952 = vmatpush.msra.mxu2 %v8927_v58  ;;  %1975 = vmatpush.msra.mxu3 %v8928_v25  ;;  %v8943_v58 = vld [vmem:[#allocation81_spill] sm:$0xff]  ;;  %v8944_v25 = vld [vmem:[#allocation115_spill] sm:$0xff] }
 0x4ae   :  { %1953 = vmatpush.msra.mxu2 %v8929_v40  ;;  %1976 = vmatpush.msra.mxu3 %v8930_v52  ;;  %v8945_v40 = vld [vmem:[#allocation83_spill] sm:$0xff]  ;;  %v8946_v52 = vld [vmem:[#allocation117_spill] sm:$0xff] }
 0x4af   :  { %1878 = vmatmul.f32.vlgmr.msrb.gmra.mxu2 %v6816_v61  ;;  %v8941_v61 = vld [vmem:[#allocation79_spill] sm:$0xff] }
 0x4b0   :  { %1954 = vmatpush.msra.mxu2 %v8931_v7  ;;  %1977 = vmatpush.msra.mxu3 %v8932_v10  ;;  %v8947_v7 = vld [vmem:[#allocation85_spill] sm:$0xff]  ;;  %v8948_v10 = vld [vmem:[#allocation119_spill] sm:$0xff] }
 0x4b2   :  { %1955 = vmatpush.msra.mxu2 %v8933_v42  ;;  %1978 = vmatpush.msra.mxu3 %v8934_v9  ;;  %v8949_v42 = vld [vmem:[#allocation121_spill] sm:$0xff]  ;;  %v8950_v9 = vld [vmem:[#allocation87_spill] sm:$0xff] }
 0x4b4   :  { %1956 = vmatpush.msra.mxu2 %v8935_v54  ;;  %1979 = vmatpush.msra.mxu3 %v8936_v31  ;;  %v8951_v54 = vld [vmem:[#allocation123_spill] sm:$0xff]  ;;  %v8952_v31 = vld [vmem:[#allocation89_spill] sm:$0xff] }
 0x4b6   :  { %1957 = vmatpush.msra.mxu2 %v8937_v48  ;;  %1980 = vmatpush.msra.mxu3 %v8938_v33  ;;  %v1859_v48 = vpop.f32.mrf.mxu1  ;;  %v1839_v33 = vpop.f32.mrf.mxu0 }
 0x4b8   :  { %1958 = vmatpush.msra.mxu2 %v8939_v51  ;;  %1981 = vmatpush.msra.mxu3 %v8940_v24  ;;  %v8953_v51 = vld [vmem:[#allocation125_spill] sm:$0xff] }
 0x4b9   :  { %v8954_v24 = vld [vmem:[#allocation93_spill] sm:$0xff] }
 0x4ba   :  { %1959 = vmatpush.msra.mxu2 %v8941_v61  ;;  %1982 = vmatpush.msra.mxu3 %v8942_v41  ;;  %v8955_v61 = vld [vmem:[#allocation114_spill] sm:$0xff]  ;;  %v8956_v41 = vld [vmem:[#allocation127_spill] sm:$0xff] }
 0x4bc   :  { %1960 = vmatpush.msra.mxu2 %v8943_v58  ;;  %1983 = vmatpush.msra.mxu3 %v8944_v25  ;;  %v8958_v58 = vld [vmem:[#allocation129_spill] sm:$0xff]  ;;  %v8959_v25 = vld [vmem:[#allocation118_spill] sm:$0xff] }
 0x4be   :  { %1961 = vmatpush.msra.mxu2 %v8945_v40  ;;  %1984 = vmatpush.msra.mxu3 %v8946_v52  ;;  %v8960_v40 = vld [vmem:[#allocation131_spill] sm:$0xff]  ;;  %v1947_v52 = vpop.f32.mrf.mxu1 }
 0x4c0   :  { %1962 = vmatpush.msra.mxu2 %v8947_v7  ;;  %1985 = vmatpush.msra.mxu3 %v8948_v10  ;;  %v1927_v7 = vpop.f32.mrf.mxu0  ;;  %v8961_v10 = vld [vmem:[#allocation120_spill] sm:$0xff] }
 0x4c1   :  { %1986 = vmatmul.f32.vlgmr.msra.gmra.mxu3 %v6947_v43  ;;  %v8957_v43 = vld [vmem:[#allocation116_spill] sm:$0xff] }
 0x4c2   :  { %2058 = vmatpush.msrb.mxu3 %v8949_v42  ;;  %1963 = vmatpush.msra.mxu2 %v8950_v9  ;;  %v8962_v42 = vld [vmem:[#allocation133_spill] sm:$0xff]  ;;  %v1860_v9 = vadd.f32 %v1859_v48, %v1839_v33  ;;  %v8969_v33 = vld [vmem:[#allocation130_spill] sm:$0xff] }
 0x4c4   :  { %2059 = vmatpush.msrb.mxu3 %v8951_v54  ;;  %1964 = vmatpush.msra.mxu2 %v8952_v31  ;;  %v8964_v54 = vld [vmem:[#allocation135_spill] sm:$0xff]  ;;  %v1928_v31 = vadd.f32 %v1927_v7, %v1860_v9 }
 0x4c5   :  { %v7357_v9 = vld [vmem:[%s8123_s13 + $0x68] sm:$0xff] }
 0x4c6   :  { %2060 = vmatpush.msrb.mxu3 %v8953_v51  ;;  %1965 = vmatpush.msra.mxu2 %v8954_v24  ;;  %v8965_v51 = vld [vmem:[#allocation124_spill] sm:$0xff]  ;;  %v8966_v24 = vld [vmem:[#allocation137_spill] sm:$0xff] }
 0x4c7   :  { %1966 = vmatmul.f32.vlgmr.msra.gmra.mxu2 %v6985_v39  ;;  %v8963_v39 = vld [vmem:[#allocation122_spill] sm:$0xff] }
 0x4c8   :  { %2038 = vmatpush.msrb.mxu2 %v8955_v61  ;;  %2061 = vmatpush.msrb.mxu3 %v8956_v41  ;;  %v8967_v61 = vld [vmem:[#allocation126_spill] sm:$0xff] }
 0x4ca   :  { %2039 = vmatpush.msrb.mxu2 %v8957_v43  ;;  %2062 = vmatpush.msrb.mxu3 %v8958_v58  ;;  %v1948_v58 = vadd.f32 %v1947_v52, %v1928_v31  ;;  %v8972_v52 = vld [vmem:[#allocation136_spill] sm:$0xff]  ;;  %v8982_v31 = vld [vmem:[#allocation145_spill] sm:$0xff] }
 0x4cc   :  { %2040 = vmatpush.msrb.mxu2 %v8959_v25  ;;  %2063 = vmatpush.msrb.mxu3 %v8960_v40  ;;  %v8968_v40 = vld [vmem:[#allocation128_spill] sm:$0xff] }
 0x4ce   :  { %2041 = vmatpush.msrb.mxu2 %v8961_v10  ;;  %2064 = vmatpush.msrb.mxu3 %v8962_v42  ;;  %v8970_v10 = vld [vmem:[#allocation132_spill] sm:$0xff]  ;;  %v8974_v42 = vld [vmem:[#allocation139_spill] sm:$0xff] }
 0x4cf   :  { %v2035_v41 = vpop.f32.mrf.mxu1 }
 0x4d0   :  { %2042 = vmatpush.msrb.mxu2 %v8963_v39  ;;  %2065 = vmatpush.msrb.mxu3 %v8964_v54  ;;  %v8980_v39 = vld [vmem:[#allocation143_spill] sm:$0xff]  ;;  %v8981_v54 = vld [vmem:[#allocation144_spill] sm:$0xff] }
 0x4d2   :  { %2043 = vmatpush.msrb.mxu2 %v8965_v51  ;;  %2066 = vmatpush.msrb.mxu3 %v8966_v24  ;;  %v7389_v51 = vld [vmem:[%s8123_s13 + $0x48] sm:$0xff] }
 0x4d3   :  { %v8984_v24 = vld [vmem:[#allocation147_spill] sm:$0xff] }
 0x4d4   :  { %2044 = vmatpush.msrb.mxu2 %v8967_v61  ;;  %2067 = vmatpush.msrb.mxu3 %v6405_v0  ;;  %v8971_v0 = vld [vmem:[#allocation134_spill] sm:$0xff] }
 0x4d5   :  { %v2015_v43 = vpop.f32.mrf.mxu0  ;;  %v7397_v61 = vld [vmem:[%s8123_s13 + $0x40] sm:$0xff] }
 0x4d6   :  { %v2036_v25 = vadd.f32 %v2035_v41, %v2015_v43  ;;  %2045 = vmatpush.msrb.mxu2 %v8968_v40  ;;  %2068 = vmatpush.msrb.mxu3 %v6411_v15  ;;  %v8973_v15 = vld [vmem:[#allocation138_spill] sm:$0xff]  ;;  %v8986_v41 = vld [vmem:[#allocation148_spill] sm:$0xff]  ;;  %v8987_v43 = vld [vmem:[#allocation157_spill] sm:$0xff] }
 0x4d7   :  { %v8989_v40 = vld [vmem:[#allocation159_spill] sm:$0xff] }
 0x4d8   :  { %v2078_v48 = vadd.f32 %v2036_v25, %v1948_v58  ;;  %2046 = vmatpush.msrb.mxu2 %v8969_v33  ;;  %2069 = vmatpush.msrb.mxu3 %v6417_v55  ;;  %v7405_v58 = vld [vmem:[%s8123_s13 + $0x38] sm:$0xff] }
 0x4d9   :  { %v8988_v25 = vld [vmem:[#allocation149_spill] sm:$0xff]  ;;  %v8990_v33 = vld [vmem:[#allocation150_spill] sm:$0xff] }
 0x4da   :  { %v2080_v7 = vadd.f32 %v2078_v48, %v8693_v19  ;;  %2047 = vmatpush.msrb.mxu2 %v8970_v10  ;;  %2070 = vmatpush.msrb.mxu3 %v6423_v3  ;;  %v8975_v3 = vld [vmem:[#allocation140_spill] sm:$0xff] }
 0x4db   :  { %v7413_v48 = vld [vmem:[%s8123_s13 + $0x30] sm:$0xff]  ;;  %v7421_v10 = vld [vmem:[%s8123_s13 + $0x28] sm:$0xff] }
 0x4dc   :  { %3785 = vtanh.f32 %v2080_v7  ;;  %2048 = vmatpush.msrb.mxu2 %v8971_v0  ;;  %2071 = vmatpush.msrb.mxu3 %v6431_v17  ;;  %v8976_v17 = vld [vmem:[#allocation146_spill] sm:$0xff]  ;;  %v8991_v7 = vld [vmem:[#allocation161_spill] sm:$0xff]  ;;  %v8992_v0 = vld [vmem:[#allocation151_spill] sm:$0xff] }
 0x4de   :  { %2049 = vmatpush.msrb.mxu2 %v8972_v52  ;;  %2072 = vmatpush.msrb.mxu3 %v6437_v28  ;;  %v7340_v28 = vld [vmem:[%s8123_s13 + $0x78] sm:$0xff]  ;;  %v8993_v52 = vld [vmem:[#allocation163_spill] sm:$0xff] }
 0x4e0   :  { %2050 = vmatpush.msrb.mxu2 %v8973_v15  ;;  %2073 = vmatpush.msrb.mxu3 %v6443_v37  ;;  %v8977_v37 = vld [vmem:[#allocation141_spill] sm:$0xff]  ;;  %v7429_v15 = vld [vmem:[%s8123_s13 + $0x20] sm:$0xff] }
 0x4e1   :  { %2074 = vmatmul.f32.vlgmr.msrb.gmra.mxu3 %v8858_v26  ;;  %v8978_v26 = vld [vmem:[#allocation69_spill] sm:$0xff] }
 0x4e2   :  { %v7330_v55 = vpop.eup %3785  ;;  %2051 = vmatpush.msrb.mxu2 %v8974_v42  ;;  %2144 = vmatpush.msra.mxu3 %v6450_v22  ;;  %v7349_v22 = vld [vmem:[%s8123_s13 + $0x70] sm:$0xff] }
 0x4e3   :  { %2100 = vmatmul.f32.vlgmr.msra.gmra.mxu0 %v7330_v55  ;;  %v8994_v42 = vld [vmem:[#allocation152_spill] sm:$0xff] }
 0x4e4   :  { %2052 = vmatpush.msrb.mxu2 %v8975_v3  ;;  %2145 = vmatpush.msra.mxu3 %v8976_v17  ;;  %v8995_v3 = vld [vmem:[#allocation164_spill] sm:$0xff]  ;;  %v7437_v17 = vld [vmem:[%s8123_s13 + $0x18] sm:$0xff] }
 0x4e5   :  { %2248 = vmatpush.msra.mxu0 %v7340_v28 }
 0x4e6   :  { %2053 = vmatpush.msrb.mxu2 %v8977_v37  ;;  %2146 = vmatpush.msra.mxu3 %v6462_v46  ;;  %v8979_v46 = vld [vmem:[#allocation142_spill] sm:$0xff] }
 0x4e7   :  { %2054 = vmatmul.f32.vlgmr.msrb.gmra.mxu2 %v8865_v44  ;;  %2249 = vmatpush.msra.mxu0 %v7349_v22  ;;  %v7365_v44 = vld [vmem:[%s8123_s13 + $0x60] sm:$0xff] }
 0x4e8   :  { %2124 = vmatpush.msra.mxu2 %v8978_v26  ;;  %2147 = vmatpush.msra.mxu3 %v6469_v57  ;;  %v7373_v57 = vld [vmem:[%s8123_s13 + $0x58] sm:$0xff] }
 0x4e9   :  { %2250 = vmatpush.msra.mxu0 %v7357_v9  ;;  %v8996_v37 = vld [vmem:[#allocation154_spill] sm:$0xff] }
 0x4ea   :  { %2125 = vmatpush.msra.mxu2 %v8979_v46  ;;  %2148 = vmatpush.msra.mxu3 %v6476_v21  ;;  %v7381_v21 = vld [vmem:[%s8123_s13 + $0x50] sm:$0xff]  ;;  %v8997_v26 = vld [vmem:[#allocation166_spill] sm:$0xff] }
 0x4eb   :  { %2251 = vmatpush.msra.mxu0 %v7365_v44  ;;  %v7445_v46 = vld [vmem:[%s8123_s13 + $0x10] sm:$0xff] }
 0x4ec   :  { %2126 = vmatpush.msra.mxu2 %v8980_v39  ;;  %2149 = vmatpush.msra.mxu3 %v6483_v4  ;;  %v8983_v4 = vld [vmem:[#allocation153_spill] sm:$0xff]  ;;  %v8998_v39 = vld [vmem:[#allocation156_spill] sm:$0xff] }
 0x4ed   :  { %2252 = vmatpush.msra.mxu0 %v7373_v57 }
 0x4ee   :  { %2127 = vmatpush.msra.mxu2 %v8981_v54  ;;  %2150 = vmatpush.msra.mxu3 %v6490_v45  ;;  %v8985_v45 = vld [vmem:[#allocation155_spill] sm:$0xff]  ;;  %v8999_v54 = vld [vmem:[#allocation168_spill] sm:$0xff] }
 0x4ef   :  { %2253 = vmatpush.msra.mxu0 %v7381_v21 }
 0x4f0   :  { %2128 = vmatpush.msra.mxu2 %v8982_v31  ;;  %2151 = vmatpush.msra.mxu3 %v8983_v4  ;;  %v9000_v31 = vld [vmem:[#allocation169_spill] sm:$0xff]  ;;  %v7454_v4 = vld [vmem:[%s8123_s13 + $0x8] sm:$0xff] }
 0x4f1   :  { %2254 = vmatpush.msra.mxu0 %v7389_v51 }
 0x4f2   :  { %2129 = vmatpush.msra.mxu2 %v8984_v24  ;;  %2152 = vmatpush.msra.mxu3 %v8985_v45  ;;  %v9001_v24 = vld [vmem:[#allocation158_spill] sm:$0xff]  ;;  %v9002_v45 = vld [vmem:[#allocation171_spill] sm:$0xff] }
 0x4f3   :  { %2255 = vmatpush.msra.mxu0 %v7397_v61 }
 0x4f4   :  { %2130 = vmatpush.msra.mxu2 %v8986_v41  ;;  %2153 = vmatpush.msra.mxu3 %v8987_v43  ;;  %v7462_v41 = vld [vmem:[%s8123_s13] sm:$0xff]  ;;  %v9003_v43 = vld [vmem:[#allocation160_spill] sm:$0xff] }
 0x4f5   :  { %2256 = vmatpush.msra.mxu0 %v7405_v58 }
 0x4f6   :  { %2131 = vmatpush.msra.mxu2 %v8988_v25  ;;  %2154 = vmatpush.msra.mxu3 %v8989_v40  ;;  %v9004_v25 = vld [vmem:[#allocation173_spill] sm:$0xff]  ;;  %v9005_v40 = vld [vmem:[#allocation162_spill] sm:$0xff] }
 0x4f7   :  { %2257 = vmatpush.msra.mxu0 %v7413_v48 }
 0x4f8   :  { %2132 = vmatpush.msra.mxu2 %v8990_v33  ;;  %2155 = vmatpush.msra.mxu3 %v8991_v7  ;;  %v9006_v33 = vld [vmem:[#allocation175_spill] sm:$0xff]  ;;  %v9007_v7 = vld [vmem:[#allocation165_spill] sm:$0xff] }
 0x4f9   :  { %2258 = vmatpush.msra.mxu0 %v7421_v10 }
 0x4fa   :  { %2133 = vmatpush.msra.mxu2 %v8992_v0  ;;  %2156 = vmatpush.msra.mxu3 %v8993_v52  ;;  %v9008_v0 = vld [vmem:[#allocation177_spill] sm:$0xff]  ;;  %v9009_v52 = vld [vmem:[#allocation167_spill] sm:$0xff] }
 0x4fb   :  { %2259 = vmatpush.msra.mxu0 %v7429_v15 }
 0x4fc   :  { %2134 = vmatpush.msra.mxu2 %v8994_v42  ;;  %2157 = vmatpush.msra.mxu3 %v8995_v3  ;;  %v9010_v42 = vld [vmem:[#allocation179_spill] sm:$0xff]  ;;  %v9011_v3 = vld [vmem:[#allocation170_spill] sm:$0xff] }
 0x4fd   :  { %2260 = vmatpush.msra.mxu0 %v7437_v17 }
 0x4fe   :  { %2135 = vmatpush.msra.mxu2 %v8996_v37  ;;  %2158 = vmatpush.msra.mxu3 %v8997_v26  ;;  %v9012_v37 = vld [vmem:[#allocation181_spill] sm:$0xff]  ;;  %v9013_v26 = vld [vmem:[#allocation172_spill] sm:$0xff] }
 0x4ff   :  { %2261 = vmatpush.msra.mxu0 %v7445_v46 }
 0x500   :  { %2136 = vmatpush.msra.mxu2 %v8998_v39  ;;  %2159 = vmatpush.msra.mxu3 %v8999_v54  ;;  %v9014_v39 = vld [vmem:[#allocation183_spill] sm:$0xff]  ;;  %v9015_v54 = vld [vmem:[#allocation174_spill] sm:$0xff] }
 0x501   :  { %2262 = vmatpush.msra.mxu0 %v7454_v4 }
 0x502   :  { %2226 = vmatpush.msrb.mxu3 %v9000_v31  ;;  %2137 = vmatpush.msra.mxu2 %v9001_v24  ;;  %v9017_v31 = vld [vmem:[#allocation176_spill] sm:$0xff]  ;;  %v9018_v24 = vld [vmem:[#allocation187_spill] sm:$0xff] }
 0x503   :  { %2263 = vmatpush.msra.mxu0 %v7462_v41 }
 0x504   :  { %2227 = vmatpush.msrb.mxu3 %v9002_v45  ;;  %2138 = vmatpush.msra.mxu2 %v9003_v43  ;;  %v9019_v45 = vld [vmem:[#allocation178_spill] sm:$0xff]  ;;  %v9020_v43 = vld [vmem:[#allocation189_spill] sm:$0xff] }
 0x506   :  { %2228 = vmatpush.msrb.mxu3 %v9004_v25  ;;  %2139 = vmatpush.msra.mxu2 %v9005_v40  ;;  %v9021_v25 = vld [vmem:[#allocation180_spill] sm:$0xff]  ;;  %v9022_v40 = vld [vmem:[#allocation191_spill] sm:$0xff] }
 0x507   :  { %2140 = vmatmul.f32.vlgmr.msra.gmra.mxu2 %v7330_v55  ;;  %v9016_v55 = vld [vmem:[#allocation185_spill] sm:$0xff] }
 0x508   :  { %2229 = vmatpush.msrb.mxu3 %v9006_v33  ;;  %2206 = vmatpush.msrb.mxu2 %v9007_v7  ;;  %v9023_v33 = vld [vmem:[#allocation182_spill] sm:$0xff] }
 0x509   :  { %v9024_v7 = vld [vmem:[#allocation194_spill] sm:$0xff] }
 0x50a   :  { %2230 = vmatpush.msrb.mxu3 %v9008_v0  ;;  %2207 = vmatpush.msrb.mxu2 %v9009_v52  ;;  %v9025_v0 = vld [vmem:[#allocation184_spill] sm:$0xff] }
 0x50b   :  { %v9026_v52 = vld [vmem:[#allocation196_spill] sm:$0xff] }
 0x50c   :  { %2231 = vmatpush.msrb.mxu3 %v9010_v42  ;;  %2208 = vmatpush.msrb.mxu2 %v9011_v3  ;;  %v9027_v42 = vld [vmem:[#allocation186_spill] sm:$0xff]  ;;  %v9028_v3 = vld [vmem:[#allocation199_spill] sm:$0xff] }
 0x50e   :  { %2232 = vmatpush.msrb.mxu3 %v9012_v37  ;;  %2209 = vmatpush.msrb.mxu2 %v9013_v26  ;;  %v9029_v37 = vld [vmem:[#allocation188_spill] sm:$0xff]  ;;  %v9030_v26 = vld [vmem:[#allocation201_spill] sm:$0xff] }
 0x510   :  { %2233 = vmatpush.msrb.mxu3 %v9014_v39  ;;  %2210 = vmatpush.msrb.mxu2 %v9015_v54  ;;  %v9031_v39 = vld [vmem:[#allocation190_spill] sm:$0xff]  ;;  %v9032_v54 = vld [vmem:[#allocation192_spill] sm:$0xff] }
 0x512   :  { %2234 = vmatpush.msrb.mxu3 %v9016_v55  ;;  %2211 = vmatpush.msrb.mxu2 %v9017_v31  ;;  %v9033_v55 = vld [vmem:[#allocation195_spill] sm:$0xff]  ;;  %v9034_v31 = vld [vmem:[#allocation197_spill] sm:$0xff] }
 0x514   :  { %2235 = vmatpush.msrb.mxu3 %v9018_v24  ;;  %2212 = vmatpush.msrb.mxu2 %v9019_v45  ;;  %v9035_v24 = vld [vmem:[#allocation198_spill] sm:$0xff]  ;;  %v9036_v45 = vld [vmem:[#allocation200_spill] sm:$0xff] }
 0x516   :  { %2236 = vmatpush.msrb.mxu3 %v9020_v43  ;;  %2213 = vmatpush.msrb.mxu2 %v9021_v25  ;;  %v9037_v25 = vld [vmem:[#allocation193_spill] sm:$0xff] }
 0x518   :  { %2237 = vmatpush.msrb.mxu3 %v9022_v40  ;;  %2214 = vmatpush.msrb.mxu2 %v9023_v33  ;;  %v9038_v33 = vld [vmem:[#allocation202_spill] sm:$0xff] }
 0x51a   :  { %2238 = vmatpush.msrb.mxu3 %v9024_v7  ;;  %2215 = vmatpush.msrb.mxu2 %v9025_v0 }
 0x51c   :  { %2239 = vmatpush.msrb.mxu3 %v9026_v52  ;;  %2216 = vmatpush.msrb.mxu2 %v9027_v42  ;;  %v9039_v52 = vld [vmem:[#allocation203_spill] sm:$0xff]  ;;  %v9040_v42 = vld [vmem:[#allocation204_spill] sm:$0xff] }
 0x51e   :  { %2240 = vmatpush.msrb.mxu3 %v9028_v3  ;;  %2217 = vmatpush.msrb.mxu2 %v9029_v37  ;;  %v9041_v3 = vld [vmem:[#allocation205_spill] sm:$0xff]  ;;  %v9042_v37 = vld [vmem:[#allocation206_spill] sm:$0xff] }
 0x520   :  { %2241 = vmatpush.msrb.mxu3 %v9030_v26  ;;  %2218 = vmatpush.msrb.mxu2 %v9031_v39  ;;  %v9043_v26 = vld [vmem:[#allocation207_spill] sm:$0xff]  ;;  %v9044_v39 = vld [vmem:[#allocation208_spill] sm:$0xff] }
 0x522   :  { %2219 = vmatpush.msrb.mxu2 %v9032_v54  ;;  %v9045_v54 = vld [vmem:[#allocation209_spill] sm:$0xff] }
 0x524   :  { %2220 = vmatpush.msrb.mxu2 %v9033_v55  ;;  %v1811_v7 = vpop.f32.mrf.mxu3  ;;  %v9046_v55 = vld [vmem:[#allocation210_spill] sm:$0xff] }
 0x526   :  { %2221 = vmatpush.msrb.mxu2 %v9034_v31  ;;  %v9047_v31 = vld [vmem:[#allocation211_spill] sm:$0xff] }
 0x528   :  { %2296 = vmatpush.msra.mxu2 %v9035_v24  ;;  %v9048_v24 = vld [vmem:[#allocation212_spill] sm:$0xff] }
 0x52a   :  { %2297 = vmatpush.msra.mxu2 %v9036_v45  ;;  %v1791_v43 = vpop.f32.mrf.mxu2  ;;  %v4228_v45 = vld [vmem:[#allocation3 + $0x20] sm:$0xff] }
 0x52b   :  { %v1792_v40 = vadd.f32 %v9037_v25, %v1791_v43  ;;  %v4229_v43 = vld [vmem:[#allocation3 + $0x10] sm:$0xff]  ;;  %v4230_v25 = vld [vmem:[#allocation3] sm:$0xff] }
 0x52c   :  { %2298 = vmatpush.msra.mxu2 %v9038_v33 }
 0x52d   :  { %v1812_v0 = vadd.f32 %v1811_v7, %v1792_v40  ;;  %v1899_v40 = vpop.f32.mrf.mxu3 }
 0x52e   :  { %2299 = vmatpush.msra.mxu2 %v9039_v52 }
 0x52f   :  { %2779 = vperm.xlu0 %3756, %v1812_v0  }
 0x530   :  { %2300 = vmatpush.msra.mxu2 %v9040_v42 }
 0x532   :  { %2301 = vmatpush.msra.mxu2 %v9041_v3  ;;  %v1879_v33 = vpop.f32.mrf.mxu2 }
 0x533   :  { %v1900_v52 = vadd.f32 %v1899_v40, %v1879_v33 }
 0x534   :  { %2302 = vmatpush.msra.mxu2 %v9042_v37 }
 0x536   :  { %2303 = vmatpush.msra.mxu2 %v9043_v26 }
 0x538   :  { %2304 = vmatpush.msra.mxu2 %v9044_v39 }
 0x53a   :  { %2305 = vmatpush.msra.mxu2 %v9045_v54 }
 0x53c   :  { %2306 = vmatpush.msra.mxu2 %v9046_v55 }
 0x53e   :  { %2307 = vmatpush.msra.mxu2 %v9047_v31 }
 0x540   :  { %2308 = vmatpush.msra.mxu2 %v9048_v24  ;;  %v7517_v24 = vld [vmem:[%s8123_s13 + $0xf8] sm:$0xff] }
 0x542   :  { %2309 = vmatpush.msra.mxu2 %v4228_v45  ;;  %v7524_v45 = vld [vmem:[%s8123_s13 + $0xf0] sm:$0xff] }
 0x544   :  { %2310 = vmatpush.msra.mxu2 %v4229_v43  ;;  %v1987_v7 = vpop.f32.mrf.mxu3 }
 0x546   :  { %2311 = vmatpush.msra.mxu2 %v4230_v25 }
 0x54a   :  { %v1967_v0 = vpop.f32.mrf.mxu2 }
 0x54b   :  { %v1968_v42 = vadd.f32 %v1967_v0, %v1900_v52 }
 0x54d   :  { %v1988_v26 = vadd.f32 %v1987_v7, %v1968_v42 }
 0x560   :  { %v2101_v43 = vpop.f32.mrf.mxu0 }
 0x561   :  { %v2102_v25 = vadd.f32 %v2101_v43, %v8772_v59  ;;  %v4253_v43 = vld [vmem:[#allocation3 + $0x1f8] sm:$0xff] }
 0x564   :  { %v2075_v3 = vpop.f32.mrf.mxu3 }
 0x56a   :  { %v2055_v37 = vpop.f32.mrf.mxu2 }
 0x56b   :  { %v2076_v39 = vadd.f32 %v2075_v3, %v2055_v37  ;;  %v2289_v3 = vrot.slane %v8782_v6, 3  ;;  %v4248_v37 = vld [vmem:[#allocation3 + $0xe8] sm:$0xff] }
 0x56d   :  { %v2079_v54 = vadd.f32 %v2076_v39, %v1988_v26  ;;  %v2288_v39 = vrot.slane %v8784_v18, 4 }
 0x56f   :  { %v2081_v55 = vadd.f32 %v2079_v54, %v8769_v34  ;;  %v4249_v54 = vld [vmem:[#allocation3 + $0xd8] sm:$0xff] }
 0x571   :  { %3787 = vtanh.f32 %v2081_v55  ;;  %v4251_v55 = vld [vmem:[#allocation3 + $0xc8] sm:$0xff] }
 0x577   :  { %v3788_v31 = vpop.eup %3787 }
 0x578   :  { %2120 = vmatmul.f32.vlgmr.msra.gmra.mxu1 %v3788_v31  ;;  %2160 = vmatmul.f32.vlgmr.msra.gmra.mxu3 %v3788_v31 }
 0x579   :  { %2316 = vmatpush.msra.mxu3 %v6692_v53  ;;  %2268 = vmatpush.msra.mxu1 %v7517_v24  ;;  %v7531_v53 = vld [vmem:[%s8123_s13 + $0xe8] sm:$0xff] }
 0x57b   :  { %2317 = vmatpush.msra.mxu3 %v6696_v49  ;;  %2269 = vmatpush.msra.mxu1 %v7524_v45  ;;  %v7538_v49 = vld [vmem:[%s8123_s13 + $0xe0] sm:$0xff] }
 0x57d   :  { %2318 = vmatpush.msra.mxu3 %v6700_v16  ;;  %2270 = vmatpush.msra.mxu1 %v7531_v53  ;;  %v7545_v16 = vld [vmem:[%s8123_s13 + $0xd8] sm:$0xff] }
 0x57f   :  { %2319 = vmatpush.msra.mxu3 %v6704_v12  ;;  %2271 = vmatpush.msra.mxu1 %v7538_v49  ;;  %v7552_v12 = vld [vmem:[%s8123_s13 + $0xd0] sm:$0xff] }
 0x581   :  { %2320 = vmatpush.msra.mxu3 %v6708_v47  ;;  %2272 = vmatpush.msra.mxu1 %v7545_v16  ;;  %v7559_v47 = vld [vmem:[%s8123_s13 + $0xc8] sm:$0xff] }
 0x583   :  { %2321 = vmatpush.msra.mxu3 %v6712_v13  ;;  %2273 = vmatpush.msra.mxu1 %v7552_v12  ;;  %v7566_v13 = vld [vmem:[%s8123_s13 + $0xc0] sm:$0xff] }
 0x585   :  { %2322 = vmatpush.msra.mxu3 %v6716_v23  ;;  %2274 = vmatpush.msra.mxu1 %v7559_v47  ;;  %v7573_v23 = vld [vmem:[%s8123_s13 + $0xb8] sm:$0xff] }
 0x587   :  { %2323 = vmatpush.msra.mxu3 %v6720_v50  ;;  %2275 = vmatpush.msra.mxu1 %v7566_v13  ;;  %v7580_v50 = vld [vmem:[%s8123_s13 + $0xb0] sm:$0xff] }
 0x589   :  { %2324 = vmatpush.msra.mxu3 %v6724_v14  ;;  %2276 = vmatpush.msra.mxu1 %v7573_v23  ;;  %v7587_v14 = vld [vmem:[%s8123_s13 + $0xa8] sm:$0xff] }
 0x58a   :  { %v2141_v33 = vpop.f32.mrf.mxu2 }
 0x58b   :  { %2325 = vmatpush.msra.mxu3 %v6728_v11  ;;  %2277 = vmatpush.msra.mxu1 %v7580_v50  ;;  %v7594_v11 = vld [vmem:[%s8123_s13 + $0xa0] sm:$0xff]  ;;  %v2142_v7 = vadd.f32 %v2141_v33, %v8771_v27  ;;  %v9051_v33 = vld [vmem:[#allocation41_spill] sm:$0xff] }
 0x58d   :  { %2326 = vmatpush.msra.mxu3 %v6732_v56  ;;  %2278 = vmatpush.msra.mxu1 %v7587_v14  ;;  %v7601_v56 = vld [vmem:[%s8123_s13 + $0x98] sm:$0xff] }
 0x58f   :  { %2327 = vmatpush.msra.mxu3 %v6736_v62  ;;  %2279 = vmatpush.msra.mxu1 %v7594_v11  ;;  %v7608_v62 = vld [vmem:[%s8123_s13 + $0x90] sm:$0xff] }
 0x591   :  { %2328 = vmatpush.msra.mxu3 %v6740_v35  ;;  %2280 = vmatpush.msra.mxu1 %v7601_v56  ;;  %v7615_v35 = vld [vmem:[%s8123_s13 + $0x88] sm:$0xff] }
 0x593   :  { %2329 = vmatpush.msra.mxu3 %v6744_v5  ;;  %2281 = vmatpush.msra.mxu1 %v7608_v62  ;;  %v7622_v5 = vld [vmem:[%s8123_s13 + $0x80] sm:$0xff] }
 0x595   :  { %2330 = vmatpush.msra.mxu3 %v6748_v8  ;;  %2282 = vmatpush.msra.mxu1 %v7615_v35 }
 0x597   :  { %2331 = vmatpush.msra.mxu3 %v6752_v36  ;;  %2283 = vmatpush.msra.mxu1 %v7622_v5  ;;  %v4247_v36 = vld [vmem:[#allocation3 + $0xf8] sm:$0xff] }
 0x5f5   :  { %v2121_v8 = vpop.f32.mrf.mxu1 }
 0x5f6   :  { %v2122_v40 = vadd.f32 %v2121_v8, %v2102_v25  ;;  %v4254_v25 = vld [vmem:[#allocation3 + $0xb8] sm:$0xff] }
 0x5f7   :  { %v9050_v8 = vld [vmem:[#allocation73_spill] sm:$0xff] }
 0x5f8   :  { %3789 = vtanh.f32 %v2122_v40  ;;  %v4255_v40 = vld [vmem:[%s8507_s28 + $0x1d0] sm:$0xff] }
 0x5fb   :  { %v2161_v0 = vpop.f32.mrf.mxu3 }
 0x5fc   :  { %v2162_v52 = vadd.f32 %v2161_v0, %v2142_v7  ;;  %v4256_v7 = vld [vmem:[#allocation3 + $0x1e8] sm:$0xff] }
 0x5fd   :  { %v4257_v0 = vld [vmem:[#allocation3 + $0xa8] sm:$0xff] }
 0x5fe   :  { %v3790_v42 = vpop.eup %3789  ;;  %3791 = vtanh.f32 %v2162_v52  ;;  %v9052_v52 = vld [vmem:[#allocation95_spill] sm:$0xff] }
 0x5ff   :  { %2182 = vmatmul.f32.vlgmr.msrb.gmra.mxu0 %v3790_v42  ;;  %2222 = vmatmul.f32.vlgmr.msrb.gmra.mxu2 %v3790_v42  ;;  %v4258_v42 = vld [vmem:[%s8507_s28 + $0x1c0] sm:$0xff] }
 0x600   :  { %2384 = vmatpush.msrb.mxu2 %v6769_v1  ;;  %2336 = vmatpush.msrb.mxu0 %v4247_v36  ;;  %v4250_v1 = vld [vmem:[%s8507_s28 + $0x1f0] sm:$0xff] }
 0x602   :  { %2385 = vmatpush.msrb.mxu2 %v6781_v30  ;;  %2337 = vmatpush.msrb.mxu0 %v4248_v37  ;;  %v7637_v30 = vsel %vm614_vm1, %v2289_v3, %v2288_v39  ;;  %v4259_v3 = vld [vmem:[#allocation3 + $0x1d8] sm:$0xff]  ;;  %v9053_v37 = vld [vmem:[#allocation96_spill] sm:$0xff] }
 0x603   :  { %v4261_v39 = vld [vmem:[#allocation3 + $0x98] sm:$0xff] }
 0x604   :  { %v3792_v26 = vpop.eup %3791  ;;  %2386 = vmatpush.msrb.mxu2 %v6791_v29  ;;  %2338 = vmatpush.msrb.mxu0 %v4249_v54  ;;  %v4252_v29 = vld [vmem:[%s8507_s28 + $0x1e0] sm:$0xff]  ;;  %v4262_v54 = vld [vmem:[#allocation3 + $0x1c8] sm:$0xff] }
 0x605   :  { %2202 = vmatmul.f32.vlgmr.msrb.gmra.mxu1 %v3792_v26  ;;  %2242 = vmatmul.f32.vlgmr.msrb.gmra.mxu3 %v3792_v26  ;;  %v4260_v26 = vld [vmem:[%s8507_s28 + $0x1b0] sm:$0xff] }
 0x606   :  { %2387 = vmatpush.msrb.mxu2 %v6806_v20  ;;  %2404 = vmatpush.msrb.mxu3 %v4250_v1  ;;  %v9049_v20 = vld [vmem:[#allocation43_spill] sm:$0xff]  ;;  %v9054_v1 = vld [vmem:[#allocation97_spill] sm:$0xff] }
 0x607   :  { %2312 = vmatmul.f32.vlgmr.msra.gmra.mxu2 %v7637_v30  ;;  %2339 = vmatpush.msrb.mxu0 %v4251_v55  ;;  %v2292_v31 = vrot.slane %v9049_v20, 3  ;;  %v9055_v55 = vld [vmem:[#allocation74_spill] sm:$0xff] }
 0x608   :  { %2388 = vmatpush.msrb.mxu2 %v6823_v2  ;;  %2405 = vmatpush.msrb.mxu3 %v4252_v29  ;;  %v2291_v2 = vrot.slane %v9051_v33, 4  ;;  %v4263_v29 = vld [vmem:[#allocation3 + $0x88] sm:$0xff] }
 0x609   :  { %2356 = vmatpush.msrb.mxu1 %v4253_v43  ;;  %2340 = vmatpush.msrb.mxu0 %v4254_v25  ;;  %v9056_v43 = vld [vmem:[#allocation99_spill] sm:$0xff] }
 0x60a   :  { %2389 = vmatpush.msrb.mxu2 %v9050_v8  ;;  %2406 = vmatpush.msrb.mxu3 %v4255_v40  ;;  %v7655_v36 = vsel %vm614_vm1, %v2292_v31, %v2291_v2  ;;  %v4264_v31 = vld [vmem:[#allocation3 + $0x1b8] sm:$0xff]  ;;  %v9057_v25 = vld [vmem:[#allocation75_spill] sm:$0xff]  ;;  %v9058_v2 = vld [vmem:[#allocation100_spill] sm:$0xff] }
 0x60b   :  { %2357 = vmatpush.msrb.mxu1 %v4256_v7  ;;  %2341 = vmatpush.msrb.mxu0 %v4257_v0  ;;  %v4265_v8 = vld [vmem:[#allocation3 + $0x78] sm:$0xff]  ;;  %v4266_v40 = vld [vmem:[#allocation3 + $0x1a8] sm:$0xff] }
 0x60c   :  { %2390 = vmatpush.msrb.mxu2 %v9052_v52  ;;  %2407 = vmatpush.msrb.mxu3 %v4258_v42  ;;  %v9059_v7 = vld [vmem:[#allocation76_spill] sm:$0xff]  ;;  %v4268_v52 = vld [vmem:[#allocation3 + $0x198] sm:$0xff] }
 0x60d   :  { %2332 = vmatmul.f32.vlgmr.msra.gmra.mxu3 %v7655_v36  ;;  %2358 = vmatpush.msrb.mxu1 %v4259_v3  ;;  %v4267_v0 = vld [vmem:[#allocation3 + $0x68] sm:$0xff]  ;;  %v9061_v3 = vld [vmem:[#allocation106_spill] sm:$0xff] }
 0x60e   :  { %2391 = vmatpush.msrb.mxu2 %v9053_v37  ;;  %2408 = vmatpush.msrb.mxu3 %v4260_v26  ;;  %v9060_v42 = vld [vmem:[#allocation40_spill] sm:$0xff]  ;;  %v4269_v37 = vld [vmem:[#allocation3 + $0x58] sm:$0xff] }
 0x60f   :  { %2342 = vmatpush.msrb.mxu0 %v4261_v39  ;;  %2359 = vmatpush.msrb.mxu1 %v4262_v54  ;;  %v4270_v26 = vld [vmem:[#allocation3 + $0x188] sm:$0xff]  ;;  %v9062_v39 = vld [vmem:[#allocation109_spill] sm:$0xff]  ;;  %v9063_v54 = vld [vmem:[#allocation94_spill] sm:$0xff] }
 0x610   :  { %2392 = vmatpush.msrb.mxu2 %v9054_v1  ;;  %2409 = vmatpush.msrb.mxu3 %v9055_v55  ;;  %v4271_v1 = vld [vmem:[#allocation3 + $0x48] sm:$0xff]  ;;  %v4272_v55 = vld [vmem:[#allocation3 + $0x178] sm:$0xff] }
 0x611   :  { %2343 = vmatpush.msrb.mxu0 %v4263_v29  ;;  %2360 = vmatpush.msrb.mxu1 %v4264_v31  ;;  %v9064_v29 = vld [vmem:[#allocation54_spill] sm:$0xff]  ;;  %v9065_v31 = vld [vmem:[#allocation108_spill] sm:$0xff] }
 0x612   :  { %2393 = vmatpush.msrb.mxu2 %v9056_v43  ;;  %2410 = vmatpush.msrb.mxu3 %v9057_v25  ;;  %v9066_v43 = vld [vmem:[#allocation38_spill] sm:$0xff] }
 0x613   :  { %2344 = vmatpush.msrb.mxu0 %v4265_v8  ;;  %2361 = vmatpush.msrb.mxu1 %v4266_v40  ;;  %v2377_v25 = vrot.slane %v9066_v43, 3  ;;  %v4273_v8 = vld [vmem:[#allocation3 + $0x38] sm:$0xff]  ;;  %v4274_v40 = vld [vmem:[#allocation3 + $0x168] sm:$0xff] }
 0x614   :  { %2394 = vmatpush.msrb.mxu2 %v9058_v2  ;;  %2411 = vmatpush.msrb.mxu3 %v9059_v7  ;;  %v9067_v2 = vld [vmem:[#allocation56_spill] sm:$0xff]  ;;  %v9068_v7 = vld [vmem:[#allocation98_spill] sm:$0xff] }
 0x615   :  { %2345 = vmatpush.msrb.mxu0 %v4267_v0  ;;  %2362 = vmatpush.msrb.mxu1 %v4268_v52  ;;  %v9069_v0 = vld [vmem:[#allocation36_spill] sm:$0xff] }
 0x616   :  { %2395 = vmatpush.msrb.mxu2 %v9060_v42  ;;  %2412 = vmatpush.msrb.mxu3 %v9061_v3  ;;  %v2376_v52 = vrot.slane %v9069_v0, 4  ;;  %v4275_v42 = vld [vmem:[#allocation3 + $0x28] sm:$0xff]  ;;  %v4276_v3 = vld [vmem:[#allocation3 + $0x158] sm:$0xff] }
 0x617   :  { %2346 = vmatpush.msrb.mxu0 %v4269_v37  ;;  %2363 = vmatpush.msrb.mxu1 %v4270_v26  ;;  %v9070_v37 = vld [vmem:[#allocation58_spill] sm:$0xff]  ;;  %v9071_v26 = vld [vmem:[#allocation107_spill] sm:$0xff] }
 0x618   :  { %2396 = vmatpush.msrb.mxu2 %v9062_v39  ;;  %2413 = vmatpush.msrb.mxu3 %v9063_v54  ;;  %v7681_v39 = vsel %vm614_vm1, %v2377_v25, %v2376_v52  ;;  %v4277_v54 = vld [vmem:[#allocation3 + $0x18] sm:$0xff]  ;;  %v9119_v0 = vld [vmem:[#allocation239_spill] sm:$0xff] }
 0x619   :  { %2347 = vmatpush.msrb.mxu0 %v4271_v1  ;;  %2364 = vmatpush.msrb.mxu1 %v4272_v55  ;;  %v9072_v1 = vld [vmem:[#allocation51_spill] sm:$0xff]  ;;  %v9073_v55 = vld [vmem:[#allocation42_spill] sm:$0xff]  ;;  %v9077_v25 = vld [vmem:[#allocation37_spill] sm:$0xff] }
 0x61a   :  { %2397 = vmatpush.msrb.mxu2 %v9064_v29  ;;  %2414 = vmatpush.msrb.mxu3 %v9065_v31  ;;  %v9074_v29 = vld [vmem:[#allocation39_spill] sm:$0xff]  ;;  %v2379_v52 = vrot.slane %v9077_v25, 4 }
 0x61b   :  { %2348 = vmatpush.msrb.mxu0 %v4273_v8  ;;  %2365 = vmatpush.msrb.mxu1 %v4274_v40  ;;  %v2380_v31 = vrot.slane %v9074_v29, 3  ;;  %v4278_v8 = vld [vmem:[#allocation3 + $0x148] sm:$0xff] }
 0x61c   :  { %2398 = vmatpush.msrb.mxu2 %v9067_v2  ;;  %2415 = vmatpush.msrb.mxu3 %v9068_v7  ;;  %v4279_v40 = vld [vmem:[#allocation3 + $0x8] sm:$0xff]  ;;  %v9075_v2 = vld [vmem:[#allocation53_spill] sm:$0xff] }
 0x61d   :  { %2349 = vmatpush.msrb.mxu0 %v4275_v42  ;;  %2366 = vmatpush.msrb.mxu1 %v4276_v3  ;;  %v9076_v7 = vld [vmem:[#allocation112_spill] sm:$0xff]  ;;  %v4280_v42 = vld [vmem:[#allocation3 + $0x138] sm:$0xff]  ;;  %v9078_v3 = vld [vmem:[#allocation55_spill] sm:$0xff] }
 0x61e   :  { %2399 = vmatpush.msrb.mxu2 %v9070_v37  ;;  %2416 = vmatpush.msrb.mxu3 %v9071_v26  ;;  %v9079_v37 = vld [vmem:[#allocation52_spill] sm:$0xff]  ;;  %v7693_v26 = vsel %vm614_vm1, %v2380_v31, %v2379_v52  ;;  %v9085_v31 = vld [vmem:[#allocation50_spill] sm:$0xff]  ;;  %v9086_v52 = vld [vmem:[#allocation101_spill] sm:$0xff] }
 0x61f   :  { %2400 = vmatmul.f32.vlgmr.msrb.gmra.mxu2 %v7681_v39  ;;  %2350 = vmatpush.msrb.mxu0 %v4277_v54  ;;  %v4281_v54 = vld [vmem:[#allocation3 + $0x128] sm:$0xff] }
 0x620   :  { %2472 = vmatpush.msra.mxu2 %v9072_v1  ;;  %2417 = vmatpush.msrb.mxu3 %v9073_v55  ;;  %v9080_v1 = vld [vmem:[#allocation57_spill] sm:$0xff]  ;;  %v9081_v55 = vld [vmem:[#allocation110_spill] sm:$0xff] }
 0x621   :  { %2367 = vmatpush.msrb.mxu1 %v4278_v8  ;;  %2351 = vmatpush.msrb.mxu0 %v4279_v40  ;;  %v4282_v8 = vld [vmem:[#allocation3 + $0x118] sm:$0xff] }
 0x622   :  { %2473 = vmatpush.msra.mxu2 %v9075_v2  ;;  %2418 = vmatpush.msrb.mxu3 %v9076_v7  ;;  %v9082_v40 = vld [vmem:[#allocation61_spill] sm:$0xff]  ;;  %v9083_v2 = vld [vmem:[#allocation111_spill] sm:$0xff] }
 0x623   :  { %2368 = vmatpush.msrb.mxu1 %v4280_v42  ;;  %v4283_v7 = vld [vmem:[#allocation3 + $0x108] sm:$0xff] }
 0x624   :  { %2474 = vmatpush.msra.mxu2 %v9078_v3  ;;  %2419 = vmatpush.msrb.mxu3 %v9079_v37  ;;  %v9084_v42 = vld [vmem:[#allocation63_spill] sm:$0xff]  ;;  %v9087_v3 = vld [vmem:[#allocation60_spill] sm:$0xff]  ;;  %v9088_v37 = vld [vmem:[#allocation102_spill] sm:$0xff] }
 0x625   :  { %2420 = vmatmul.f32.vlgmr.msrb.gmra.mxu3 %v7693_v26  ;;  %2369 = vmatpush.msrb.mxu1 %v4281_v54  ;;  %v9089_v54 = vld [vmem:[#allocation62_spill] sm:$0xff] }
 0x626   :  { %2475 = vmatpush.msra.mxu2 %v9080_v1  ;;  %2492 = vmatpush.msra.mxu3 %v9081_v55  ;;  %v9090_v1 = vld [vmem:[#allocation103_spill] sm:$0xff]  ;;  %v9091_v55 = vld [vmem:[#allocation64_spill] sm:$0xff] }
 0x627   :  { %2370 = vmatpush.msrb.mxu1 %v4282_v8  ;;  %v9092_v8 = vld [vmem:[#allocation104_spill] sm:$0xff] }
 0x628   :  { %2476 = vmatpush.msra.mxu2 %v9082_v40  ;;  %2493 = vmatpush.msra.mxu3 %v9083_v2  ;;  %v9093_v40 = vld [vmem:[#allocation59_spill] sm:$0xff]  ;;  %v9094_v2 = vld [vmem:[#allocation213_spill] sm:$0xff] }
 0x629   :  { %2371 = vmatpush.msrb.mxu1 %v4283_v7  ;;  %v4284_v7 = vld [vmem:[#allocation6 + $0x180] sm:$0xff] }
 0x62a   :  { %2477 = vmatpush.msra.mxu2 %v9084_v42  ;;  %2494 = vmatpush.msra.mxu3 %v9085_v31  ;;  %v9095_v42 = vld [vmem:[#allocation215_spill] sm:$0xff]  ;;  %v4285_v31 = vld [vmem:[#allocation6 + $0x170] sm:$0xff] }
 0x62c   :  { %2478 = vmatpush.msra.mxu2 %v9086_v52  ;;  %2495 = vmatpush.msra.mxu3 %v9087_v3  ;;  %v9096_v52 = vld [vmem:[#allocation217_spill] sm:$0xff]  ;;  %v4286_v3 = vld [vmem:[#allocation6 + $0x160] sm:$0xff] }
 0x62e   :  { %2479 = vmatpush.msra.mxu2 %v9088_v37  ;;  %2496 = vmatpush.msra.mxu3 %v9089_v54  ;;  %v9097_v37 = vld [vmem:[#allocation44_spill] sm:$0xff] }
 0x62f   :  { %v4287_v54 = vld [vmem:[#allocation6 + $0x150] sm:$0xff] }
 0x630   :  { %2480 = vmatpush.msra.mxu2 %v9090_v1  ;;  %2497 = vmatpush.msra.mxu3 %v9091_v55  ;;  %v9098_v1 = vld [vmem:[#allocation220_spill] sm:$0xff]  ;;  %v4288_v55 = vld [vmem:[#allocation6 + $0x140] sm:$0xff] }
 0x632   :  { %2481 = vmatpush.msra.mxu2 %v9092_v8  ;;  %2498 = vmatpush.msra.mxu3 %v9093_v40  ;;  %v9099_v8 = vld [vmem:[#allocation222_spill] sm:$0xff]  ;;  %v9100_v40 = vld [vmem:[#allocation105_spill] sm:$0xff] }
 0x634   :  { %2482 = vmatpush.msra.mxu2 %v9094_v2  ;;  %2499 = vmatpush.msra.mxu3 %v4284_v7  ;;  %v9101_v2 = vld [vmem:[#allocation46_spill] sm:$0xff] }
 0x635   :  { %v9102_v7 = vld [vmem:[#allocation214_spill] sm:$0xff] }
 0x636   :  { %2483 = vmatpush.msra.mxu2 %v9095_v42  ;;  %2500 = vmatpush.msra.mxu3 %v4285_v31  ;;  %v9103_v42 = vld [vmem:[#allocation45_spill] sm:$0xff]  ;;  %v9104_v31 = vld [vmem:[#allocation216_spill] sm:$0xff] }
 0x638   :  { %2484 = vmatpush.msra.mxu2 %v9096_v52  ;;  %2501 = vmatpush.msra.mxu3 %v4286_v3  ;;  %v9105_v52 = vld [vmem:[#allocation225_spill] sm:$0xff]  ;;  %v9106_v3 = vld [vmem:[#allocation218_spill] sm:$0xff] }
 0x63a   :  { %2485 = vmatpush.msra.mxu2 %v9097_v37  ;;  %2502 = vmatpush.msra.mxu3 %v4287_v54  ;;  %v9107_v37 = vld [vmem:[#allocation227_spill] sm:$0xff] }
 0x63b   :  { %v9108_v54 = vld [vmem:[#allocation47_spill] sm:$0xff] }
 0x63c   :  { %2486 = vmatpush.msra.mxu2 %v9098_v1  ;;  %2503 = vmatpush.msra.mxu3 %v4288_v55  ;;  %v9109_v1 = vld [vmem:[#allocation229_spill] sm:$0xff]  ;;  %v9110_v55 = vld [vmem:[#allocation219_spill] sm:$0xff] }
 0x63e   :  { %2487 = vmatpush.msra.mxu2 %v9099_v8  ;;  %2504 = vmatpush.msra.mxu3 %v9100_v40  ;;  %v9111_v8 = vld [vmem:[#allocation231_spill] sm:$0xff]  ;;  %v9112_v40 = vld [vmem:[#allocation221_spill] sm:$0xff] }
 0x63f   :  { %2488 = vmatmul.f32.vlgmr.msra.gmra.mxu2 %v9101_v2 }
 0x640   :  { %2505 = vmatpush.msra.mxu3 %v9102_v7  ;;  %2558 = vmatpush.msrb.mxu2 %v9103_v42  ;;  %v9113_v7 = vld [vmem:[#allocation233_spill] sm:$0xff]  ;;  %v9114_v42 = vld [vmem:[#allocation223_spill] sm:$0xff] }
 0x642   :  { %2506 = vmatpush.msra.mxu3 %v9104_v31  ;;  %2559 = vmatpush.msrb.mxu2 %v9105_v52  ;;  %v9115_v31 = vld [vmem:[#allocation235_spill] sm:$0xff]  ;;  %v9116_v52 = vld [vmem:[#allocation224_spill] sm:$0xff] }
 0x644   :  { %2507 = vmatpush.msra.mxu3 %v9106_v3  ;;  %2560 = vmatpush.msrb.mxu2 %v9107_v37  ;;  %v9117_v3 = vld [vmem:[#allocation237_spill] sm:$0xff]  ;;  %v9118_v37 = vld [vmem:[#allocation226_spill] sm:$0xff] }
 0x645   :  { %2508 = vmatmul.f32.vlgmr.msra.gmra.mxu3 %v9108_v54 }
 0x646   :  { %2561 = vmatpush.msrb.mxu2 %v9109_v1  ;;  %2578 = vmatpush.msrb.mxu3 %v9110_v55  ;;  %v9120_v1 = vld [vmem:[#allocation228_spill] sm:$0xff]  ;;  %v9121_v55 = vld [vmem:[#allocation241_spill] sm:$0xff] }
 0x648   :  { %2562 = vmatpush.msrb.mxu2 %v9111_v8  ;;  %2579 = vmatpush.msrb.mxu3 %v9112_v40  ;;  %v9122_v8 = vld [vmem:[#allocation230_spill] sm:$0xff]  ;;  %v9123_v40 = vld [vmem:[#allocation243_spill] sm:$0xff] }
 0x64a   :  { %2563 = vmatpush.msrb.mxu2 %v9113_v7  ;;  %2580 = vmatpush.msrb.mxu3 %v9114_v42  ;;  %v9124_v7 = vld [vmem:[#allocation232_spill] sm:$0xff]  ;;  %v9125_v42 = vld [vmem:[#allocation245_spill] sm:$0xff] }
 0x64c   :  { %2564 = vmatpush.msrb.mxu2 %v9115_v31  ;;  %2581 = vmatpush.msrb.mxu3 %v9116_v52  ;;  %v9126_v31 = vld [vmem:[#allocation234_spill] sm:$0xff]  ;;  %v9127_v52 = vld [vmem:[#allocation247_spill] sm:$0xff] }
 0x64e   :  { %2565 = vmatpush.msrb.mxu2 %v9117_v3  ;;  %2582 = vmatpush.msrb.mxu3 %v9118_v37  ;;  %v9128_v3 = vld [vmem:[#allocation236_spill] sm:$0xff]  ;;  %v9129_v37 = vld [vmem:[#allocation250_spill] sm:$0xff] }
 0x650   :  { %2566 = vmatpush.msrb.mxu2 %v9119_v0  ;;  %2583 = vmatpush.msrb.mxu3 %v9120_v1  ;;  %v9130_v0 = vld [vmem:[#allocation238_spill] sm:$0xff]  ;;  %v9131_v1 = vld [vmem:[#allocation252_spill] sm:$0xff] }
 0x652   :  { %2567 = vmatpush.msrb.mxu2 %v9121_v55  ;;  %2584 = vmatpush.msrb.mxu3 %v9122_v8  ;;  %v9132_v55 = vld [vmem:[#allocation240_spill] sm:$0xff]  ;;  %v9133_v8 = vld [vmem:[#allocation254_spill] sm:$0xff] }
 0x654   :  { %2568 = vmatpush.msrb.mxu2 %v9123_v40  ;;  %2585 = vmatpush.msrb.mxu3 %v9124_v7  ;;  %v9134_v40 = vld [vmem:[#allocation242_spill] sm:$0xff]  ;;  %v9135_v7 = vld [vmem:[#allocation255_spill] sm:$0xff] }
 0x656   :  { %2569 = vmatpush.msrb.mxu2 %v9125_v42  ;;  %2586 = vmatpush.msrb.mxu3 %v9126_v31  ;;  %v9136_v42 = vld [vmem:[#allocation244_spill] sm:$0xff]  ;;  %v9137_v31 = vld [vmem:[#allocation257_spill] sm:$0xff] }
 0x658   :  { %2570 = vmatpush.msrb.mxu2 %v9127_v52  ;;  %2587 = vmatpush.msrb.mxu3 %v9128_v3  ;;  %v9138_v52 = vld [vmem:[#allocation246_spill] sm:$0xff]  ;;  %v9139_v3 = vld [vmem:[#allocation259_spill] sm:$0xff] }
 0x65a   :  { %2571 = vmatpush.msrb.mxu2 %v9129_v37  ;;  %2588 = vmatpush.msrb.mxu3 %v9130_v0  ;;  %v9140_v37 = vld [vmem:[#allocation248_spill] sm:$0xff]  ;;  %v9141_v0 = vld [vmem:[#allocation249_spill] sm:$0xff] }
 0x65c   :  { %2572 = vmatpush.msrb.mxu2 %v9131_v1  ;;  %2589 = vmatpush.msrb.mxu3 %v9132_v55  ;;  %v9142_v1 = vld [vmem:[#allocation261_spill] sm:$0xff]  ;;  %v9143_v55 = vld [vmem:[#allocation251_spill] sm:$0xff] }
 0x65e   :  { %2573 = vmatpush.msrb.mxu2 %v9133_v8  ;;  %2590 = vmatpush.msrb.mxu3 %v9134_v40  ;;  %v9144_v8 = vld [vmem:[#allocation263_spill] sm:$0xff]  ;;  %v9145_v40 = vld [vmem:[#allocation253_spill] sm:$0xff] }
 0x660   :  { %2640 = vmatpush.msra.mxu2 %v9135_v7  ;;  %2591 = vmatpush.msrb.mxu3 %v9136_v42  ;;  %v9146_v7 = vld [vmem:[#allocation265_spill] sm:$0xff]  ;;  %v9147_v42 = vld [vmem:[#allocation256_spill] sm:$0xff] }
 0x662   :  { %2641 = vmatpush.msra.mxu2 %v9137_v31  ;;  %2592 = vmatpush.msrb.mxu3 %v9138_v52  ;;  %v9148_v31 = vld [vmem:[#allocation267_spill] sm:$0xff]  ;;  %v9149_v52 = vld [vmem:[#allocation258_spill] sm:$0xff] }
 0x664   :  { %2642 = vmatpush.msra.mxu2 %v9139_v3  ;;  %2593 = vmatpush.msrb.mxu3 %v9140_v37  ;;  %v9150_v3 = vld [vmem:[#allocation269_spill] sm:$0xff]  ;;  %v9151_v37 = vld [vmem:[#allocation260_spill] sm:$0xff] }
 0x666   :  { %2660 = vmatpush.msra.mxu3 %v9141_v0  ;;  %2643 = vmatpush.msra.mxu2 %v9142_v1  ;;  %v9152_v0 = vld [vmem:[#allocation271_spill] sm:$0xff]  ;;  %v9153_v1 = vld [vmem:[#allocation262_spill] sm:$0xff] }
 0x668   :  { %2661 = vmatpush.msra.mxu3 %v9143_v55  ;;  %2644 = vmatpush.msra.mxu2 %v9144_v8  ;;  %v9154_v55 = vld [vmem:[#allocation273_spill] sm:$0xff]  ;;  %v9155_v8 = vld [vmem:[#allocation264_spill] sm:$0xff] }
 0x66a   :  { %2662 = vmatpush.msra.mxu3 %v9145_v40  ;;  %2645 = vmatpush.msra.mxu2 %v9146_v7  ;;  %v9156_v40 = vld [vmem:[#allocation275_spill] sm:$0xff]  ;;  %v9157_v7 = vld [vmem:[#allocation266_spill] sm:$0xff] }
 0x66c   :  { %2663 = vmatpush.msra.mxu3 %v9147_v42  ;;  %2646 = vmatpush.msra.mxu2 %v9148_v31  ;;  %v9158_v42 = vld [vmem:[#allocation277_spill] sm:$0xff]  ;;  %v9159_v31 = vld [vmem:[#allocation268_spill] sm:$0xff] }
 0x66e   :  { %2664 = vmatpush.msra.mxu3 %v9149_v52  ;;  %2647 = vmatpush.msra.mxu2 %v9150_v3  ;;  %v9160_v52 = vld [vmem:[#allocation279_spill] sm:$0xff]  ;;  %v9161_v3 = vld [vmem:[#allocation270_spill] sm:$0xff] }
 0x670   :  { %2665 = vmatpush.msra.mxu3 %v9151_v37  ;;  %2648 = vmatpush.msra.mxu2 %v9152_v0  ;;  %v9162_v37 = vld [vmem:[#allocation281_spill] sm:$0xff]  ;;  %v9163_v0 = vld [vmem:[#allocation272_spill] sm:$0xff] }
 0x672   :  { %2666 = vmatpush.msra.mxu3 %v9153_v1  ;;  %2649 = vmatpush.msra.mxu2 %v9154_v55  ;;  %v9164_v1 = vld [vmem:[#allocation274_spill] sm:$0xff] }
 0x674   :  { %2667 = vmatpush.msra.mxu3 %v9155_v8  ;;  %2650 = vmatpush.msra.mxu2 %v9156_v40  ;;  %v9165_v8 = vld [vmem:[#allocation276_spill] sm:$0xff] }
 0x676   :  { %2668 = vmatpush.msra.mxu3 %v9157_v7  ;;  %2651 = vmatpush.msra.mxu2 %v9158_v42  ;;  %v9166_v7 = vld [vmem:[#allocation278_spill] sm:$0xff] }
 0x678   :  { %2669 = vmatpush.msra.mxu3 %v9159_v31  ;;  %2652 = vmatpush.msra.mxu2 %v9160_v52  ;;  %v9167_v52 = vld [vmem:[#allocation280_spill] sm:$0xff] }
 0x67a   :  { %2670 = vmatpush.msra.mxu3 %v9161_v3  ;;  %2653 = vmatpush.msra.mxu2 %v9162_v37 }
 0x67c   :  { %2671 = vmatpush.msra.mxu3 %v9163_v0  ;;  %2654 = vmatpush.msra.mxu2 %v7255_v60  ;;  %v2183_v55 = vpop.f32.mrf.mxu0 }
 0x67d   :  { %v2184_v40 = vadd.f32 %v2183_v55, %v6129_v63  ;;  %v4290_v55 = vld [vmem:[%s8507_s28 + $0xe8] sm:$0xff]  ;;  %v4346_v63 = vld [vmem:[#allocation6 + $0x18] sm:$0xff] }
 0x67e   :  { %2672 = vmatpush.msra.mxu3 %v9164_v1  ;;  %2655 = vmatpush.msra.mxu2 %v7259_v38  ;;  %v4289_v38 = vld [vmem:[%s8507_s28 + $0xf8] sm:$0xff] }
 0x680   :  { %2673 = vmatpush.msra.mxu3 %v9165_v8 }
 0x682   :  { %2674 = vmatpush.msra.mxu3 %v9166_v7  ;;  %v2203_v42 = vpop.f32.mrf.mxu1  ;;  %v2223_v3 = vpop.f32.mrf.mxu2  ;;  %v4292_v7 = vld [vmem:[%s8507_s28 + $0xc8] sm:$0xff] }
 0x683   :  { %v2204_v31 = vadd.f32 %v2203_v42, %v2184_v40  ;;  %v2224_v37 = vadd.f32 %v2223_v3, %v6138_v32  ;;  %v4291_v40 = vld [vmem:[%s8507_s28 + $0xd8] sm:$0xff]  ;;  %v4296_v3 = vld [vmem:[%s8507_s28 + $0xa8] sm:$0xff] }
 0x684   :  { %2675 = vmatpush.msra.mxu3 %v9167_v52  ;;  %v4293_v42 = vld [vmem:[%s8507_s28 + $0x1f8] sm:$0xff]  ;;  %v4295_v52 = vld [vmem:[%s8507_s28 + $0x1e8] sm:$0xff] }
 0x685   :  { %3793 = vtanh.f32 %v2204_v31  ;;  %v4294_v31 = vld [vmem:[%s8507_s28 + $0xb8] sm:$0xff] }
 0x688   :  { %v2243_v60 = vpop.f32.mrf.mxu3 }
 0x689   :  { %v2244_v0 = vadd.f32 %v2243_v60, %v2224_v37  ;;  %v4297_v37 = vld [vmem:[%s8507_s28 + $0x1d8] sm:$0xff]  ;;  %v4299_v60 = vld [vmem:[%s8507_s28 + $0x1c8] sm:$0xff] }
 0x68b   :  { %v3794_v1 = vpop.eup %3793  ;;  %3795 = vtanh.f32 %v2244_v0  ;;  %v4300_v0 = vld [vmem:[%s8507_s28 + $0x88] sm:$0xff] }
 0x68c   :  { %2264 = vmatmul.f32.vlgmr.msra.gmra.mxu0 %v3794_v1  ;;  %v4301_v1 = vld [vmem:[%s8507_s28 + $0x1b8] sm:$0xff] }
 0x68d   :  { %2424 = vmatpush.msra.mxu0 %v4289_v38  ;;  %v4302_v38 = vld [vmem:[%s8507_s28 + $0x78] sm:$0xff] }
 0x68f   :  { %2425 = vmatpush.msra.mxu0 %v4290_v55  ;;  %v4303_v55 = vld [vmem:[%s8507_s28 + $0x1a8] sm:$0xff] }
 0x691   :  { %v3796_v8 = vpop.eup %3795  ;;  %2426 = vmatpush.msra.mxu0 %v4291_v40  ;;  %v4306_v40 = vld [vmem:[%s8507_s28 + $0x58] sm:$0xff] }
 0x692   :  { %2284 = vmatmul.f32.vlgmr.msra.gmra.mxu1 %v3796_v8  ;;  %v4305_v8 = vld [vmem:[%s8507_s28 + $0x198] sm:$0xff] }
 0x693   :  { %2427 = vmatpush.msra.mxu0 %v4292_v7  ;;  %2444 = vmatpush.msra.mxu1 %v4293_v42  ;;  %v4307_v7 = vld [vmem:[%s8507_s28 + $0x188] sm:$0xff] }
 0x694   :  { %2352 = vmatmul.f32.vlgmr.msrb.gmra.mxu0 %v7637_v30  ;;  %v4298_v30 = vld [vmem:[%s8507_s28 + $0x98] sm:$0xff]  ;;  %v4308_v42 = vld [vmem:[%s8507_s28 + $0x48] sm:$0xff] }
 0x695   :  { %2428 = vmatpush.msra.mxu0 %v4294_v31  ;;  %2445 = vmatpush.msra.mxu1 %v4295_v52  ;;  %v4309_v31 = vld [vmem:[%s8507_s28 + $0x178] sm:$0xff] }
 0x696   :  { %v4310_v52 = vld [vmem:[%s8507_s28 + $0x38] sm:$0xff] }
 0x697   :  { %2429 = vmatpush.msra.mxu0 %v4296_v3  ;;  %2446 = vmatpush.msra.mxu1 %v4297_v37  ;;  %v4311_v3 = vld [vmem:[%s8507_s28 + $0x168] sm:$0xff] }
 0x698   :  { %v4312_v37 = vld [vmem:[%s8507_s28 + $0x28] sm:$0xff] }
 0x699   :  { %2430 = vmatpush.msra.mxu0 %v4298_v30  ;;  %2447 = vmatpush.msra.mxu1 %v4299_v60  ;;  %v4313_v30 = vld [vmem:[%s8507_s28 + $0x158] sm:$0xff] }
 0x69a   :  { %2372 = vmatmul.f32.vlgmr.msrb.gmra.mxu1 %v7655_v36  ;;  %v4304_v36 = vld [vmem:[%s8507_s28 + $0x68] sm:$0xff]  ;;  %v4314_v60 = vld [vmem:[%s8507_s28 + $0x18] sm:$0xff] }
 0x69b   :  { %2431 = vmatpush.msra.mxu0 %v4300_v0  ;;  %2448 = vmatpush.msra.mxu1 %v4301_v1  ;;  %v4315_v0 = vld [vmem:[%s8507_s28 + $0x148] sm:$0xff] }
 0x69c   :  { %v4316_v1 = vld [vmem:[%s8507_s28 + $0x8] sm:$0xff] }
 0x69d   :  { %2432 = vmatpush.msra.mxu0 %v4302_v38  ;;  %2449 = vmatpush.msra.mxu1 %v4303_v55  ;;  %v4317_v38 = vld [vmem:[%s8507_s28 + $0x138] sm:$0xff] }
 0x69e   :  { %v4318_v55 = vld [vmem:[#allocation6 + $0xf8] sm:$0xff] }
 0x69f   :  { %2433 = vmatpush.msra.mxu0 %v4304_v36  ;;  %2450 = vmatpush.msra.mxu1 %v4305_v8  ;;  %v4319_v36 = vld [vmem:[%s8507_s28 + $0x128] sm:$0xff] }
 0x6a0   :  { %v4320_v8 = vld [vmem:[#allocation6 + $0xe8] sm:$0xff] }
 0x6a1   :  { %2434 = vmatpush.msra.mxu0 %v4306_v40  ;;  %2451 = vmatpush.msra.mxu1 %v4307_v7  ;;  %v4321_v40 = vld [vmem:[%s8507_s28 + $0x118] sm:$0xff] }
 0x6a2   :  { %v4322_v7 = vld [vmem:[#allocation6 + $0xd8] sm:$0xff] }
 0x6a3   :  { %2435 = vmatpush.msra.mxu0 %v4308_v42  ;;  %2452 = vmatpush.msra.mxu1 %v4309_v31  ;;  %v4324_v42 = vld [vmem:[#allocation6 + $0xc8] sm:$0xff]  ;;  %v4325_v31 = vld [vmem:[#allocation6 + $0x1f8] sm:$0xff] }
 0x6a5   :  { %2436 = vmatpush.msra.mxu0 %v4310_v52  ;;  %2453 = vmatpush.msra.mxu1 %v4311_v3  ;;  %v4326_v52 = vld [vmem:[#allocation6 + $0xb8] sm:$0xff]  ;;  %v4327_v3 = vld [vmem:[#allocation6 + $0x1e8] sm:$0xff] }
 0x6a7   :  { %2437 = vmatpush.msra.mxu0 %v4312_v37  ;;  %2454 = vmatpush.msra.mxu1 %v4313_v30  ;;  %v4328_v37 = vld [vmem:[#allocation6 + $0xa8] sm:$0xff]  ;;  %v4329_v30 = vld [vmem:[#allocation6 + $0x1d8] sm:$0xff] }
 0x6a9   :  { %2438 = vmatpush.msra.mxu0 %v4314_v60  ;;  %2455 = vmatpush.msra.mxu1 %v4315_v0  ;;  %v2313_v60 = vpop.f32.mrf.mxu2  ;;  %v2333_v0 = vpop.f32.mrf.mxu3 }
 0x6ab   :  { %2439 = vmatpush.msra.mxu0 %v4316_v1  ;;  %2456 = vmatpush.msra.mxu1 %v4317_v38  ;;  %v4330_v1 = vld [vmem:[#allocation6 + $0x98] sm:$0xff]  ;;  %v4331_v38 = vld [vmem:[#allocation6 + $0x1c8] sm:$0xff] }
 0x6ac   :  { %2440 = vmatmul.f32.vlgmr.msra.gmra.mxu0 %v7681_v39  ;;  %v4323_v39 = vld [vmem:[%s8507_s28 + $0x108] sm:$0xff] }
 0x6ad   :  { %2512 = vmatpush.msrb.mxu0 %v4318_v55  ;;  %2457 = vmatpush.msra.mxu1 %v4319_v36  ;;  %v4332_v55 = vld [vmem:[#allocation6 + $0x88] sm:$0xff]  ;;  %v4334_v36 = vld [vmem:[#allocation6 + $0x78] sm:$0xff] }
 0x6af   :  { %2513 = vmatpush.msrb.mxu0 %v4320_v8  ;;  %2458 = vmatpush.msra.mxu1 %v4321_v40  ;;  %v4335_v8 = vld [vmem:[#allocation6 + $0x1a8] sm:$0xff] }
 0x6b0   :  { %v4336_v40 = vld [vmem:[#allocation6 + $0x68] sm:$0xff] }
 0x6b1   :  { %2514 = vmatpush.msrb.mxu0 %v4322_v7  ;;  %2459 = vmatpush.msra.mxu1 %v4323_v39  ;;  %v4337_v7 = vld [vmem:[#allocation6 + $0x198] sm:$0xff]  ;;  %v2401_v39 = vpop.f32.mrf.mxu2 }
 0x6b2   :  { %2460 = vmatmul.f32.vlgmr.msra.gmra.mxu1 %v7693_v26  ;;  %v4333_v26 = vld [vmem:[#allocation6 + $0x1b8] sm:$0xff] }
 0x6b3   :  { %2515 = vmatpush.msrb.mxu0 %v4324_v42  ;;  %2532 = vmatpush.msrb.mxu1 %v4325_v31  ;;  %v2421_v42 = vpop.f32.mrf.mxu3  ;;  %v4338_v31 = vld [vmem:[#allocation6 + $0x58] sm:$0xff] }
 0x6b5   :  { %2516 = vmatpush.msrb.mxu0 %v4326_v52  ;;  %2533 = vmatpush.msrb.mxu1 %v4327_v3  ;;  %v4339_v52 = vld [vmem:[#allocation6 + $0x188] sm:$0xff] }
 0x6b6   :  { %v4340_v3 = vld [vmem:[#allocation6 + $0x48] sm:$0xff] }
 0x6b7   :  { %2517 = vmatpush.msrb.mxu0 %v4328_v37  ;;  %2534 = vmatpush.msrb.mxu1 %v4329_v30  ;;  %v4341_v37 = vld [vmem:[#allocation6 + $0x178] sm:$0xff]  ;;  %v2334_v30 = vadd.f32 %v2333_v0, %v2313_v60 }
 0x6b8   :  { %v4349_v60 = vld [vmem:[#allocation6 + $0x138] sm:$0xff] }
 0x6b9   :  { %2518 = vmatpush.msrb.mxu0 %v4330_v1  ;;  %2535 = vmatpush.msrb.mxu1 %v4331_v38  ;;  %v4342_v1 = vld [vmem:[#allocation6 + $0x38] sm:$0xff]  ;;  %v4343_v38 = vld [vmem:[#allocation6 + $0x168] sm:$0xff] }
 0x6bb   :  { %2519 = vmatpush.msrb.mxu0 %v4332_v55  ;;  %2536 = vmatpush.msrb.mxu1 %v4333_v26  ;;  %v2402_v55 = vadd.f32 %v2401_v39, %v2334_v30  ;;  %v4344_v26 = vld [vmem:[#allocation6 + $0x28] sm:$0xff]  ;;  %v4350_v39 = vld [vmem:[#allocation8 + $0xf8] sm:$0xff] }
 0x6bc   :  { %v4351_v30 = vld [vmem:[#allocation6 + $0x128] sm:$0xff] }
 0x6bd   :  { %2520 = vmatpush.msrb.mxu0 %v4334_v36  ;;  %2537 = vmatpush.msrb.mxu1 %v4335_v8  ;;  %v4345_v36 = vld [vmem:[#allocation6 + $0x158] sm:$0xff] }
 0x6bf   :  { %2521 = vmatpush.msrb.mxu0 %v4336_v40  ;;  %2538 = vmatpush.msrb.mxu1 %v4337_v7  ;;  %v2422_v7 = vadd.f32 %v2421_v42, %v2402_v55  ;;  %v4352_v42 = vld [vmem:[#allocation8 + $0xe8] sm:$0xff] }
 0x6c0   :  { %v4356_v55 = vld [vmem:[#allocation8 + $0xc8] sm:$0xff] }
 0x6c1   :  { %2522 = vmatpush.msrb.mxu0 %v4338_v31  ;;  %2539 = vmatpush.msrb.mxu1 %v4339_v52  ;;  %v4347_v52 = vld [vmem:[#allocation6 + $0x148] sm:$0xff] }
 0x6c2   :  { %v2489_v8 = vpop.f32.mrf.mxu2 }
 0x6c3   :  { %2523 = vmatpush.msrb.mxu0 %v4340_v3  ;;  %2540 = vmatpush.msrb.mxu1 %v4341_v37  ;;  %v4348_v37 = vld [vmem:[#allocation6 + $0x8] sm:$0xff] }
 0x6c5   :  { %2524 = vmatpush.msrb.mxu0 %v4342_v1  ;;  %2541 = vmatpush.msrb.mxu1 %v4343_v38  ;;  %v4353_v1 = vld [vmem:[#allocation6 + $0x118] sm:$0xff]  ;;  %v4355_v38 = vld [vmem:[#allocation6 + $0x108] sm:$0xff] }
 0x6c7   :  { %2525 = vmatpush.msrb.mxu0 %v4344_v26  ;;  %2542 = vmatpush.msrb.mxu1 %v4345_v36  ;;  %v4358_v26 = vld [vmem:[#allocation8 + $0xb8] sm:$0xff]  ;;  %v4359_v36 = vld [vmem:[#allocation8 + $0x1e8] sm:$0xff] }
 0x6c8   :  { %v2509_v40 = vpop.f32.mrf.mxu3 }
 0x6c9   :  { %v2510_v31 = vadd.f32 %v2509_v40, %v2489_v8  ;;  %2526 = vmatpush.msrb.mxu0 %v4346_v63  ;;  %2543 = vmatpush.msrb.mxu1 %v4347_v52  ;;  %v4354_v63 = vld [vmem:[#allocation8 + $0xd8] sm:$0xff]  ;;  %v4360_v8 = vld [vmem:[#allocation8 + $0xa8] sm:$0xff] }
 0x6ca   :  { %v4361_v40 = vld [vmem:[#allocation8 + $0x1d8] sm:$0xff] }
 0x6cb   :  { %v2552_v3 = vadd.f32 %v2510_v31, %v2422_v7  ;;  %2527 = vmatpush.msrb.mxu0 %v4348_v37  ;;  %2544 = vmatpush.msrb.mxu1 %v4349_v60  ;;  %v4362_v7 = vld [vmem:[#allocation8 + $0x98] sm:$0xff]  ;;  %v4363_v31 = vld [vmem:[#allocation8 + $0x1c8] sm:$0xff] }
 0x6cc   :  { %2528 = vmatmul.f32.vlgmr.msrb.gmra.mxu0 %v9101_v2  ;;  %v4357_v2 = vld [vmem:[#allocation8 + $0x1f8] sm:$0xff]  ;;  %v4367_v37 = vld [vmem:[#allocation8 + $0x1a8] sm:$0xff] }
 0x6cd   :  { %v2554_v0 = vadd.f32 %v2552_v3, %v8693_v19  ;;  %2598 = vmatpush.msra.mxu0 %v4350_v39  ;;  %2545 = vmatpush.msrb.mxu1 %v4351_v30  ;;  %v4365_v52 = vld [vmem:[#allocation8 + $0x1b8] sm:$0xff]  ;;  %v4368_v60 = vld [vmem:[#allocation8 + $0x68] sm:$0xff] }
 0x6ce   :  { %v4366_v3 = vld [vmem:[#allocation8 + $0x78] sm:$0xff]  ;;  %v4372_v39 = vld [vmem:[#allocation8 + $0x48] sm:$0xff] }
 0x6cf   :  { %3797 = vtanh.f32 %v2554_v0  ;;  %2599 = vmatpush.msra.mxu0 %v4352_v42  ;;  %2546 = vmatpush.msrb.mxu1 %v4353_v1  ;;  %v4370_v0 = vld [vmem:[#allocation8 + $0x58] sm:$0xff]  ;;  %v4376_v42 = vld [vmem:[#allocation8 + $0x28] sm:$0xff] }
 0x6d0   :  { %v4374_v30 = vld [vmem:[#allocation8 + $0x38] sm:$0xff] }
 0x6d1   :  { %2600 = vmatpush.msra.mxu0 %v4354_v63  ;;  %2547 = vmatpush.msrb.mxu1 %v4355_v38  ;;  %v4378_v1 = vld [vmem:[#allocation8 + $0x18] sm:$0xff]  ;;  %v4380_v63 = vld [vmem:[#allocation8 + $0x8] sm:$0xff] }
 0x6d2   :  { %2548 = vmatmul.f32.vlgmr.msrb.gmra.mxu1 %v9108_v54  ;;  %v4364_v54 = vld [vmem:[#allocation8 + $0x88] sm:$0xff]  ;;  %v4383_v38 = vld [vmem:[#allocation11 + $0xf8] sm:$0xff] }
 0x6d3   :  { %2601 = vmatpush.msra.mxu0 %v4356_v55  ;;  %2618 = vmatpush.msra.mxu1 %v4357_v2  ;;  %v4385_v55 = vld [vmem:[#allocation11 + $0xe8] sm:$0xff]  ;;  %v4387_v2 = vld [vmem:[#allocation11 + $0xd8] sm:$0xff] }
 0x6d5   :  { %v3798_v19 = vpop.eup %3797  ;;  %2602 = vmatpush.msra.mxu0 %v4358_v26  ;;  %2619 = vmatpush.msra.mxu1 %v4359_v36  ;;  %v4388_v26 = vld [vmem:[#allocation11 + $0x1f8] sm:$0xff] }
 0x6d6   :  { %2574 = vmatmul.f32.vlgmr.msrb.gmra.mxu2 %v3798_v19  ;;  %v4392_v36 = vld [vmem:[#allocation11 + $0x1d8] sm:$0xff] }
 0x6d7   :  { %2603 = vmatpush.msra.mxu0 %v4360_v8  ;;  %2620 = vmatpush.msra.mxu1 %v4361_v40  ;;  %v4394_v8 = vld [vmem:[#allocation11 + $0x1c8] sm:$0xff]  ;;  %v4395_v40 = vld [vmem:[#allocation11 + $0x98] sm:$0xff] }
 0x6d8   :  { %2722 = vmatpush.msrb.mxu2 %v7340_v28  ;;  %v4369_v28 = vld [vmem:[#allocation8 + $0x198] sm:$0xff] }
 0x6d9   :  { %2604 = vmatpush.msra.mxu0 %v4362_v7  ;;  %2621 = vmatpush.msra.mxu1 %v4363_v31  ;;  %v4396_v7 = vld [vmem:[#allocation11 + $0x1b8] sm:$0xff]  ;;  %v4398_v31 = vld [vmem:[#allocation11 + $0x1a8] sm:$0xff] }
 0x6da   :  { %2723 = vmatpush.msrb.mxu2 %v7349_v22  ;;  %v4371_v22 = vld [vmem:[#allocation8 + $0x188] sm:$0xff] }
 0x6db   :  { %2605 = vmatpush.msra.mxu0 %v4364_v54  ;;  %2622 = vmatpush.msra.mxu1 %v4365_v52  ;;  %v4399_v54 = vld [vmem:[#allocation11 + $0x78] sm:$0xff]  ;;  %v4401_v52 = vld [vmem:[#allocation11 + $0x68] sm:$0xff] }
 0x6dc   :  { %2724 = vmatpush.msrb.mxu2 %v7357_v9  ;;  %v4373_v9 = vld [vmem:[#allocation8 + $0x178] sm:$0xff] }
 0x6dd   :  { %2606 = vmatpush.msra.mxu0 %v4366_v3  ;;  %2623 = vmatpush.msra.mxu1 %v4367_v37  ;;  %v4402_v3 = vld [vmem:[#allocation11 + $0x188] sm:$0xff]  ;;  %v4404_v37 = vld [vmem:[#allocation11 + $0x178] sm:$0xff] }
 0x6de   :  { %2725 = vmatpush.msrb.mxu2 %v7365_v44  ;;  %v4375_v44 = vld [vmem:[#allocation8 + $0x168] sm:$0xff] }
 0x6df   :  { %2607 = vmatpush.msra.mxu0 %v4368_v60  ;;  %2624 = vmatpush.msra.mxu1 %v4369_v28  ;;  %v4405_v60 = vld [vmem:[#allocation11 + $0x48] sm:$0xff] }
 0x6e0   :  { %2726 = vmatpush.msrb.mxu2 %v7373_v57  ;;  %v4377_v57 = vld [vmem:[#allocation8 + $0x158] sm:$0xff]  ;;  %v4406_v28 = vld [vmem:[#allocation11 + $0x168] sm:$0xff] }
 0x6e1   :  { %2608 = vmatpush.msra.mxu0 %v4370_v0  ;;  %2625 = vmatpush.msra.mxu1 %v4371_v22  ;;  %v4407_v0 = vld [vmem:[#allocation11 + $0x38] sm:$0xff] }
 0x6e2   :  { %2727 = vmatpush.msrb.mxu2 %v7381_v21  ;;  %v4379_v21 = vld [vmem:[#allocation8 + $0x148] sm:$0xff]  ;;  %v4408_v22 = vld [vmem:[#allocation11 + $0x158] sm:$0xff] }
 0x6e3   :  { %2609 = vmatpush.msra.mxu0 %v4372_v39  ;;  %2626 = vmatpush.msra.mxu1 %v4373_v9  ;;  %v4409_v39 = vld [vmem:[#allocation11 + $0x28] sm:$0xff] }
 0x6e4   :  { %2728 = vmatpush.msrb.mxu2 %v7389_v51  ;;  %v4381_v51 = vld [vmem:[#allocation8 + $0x138] sm:$0xff]  ;;  %v4410_v9 = vld [vmem:[#allocation11 + $0x148] sm:$0xff] }
 0x6e5   :  { %2610 = vmatpush.msra.mxu0 %v4374_v30  ;;  %2627 = vmatpush.msra.mxu1 %v4375_v44  ;;  %v4411_v30 = vld [vmem:[#allocation11 + $0x18] sm:$0xff] }
 0x6e6   :  { %2729 = vmatpush.msrb.mxu2 %v7397_v61  ;;  %v4382_v61 = vld [vmem:[#allocation8 + $0x128] sm:$0xff]  ;;  %v4412_v44 = vld [vmem:[#allocation11 + $0x138] sm:$0xff] }
 0x6e7   :  { %2611 = vmatpush.msra.mxu0 %v4376_v42  ;;  %2628 = vmatpush.msra.mxu1 %v4377_v57  ;;  %v4413_v57 = vld [vmem:[#allocation11 + $0x8] sm:$0xff] }
 0x6e8   :  { %2730 = vmatpush.msrb.mxu2 %v7405_v58  ;;  %v4384_v58 = vld [vmem:[#allocation8 + $0x118] sm:$0xff] }
 0x6e9   :  { %2612 = vmatpush.msra.mxu0 %v4378_v1  ;;  %2629 = vmatpush.msra.mxu1 %v4379_v21  ;;  %v4414_v1 = vld [vmem:[#allocation11 + $0x128] sm:$0xff]  ;;  %v7907_v21 = vld [vmem:[#allocation2] ss:$0 sm:$0xff] }
 0x6ea   :  { %2731 = vmatpush.msrb.mxu2 %v7413_v48  ;;  %v4386_v48 = vld [vmem:[#allocation8 + $0x108] sm:$0xff] }
 0x6eb   :  { %2613 = vmatpush.msra.mxu0 %v4380_v63  ;;  %2630 = vmatpush.msra.mxu1 %v4381_v51  ;;  %v4416_v51 = vld [vmem:[#allocation11 + $0x118] sm:$0xff] }
 0x6ec   :  { %2614 = vmatmul.f32.vlgmr.msra.gmra.mxu0 %v3798_v19  ;;  %2732 = vmatpush.msrb.mxu2 %v7421_v10  ;;  %v4389_v10 = vld [vmem:[#allocation11 + $0xc8] sm:$0xff] }
 0x6ed   :  { %2631 = vmatpush.msra.mxu1 %v4382_v61  ;;  %2680 = vmatpush.msrb.mxu0 %v4383_v38  ;;  %v4390_v19 = vld [vmem:[#allocation11 + $0x1e8] sm:$0xff] }
 0x6ee   :  { %2733 = vmatpush.msrb.mxu2 %v7429_v15  ;;  %v4391_v15 = vld [vmem:[#allocation11 + $0xb8] sm:$0xff] }
 0x6ef   :  { %2632 = vmatpush.msra.mxu1 %v4384_v58  ;;  %2681 = vmatpush.msrb.mxu0 %v4385_v55  ;;  %v4417_v58 = vld [vmem:[#allocation11 + $0x108] sm:$0xff] }
 0x6f0   :  { %2734 = vmatpush.msrb.mxu2 %v7437_v17  ;;  %v4393_v17 = vld [vmem:[#allocation11 + $0xa8] sm:$0xff] }
 0x6f1   :  { %2633 = vmatpush.msra.mxu1 %v4386_v48  ;;  %2682 = vmatpush.msrb.mxu0 %v4387_v2 }
 0x6f2   :  { %2735 = vmatpush.msrb.mxu2 %v7445_v46  ;;  %v4397_v46 = vld [vmem:[#allocation11 + $0x88] sm:$0xff] }
 0x6f3   :  { %2700 = vmatpush.msrb.mxu1 %v4388_v26  ;;  %2683 = vmatpush.msrb.mxu0 %v4389_v10 }
 0x6f4   :  { %2736 = vmatpush.msrb.mxu2 %v7454_v4  ;;  %v4400_v4 = vld [vmem:[#allocation11 + $0x198] sm:$0xff] }
 0x6f5   :  { %2701 = vmatpush.msrb.mxu1 %v4390_v19  ;;  %2684 = vmatpush.msrb.mxu0 %v4391_v15 }
 0x6f6   :  { %2737 = vmatpush.msrb.mxu2 %v7462_v41  ;;  %v4403_v41 = vld [vmem:[#allocation11 + $0x58] sm:$0xff] }
 0x6f7   :  { %2702 = vmatpush.msrb.mxu1 %v4392_v36  ;;  %2685 = vmatpush.msrb.mxu0 %v4393_v17 }
 0x6f9   :  { %2703 = vmatpush.msrb.mxu1 %v4394_v8  ;;  %2686 = vmatpush.msrb.mxu0 %v4395_v40 }
 0x6fb   :  { %2704 = vmatpush.msrb.mxu1 %v4396_v7  ;;  %2687 = vmatpush.msrb.mxu0 %v4397_v46 }
 0x6fd   :  { %2705 = vmatpush.msrb.mxu1 %v4398_v31  ;;  %2688 = vmatpush.msrb.mxu0 %v4399_v54  ;;  %v2949_v31 = vld [vmem:[#allocation15 + $0x1f0] sm:$0xff]  ;;  %v2947_v54 = vld [vmem:[#allocation15 + $0x1e0] sm:$0xff] }
 0x6ff   :  { %2706 = vmatpush.msrb.mxu1 %v4400_v4  ;;  %2689 = vmatpush.msrb.mxu0 %v4401_v52  ;;  %v2917_v4 = vld [vmem:[#allocation15 + $0xf0] sm:$0xff]  ;;  %v2915_v52 = vld [vmem:[#allocation15 + $0xe0] sm:$0xff] }
 0x701   :  { %2707 = vmatpush.msrb.mxu1 %v4402_v3  ;;  %2690 = vmatpush.msrb.mxu0 %v4403_v41  ;;  %v2913_v3 = vld [vmem:[#allocation15 + $0xd0] sm:$0xff] }
 0x702   :  { %v2937_v41 = vld [vmem:[#allocation15 + $0x190] sm:$0xff] }
 0x703   :  { %2708 = vmatpush.msrb.mxu1 %v4404_v37  ;;  %2691 = vmatpush.msrb.mxu0 %v4405_v60  ;;  %v2935_v37 = vld [vmem:[#allocation15 + $0x180] sm:$0xff]  ;;  %v2933_v60 = vld [vmem:[#allocation15 + $0x170] sm:$0xff] }
 0x705   :  { %2709 = vmatpush.msrb.mxu1 %v4406_v28  ;;  %2692 = vmatpush.msrb.mxu0 %v4407_v0  ;;  %v2927_v28 = vld [vmem:[#allocation15 + $0x140] sm:$0xff]  ;;  %v2925_v0 = vld [vmem:[#allocation15 + $0x130] sm:$0xff] }
 0x707   :  { %2710 = vmatpush.msrb.mxu1 %v4408_v22  ;;  %2693 = vmatpush.msrb.mxu0 %v4409_v39  ;;  %v2897_v22 = vld [vmem:[#allocation15 + $0x50] sm:$0xff] }
 0x708   :  { %v2921_v39 = vld [vmem:[#allocation15 + $0x110] sm:$0xff] }
 0x709   :  { %2711 = vmatpush.msrb.mxu1 %v4410_v9  ;;  %2694 = vmatpush.msrb.mxu0 %v4411_v30  ;;  %v2265_v42 = vpop.f32.mrf.mxu0  ;;  %v2919_v9 = vld [vmem:[#allocation15 + $0x100] sm:$0xff]  ;;  %v2889_v30 = vld [vmem:[#allocation15 + $0x10] sm:$0xff] }
 0x70a   :  { %v2266_v63 = vadd.f32 %v7907_v21, %v2265_v42 }
 0x70b   :  { %2712 = vmatpush.msrb.mxu1 %v4412_v44  ;;  %2695 = vmatpush.msrb.mxu0 %v4413_v57  ;;  %v2887_v44 = vld [vmem:[#allocation15] sm:$0xff] }
 0x70d   :  { %2713 = vmatpush.msrb.mxu1 %v4414_v1  ;;  %2957 = vmatpush.msra.mxu0 %v2917_v4  ;;  %v2843_v4 = vld [vmem:[#allocation14 + $0xa0] sm:$0xff] }
 0x70f   :  { %2714 = vmatpush.msrb.mxu1 %v4416_v51  ;;  %v2285_v61 = vpop.f32.mrf.mxu1  ;;  %2958 = vmatpush.msra.mxu0 %v2915_v52  ;;  %v2869_v52 = vld [vmem:[#allocation14 + $0x170] sm:$0xff] }
 0x710   :  { %v2286_v38 = vadd.f32 %v2285_v61, %v2266_v63 }
 0x711   :  { %2715 = vmatpush.msrb.mxu1 %v4417_v58  ;;  %v2353_v55 = vpop.f32.mrf.mxu0  ;;  %2959 = vmatpush.msra.mxu0 %v2913_v3  ;;  %v2839_v3 = vld [vmem:[#allocation14 + $0x80] sm:$0xff] }
 0x712   :  { %2795 = vperm.xlu1 %3757, %v2286_v38  }
 0x717   :  { %v2373_v48 = vpop.f32.mrf.mxu1 }
 0x718   :  { %v2374_v10 = vadd.f32 %v2373_v48, %v2353_v55  ;;  %v2885_v55 = vld [vmem:[#allocation14 + $0x1f0] sm:$0xff] }
 0x729   :  { %v2441_v2 = vpop.f32.mrf.mxu0 }
 0x72a   :  { %v2442_v19 = vadd.f32 %v2441_v2, %v2374_v10  ;;  %v2883_v2 = vld [vmem:[#allocation14 + $0x1e0] sm:$0xff]  ;;  %v2953_v10 = vrot.slane %v9049_v20, 7  ;;  %v2951_v20 = vrot.slane %v8782_v6, 7 }
 0x72b   :  { %v2867_v6 = vld [vmem:[#allocation14 + $0x160] sm:$0xff] }
 0x72f   :  { %v2461_v26 = vpop.f32.mrf.mxu1 }
 0x730   :  { %v2462_v17 = vadd.f32 %v2461_v26, %v2442_v19  ;;  %v2881_v26 = vld [vmem:[#allocation14 + $0x1d0] sm:$0xff]  ;;  %v2879_v19 = vld [vmem:[#allocation14 + $0x1c0] sm:$0xff] }
 0x749   :  { %v2529_v15 = vpop.f32.mrf.mxu0 }
 0x74f   :  { %v2549_v36 = vpop.f32.mrf.mxu1 }
 0x750   :  { %v2550_v8 = vadd.f32 %v2549_v36, %v2529_v15  ;;  %v2877_v36 = vld [vmem:[#allocation14 + $0x1b0] sm:$0xff] }
 0x752   :  { %v2553_v40 = vadd.f32 %v2550_v8, %v2462_v17  ;;  %v7932_v17 = vsel %vm614_vm1, %v2953_v10, %v9051_v33  ;;  %v2849_v8 = vld [vmem:[#allocation14 + $0xd0] sm:$0xff]  ;;  %v7938_v33 = vsel %vm614_vm1, %v2951_v20, %v8784_v18  ;;  %v2835_v18 = vld [vmem:[#allocation14 + $0x60] sm:$0xff] }
 0x753   :  { %v3169_v10 = vld [vmem:[#allocation17 + $0x170] sm:$0xff]  ;;  %v3163_v20 = vld [vmem:[#allocation17 + $0x140] sm:$0xff] }
 0x754   :  { %v2555_v7 = vadd.f32 %v2553_v40, %v8769_v34  ;;  %v2945_v34 = vld [vmem:[#allocation15 + $0x1d0] sm:$0xff]  ;;  %v2875_v40 = vld [vmem:[#allocation14 + $0x1a0] sm:$0xff] }
 0x756   :  { %3799 = vtanh.f32 %v2555_v7  ;;  %v2847_v7 = vld [vmem:[#allocation14 + $0xc0] sm:$0xff] }
 0x759   :  { %v2575_v51 = vpop.f32.mrf.mxu2 }
 0x75a   :  { %v2576_v61 = vadd.f32 %v2575_v51, %v8772_v59  ;;  %v2851_v59 = vld [vmem:[#allocation14 + $0xe0] sm:$0xff] }
 0x75b   :  { %v3147_v51 = vld [vmem:[#allocation17 + $0xc0] sm:$0xff] }
 0x75c   :  { %v3800_v46 = vpop.eup %3799 }
 0x75d   :  { %2594 = vmatmul.f32.vlgmr.msrb.gmra.mxu3 %v3800_v46  ;;  %2634 = vmatmul.f32.vlgmr.msra.gmra.mxu1 %v3800_v46  ;;  %v2873_v46 = vld [vmem:[#allocation14 + $0x190] sm:$0xff] }
 0x75e   :  { %2742 = vmatpush.msrb.mxu3 %v7517_v24  ;;  %2977 = vmatpush.msra.mxu1 %v2949_v31  ;;  %v2943_v24 = vld [vmem:[#allocation15 + $0x1c0] sm:$0xff]  ;;  %v2845_v31 = vld [vmem:[#allocation14 + $0xb0] sm:$0xff] }
 0x760   :  { %2743 = vmatpush.msrb.mxu3 %v7524_v45  ;;  %2978 = vmatpush.msra.mxu1 %v2947_v54  ;;  %v2911_v45 = vld [vmem:[#allocation15 + $0xc0] sm:$0xff] }
 0x761   :  { %2960 = vmatpush.msra.mxu0 %v2911_v45  ;;  %v2871_v54 = vld [vmem:[#allocation14 + $0x180] sm:$0xff]  ;;  %v2837_v45 = vld [vmem:[#allocation14 + $0x70] sm:$0xff] }
 0x762   :  { %2744 = vmatpush.msrb.mxu3 %v7531_v53  ;;  %2979 = vmatpush.msra.mxu1 %v2945_v34  ;;  %v2941_v53 = vld [vmem:[#allocation15 + $0x1b0] sm:$0xff] }
 0x763   :  { %v2841_v34 = vld [vmem:[#allocation14 + $0x90] sm:$0xff] }
 0x764   :  { %2745 = vmatpush.msrb.mxu3 %v7538_v49  ;;  %2980 = vmatpush.msra.mxu1 %v2943_v24  ;;  %v2909_v49 = vld [vmem:[#allocation15 + $0xb0] sm:$0xff] }
 0x765   :  { %2961 = vmatpush.msra.mxu0 %v2909_v49  ;;  %v2865_v24 = vld [vmem:[#allocation14 + $0x150] sm:$0xff] }
 0x766   :  { %2746 = vmatpush.msrb.mxu3 %v7545_v16  ;;  %v2939_v16 = vld [vmem:[#allocation15 + $0x1a0] sm:$0xff]  ;;  %2981 = vmatpush.msra.mxu1 %v2941_v53  ;;  %v2861_v49 = vld [vmem:[#allocation14 + $0x130] sm:$0xff] }
 0x767   :  { %v2863_v53 = vld [vmem:[#allocation14 + $0x140] sm:$0xff] }
 0x768   :  { %2747 = vmatpush.msrb.mxu3 %v7552_v12  ;;  %v2907_v12 = vld [vmem:[#allocation15 + $0xa0] sm:$0xff]  ;;  %2982 = vmatpush.msra.mxu1 %v2939_v16  ;;  %v2833_v16 = vld [vmem:[#allocation14 + $0x50] sm:$0xff] }
 0x769   :  { %2962 = vmatpush.msra.mxu0 %v2907_v12  ;;  %v2615_v42 = vpop.f32.mrf.mxu0  ;;  %v2859_v12 = vld [vmem:[#allocation14 + $0x120] sm:$0xff] }
 0x76a   :  { %2748 = vmatpush.msrb.mxu3 %v7559_v47  ;;  %v2905_v47 = vld [vmem:[#allocation15 + $0x90] sm:$0xff]  ;;  %2983 = vmatpush.msra.mxu1 %v2937_v41  ;;  %v2616_v57 = vadd.f32 %v2615_v42, %v8771_v27  ;;  %v2831_v41 = vld [vmem:[#allocation14 + $0x40] sm:$0xff] }
 0x76b   :  { %2963 = vmatpush.msra.mxu0 %v2905_v47  ;;  %v2853_v27 = vld [vmem:[#allocation14 + $0xf0] sm:$0xff] }
 0x76c   :  { %2749 = vmatpush.msrb.mxu3 %v7566_v13  ;;  %v2903_v13 = vld [vmem:[#allocation15 + $0x80] sm:$0xff]  ;;  %2984 = vmatpush.msra.mxu1 %v2935_v37  ;;  %v2857_v47 = vld [vmem:[#allocation14 + $0x110] sm:$0xff]  ;;  %v3039_v37 = vrot.slane %v9074_v29, 7  ;;  %v3037_v29 = vrot.slane %v9066_v43, 7  ;;  %v2948_v43 = vld [vmem:[#allocation15 + $0x1e8] sm:$0xff] }
 0x76d   :  { %2964 = vmatpush.msra.mxu0 %v2903_v13  ;;  %v2829_v13 = vld [vmem:[#allocation14 + $0x30] sm:$0xff] }
 0x76e   :  { %2750 = vmatpush.msrb.mxu3 %v7573_v23  ;;  %v2931_v23 = vld [vmem:[#allocation15 + $0x160] sm:$0xff]  ;;  %2985 = vmatpush.msra.mxu1 %v2933_v60  ;;  %v3149_v42 = vld [vmem:[#allocation17 + $0xd0] sm:$0xff] }
 0x76f   :  { %v2855_v60 = vld [vmem:[#allocation14 + $0x100] sm:$0xff] }
 0x770   :  { %2751 = vmatpush.msrb.mxu3 %v7580_v50  ;;  %v2929_v50 = vld [vmem:[#allocation15 + $0x150] sm:$0xff]  ;;  %2986 = vmatpush.msra.mxu1 %v2931_v23 }
 0x771   :  { %v3185_v23 = vld [vmem:[#allocation17 + $0x1f0] sm:$0xff] }
 0x772   :  { %2752 = vmatpush.msrb.mxu3 %v7587_v14  ;;  %2987 = vmatpush.msra.mxu1 %v2929_v50  ;;  %v2901_v14 = vld [vmem:[#allocation15 + $0x70] sm:$0xff]  ;;  %v2827_v50 = vld [vmem:[#allocation14 + $0x20] sm:$0xff] }
 0x773   :  { %2965 = vmatpush.msra.mxu0 %v2901_v14  ;;  %v7944_v14 = vsel %vm614_vm1, %v3039_v37, %v9077_v25  ;;  %v2932_v37 = vld [vmem:[#allocation15 + $0x168] sm:$0xff] }
 0x774   :  { %2753 = vmatpush.msrb.mxu3 %v7594_v11  ;;  %2988 = vmatpush.msra.mxu1 %v2927_v28  ;;  %v2899_v11 = vld [vmem:[#allocation15 + $0x60] sm:$0xff] }
 0x775   :  { %2966 = vmatpush.msra.mxu0 %v2899_v11  ;;  %v3183_v28 = vld [vmem:[#allocation17 + $0x1e0] sm:$0xff]  ;;  %v2825_v11 = vld [vmem:[#allocation14 + $0x10] sm:$0xff] }
 0x776   :  { %2754 = vmatpush.msrb.mxu3 %v7601_v56  ;;  %2989 = vmatpush.msra.mxu1 %v2925_v0  ;;  %v2923_v56 = vld [vmem:[#allocation15 + $0x120] sm:$0xff]  ;;  %v3181_v0 = vld [vmem:[#allocation17 + $0x1d0] sm:$0xff] }
 0x777   :  { %2967 = vmatpush.msra.mxu0 %v2897_v22  ;;  %v2823_v22 = vld [vmem:[#allocation14] sm:$0xff] }
 0x778   :  { %2755 = vmatpush.msrb.mxu3 %v7608_v62  ;;  %2990 = vmatpush.msra.mxu1 %v2923_v56  ;;  %v2895_v62 = vld [vmem:[#allocation15 + $0x40] sm:$0xff]  ;;  %v3153_v56 = vld [vmem:[#allocation17 + $0xf0] sm:$0xff] }
 0x779   :  { %2968 = vmatpush.msra.mxu0 %v2895_v62  ;;  %v3179_v62 = vld [vmem:[#allocation17 + $0x1c0] sm:$0xff] }
 0x77a   :  { %2756 = vmatpush.msrb.mxu3 %v7615_v35  ;;  %2991 = vmatpush.msra.mxu1 %v2921_v39  ;;  %v2893_v35 = vld [vmem:[#allocation15 + $0x30] sm:$0xff]  ;;  %v9168_v39 = vld [vmem:[#allocation36_spill] sm:$0xff] }
 0x77b   :  { %2969 = vmatpush.msra.mxu0 %v2893_v35  ;;  %v7950_v25 = vsel %vm614_vm1, %v3037_v29, %v9168_v39  ;;  %v3151_v35 = vld [vmem:[#allocation17 + $0xe0] sm:$0xff]  ;;  %v2898_v29 = vld [vmem:[#allocation15 + $0x58] sm:$0xff]  ;;  %v2920_v39 = vld [vmem:[#allocation15 + $0x108] sm:$0xff] }
 0x77c   :  { %2757 = vmatpush.msrb.mxu3 %v7622_v5  ;;  %2992 = vmatpush.msra.mxu1 %v2919_v9  ;;  %v2891_v5 = vld [vmem:[#allocation15 + $0x20] sm:$0xff]  ;;  %v3177_v9 = vld [vmem:[#allocation17 + $0x1b0] sm:$0xff] }
 0x77d   :  { %2970 = vmatpush.msra.mxu0 %v2891_v5  ;;  %v2950_v5 = vld [vmem:[#allocation15 + $0x1f8] sm:$0xff] }
 0x77f   :  { %2971 = vmatpush.msra.mxu0 %v2889_v30  ;;  %v2918_v30 = vld [vmem:[#allocation15 + $0xf8] sm:$0xff] }
 0x781   :  { %2972 = vmatpush.msra.mxu0 %v2887_v44  ;;  %v2916_v44 = vld [vmem:[#allocation15 + $0xe8] sm:$0xff] }
 0x7da   :  { %v2635_v1 = vpop.f32.mrf.mxu1 }
 0x7db   :  { %v2636_v63 = vadd.f32 %v2635_v1, %v2616_v57  ;;  %v3175_v57 = vld [vmem:[#allocation17 + $0x1a0] sm:$0xff]  ;;  %v2946_v1 = vld [vmem:[#allocation15 + $0x1d8] sm:$0xff] }
 0x7dd   :  { %3801 = vtanh.f32 %v2636_v63  ;;  %v2914_v63 = vld [vmem:[#allocation15 + $0xd8] sm:$0xff] }
 0x7e0   :  { %v2595_v38 = vpop.f32.mrf.mxu3 }
 0x7e1   :  { %v2596_v58 = vadd.f32 %v2595_v38, %v2576_v61  ;;  %v3173_v61 = vld [vmem:[#allocation17 + $0x190] sm:$0xff]  ;;  %v2944_v38 = vld [vmem:[#allocation15 + $0x1c8] sm:$0xff] }
 0x7e3   :  { %v3802_v48 = vpop.eup %3801  ;;  %3803 = vtanh.f32 %v2596_v58  ;;  %v2912_v58 = vld [vmem:[#allocation15 + $0xc8] sm:$0xff] }
 0x7e4   :  { %2676 = vmatmul.f32.vlgmr.msra.gmra.mxu3 %v3802_v48  ;;  %2716 = vmatmul.f32.vlgmr.msrb.gmra.mxu1 %v3802_v48  ;;  %v3171_v48 = vld [vmem:[#allocation17 + $0x180] sm:$0xff] }
 0x7e5   :  { %3063 = vmatpush.msrb.mxu1 %v2885_v55  ;;  %3017 = vmatpush.msra.mxu3 %v2950_v5  ;;  %v3145_v55 = vld [vmem:[#allocation17 + $0xb0] sm:$0xff]  ;;  %v2888_v5 = vld [vmem:[#allocation15 + $0x8] sm:$0xff] }
 0x7e7   :  { %3064 = vmatpush.msrb.mxu1 %v2883_v2  ;;  %3018 = vmatpush.msra.mxu3 %v2948_v43  ;;  %v2942_v2 = vld [vmem:[#allocation15 + $0x1b8] sm:$0xff] }
 0x7e9   :  { %v3804_v15 = vpop.eup %3803  ;;  %3065 = vmatpush.msrb.mxu1 %v2881_v26  ;;  %3019 = vmatpush.msra.mxu3 %v2946_v1  ;;  %v3143_v26 = vld [vmem:[#allocation17 + $0xa0] sm:$0xff]  ;;  %v9171_v1 = vld [vmem:[#allocation65_spill] sm:$0xff] }
 0x7ea   :  { %2656 = vmatmul.f32.vlgmr.msra.gmra.mxu2 %v3804_v15  ;;  %2696 = vmatmul.f32.vlgmr.msrb.gmra.mxu0 %v3804_v15  ;;  %v3167_v15 = vld [vmem:[#allocation17 + $0x160] sm:$0xff] }
 0x7eb   :  { %3043 = vmatpush.msrb.mxu0 %v2853_v27  ;;  %3066 = vmatpush.msrb.mxu1 %v2879_v19  ;;  %v2940_v27 = vld [vmem:[#allocation15 + $0x1a8] sm:$0xff]  ;;  %v3141_v19 = vld [vmem:[#allocation17 + $0x90] sm:$0xff] }
 0x7ec   :  { %2993 = vmatmul.f32.vlgmr.msra.gmra.mxu1 %v7932_v17  ;;  %2997 = vmatpush.msra.mxu2 %v2918_v30 }
 0x7ed   :  { %3044 = vmatpush.msrb.mxu0 %v2851_v59  ;;  %3067 = vmatpush.msrb.mxu1 %v2877_v36  ;;  %v2938_v59 = vld [vmem:[#allocation15 + $0x198] sm:$0xff]  ;;  %v3139_v36 = vld [vmem:[#allocation17 + $0x80] sm:$0xff] }
 0x7ee   :  { %2998 = vmatpush.msra.mxu2 %v2916_v44  ;;  %3020 = vmatpush.msra.mxu3 %v2944_v38  ;;  %v2886_v38 = vld [vmem:[#allocation14 + $0x1f8] sm:$0xff] }
 0x7ef   :  { %3045 = vmatpush.msrb.mxu0 %v2849_v8  ;;  %3068 = vmatpush.msrb.mxu1 %v2875_v40  ;;  %v3165_v8 = vld [vmem:[#allocation17 + $0x150] sm:$0xff] }
 0x7f0   :  { %2999 = vmatpush.msra.mxu2 %v2914_v63  ;;  %3021 = vmatpush.msra.mxu3 %v2942_v2  ;;  %v3137_v40 = vld [vmem:[#allocation17 + $0x70] sm:$0xff]  ;;  %v2854_v2 = vld [vmem:[#allocation14 + $0xf8] sm:$0xff] }
 0x7f1   :  { %3046 = vmatpush.msrb.mxu0 %v2847_v7  ;;  %3069 = vmatpush.msrb.mxu1 %v2873_v46  ;;  %v3135_v7 = vld [vmem:[#allocation17 + $0x60] sm:$0xff]  ;;  %v3161_v46 = vld [vmem:[#allocation17 + $0x130] sm:$0xff] }
 0x7f2   :  { %2973 = vmatmul.f32.vlgmr.msra.gmra.mxu0 %v7938_v33  ;;  %3000 = vmatpush.msra.mxu2 %v2912_v58 }
 0x7f3   :  { %3047 = vmatpush.msrb.mxu0 %v2845_v31  ;;  %3070 = vmatpush.msrb.mxu1 %v2871_v54  ;;  %v3133_v31 = vld [vmem:[#allocation17 + $0x50] sm:$0xff]  ;;  %v3159_v54 = vld [vmem:[#allocation17 + $0x120] sm:$0xff] }
 0x7f4   :  { %3022 = vmatpush.msra.mxu3 %v2940_v27  ;;  %v2878_v27 = vld [vmem:[#allocation14 + $0x1b8] sm:$0xff] }
 0x7f5   :  { %3048 = vmatpush.msrb.mxu0 %v2843_v4  ;;  %3071 = vmatpush.msrb.mxu1 %v2869_v52  ;;  %v3131_v4 = vld [vmem:[#allocation17 + $0x40] sm:$0xff]  ;;  %v3157_v52 = vld [vmem:[#allocation17 + $0x110] sm:$0xff] }
 0x7f6   :  { %3023 = vmatpush.msra.mxu3 %v2938_v59  ;;  %v2848_v59 = vld [vmem:[#allocation14 + $0xc8] sm:$0xff] }
 0x7f7   :  { %3049 = vmatpush.msrb.mxu0 %v2841_v34  ;;  %3072 = vmatpush.msrb.mxu1 %v2867_v6  ;;  %v3129_v34 = vld [vmem:[#allocation17 + $0x30] sm:$0xff]  ;;  %v3155_v6 = vld [vmem:[#allocation17 + $0x100] sm:$0xff] }
 0x7f9   :  { %3050 = vmatpush.msrb.mxu0 %v2839_v3  ;;  %3073 = vmatpush.msrb.mxu1 %v2865_v24  ;;  %v3127_v3 = vld [vmem:[#allocation17 + $0x20] sm:$0xff]  ;;  %v9169_v24 = vld [vmem:[#allocation48_spill] sm:$0xff] }
 0x7fb   :  { %3051 = vmatpush.msrb.mxu0 %v2837_v45  ;;  %3074 = vmatpush.msrb.mxu1 %v2863_v53  ;;  %v3125_v45 = vld [vmem:[#allocation17 + $0x10] sm:$0xff]  ;;  %v3123_v53 = vld [vmem:[#allocation17] sm:$0xff] }
 0x7fd   :  { %3052 = vmatpush.msrb.mxu0 %v2835_v18  ;;  %3075 = vmatpush.msrb.mxu1 %v2861_v49  ;;  %v9170_v18 = vld [vmem:[#allocation49_spill] sm:$0xff]  ;;  %v2910_v49 = vld [vmem:[#allocation15 + $0xb8] sm:$0xff] }
 0x7fe   :  { %3001 = vmatpush.msra.mxu2 %v2910_v49  ;;  %v2830_v49 = vld [vmem:[#allocation14 + $0x38] sm:$0xff] }
 0x7ff   :  { %3053 = vmatpush.msrb.mxu0 %v2833_v16  ;;  %3076 = vmatpush.msrb.mxu1 %v2859_v12  ;;  %v2936_v16 = vld [vmem:[#allocation15 + $0x188] sm:$0xff] }
 0x800   :  { %v2908_v12 = vld [vmem:[#allocation15 + $0xa8] sm:$0xff]  ;;  %3024 = vmatpush.msra.mxu3 %v2936_v16 }
 0x801   :  { %3054 = vmatpush.msrb.mxu0 %v2831_v41  ;;  %3077 = vmatpush.msrb.mxu1 %v2857_v47  ;;  %v2934_v41 = vld [vmem:[#allocation15 + $0x178] sm:$0xff]  ;;  %v2856_v16 = vld [vmem:[#allocation14 + $0x108] sm:$0xff] }
 0x802   :  { %v2906_v47 = vld [vmem:[#allocation15 + $0x98] sm:$0xff]  ;;  %3002 = vmatpush.msra.mxu2 %v2908_v12  ;;  %3025 = vmatpush.msra.mxu3 %v2934_v41  ;;  %v2828_v41 = vld [vmem:[#allocation14 + $0x28] sm:$0xff] }
 0x803   :  { %3055 = vmatpush.msrb.mxu0 %v2829_v13  ;;  %3078 = vmatpush.msrb.mxu1 %v2855_v60  ;;  %v2904_v13 = vld [vmem:[#allocation15 + $0x88] sm:$0xff]  ;;  %v2930_v60 = vld [vmem:[#allocation15 + $0x158] sm:$0xff] }
 0x804   :  { %3079 = vmatmul.f32.vlgmr.msrb.gmra.mxu1 %v7944_v14  ;;  %3003 = vmatpush.msra.mxu2 %v2906_v47  ;;  %v3186_v12 = vld [vmem:[#allocation17 + $0x1f8] sm:$0xff]  ;;  %v3184_v47 = vld [vmem:[#allocation17 + $0x1e8] sm:$0xff] }
 0x805   :  { %3213 = vmatpush.msra.mxu1 %v3185_v23  ;;  %3056 = vmatpush.msrb.mxu0 %v2827_v50  ;;  %v2902_v23 = vld [vmem:[#allocation15 + $0x78] sm:$0xff]  ;;  %v2928_v50 = vld [vmem:[#allocation15 + $0x148] sm:$0xff] }
 0x806   :  { %3026 = vmatpush.msra.mxu3 %v2932_v37  ;;  %3004 = vmatpush.msra.mxu2 %v2904_v13  ;;  %v2826_v37 = vld [vmem:[#allocation14 + $0x18] sm:$0xff] }
 0x807   :  { %3214 = vmatpush.msra.mxu1 %v3183_v28  ;;  %3057 = vmatpush.msrb.mxu0 %v2825_v11  ;;  %v2900_v28 = vld [vmem:[#allocation15 + $0x68] sm:$0xff]  ;;  %v2926_v11 = vld [vmem:[#allocation15 + $0x138] sm:$0xff] }
 0x808   :  { %3027 = vmatpush.msra.mxu3 %v2930_v60  ;;  %3005 = vmatpush.msra.mxu2 %v2902_v23  ;;  %v3182_v13 = vld [vmem:[#allocation17 + $0x1d8] sm:$0xff]  ;;  %v2824_v60 = vld [vmem:[#allocation14 + $0x8] sm:$0xff] }
 0x809   :  { %3215 = vmatpush.msra.mxu1 %v3181_v0  ;;  %3058 = vmatpush.msrb.mxu0 %v2823_v22  ;;  %v2924_v0 = vld [vmem:[#allocation15 + $0x128] sm:$0xff]  ;;  %v3154_v23 = vld [vmem:[#allocation17 + $0xf8] sm:$0xff] }
 0x80a   :  { %3059 = vmatmul.f32.vlgmr.msrb.gmra.mxu0 %v7950_v25  ;;  %3028 = vmatpush.msra.mxu3 %v2928_v50  ;;  %v2896_v22 = vld [vmem:[#allocation15 + $0x48] sm:$0xff] }
 0x80b   :  { %3193 = vmatpush.msra.mxu0 %v3153_v56  ;;  %3216 = vmatpush.msra.mxu1 %v3179_v62  ;;  %v2922_v56 = vld [vmem:[#allocation15 + $0x118] sm:$0xff]  ;;  %v3180_v50 = vld [vmem:[#allocation17 + $0x1c8] sm:$0xff] }
 0x80c   :  { %3006 = vmatpush.msra.mxu2 %v2900_v28  ;;  %3029 = vmatpush.msra.mxu3 %v2926_v11  ;;  %v2894_v62 = vld [vmem:[#allocation15 + $0x38] sm:$0xff]  ;;  %v3152_v28 = vld [vmem:[#allocation17 + $0xe8] sm:$0xff] }
 0x80d   :  { %3194 = vmatpush.msra.mxu0 %v3151_v35  ;;  %3217 = vmatpush.msra.mxu1 %v3177_v9  ;;  %v2892_v35 = vld [vmem:[#allocation15 + $0x28] sm:$0xff]  ;;  %v2890_v9 = vld [vmem:[#allocation15 + $0x18] sm:$0xff] }
 0x80e   :  { %3007 = vmatpush.msra.mxu2 %v2898_v29  ;;  %3030 = vmatpush.msra.mxu3 %v2924_v0  ;;  %v3178_v11 = vld [vmem:[#allocation17 + $0x1b8] sm:$0xff]  ;;  %v3148_v0 = vld [vmem:[#allocation17 + $0xc8] sm:$0xff] }
 0x80f   :  { %3195 = vmatpush.msra.mxu0 %v3149_v42  ;;  %3218 = vmatpush.msra.mxu1 %v3175_v57  ;;  %v3150_v29 = vld [vmem:[#allocation17 + $0xd8] sm:$0xff] }
 0x810   :  { %3008 = vmatpush.msra.mxu2 %v2896_v22  ;;  %3031 = vmatpush.msra.mxu3 %v2922_v56  ;;  %v3174_v22 = vld [vmem:[#allocation17 + $0x198] sm:$0xff] }
 0x811   :  { %3196 = vmatpush.msra.mxu0 %v3147_v51  ;;  %3219 = vmatpush.msra.mxu1 %v3173_v61  ;;  %v3146_v56 = vld [vmem:[#allocation17 + $0xb8] sm:$0xff] }
 0x812   :  { %3009 = vmatpush.msra.mxu2 %v2894_v62  ;;  %3032 = vmatpush.msra.mxu3 %v2920_v39  ;;  %v3172_v62 = vld [vmem:[#allocation17 + $0x188] sm:$0xff] }
 0x813   :  { %3197 = vmatpush.msra.mxu0 %v3145_v55  ;;  %3220 = vmatpush.msra.mxu1 %v3171_v48  ;;  %v2884_v55 = vld [vmem:[#allocation14 + $0x1e8] sm:$0xff]  ;;  %v2882_v48 = vld [vmem:[#allocation14 + $0x1d8] sm:$0xff] }
 0x814   :  { %3010 = vmatpush.msra.mxu2 %v2892_v35  ;;  %v3144_v39 = vld [vmem:[#allocation17 + $0xa8] sm:$0xff]  ;;  %v3170_v35 = vld [vmem:[#allocation17 + $0x178] sm:$0xff] }
 0x815   :  { %3198 = vmatpush.msra.mxu0 %v3143_v26  ;;  %3221 = vmatpush.msra.mxu1 %v3169_v10  ;;  %v2880_v26 = vld [vmem:[#allocation14 + $0x1c8] sm:$0xff] }
 0x816   :  { %3011 = vmatpush.msra.mxu2 %v2890_v9  ;;  %v3168_v9 = vld [vmem:[#allocation17 + $0x168] sm:$0xff] }
 0x817   :  { %3199 = vmatpush.msra.mxu0 %v3141_v19  ;;  %3222 = vmatpush.msra.mxu1 %v3167_v15  ;;  %v2850_v19 = vld [vmem:[#allocation14 + $0xd8] sm:$0xff]  ;;  %v2876_v15 = vld [vmem:[#allocation14 + $0x1a8] sm:$0xff] }
 0x818   :  { %3012 = vmatpush.msra.mxu2 %v2888_v5  ;;  %v3140_v5 = vld [vmem:[#allocation17 + $0x88] sm:$0xff] }
 0x819   :  { %3200 = vmatpush.msra.mxu0 %v3139_v36  ;;  %3223 = vmatpush.msra.mxu1 %v3165_v8  ;;  %v2874_v36 = vld [vmem:[#allocation14 + $0x198] sm:$0xff] }
 0x81a   :  { %v2846_v8 = vld [vmem:[#allocation14 + $0xb8] sm:$0xff] }
 0x81b   :  { %3201 = vmatpush.msra.mxu0 %v3137_v40  ;;  %3224 = vmatpush.msra.mxu1 %v3163_v20  ;;  %v2872_v40 = vld [vmem:[#allocation14 + $0x188] sm:$0xff] }
 0x81c   :  { %v2844_v20 = vld [vmem:[#allocation14 + $0xa8] sm:$0xff] }
 0x81d   :  { %3202 = vmatpush.msra.mxu0 %v3135_v7  ;;  %3225 = vmatpush.msra.mxu1 %v3161_v46  ;;  %v2870_v7 = vld [vmem:[#allocation14 + $0x178] sm:$0xff] }
 0x81e   :  { %v2842_v46 = vld [vmem:[#allocation14 + $0x98] sm:$0xff] }
 0x81f   :  { %3203 = vmatpush.msra.mxu0 %v3133_v31  ;;  %3226 = vmatpush.msra.mxu1 %v3159_v54  ;;  %v2840_v31 = vld [vmem:[#allocation14 + $0x88] sm:$0xff]  ;;  %v2866_v54 = vld [vmem:[#allocation14 + $0x158] sm:$0xff] }
 0x821   :  { %3204 = vmatpush.msra.mxu0 %v3131_v4  ;;  %3227 = vmatpush.msra.mxu1 %v3157_v52  ;;  %v2838_v4 = vld [vmem:[#allocation14 + $0x78] sm:$0xff]  ;;  %v2864_v52 = vld [vmem:[#allocation14 + $0x148] sm:$0xff] }
 0x823   :  { %3205 = vmatpush.msra.mxu0 %v3129_v34  ;;  %3228 = vmatpush.msra.mxu1 %v3155_v6  ;;  %v2836_v34 = vld [vmem:[#allocation14 + $0x68] sm:$0xff]  ;;  %v2862_v6 = vld [vmem:[#allocation14 + $0x138] sm:$0xff] }
 0x824   :  { %3229 = vmatmul.f32.vlgmr.msra.gmra.mxu1 %v9169_v24 }
 0x825   :  { %3206 = vmatpush.msra.mxu0 %v3127_v3  ;;  %v2860_v3 = vld [vmem:[#allocation14 + $0x128] sm:$0xff] }
 0x827   :  { %3207 = vmatpush.msra.mxu0 %v3125_v45  ;;  %v2832_v45 = vld [vmem:[#allocation14 + $0x48] sm:$0xff] }
 0x829   :  { %3208 = vmatpush.msra.mxu0 %v3123_v53  ;;  %v2858_v53 = vld [vmem:[#allocation14 + $0x118] sm:$0xff] }
 0x82a   :  { %3209 = vmatmul.f32.vlgmr.msra.gmra.mxu0 %v9170_v18 }
 0x861   :  { %v2717_v44 = vpop.f32.mrf.mxu1 }
 0x867   :  { %v2697_v43 = vpop.f32.mrf.mxu0  ;;  %v2677_v51 = vpop.f32.mrf.mxu3 }
 0x868   :  { %v2698_v30 = vadd.f32 %v2697_v43, %v6138_v32  ;;  %v2852_v32 = vld [vmem:[#allocation14 + $0xe8] sm:$0xff]  ;;  %v3166_v43 = vld [vmem:[#allocation17 + $0x158] sm:$0xff] }
 0x86a   :  { %v2718_v42 = vadd.f32 %v2717_v44, %v2698_v30  ;;  %v3138_v30 = vld [vmem:[#allocation17 + $0x78] sm:$0xff]  ;;  %v3164_v44 = vld [vmem:[#allocation17 + $0x148] sm:$0xff] }
 0x86c   :  { %3805 = vtanh.f32 %v2718_v42  ;;  %v3136_v42 = vld [vmem:[#allocation17 + $0x68] sm:$0xff] }
 0x86d   :  { %v2657_v57 = vpop.f32.mrf.mxu2 }
 0x86e   :  { %v2658_v63 = vadd.f32 %v2657_v57, %v9171_v1  ;;  %v3162_v57 = vld [vmem:[#allocation17 + $0x138] sm:$0xff] }
 0x86f   :  { %v3134_v1 = vld [vmem:[#allocation17 + $0x58] sm:$0xff] }
 0x870   :  { %v2678_v61 = vadd.f32 %v2677_v51, %v2658_v63  ;;  %v3160_v63 = vld [vmem:[#allocation17 + $0x128] sm:$0xff] }
 0x871   :  { %v3132_v51 = vld [vmem:[#allocation17 + $0x48] sm:$0xff] }
 0x872   :  { %v3806_v58 = vpop.eup %3805  ;;  %3807 = vtanh.f32 %v2678_v61  ;;  %v3158_v61 = vld [vmem:[#allocation17 + $0x118] sm:$0xff] }
 0x873   :  { %2758 = vmatmul.f32.vlgmr.msrb.gmra.mxu3 %v3806_v58  ;;  %v3156_v58 = vld [vmem:[#allocation17 + $0x108] sm:$0xff] }
 0x874   :  { %3103 = vmatpush.msrb.mxu3 %v2886_v38  ;;  %v3130_v38 = vld [vmem:[#allocation17 + $0x38] sm:$0xff] }
 0x876   :  { %3104 = vmatpush.msrb.mxu3 %v2884_v55  ;;  %v3128_v55 = vld [vmem:[#allocation17 + $0x28] sm:$0xff] }
 0x878   :  { %v3808_v10 = vpop.eup %3807  ;;  %3105 = vmatpush.msrb.mxu3 %v2882_v48  ;;  %v3126_v48 = vld [vmem:[#allocation17 + $0x18] sm:$0xff] }
 0x879   :  { %2738 = vmatmul.f32.vlgmr.msrb.gmra.mxu2 %v3808_v10 }
 0x87a   :  { %3083 = vmatpush.msrb.mxu2 %v2854_v2  ;;  %3106 = vmatpush.msrb.mxu3 %v2880_v26  ;;  %v3124_v2 = vld [vmem:[#allocation17 + $0x8] sm:$0xff] }
 0x87b   :  { %3033 = vmatmul.f32.vlgmr.msra.gmra.mxu3 %v7932_v17  ;;  %v2868_v17 = vld [vmem:[#allocation14 + $0x168] sm:$0xff] }
 0x87c   :  { %3084 = vmatpush.msrb.mxu2 %v2852_v32  ;;  %3107 = vmatpush.msrb.mxu3 %v2878_v27 }
 0x87e   :  { %3085 = vmatpush.msrb.mxu2 %v2850_v19  ;;  %3108 = vmatpush.msrb.mxu3 %v2876_v15  ;;  %v3317_v19 = vld [vmem:[#allocation20 + $0xf0] sm:$0xff] }
 0x87f   :  { %v3349_v15 = vld [vmem:[#allocation20 + $0x1f0] sm:$0xff]  ;;  %3357 = vmatpush.msrb.mxu0 %v3317_v19  ;;  %v3287_v19 = vld [vmem:[#allocation20] sm:$0xff] }
 0x880   :  { %3086 = vmatpush.msrb.mxu2 %v2848_v59  ;;  %3109 = vmatpush.msrb.mxu3 %v2874_v36  ;;  %v3318_v59 = vld [vmem:[#allocation20 + $0xf8] sm:$0xff] }
 0x881   :  { %3013 = vmatmul.f32.vlgmr.msra.gmra.mxu2 %v7938_v33  ;;  %v2834_v33 = vld [vmem:[#allocation14 + $0x58] sm:$0xff]  ;;  %3377 = vmatpush.msrb.mxu1 %v3349_v15  ;;  %v3319_v15 = vld [vmem:[#allocation20 + $0x100] sm:$0xff] }
 0x882   :  { %3087 = vmatpush.msrb.mxu2 %v2846_v8  ;;  %3110 = vmatpush.msrb.mxu3 %v2872_v40  ;;  %v3350_v36 = vld [vmem:[#allocation20 + $0x1f8] sm:$0xff]  ;;  %v3347_v8 = vld [vmem:[#allocation20 + $0x1e0] sm:$0xff]  ;;  %v3316_v40 = vld [vmem:[#allocation20 + $0xe8] sm:$0xff] }
 0x883   :  { %3378 = vmatpush.msrb.mxu1 %v3347_v8  ;;  %v3469_v8 = vld [vmem:[#allocation23 + $0xf0] sm:$0xff] }
 0x884   :  { %3088 = vmatpush.msrb.mxu2 %v2844_v20  ;;  %3111 = vmatpush.msrb.mxu3 %v2870_v7  ;;  %v3348_v20 = vld [vmem:[#allocation20 + $0x1e8] sm:$0xff]  ;;  %v3313_v7 = vld [vmem:[#allocation20 + $0xd0] sm:$0xff] }
 0x886   :  { %3089 = vmatpush.msrb.mxu2 %v2842_v46  ;;  %3112 = vmatpush.msrb.mxu3 %v2868_v17  ;;  %v3346_v46 = vld [vmem:[#allocation20 + $0x1d8] sm:$0xff]  ;;  %v3311_v17 = vld [vmem:[#allocation20 + $0xc0] sm:$0xff] }
 0x888   :  { %3090 = vmatpush.msrb.mxu2 %v2840_v31  ;;  %3113 = vmatpush.msrb.mxu3 %v2866_v54  ;;  %v3343_v31 = vld [vmem:[#allocation20 + $0x1c0] sm:$0xff]  ;;  %v3312_v54 = vld [vmem:[#allocation20 + $0xc8] sm:$0xff] }
 0x88a   :  { %3091 = vmatpush.msrb.mxu2 %v2838_v4  ;;  %3114 = vmatpush.msrb.mxu3 %v2864_v52  ;;  %v3344_v4 = vld [vmem:[#allocation20 + $0x1c8] sm:$0xff]  ;;  %v3309_v52 = vld [vmem:[#allocation20 + $0xb0] sm:$0xff] }
 0x88c   :  { %3092 = vmatpush.msrb.mxu2 %v2836_v34  ;;  %3115 = vmatpush.msrb.mxu3 %v2862_v6  ;;  %v3341_v34 = vld [vmem:[#allocation20 + $0x1b0] sm:$0xff]  ;;  %v3310_v6 = vld [vmem:[#allocation20 + $0xb8] sm:$0xff] }
 0x88e   :  { %3093 = vmatpush.msrb.mxu2 %v2834_v33  ;;  %3116 = vmatpush.msrb.mxu3 %v2860_v3  ;;  %v3342_v33 = vld [vmem:[#allocation20 + $0x1b8] sm:$0xff]  ;;  %v3307_v3 = vld [vmem:[#allocation20 + $0xa0] sm:$0xff] }
 0x890   :  { %3094 = vmatpush.msrb.mxu2 %v2832_v45  ;;  %3117 = vmatpush.msrb.mxu3 %v2858_v53  ;;  %v3339_v45 = vld [vmem:[#allocation20 + $0x1a0] sm:$0xff]  ;;  %v3308_v53 = vld [vmem:[#allocation20 + $0xa8] sm:$0xff] }
 0x892   :  { %3095 = vmatpush.msrb.mxu2 %v2830_v49  ;;  %3118 = vmatpush.msrb.mxu3 %v2856_v16  ;;  %v3340_v49 = vld [vmem:[#allocation20 + $0x1a8] sm:$0xff]  ;;  %v3305_v16 = vld [vmem:[#allocation20 + $0x90] sm:$0xff] }
 0x893   :  { %3119 = vmatmul.f32.vlgmr.msrb.gmra.mxu3 %v7944_v14  ;;  %v3176_v14 = vld [vmem:[#allocation17 + $0x1a8] sm:$0xff] }
 0x894   :  { %3253 = vmatpush.msra.mxu3 %v3186_v12  ;;  %3096 = vmatpush.msrb.mxu2 %v2828_v41  ;;  %v3337_v12 = vld [vmem:[#allocation20 + $0x190] sm:$0xff]  ;;  %v3306_v41 = vld [vmem:[#allocation20 + $0x98] sm:$0xff] }
 0x896   :  { %3254 = vmatpush.msra.mxu3 %v3184_v47  ;;  %3097 = vmatpush.msrb.mxu2 %v2826_v37  ;;  %v3338_v47 = vld [vmem:[#allocation20 + $0x198] sm:$0xff]  ;;  %v3303_v37 = vld [vmem:[#allocation20 + $0x80] sm:$0xff] }
 0x898   :  { %3255 = vmatpush.msra.mxu3 %v3182_v13  ;;  %3098 = vmatpush.msrb.mxu2 %v2824_v60  ;;  %v3335_v13 = vld [vmem:[#allocation20 + $0x180] sm:$0xff]  ;;  %v3304_v60 = vld [vmem:[#allocation20 + $0x88] sm:$0xff] }
 0x899   :  { %3099 = vmatmul.f32.vlgmr.msrb.gmra.mxu2 %v7950_v25  ;;  %v3142_v25 = vld [vmem:[#allocation17 + $0x98] sm:$0xff] }
 0x89a   :  { %3233 = vmatpush.msra.mxu2 %v3154_v23  ;;  %3256 = vmatpush.msra.mxu3 %v3180_v50  ;;  %v3336_v23 = vld [vmem:[#allocation20 + $0x188] sm:$0xff]  ;;  %v3301_v50 = vld [vmem:[#allocation20 + $0x70] sm:$0xff] }
 0x89c   :  { %3234 = vmatpush.msra.mxu2 %v3152_v28  ;;  %3257 = vmatpush.msra.mxu3 %v3178_v11  ;;  %v3333_v28 = vld [vmem:[#allocation20 + $0x170] sm:$0xff]  ;;  %v3302_v11 = vld [vmem:[#allocation20 + $0x78] sm:$0xff] }
 0x89e   :  { %3235 = vmatpush.msra.mxu2 %v3150_v29  ;;  %3258 = vmatpush.msra.mxu3 %v3176_v14  ;;  %v3334_v29 = vld [vmem:[#allocation20 + $0x178] sm:$0xff]  ;;  %v3299_v14 = vld [vmem:[#allocation20 + $0x60] sm:$0xff] }
 0x8a0   :  { %3236 = vmatpush.msra.mxu2 %v3148_v0  ;;  %3259 = vmatpush.msra.mxu3 %v3174_v22  ;;  %v3331_v0 = vld [vmem:[#allocation20 + $0x160] sm:$0xff]  ;;  %v3300_v22 = vld [vmem:[#allocation20 + $0x68] sm:$0xff] }
 0x8a2   :  { %3237 = vmatpush.msra.mxu2 %v3146_v56  ;;  %3260 = vmatpush.msra.mxu3 %v3172_v62  ;;  %v3332_v56 = vld [vmem:[#allocation20 + $0x168] sm:$0xff]  ;;  %v3297_v62 = vld [vmem:[#allocation20 + $0x50] sm:$0xff] }
 0x8a4   :  { %3238 = vmatpush.msra.mxu2 %v3144_v39  ;;  %3261 = vmatpush.msra.mxu3 %v3170_v35  ;;  %v3329_v39 = vld [vmem:[#allocation20 + $0x150] sm:$0xff]  ;;  %v3298_v35 = vld [vmem:[#allocation20 + $0x58] sm:$0xff] }
 0x8a6   :  { %3239 = vmatpush.msra.mxu2 %v3142_v25  ;;  %3262 = vmatpush.msra.mxu3 %v3168_v9  ;;  %v3330_v25 = vld [vmem:[#allocation20 + $0x158] sm:$0xff]  ;;  %v3295_v9 = vld [vmem:[#allocation20 + $0x40] sm:$0xff] }
 0x8a8   :  { %3240 = vmatpush.msra.mxu2 %v3140_v5  ;;  %3263 = vmatpush.msra.mxu3 %v3166_v43  ;;  %v3327_v5 = vld [vmem:[#allocation20 + $0x140] sm:$0xff]  ;;  %v3296_v43 = vld [vmem:[#allocation20 + $0x48] sm:$0xff] }
 0x8aa   :  { %3241 = vmatpush.msra.mxu2 %v3138_v30  ;;  %3264 = vmatpush.msra.mxu3 %v3164_v44  ;;  %v3328_v30 = vld [vmem:[#allocation20 + $0x148] sm:$0xff]  ;;  %v3293_v44 = vld [vmem:[#allocation20 + $0x30] sm:$0xff] }
 0x8ac   :  { %3242 = vmatpush.msra.mxu2 %v3136_v42  ;;  %3265 = vmatpush.msra.mxu3 %v3162_v57  ;;  %v3325_v42 = vld [vmem:[#allocation20 + $0x130] sm:$0xff]  ;;  %v3294_v57 = vld [vmem:[#allocation20 + $0x38] sm:$0xff] }
 0x8ae   :  { %3243 = vmatpush.msra.mxu2 %v3134_v1  ;;  %3266 = vmatpush.msra.mxu3 %v3160_v63  ;;  %v7964_v1 = vpop.f32.mrf.mxu0  ;;  %v3326_v63 = vld [vmem:[#allocation20 + $0x138] sm:$0xff] }
 0x8b0   :  { %3244 = vmatpush.msra.mxu2 %v3132_v51  ;;  %3267 = vmatpush.msra.mxu3 %v3158_v61  ;;  %v3291_v51 = vld [vmem:[#allocation20 + $0x20] sm:$0xff] }
 0x8b1   :  { %v3323_v61 = vld [vmem:[#allocation20 + $0x120] sm:$0xff] }
 0x8b2   :  { %3245 = vmatpush.msra.mxu2 %v3130_v38  ;;  %3268 = vmatpush.msra.mxu3 %v3156_v58  ;;  %v3292_v58 = vld [vmem:[#allocation20 + $0x28] sm:$0xff] }
 0x8b3   :  { %3269 = vmatmul.f32.vlgmr.msra.gmra.mxu3 %v9169_v24  ;;  %v3315_v24 = vld [vmem:[#allocation20 + $0xe0] sm:$0xff] }
 0x8b4   :  { %3246 = vmatpush.msra.mxu2 %v3128_v55  ;;  %3417 = vmatpush.msrb.mxu3 %v3350_v36  ;;  %v3324_v55 = vld [vmem:[#allocation20 + $0x128] sm:$0xff] }
 0x8b5   :  { %3358 = vmatpush.msrb.mxu0 %v3315_v24  ;;  %v3288_v36 = vld [vmem:[#allocation20 + $0x8] sm:$0xff] }
 0x8b6   :  { %3247 = vmatpush.msra.mxu2 %v3126_v48  ;;  %3418 = vmatpush.msrb.mxu3 %v3348_v20  ;;  %v3289_v48 = vld [vmem:[#allocation20 + $0x10] sm:$0xff]  ;;  %v3320_v24 = vld [vmem:[#allocation20 + $0x108] sm:$0xff]  ;;  %v2762_v20 = vld [vmem:[%s8128_s18] ss:$4 sm:$0x3] }
 0x8b7   :  { %3359 = vmatpush.msrb.mxu0 %v3313_v7  ;;  %v3467_v7 = vld [vmem:[#allocation23 + $0xe0] sm:$0xff] }
 0x8b8   :  { %3248 = vmatpush.msra.mxu2 %v3124_v2  ;;  %3419 = vmatpush.msrb.mxu3 %v3346_v46  ;;  %v7968_v2 = vpop.f32.mrf.mxu1  ;;  %v3060_v46 = vpop.f32.mrf.mxu0 }
 0x8b9   :  { %3249 = vmatmul.f32.vlgmr.msra.gmra.mxu2 %v9170_v18  ;;  %v3345_v18 = vld [vmem:[#allocation20 + $0x1d0] sm:$0xff]  ;;  %3360 = vmatpush.msrb.mxu0 %v3311_v17 }
 0x8ba   :  { %3397 = vmatpush.msrb.mxu2 %v3318_v59  ;;  %3379 = vmatpush.msrb.mxu1 %v3345_v18  ;;  %v7972_v59 = vpop.permute.xlu0 %2765  ;;  %v3468_v18 = vld [vmem:[#allocation23 + $0xe8] sm:$0xff]  ;;  %v3465_v17 = vld [vmem:[#allocation23 + $0xd0] sm:$0xff] }
 0x8bb   :  { %3420 = vmatpush.msrb.mxu3 %v3344_v4  ;;  %3361 = vmatpush.msrb.mxu0 %v3309_v52  ;;  %v3466_v4 = vld [vmem:[#allocation23 + $0xd8] sm:$0xff] }
 0x8bc   :  { %3398 = vmatpush.msrb.mxu2 %v3316_v40  ;;  %3380 = vmatpush.msrb.mxu1 %v3343_v31  ;;  %v3470_v40 = vld [vmem:[#allocation23 + $0xf8] sm:$0xff]  ;;  %v3501_v31 = vld [vmem:[#allocation23 + $0x1f0] sm:$0xff] }
 0x8bd   :  { %3421 = vmatpush.msrb.mxu3 %v3342_v33  ;;  %3362 = vmatpush.msrb.mxu0 %v3307_v3  ;;  %v3502_v52 = vld [vmem:[#allocation23 + $0x1f8] sm:$0xff]  ;;  %v3500_v3 = vld [vmem:[#allocation23 + $0x1e8] sm:$0xff] }
 0x8be   :  { %3381 = vmatpush.msrb.mxu1 %v3341_v34  ;;  %v3499_v34 = vld [vmem:[#allocation23 + $0x1e0] sm:$0xff] }
 0x8bf   :  { %3422 = vmatpush.msrb.mxu3 %v3340_v49  ;;  %3363 = vmatpush.msrb.mxu0 %v3305_v16  ;;  %v3463_v16 = vld [vmem:[#allocation23 + $0xc0] sm:$0xff] }
 0x8c0   :  { %3382 = vmatpush.msrb.mxu1 %v3339_v45  ;;  %v7983_v33 = vpop.f32.mrf.mxu1 }
 0x8c1   :  { %3423 = vmatpush.msrb.mxu3 %v3338_v47  ;;  %3364 = vmatpush.msrb.mxu0 %v3303_v37  ;;  %v2769_v47 = vperm.slane %v2762_v20, 0  ;;  %v2770_v37 = vperm.slane %v2762_v20, 1  ;;  %v3490_v20 = vld [vmem:[#allocation23 + $0x198] sm:$0xff] }
 0x8c2   :  { %3383 = vmatpush.msrb.mxu1 %v3337_v12  ;;  %v3464_v12 = vld [vmem:[#allocation23 + $0xc8] sm:$0xff] }
 0x8c3   :  { %3424 = vmatpush.msrb.mxu3 %v3336_v23  ;;  %3365 = vmatpush.msrb.mxu0 %v3301_v50  ;;  %v3495_v23 = vld [vmem:[#allocation23 + $0x1c0] sm:$0xff] }
 0x8c4   :  { %3384 = vmatpush.msrb.mxu1 %v3335_v13  ;;  %v2780_v13 = vpop.permute.xlu0 %2779 }
 0x8c5   :  { %3425 = vmatpush.msrb.mxu3 %v3334_v29  ;;  %3366 = vmatpush.msrb.mxu0 %v3299_v14  ;;  %v3461_v29 = vld [vmem:[#allocation23 + $0xb0] sm:$0xff]  ;;  %v3462_v14 = vld [vmem:[#allocation23 + $0xb8] sm:$0xff] }
 0x8c6   :  { %3385 = vmatpush.msrb.mxu1 %v3333_v28 }
 0x8c7   :  { %3426 = vmatpush.msrb.mxu3 %v3332_v56  ;;  %3367 = vmatpush.msrb.mxu0 %v3297_v62 }
 0x8c8   :  { %3386 = vmatpush.msrb.mxu1 %v3331_v0  ;;  %v3496_v0 = vld [vmem:[#allocation23 + $0x1c8] sm:$0xff] }
 0x8c9   :  { %3427 = vmatpush.msrb.mxu3 %v3330_v25  ;;  %3368 = vmatpush.msrb.mxu0 %v3295_v9  ;;  %v3459_v25 = vld [vmem:[#allocation23 + $0xa0] sm:$0xff]  ;;  %v3460_v9 = vld [vmem:[#allocation23 + $0xa8] sm:$0xff] }
 0x8ca   :  { %3387 = vmatpush.msrb.mxu1 %v3329_v39  ;;  %v2995_v39 = vadd.f32 %v7968_v2, %v7964_v1 }
 0x8cb   :  { %3428 = vmatpush.msrb.mxu3 %v3328_v30  ;;  %3369 = vmatpush.msrb.mxu0 %v3293_v44  ;;  %v3210_v30 = vpop.f32.mrf.mxu0 }
 0x8cc   :  { %3388 = vmatpush.msrb.mxu1 %v3327_v5  ;;  %v2773_v5 = vmul.f32 %v2769_v47, %v7972_v59 }
 0x8cd   :  { %3429 = vmatpush.msrb.mxu3 %v3326_v63  ;;  %3370 = vmatpush.msrb.mxu0 %v3291_v51  ;;  %v3061_v51 = vadd.f32 %v3060_v46, %v2995_v39  ;;  %v3446_v39 = vld [vmem:[#allocation23 + $0x38] sm:$0xff] }
 0x8ce   :  { %3389 = vmatpush.msrb.mxu1 %v3325_v42  ;;  %v3494_v42 = vld [vmem:[#allocation23 + $0x1b8] sm:$0xff] }
 0x8cf   :  { %3430 = vmatpush.msrb.mxu3 %v3324_v55  ;;  %3371 = vmatpush.msrb.mxu0 %v3289_v48  ;;  %v3458_v55 = vld [vmem:[#allocation23 + $0x98] sm:$0xff]  ;;  %v3230_v48 = vpop.f32.mrf.mxu1 }
 0x8d0   :  { %3390 = vmatpush.msrb.mxu1 %v3323_v61 }
 0x8d1   :  { %3372 = vmatpush.msrb.mxu0 %v3287_v19 }
 0x8d3   :  { %3509 = vmatpush.msra.mxu0 %v3469_v8 }
 0x8d5   :  { %3510 = vmatpush.msra.mxu0 %v3467_v7 }
 0x8d7   :  { %3511 = vmatpush.msra.mxu0 %v3465_v17  ;;  %v3453_v17 = vld [vmem:[#allocation23 + $0x70] sm:$0xff] }
 0x8d9   :  { %3512 = vmatpush.msra.mxu0 %v3463_v16 }
 0x8db   :  { %3513 = vmatpush.msra.mxu0 %v3461_v29  ;;  %v3447_v29 = vld [vmem:[#allocation23 + $0x40] sm:$0xff] }
 0x8dd   :  { %3514 = vmatpush.msra.mxu0 %v3459_v25  ;;  %v3443_v25 = vld [vmem:[#allocation23 + $0x20] sm:$0xff] }
 0x8f6   :  { %v2759_v32 = vpop.f32.mrf.mxu3 }
 0x8fc   :  { %v2739_v26 = vpop.f32.mrf.mxu2 }
 0x8fd   :  { %v2740_v10 = vadd.f32 %v7907_v21, %v2739_v26  ;;  %v3314_v21 = vld [vmem:[#allocation20 + $0xd8] sm:$0xff]  ;;  %v3321_v26 = vld [vmem:[#allocation20 + $0x110] sm:$0xff] }
 0x8fe   :  { %3399 = vmatpush.msrb.mxu2 %v3314_v21  ;;  %3391 = vmatpush.msrb.mxu1 %v3321_v26  ;;  %v3733_v21 = vld [vmem:[%s8128_s18 + $0x1] ss:$4 sm:$0x3] }
 0x8ff   :  { %v2760_v27 = vadd.f32 %v2759_v32, %v2740_v10  ;;  %v3290_v10 = vld [vmem:[#allocation20 + $0x18] sm:$0xff]  ;;  %v2783_v45 = vperm.slane %v3733_v21, 0 }
 0x900   :  { %3400 = vmatpush.msrb.mxu2 %v3312_v54  ;;  %v3322_v32 = vld [vmem:[#allocation20 + $0x118] sm:$0xff]  ;;  %3392 = vmatpush.msrb.mxu1 %v3319_v15  ;;  %v3231_v15 = vadd.f32 %v3230_v48, %v3210_v30 }
 0x901   :  { %2811 = vperm.xlu1 %3757, %v2760_v27   ;;  %v7970_v27 = vpop.f32.mrf.mxu3  ;;  %3431 = vmatpush.msrb.mxu3 %v3322_v32  ;;  %v2787_v56 = vmul.f32 %v2783_v45, %v2780_v13  ;;  %v3492_v32 = vld [vmem:[#allocation23 + $0x1a8] sm:$0xff]  ;;  %v3441_v30 = vld [vmem:[#allocation23 + $0x10] sm:$0xff] }
 0x902   :  { %3401 = vmatpush.msrb.mxu2 %v3310_v6  ;;  %3529 = vmatpush.msra.mxu1 %v3501_v31  ;;  %v3734_v6 = vld [vmem:[%s8128_s18 + $0x2] ss:$4 sm:$0x3]  ;;  %v3452_v45 = vld [vmem:[#allocation23 + $0x68] sm:$0xff]  ;;  %v3473_v48 = vld [vmem:[#allocation23 + $0x110] sm:$0xff] }
 0x903   :  { %3432 = vmatpush.msrb.mxu3 %v3320_v24  ;;  %v2799_v50 = vperm.slane %v3734_v6, 0  ;;  %v2800_v28 = vperm.slane %v3734_v6, 1  ;;  %v3456_v24 = vld [vmem:[#allocation23 + $0x88] sm:$0xff]  ;;  %v3454_v31 = vld [vmem:[#allocation23 + $0x78] sm:$0xff] }
 0x904   :  { %3402 = vmatpush.msrb.mxu2 %v3308_v53  ;;  %v7966_v38 = vpop.f32.mrf.mxu2  ;;  %v2784_v53 = vperm.slane %v3733_v21, 1  ;;  %3530 = vmatpush.msra.mxu1 %v3499_v34  ;;  %v3081_v21 = vadd.f32 %v7983_v33, %v3061_v51  ;;  %v3440_v51 = vld [vmem:[#allocation23 + $0x8] sm:$0xff] }
 0x905   :  { %3569 = vmatpush.msra.mxu3 %v3502_v52  ;;  %v3035_v44 = vadd.f32 %v7970_v27, %v7966_v38  ;;  %v3489_v38 = vld [vmem:[#allocation23 + $0x190] sm:$0xff]  ;;  %v2789_v27 = vadd.f32 %v2787_v56, %v2773_v5  ;;  %v3444_v5 = vld [vmem:[#allocation23 + $0x28] sm:$0xff] }
 0x906   :  { %3403 = vmatpush.msrb.mxu2 %v3306_v41  ;;  %v3497_v41 = vld [vmem:[#allocation23 + $0x1d0] sm:$0xff]  ;;  %v2788_v62 = vmul.f32 %v2784_v53, %v2780_v13  ;;  %v3273_v34 = vadd.f32 %v3231_v15, %v3081_v21  ;;  %v3621_v15 = vld [vmem:[%s8134_s24 + $0xf0] sm:$0xff] }
 0x907   :  { %3570 = vmatpush.msra.mxu3 %v3500_v3  ;;  %3531 = vmatpush.msra.mxu1 %v3497_v41  ;;  %v3451_v3 = vld [vmem:[#allocation23 + $0x60] sm:$0xff]  ;;  %v3445_v56 = vld [vmem:[#allocation23 + $0x30] sm:$0xff] }
 0x908   :  { %3404 = vmatpush.msrb.mxu2 %v3304_v60  ;;  %v3498_v60 = vld [vmem:[#allocation23 + $0x1d8] sm:$0xff] }
 0x909   :  { %3571 = vmatpush.msra.mxu3 %v3498_v60  ;;  %3532 = vmatpush.msra.mxu1 %v3495_v23  ;;  %v3449_v23 = vld [vmem:[#allocation23 + $0x50] sm:$0xff] }
 0x90a   :  { %3405 = vmatpush.msrb.mxu2 %v3302_v11  ;;  %v2796_v11 = vpop.permute.xlu1 %2795 }
 0x90b   :  { %v2803_v1 = vmul.f32 %v2799_v50, %v2796_v11  ;;  %v2804_v63 = vmul.f32 %v2800_v28, %v2796_v11  ;;  %3572 = vmatpush.msra.mxu3 %v3496_v0  ;;  %v3487_v50 = vld [vmem:[#allocation23 + $0x180] sm:$0xff]  ;;  %v3450_v28 = vld [vmem:[#allocation23 + $0x58] sm:$0xff]  ;;  %v3488_v11 = vld [vmem:[#allocation23 + $0x188] sm:$0xff] }
 0x90c   :  { %3406 = vmatpush.msrb.mxu2 %v3300_v22  ;;  %v3493_v22 = vld [vmem:[#allocation23 + $0x1b0] sm:$0xff]  ;;  %v3448_v0 = vld [vmem:[#allocation23 + $0x48] sm:$0xff] }
 0x90d   :  { %3533 = vmatpush.msra.mxu1 %v3493_v22  ;;  %3573 = vmatpush.msra.mxu3 %v3494_v42  ;;  %v2805_v7 = vadd.f32 %v2803_v1, %v2789_v27  ;;  %v3486_v22 = vld [vmem:[#allocation23 + $0x178] sm:$0xff]  ;;  %v3439_v1 = vld [vmem:[#allocation23] sm:$0xff]  ;;  %v3622_v27 = vld [vmem:[%s8134_s24 + $0xf8] sm:$0xff] }
 0x90e   :  { %3407 = vmatpush.msrb.mxu2 %v3298_v35  ;;  %v3735_v35 = vld [vmem:[%s8128_s18 + $0x3] ss:$4 sm:$0x3] }
 0x90f   :  { %v2815_v26 = vperm.slane %v3735_v35, 0  ;;  %3574 = vmatpush.msra.mxu3 %v3492_v32  ;;  %v3442_v42 = vld [vmem:[#allocation23 + $0x18] sm:$0xff]  ;;  %v3606_v32 = vld [vmem:[%s8134_s24 + $0x78] sm:$0xff] }
 0x910   :  { %3408 = vmatpush.msrb.mxu2 %v3296_v43  ;;  %v2774_v43 = vmul.f32 %v2770_v37, %v7972_v59 }
 0x911   :  { %3575 = vmatpush.msra.mxu3 %v3490_v20  ;;  %v3351_v20 = vld [vmem:[#allocation21] sm:$0x3] }
 0x912   :  { %3409 = vmatpush.msrb.mxu2 %v3294_v57  ;;  %v3491_v57 = vld [vmem:[#allocation23 + $0x1a0] sm:$0xff]  ;;  %v2790_v19 = vadd.f32 %v2788_v62, %v2774_v43  ;;  %v3482_v43 = vld [vmem:[#allocation23 + $0x158] sm:$0xff]  ;;  %v3353_v21 = vperm.slane %v3351_v20, 0 }
 0x913   :  { %3534 = vmatpush.msra.mxu1 %v3491_v57  ;;  %3576 = vmatpush.msra.mxu3 %v3488_v11  ;;  %v3483_v62 = vld [vmem:[#allocation23 + $0x160] sm:$0xff]  ;;  %v3480_v57 = vld [vmem:[#allocation23 + $0x148] sm:$0xff] }
 0x914   :  { %3410 = vmatpush.msrb.mxu2 %v3292_v58  ;;  %v3457_v58 = vld [vmem:[#allocation23 + $0x90] sm:$0xff]  ;;  %v3612_v11 = vld [vmem:[%s8134_s24 + $0xa8] sm:$0xff] }
 0x915   :  { %3515 = vmatpush.msra.mxu0 %v3457_v58  ;;  %3535 = vmatpush.msra.mxu1 %v3489_v38  ;;  %v3475_v58 = vld [vmem:[#allocation23 + $0x120] sm:$0xff] }
 0x916   :  { %3411 = vmatpush.msrb.mxu2 %v3290_v10  ;;  %v7985_v49 = vpop.f32.mrf.mxu3  ;;  %v2816_v10 = vperm.slane %v3735_v35, 1  ;;  %3577 = vmatpush.msra.mxu3 %v3486_v22  ;;  %v3484_v35 = vld [vmem:[#allocation23 + $0x168] sm:$0xff] }
 0x917   :  { %3536 = vmatpush.msra.mxu1 %v3487_v50  ;;  %v3605_v38 = vld [vmem:[%s8134_s24 + $0x70] sm:$0xff]  ;;  %v3610_v22 = vld [vmem:[%s8134_s24 + $0x98] sm:$0xff] }
 0x918   :  { %3412 = vmatpush.msrb.mxu2 %v3288_v36  ;;  %v3455_v36 = vld [vmem:[#allocation23 + $0x80] sm:$0xff]  ;;  %3578 = vmatpush.msra.mxu3 %v3484_v35 }
 0x919   :  { %3516 = vmatpush.msra.mxu0 %v3455_v36  ;;  %v3603_v36 = vld [vmem:[%s8134_s24 + $0x60] sm:$0xff]  ;;  %v3613_v50 = vld [vmem:[%s8134_s24 + $0xb0] sm:$0xff]  ;;  %v3503_v35 = vld [vmem:[#allocation24] sm:$0x3] }
 0x91a   :  { %3549 = vmatpush.msra.mxu2 %v3470_v40  ;;  %v3277_v40 = vld [vmem:[#allocation18] sm:$0x3]  ;;  %3579 = vmatpush.msra.mxu3 %v3482_v43 }
 0x91b   :  { %v3279_v6 = vperm.slane %v3277_v40, 0  ;;  %v3280_v16 = vperm.slane %v3277_v40, 1  ;;  %3517 = vmatpush.msra.mxu0 %v3453_v17  ;;  %v3618_v40 = vld [vmem:[%s8134_s24 + $0xd8] sm:$0xff] }
 0x91c   :  { %v3100_v54 = vpop.f32.mrf.mxu2  ;;  %3550 = vmatpush.msra.mxu2 %v3468_v18  ;;  %v2806_v18 = vadd.f32 %v2804_v63, %v2790_v19  ;;  %v3477_v63 = vld [vmem:[#allocation23 + $0x130] sm:$0xff]  ;;  %3580 = vmatpush.msra.mxu3 %v3480_v57  ;;  %v3604_v19 = vld [vmem:[%s8134_s24 + $0x68] sm:$0xff] }
 0x91d   :  { %v3101_v2 = vadd.f32 %v3100_v54, %v3035_v44  ;;  %3518 = vmatpush.msra.mxu0 %v3451_v3  ;;  %v3479_v44 = vld [vmem:[#allocation23 + $0x140] sm:$0xff] }
 0x91e   :  { %3551 = vmatpush.msra.mxu2 %v3466_v4 }
 0x91f   :  { %v3121_v54 = vadd.f32 %v7985_v49, %v3101_v2  ;;  %3519 = vmatpush.msra.mxu0 %v3449_v23  ;;  %v3474_v2 = vld [vmem:[#allocation23 + $0x118] sm:$0xff]  ;;  %v3594_v23 = vld [vmem:[%s8134_s24 + $0x18] sm:$0xff] }
 0x920   :  { %3552 = vmatpush.msra.mxu2 %v3464_v12 }
 0x921   :  { %3520 = vmatpush.msra.mxu0 %v3447_v29  ;;  %v3592_v29 = vld [vmem:[%s8134_s24 + $0x8] sm:$0xff] }
 0x922   :  { %3553 = vmatpush.msra.mxu2 %v3462_v14  ;;  %v3485_v14 = vld [vmem:[#allocation23 + $0x170] sm:$0xff] }
 0x923   :  { %3537 = vmatpush.msra.mxu1 %v3485_v14  ;;  %3521 = vmatpush.msra.mxu0 %v3445_v56  ;;  %v3611_v14 = vld [vmem:[%s8134_s24 + $0xa0] sm:$0xff]  ;;  %v3609_v56 = vld [vmem:[%s8134_s24 + $0x90] sm:$0xff] }
 0x924   :  { %3554 = vmatpush.msra.mxu2 %v3460_v9  ;;  %v3481_v9 = vld [vmem:[#allocation23 + $0x150] sm:$0xff] }
 0x925   :  { %3538 = vmatpush.msra.mxu1 %v3483_v62  ;;  %3522 = vmatpush.msra.mxu0 %v3443_v25  ;;  %v3608_v62 = vld [vmem:[%s8134_s24 + $0x88] sm:$0xff]  ;;  %v3505_v25 = vperm.slane %v3503_v35, 0 }
 0x926   :  { %3555 = vmatpush.msra.mxu2 %v3458_v55  ;;  %v3476_v55 = vld [vmem:[#allocation23 + $0x128] sm:$0xff] }
 0x927   :  { %3539 = vmatpush.msra.mxu1 %v3481_v9  ;;  %3523 = vmatpush.msra.mxu0 %v3441_v30 }
 0x928   :  { %3556 = vmatpush.msra.mxu2 %v3456_v24  ;;  %v3619_v24 = vld [vmem:[%s8134_s24 + $0xe0] sm:$0xff] }
 0x929   :  { %3540 = vmatpush.msra.mxu1 %v3479_v44  ;;  %3524 = vmatpush.msra.mxu0 %v3439_v1  ;;  %v3506_v44 = vperm.slane %v3503_v35, 1 }
 0x92a   :  { %3557 = vmatpush.msra.mxu2 %v3454_v31 }
 0x92b   :  { %3541 = vmatpush.msra.mxu1 %v3477_v63 }
 0x92c   :  { %3558 = vmatpush.msra.mxu2 %v3452_v45 }
 0x92d   :  { %3542 = vmatpush.msra.mxu1 %v3475_v58  ;;  %v3760_v58 = vld [vmem:[%s8135_s25] ss:$0 sm:$0xff]  ;;  %s4814_s25 = smov [#allocation26]  }
 0x92e   :  { %3559 = vmatpush.msra.mxu2 %v3450_v28  ;;  %v3593_v28 = vld [vmem:[%s8134_s24 + $0x10] sm:$0xff]  ;;  %s3702_s2 = sshll.u32 %s4814_s25, 4  ;;  %s3703_s2 = int_to_ptr.vmem [resolvable:$true] %s3702_s2 }
 0x92f   :  { %3543 = vmatpush.msra.mxu1 %v3473_v48 }
 0x930   :  { %3560 = vmatpush.msra.mxu2 %v3448_v0  ;;  %v3591_v0 = vld [vmem:[%s8134_s24] sm:$0xff] }
 0x932   :  { %3561 = vmatpush.msra.mxu2 %v3446_v39  ;;  %v3607_v39 = vld [vmem:[%s8134_s24 + $0x80] sm:$0xff] }
 0x934   :  { %3562 = vmatpush.msra.mxu2 %v3444_v5 }
 0x936   :  { %v3270_v59 = vpop.f32.mrf.mxu3  ;;  %3563 = vmatpush.msra.mxu2 %v3442_v42 }
 0x938   :  { %3564 = vmatpush.msra.mxu2 %v3440_v51 }
 0x93c   :  { %v3250_v61 = vpop.f32.mrf.mxu2 }
 0x93d   :  { %v3271_v8 = vadd.f32 %v3270_v59, %v3250_v61  ;;  %v3478_v61 = vld [vmem:[#allocation23 + $0x138] sm:$0xff] }
 0x93e   :  { %3581 = vmatpush.msra.mxu3 %v3478_v61  ;;  %v3620_v59 = vld [vmem:[%s8134_s24 + $0xe8] sm:$0xff] }
 0x93f   :  { %v3274_v53 = vadd.f32 %v3271_v8, %v3121_v54  ;;  %v3602_v8 = vld [vmem:[%s8134_s24 + $0x58] sm:$0xff] }
 0x940   :  { %3582 = vmatpush.msra.mxu3 %v3476_v55 }
 0x942   :  { %3583 = vmatpush.msra.mxu3 %v3474_v2 }
 0x973   :  { %v2812_v46 = vpop.permute.xlu1 %2811 }
 0x974   :  { %v2819_v4 = vmul.f32 %v2815_v26, %v2812_v46  ;;  %v2820_v52 = vmul.f32 %v2816_v10, %v2812_v46  ;;  %v3471_v26 = vld [vmem:[#allocation23 + $0x100] sm:$0xff]  ;;  %v3472_v10 = vld [vmem:[#allocation23 + $0x108] sm:$0xff]  ;;  %v3599_v46 = vld [vmem:[%s8134_s24 + $0x40] sm:$0xff] }
 0x975   :  { %3544 = vmatpush.msra.mxu1 %v3471_v26  ;;  %3584 = vmatpush.msra.mxu3 %v3472_v10 }
 0x976   :  { %v2821_v12 = vadd.f32 %v2819_v4, %v2805_v7  ;;  %v2822_v33 = vadd.f32 %v2820_v52, %v2806_v18  ;;  %v3601_v7 = vld [vmem:[%s8134_s24 + $0x50] sm:$0xff]  ;;  %v3600_v18 = vld [vmem:[%s8134_s24 + $0x48] sm:$0xff]  ;;  %v3354_v52 = vperm.slane %v3351_v20, 1 }
 0x978   :  { %v3275_v41 = vadd.f32 %v3273_v34, %v2821_v12  ;;  %v3276_v47 = vadd.f32 %v3274_v53, %v2822_v33  ;;  %v3598_v12 = vld [vmem:[%s8134_s24 + $0x38] sm:$0xff]  ;;  %v3617_v33 = vld [vmem:[%s8134_s24 + $0xd0] sm:$0xff] }
 0x97a   :  { %v3283_v49 = vadd.f32 %v3279_v6, %v3275_v41  ;;  %v3284_v37 = vadd.f32 %v3280_v16, %v3276_v47  ;;  %v3597_v41 = vld [vmem:[%s8134_s24 + $0x30] sm:$0xff]  ;;  %v3616_v47 = vld [vmem:[%s8134_s24 + $0xc8] sm:$0xff] }
 0x97c   :  { %3809 = vtanh.f32 %v3283_v49  ;;  %v3596_v49 = vld [vmem:[%s8134_s24 + $0x28] sm:$0xff] }
 0x97d   :  { %3811 = vtanh.f32 %v3284_v37  ;;  %v3615_v37 = vld [vmem:[%s8134_s24 + $0xc0] sm:$0xff] }
 0x982   :  { %v3810_v13 = vpop.eup %3809 }
 0x983   :  { %v3812_v60 = vpop.eup %3811  ;;  %3373 = vmatmul.f32.vlgmr.msrb.gmra.mxu0 %v3810_v13  ;;  %3413 = vmatmul.f32.vlgmr.msrb.gmra.mxu2 %v3810_v13  ;;  %v3595_v13 = vld [vmem:[%s8134_s24 + $0x20] sm:$0xff] }
 0x984   :  { %3393 = vmatmul.f32.vlgmr.msrb.gmra.mxu1 %v3812_v60  ;;  %3433 = vmatmul.f32.vlgmr.msrb.gmra.mxu3 %v3812_v60  ;;  %v3614_v60 = vld [vmem:[%s8134_s24 + $0xb8] sm:$0xff] }
 0x985   :  { %3627 = vmatpush.msrb.mxu0 %v3606_v32  ;;  %3647 = vmatpush.msrb.mxu1 %v3622_v27  ;;  %v3671_v32 = vld [vmem:[%s9172_s0] sm:$0x3] }
 0x987   :  { %3628 = vmatpush.msrb.mxu0 %v3605_v38  ;;  %3648 = vmatpush.msrb.mxu1 %v3621_v15 }
 0x989   :  { %3629 = vmatpush.msrb.mxu0 %v3604_v19  ;;  %3649 = vmatpush.msrb.mxu1 %v3620_v59  ;;  %v3669_v19 = vlaneseq }
 0x98b   :  { %3630 = vmatpush.msrb.mxu0 %v3603_v36  ;;  %3650 = vmatpush.msrb.mxu1 %v3619_v24  ;;  %v3670_v59 = vand.u32 127, %v3669_v19  ;;  %v4813_v24 = vmov 0.0  }
 0x98d   :  { %3631 = vmatpush.msrb.mxu0 %v3602_v8  ;;  %3651 = vmatpush.msrb.mxu1 %v3618_v40 }
 0x98f   :  { %3632 = vmatpush.msrb.mxu0 %v3601_v7  ;;  %3652 = vmatpush.msrb.mxu1 %v3617_v33 }
 0x991   :  { %3633 = vmatpush.msrb.mxu0 %v3600_v18  ;;  %3653 = vmatpush.msrb.mxu1 %v3616_v47 }
 0x993   :  { %3634 = vmatpush.msrb.mxu0 %v3599_v46  ;;  %3654 = vmatpush.msrb.mxu1 %v3615_v37 }
 0x995   :  { %3635 = vmatpush.msrb.mxu0 %v3598_v12  ;;  %3655 = vmatpush.msrb.mxu1 %v3614_v60 }
 0x997   :  { %3636 = vmatpush.msrb.mxu0 %v3597_v41  ;;  %3656 = vmatpush.msrb.mxu1 %v3613_v50 }
 0x999   :  { %3637 = vmatpush.msrb.mxu0 %v3596_v49  ;;  %3657 = vmatpush.msrb.mxu1 %v3612_v11 }
 0x99b   :  { %3638 = vmatpush.msrb.mxu0 %v3595_v13  ;;  %3658 = vmatpush.msrb.mxu1 %v3611_v14 }
 0x99d   :  { %3639 = vmatpush.msrb.mxu0 %v3594_v23  ;;  %3659 = vmatpush.msrb.mxu1 %v3610_v22 }
 0x99f   :  { %3640 = vmatpush.msrb.mxu0 %v3593_v28  ;;  %3660 = vmatpush.msrb.mxu1 %v3609_v56 }
 0x9a1   :  { %3641 = vmatpush.msrb.mxu0 %v3592_v29  ;;  %3661 = vmatpush.msrb.mxu1 %v3608_v62 }
 0x9a3   :  { %3642 = vmatpush.msrb.mxu0 %v3591_v0  ;;  %3662 = vmatpush.msrb.mxu1 %v3607_v39 }
 0xa00   :  { %v3374_v17 = vpop.f32.mrf.mxu0 }
 0xa01   :  { %v3375_v31 = vadd.f32 %v3374_v17, %v3353_v21  ;;  %v3394_v54 = vpop.f32.mrf.mxu1 }
 0xa03   :  { %v3395_v4 = vadd.f32 %v3394_v54, %v3375_v31 }
 0xa05   :  { %3813 = vtanh.f32 %v3395_v4 }
 0xa06   :  { %v3414_v34 = vpop.f32.mrf.mxu2 }
 0xa07   :  { %v3415_v6 = vadd.f32 %v3414_v34, %v3354_v52  ;;  %v3434_v3 = vpop.f32.mrf.mxu3 }
 0xa09   :  { %v3435_v45 = vadd.f32 %v3434_v3, %v3415_v6 }
 0xa0b   :  { %v3814_v53 = vpop.eup %3813  ;;  %3815 = vtanh.f32 %v3435_v45 }
 0xa0c   :  { %3525 = vmatmul.f32.vlgmr.msra.gmra.mxu0 %v3814_v53  ;;  %3565 = vmatmul.f32.vlgmr.msra.gmra.mxu2 %v3814_v53 }
 0xa11   :  { %v3816_v16 = vpop.eup %3815 }
 0xa12   :  { %3545 = vmatmul.f32.vlgmr.msra.gmra.mxu1 %v3816_v16  ;;  %3585 = vmatmul.f32.vlgmr.msra.gmra.mxu3 %v3816_v16 }
 0xa89   :  { %v3526_v9 = vpop.f32.mrf.mxu0 }
 0xa8a   :  { %v3527_v5 = vadd.f32 %v3526_v9, %v3505_v25 }
 0xa8f   :  { %v3546_v43 = vpop.f32.mrf.mxu1  ;;  %v3566_v42 = vpop.f32.mrf.mxu2 }
 0xa90   :  { %v3547_v30 = vadd.f32 %v3546_v43, %v3527_v5  ;;  %v3567_v57 = vadd.f32 %v3566_v42, %v3506_v44 }
 0xa92   :  { %3817 = vtanh.f32 %v3547_v30 }
 0xa95   :  { %v3586_v1 = vpop.f32.mrf.mxu3 }
 0xa96   :  { %v3587_v63 = vadd.f32 %v3586_v1, %v3567_v57 }
 0xa98   :  { %v3818_v51 = vpop.eup %3817  ;;  %3819 = vtanh.f32 %v3587_v63 }
 0xa99   :  { %3643 = vmatmul.f32.vlgmr.msrb.gmra.mxu0 %v3818_v51 }
 0xa9e   :  { %v3820_v61 = vpop.eup %3819 }
 0xa9f   :  { %3663 = vmatmul.f32.vlgmr.msrb.gmra.mxu1 %v3820_v61 }
 0xb16   :  { %v3644_v55 = vpop.f32.mrf.mxu0 }
 0xb17   :  { %v3645_v48 = vadd.f32 %v3760_v58, %v3644_v55 }
 0xb1c   :  { %v3664_v2 = vpop.f32.mrf.mxu1 }
 0xb1d   :  { %v3665_v26 = vadd.f32 %v3664_v2, %v3645_v48 }
 0xb1f   :  { %v3678_v10 = vsel %vm3667_vm2, %v3665_v26, -inf  ;;  %3668 = vst.msk [vmem:[#allocation26] sm:$0x3] %vm3667_vm2, %v3665_v26 }
 0xb20   :  { %3679 = vmax.xlane.f32.xlu2 %v3678_v10  ;;  %3707 = dma.vmem_to_hbm [thread:$0]  %s3703_s2, 32, %s3705_s21, [#allocation5]  }
 0xb38   :  { %3673 = vperm.xlu2 %3758, %v3671_v32  }
 0xb93   :  { %v3680_v38 = vpop.xlane.xlu2 %3679 }
 0xb94   :  { %v3681_v27 = vsub.f32 %v3665_v26, %v3680_v38 }
 0xb96   :  { %v3682_v15 = vmul.f32 1.442695, %v3681_v27 }
 0xb98   :  { %3821 = vpow2.f32 %v3682_v15 }
 0xb9b   :  { %v3674_v36 = vpop.permute.xlu2 %3673 }
 0xb9c   :  { %vm3675_vm3 = vcmp.eq.s32.totalorder %v3670_v59, %v3674_v36 }
 0xb9d   :  { %v3736_v8 = vsel %vm3675_vm3, 1.0, %v4813_v24 }
 0xb9e   :  { %v3822_v40 = vpop.eup %3821  ;;  %v3690_v20 = vmul.f32 %v3736_v8, %v3665_v26 }
 0xb9f   :  { %v3684_v7 = vsel %vm3667_vm2, %v3822_v40, 0.0 }
 0xba0   :  { %3685 = vadd.xlane.f32.xlu0 %v3684_v7  ;;  %v3691_v18 = vsel %vm3667_vm2, %v3690_v20, 0.0 }
 0xba1   :  { %3692 = vadd.xlane.f32.xlu1 %v3691_v18 }
 0xc13   :  { %v3686_v21 = vpop.xlane.xlu0 %3685 }
 0xc14   :  { %3823 = vlog2.f32 %v3686_v21  ;;  %v3693_v54 = vpop.xlane.xlu1 %3692 }
 0xc1a   :  { %v3824_v46 = vpop.eup %3823 }
 0xc1b   :  { %v3688_v17 = vmul.f32 0.6931472, %v3824_v46 }
 0xc1d   :  { %v3689_v31 = vadd.f32 %v3688_v17, %v3680_v38 }
 0xc1f   :  { %v3694_v4 = vsub.f32 %v3689_v31, %v3693_v54 }
 0xc21   :  { %3696 = vst.msk [vmem:[%s8137_s27] sm:$0x3] %vm3695_vm4, %v3694_v4 }
 0xc22   :  { %4794 = dma.done.wait [#allocation5], 32  }
 0xc23   :  { %4795 = vsyncadd [#allocation5], 4294967264 }
 0xc24   :  { %3716 = vsyncpa [#allocation4], 1 }
 0xc25   :  { %3717 = vsyncpa [#allocation7], 1 }
 0xc26   :  { %3718 = vsyncpa [#allocation10], 1 }
 0xc27   :  { %3719 = vsyncpa [#allocation13], 1 }
 0xc28   :  { %3720 = vsyncpa [#allocation16], 1 }
 0xc29   :  { %3721 = vsyncpa [#allocation19], 1 }
 0xc2a   :  { %3722 = vsyncpa [#allocation22], 1 }
 0xc2b   :  { %3723 = vsyncpa [#allocation25], 1 }
 0xc2c   :  { %3724 = vsyncpa [#allocation5], 1 }

</bundles_post_ra>
